<compile_context>
chip_gen: v5e
topology: v5e:2x2
jax: 0.10.0
libtpu: 0.0.40
codegen_flags: <defaults>
</compile_context>

<pallas_src>
import functools

import jax
import jax.numpy as jnp
import numpy as np
from jax.experimental import pallas as pl
from jax.experimental.pallas import tpu as pltpu

NDF = 32
EPS = 1e-5            # PyTorch BatchNorm2d default eps
NEG_SLOPE = 0.2       # LeakyReLU(0.2)
VMEM_LIMIT = 48 * 1024 * 1024


def _round_up(x, m):
    return (x + m - 1) // m * m


def _lrelu(x):
    return jnp.where(x >= 0, x, NEG_SLOPE * x)


# ----------------------------------------------------------------------------
# Pallas kernels
# ----------------------------------------------------------------------------
def _conv_lrelu_kernel(p_ref, w_ref, o_ref):
    """One M-tile of the im2col GEMM with fused LeakyReLU (no BatchNorm)."""
    acc = jnp.dot(p_ref[...], w_ref[...], preferred_element_type=jnp.float32)
    o_ref[...] = _lrelu(acc).astype(o_ref.dtype)


def _conv_bn_lrelu_kernel(p_ref, w_ref, g_ref, b_ref, o_ref, *, m_valid, m_pad):
    """Whole-layer im2col GEMM with fused training-mode BatchNorm + LeakyReLU.

    Runs as a single grid step: the f32 accumulator for the full M extent is
    live in VMEM, so per-channel batch statistics (two-pass, subtract-mean
    variance) are computed in-kernel and the folded scale/shift + LeakyReLU
    are applied before a single bf16 store.
    """
    acc = jnp.dot(p_ref[...], w_ref[...], preferred_element_type=jnp.float32)
    inv_m = 1.0 / m_valid
    mean = jnp.sum(acc, axis=0, keepdims=True) * inv_m            # (1, Cout)
    centered = acc - mean
    ssq = jnp.sum(centered * centered, axis=0, keepdims=True)
    if m_pad:
        # Zero-padded rows contributed (0 - mean)^2 each; remove that bias.
        ssq = ssq - m_pad * mean * mean
    var = jnp.maximum(ssq * inv_m, 0.0)
    scale = g_ref[...] * jax.lax.rsqrt(var + EPS)                  # (1, Cout)
    y = centered * scale + b_ref[...]
    o_ref[...] = _lrelu(y).astype(o_ref.dtype)


# ----------------------------------------------------------------------------
# JAX glue
# ----------------------------------------------------------------------------
def _im2col(x, kh, kw, stride, pad):
    """x: (N,H,W,C) bf16 -> (N*Ho*Wo, kh*kw*C) patches with (kh,kw,C) order."""
    N, H, W, C = x.shape
    xp = jnp.pad(x, ((0, 0), (pad, pad), (pad, pad), (0, 0)))
    Ho = (H + 2 * pad - kh) // stride + 1
    Wo = (W + 2 * pad - kw) // stride + 1
    cols = []
    for i in range(kh):
        for j in range(kw):
            cols.append(xp[:, i:i + Ho * stride:stride, j:j + Wo * stride:stride, :])
    patches = jnp.stack(cols, axis=3)            # (N, Ho, Wo, kh*kw, C)
    return patches.reshape(N * Ho * Wo, kh * kw * C), Ho, Wo


def _compiler_params(sem):
    return pltpu.CompilerParams(
        dimension_semantics=sem,
        vmem_limit_bytes=VMEM_LIMIT,
    )


def conv_lrelu_block(x, w_hwio, *, stride, pad):
    """Conv2d(bias=False) + LeakyReLU(0.2) as a tiled Pallas GEMM."""
    kh, kw, cin, cout = w_hwio.shape
    N = x.shape[0]
    patches, Ho, Wo = _im2col(x, kh, kw, stride, pad)
    M, K = patches.shape
    w2d = w_hwio.reshape(K, cout).astype(jnp.bfloat16)

    # 1-2 grid steps over M (per perf review): two balanced "parallel" steps
    # when there is enough work (keeps both v7x TensorCores busy), else one.
    if M >= 1024:
        TM = _round_up(pl.cdiv(M, 2), 16)
    else:
        TM = _round_up(M, 16)
    Mp = _round_up(M, TM)
    if Mp != M:
        patches = jnp.pad(patches, ((0, Mp - M), (0, 0)))
    grid_m = Mp // TM

    out = pl.pallas_call(
        _conv_lrelu_kernel,
        grid=(grid_m,),
        in_specs=[
            pl.BlockSpec((TM, K), lambda i: (i, 0)),
            pl.BlockSpec((K, cout), lambda i: (0, 0)),   # VMEM-resident weights
        ],
        out_specs=pl.BlockSpec((TM, cout), lambda i: (i, 0)),
        out_shape=jax.ShapeDtypeStruct((Mp, cout), jnp.bfloat16),
        compiler_params=_compiler_params(("parallel",)),
        cost_estimate=pl.CostEstimate(
            flops=2 * Mp * K * cout,
            transcendentals=0,
            bytes_accessed=Mp * K * 2 + K * cout * 2 + Mp * cout * 2),
    )(patches, w2d)
    return out[:M].reshape(N, Ho, Wo, cout)


def conv_bn_lrelu_block(x, w_hwio, gamma, beta, *, stride, pad):
    """Conv2d(bias=False) + BatchNorm2d (training stats) + LeakyReLU(0.2),
    fully fused into one single-step Pallas GEMM call."""
    kh, kw, cin, cout = w_hwio.shape
    N = x.shape[0]
    patches, Ho, Wo = _im2col(x, kh, kw, stride, pad)
    M, K = patches.shape
    w2d = w_hwio.reshape(K, cout).astype(jnp.bfloat16)

    Mp = _round_up(M, 16)
    if Mp != M:
        patches = jnp.pad(patches, ((0, Mp - M), (0, 0)))

    kernel = functools.partial(
        _conv_bn_lrelu_kernel, m_valid=float(M), m_pad=Mp - M)

    out = pl.pallas_call(
        kernel,
        grid=(1,),
        in_specs=[
            pl.BlockSpec((Mp, K), lambda i: (0, 0)),
            pl.BlockSpec((K, cout), lambda i: (0, 0)),
            pl.BlockSpec((1, cout), lambda i: (0, 0)),
            pl.BlockSpec((1, cout), lambda i: (0, 0)),
        ],
        out_specs=pl.BlockSpec((Mp, cout), lambda i: (0, 0)),
        out_shape=jax.ShapeDtypeStruct((Mp, cout), jnp.bfloat16),
        compiler_params=_compiler_params(("arbitrary",)),
        cost_estimate=pl.CostEstimate(
            flops=2 * Mp * K * cout + 8 * Mp * cout,
            transcendentals=cout,
            bytes_accessed=Mp * K * 2 + K * cout * 2 + Mp * cout * 2),
    )(patches, w2d, gamma.reshape(1, cout).astype(jnp.float32),
      beta.reshape(1, cout).astype(jnp.float32))
    return out[:M].reshape(N, Ho, Wo, cout)


# ----------------------------------------------------------------------------
# DNet forward (matches the nn.Sequential in the PyTorch module)
# ----------------------------------------------------------------------------
def dnet_forward(x_nchw, params):
    # NCHW -> NHWC; activations flow in bf16 (halves patch/intermediate bytes).
    x = jnp.transpose(x_nchw, (0, 2, 3, 1)).astype(jnp.bfloat16)
    w1, w2, g2, b2, w3, g3, b3, w4, g4, b4, w5 = params
    h = conv_lrelu_block(x, w1, stride=2, pad=1)
    h = conv_bn_lrelu_block(h, w2, g2, b2, stride=2, pad=1)
    h = conv_bn_lrelu_block(h, w3, g3, b3, stride=2, pad=1)
    h = conv_bn_lrelu_block(h, w4, g4, b4, stride=2, pad=1)
    # Final 4x4 valid conv to a single logit: Cout=1 would run the MXU at
    # 1/256 width with masked width-1 stores; do the tiny dot in plain JAX.
    N = h.shape[0]
    logits = jnp.dot(h.reshape(N, -1).astype(jnp.float32),
                     w5.reshape(-1, 1).astype(jnp.float32),
                     preferred_element_type=jnp.float32)
    # torch's .squeeze() removes all singleton dims -> (N,)
    return jnp.squeeze(logits)


def init_params(key):
    ks = jax.random.split(key, 5)

    def w(k, cin, cout):
        # DCGAN-style init N(0, 0.02), stored as (kh, kw, Cin, Cout)
        return 0.02 * jax.random.normal(k, (4, 4, cin, cout), jnp.float32)

    w1 = w(ks[0], 3, NDF)
    w2 = w(ks[1], NDF, NDF * 2)
    w3 = w(ks[2], NDF * 2, NDF * 4)
    w4 = w(ks[3], NDF * 4, NDF * 8)
    w5 = w(ks[4], NDF * 8, 1)
    g2, b2 = jnp.ones((NDF * 2,), jnp.float32), jnp.zeros((NDF * 2,), jnp.float32)
    g3, b3 = jnp.ones((NDF * 4,), jnp.float32), jnp.zeros((NDF * 4,), jnp.float32)
    g4, b4 = jnp.ones((NDF * 8,), jnp.float32), jnp.zeros((NDF * 8,), jnp.float32)
    return (w1, w2, g2, b2, w3, g3, b3, w4, g4, b4, w5)


# ----------------------------------------------------------------------------
# Pure-JAX f32 reference (for correctness check)
# ----------------------------------------------------------------------------
def ref_forward(x_nchw, params):
    x = jnp.transpose(x_nchw, (0, 2, 3, 1)).astype(jnp.float32)
    dn = ("NHWC", "HWIO", "NHWC")

    def conv(x, w, stride, pad):
        return jax.lax.conv_general_dilated(
            x, w, (stride, stride), [(pad, pad), (pad, pad)],
            dimension_numbers=dn, precision=jax.lax.Precision.HIGHEST)

    def bn(x, g, b):
        mean = jnp.mean(x, axis=(0, 1, 2), keepdims=True)
        var = jnp.mean(jnp.square(x - mean), axis=(0, 1, 2), keepdims=True)
        return (x - mean) * jax.lax.rsqrt(var + EPS) * g + b

    w1, w2, g2, b2, w3, g3, b3, w4, g4, b4, w5 = params
    h = _lrelu(conv(x, w1, 2, 1))
    h = _lrelu(bn(conv(h, w2, 2, 1), g2, b2))
    h = _lrelu(bn(conv(h, w3, 2, 1), g3, b3))
    h = _lrelu(bn(conv(h, w4, 2, 1), g4, b4))
    h = conv(h, w5, 1, 0)
    return jnp.squeeze(h)


if __name__ == "__main__":
    key = jax.random.PRNGKey(0)
    pkey, xkey = jax.random.split(key)
    params = init_params(pkey)
    # DCGAN discriminator expects 64x64 RGB input (so the final 4x4 valid conv
    # reduces to a single logit); batch kept small.
    x = jax.random.normal(xkey, (2, 3, 64, 64), jnp.float32)   # NCHW like PyTorch

    out = jax.jit(dnet_forward)(x, params)
    out = jax.block_until_ready(out)

    ref = ref_forward(x, params)
    # MXU operands and inter-layer activations are bf16 (per perf review);
    # accumulation / BN epilogue are f32.  Tolerance relaxed accordingly.
    np.testing.assert_allclose(np.asarray(out), np.asarray(ref), rtol=5e-2, atol=5e-2)
    assert out.shape == (2,)
    print("KERNEL_OK")
</pallas_src>

<mosaic_0001>
module attributes {stable_mosaic.version = 11 : i64} {
  func.func @_conv_lrelu_kernel(%arg0: i32, %arg1: memref<1024x48xbf16, #tpu.memory_space<vmem>>, %arg2: memref<48x32xbf16, #tpu.memory_space<vmem>>, %arg3: memref<1024x32xbf16, #tpu.memory_space<vmem>>) attributes {dimension_semantics = [#tpu.dimension_semantics<parallel>], iteration_bounds = array<i64: 2>, scalar_prefetch = 0 : i64, scratch_operands = 0 : i64, tpu.core_type = #tpu.core_type<tc>, window_params = [{transform_indices = @transform_0, window_bounds = array<i64: 1024, 48>}, {pipeline_mode = #tpu.pipeline_mode<synchronous>, transform_indices = @transform_1, window_bounds = array<i64: 48, 32>}, {transform_indices = @transform_2, window_bounds = array<i64: 1024, 32>}]} {
    %c0 = arith.constant 0 : index
    %c0_0 = arith.constant 0 : index
    %0 = vector.load %arg1[%c0, %c0_0] : memref<1024x48xbf16, #tpu.memory_space<vmem>>, vector<1024x48xbf16>
    %c0_1 = arith.constant 0 : index
    %c0_2 = arith.constant 0 : index
    %1 = vector.load %arg2[%c0_1, %c0_2] : memref<48x32xbf16, #tpu.memory_space<vmem>>, vector<48x32xbf16>
    %cst = arith.constant dense<0.000000e+00> : vector<1024x32xf32>
    %2 = tpu.matmul %0, %1, %cst {dimension_numbers = #tpu.dot_dimension_numbers<[1], [0], [0], [1], [0, 0, 1, 1], [], []>} : vector<1024x48xbf16>, vector<48x32xbf16>, vector<1024x32xf32> -> vector<1024x32xf32>
    %cst_3 = arith.constant 0.000000e+00 : f32
    %3 = vector.broadcast %cst_3 : f32 to vector<1024x32xf32>
    %4 = arith.cmpf oge, %2, %3 : vector<1024x32xf32>
    %cst_4 = arith.constant 2.000000e-01 : f32
    %5 = vector.broadcast %cst_4 : f32 to vector<1024x32xf32>
    %6 = arith.mulf %5, %2 : vector<1024x32xf32>
    %7 = arith.select %4, %2, %6 : vector<1024x32xi1>, vector<1024x32xf32>
    %8 = arith.truncf %7 : vector<1024x32xf32> to vector<1024x32xbf16>
    %c0_5 = arith.constant 0 : index
    %c0_6 = arith.constant 0 : index
    %9 = vector.load %arg3[%c0_5, %c0_6] : memref<1024x32xbf16, #tpu.memory_space<vmem>>, vector<1024x32xbf16>
    tpu.vector_store %arg3[%c0_5, %c0_6], %8 {strides = array<i32>} : memref<1024x32xbf16, #tpu.memory_space<vmem>>, vector<1024x32xbf16>,
    return
  }
  func.func @transform_0(%arg0: i32) -> (i32, i32) {
    %c0_i32 = arith.constant 0 : i32
    %c0_i32_0 = arith.constant 0 : i32
    return %arg0, %c0_i32 : i32, i32
  }
  func.func @transform_1(%arg0: i32) -> (i32, i32) {
    %c0_i32 = arith.constant 0 : i32
    %c0_i32_0 = arith.constant 0 : i32
    %c0_i32_1 = arith.constant 0 : i32
    return %c0_i32, %c0_i32_0 : i32, i32
  }
  func.func @transform_2(%arg0: i32) -> (i32, i32) {
    %c0_i32 = arith.constant 0 : i32
    %c0_i32_0 = arith.constant 0 : i32
    return %arg0, %c0_i32 : i32, i32
  }
}

module attributes {stable_mosaic.version = 11 : i64} {
  func.func @_conv_bn_lrelu_kernel(%arg0: i32, %arg1: memref<512x512xbf16, #tpu.memory_space<vmem>>, %arg2: memref<512x64xbf16, #tpu.memory_space<vmem>>, %arg3: memref<1x64xf32, #tpu.memory_space<vmem>>, %arg4: memref<1x64xf32, #tpu.memory_space<vmem>>, %arg5: memref<512x64xbf16, #tpu.memory_space<vmem>>) attributes {dimension_semantics = [#tpu.dimension_semantics<arbitrary>], iteration_bounds = array<i64: 1>, scalar_prefetch = 0 : i64, scratch_operands = 0 : i64, tpu.core_type = #tpu.core_type<tc>, window_params = [{pipeline_mode = #tpu.pipeline_mode<synchronous>, transform_indices = @transform_0, window_bounds = array<i64: 512, 512>}, {pipeline_mode = #tpu.pipeline_mode<synchronous>, transform_indices = @transform_1, window_bounds = array<i64: 512, 64>}, {pipeline_mode = #tpu.pipeline_mode<synchronous>, transform_indices = @transform_2, window_bounds = array<i64: 1, 64>}, {pipeline_mode = #tpu.pipeline_mode<synchronous>, transform_indices = @transform_3, window_bounds = array<i64: 1, 64>}, {pipeline_mode = #tpu.pipeline_mode<synchronous>, transform_indices = @transform_4, window_bounds = array<i64: 512, 64>}]} {
    %c0 = arith.constant 0 : index
    %c0_0 = arith.constant 0 : index
    %0 = vector.load %arg1[%c0, %c0_0] : memref<512x512xbf16, #tpu.memory_space<vmem>>, vector<512x512xbf16>
    %c0_1 = arith.constant 0 : index
    %c0_2 = arith.constant 0 : index
    %1 = vector.load %arg2[%c0_1, %c0_2] : memref<512x64xbf16, #tpu.memory_space<vmem>>, vector<512x64xbf16>
    %cst = arith.constant dense<0.000000e+00> : vector<512x64xf32>
    %2 = tpu.matmul %0, %1, %cst {dimension_numbers = #tpu.dot_dimension_numbers<[1], [0], [0], [1], [0, 0, 1, 1], [], []>} : vector<512x512xbf16>, vector<512x64xbf16>, vector<512x64xf32> -> vector<512x64xf32>
    %cst_3 = arith.constant dense<0.000000e+00> : vector<64xf32>
    %3 = vector.multi_reduction <add>, %2, %cst_3 [0] : vector<512x64xf32> to vector<64xf32>
    %4 = vector.shape_cast %3 : vector<64xf32> to vector<1x64xf32>
    %cst_4 = arith.constant 0.001953125 : f32
    %5 = vector.broadcast %cst_4 : f32 to vector<1x64xf32>
    %6 = arith.mulf %4, %5 : vector<1x64xf32>
    %7 = vector.broadcast %6 : vector<1x64xf32> to vector<512x64xf32>
    %8 = arith.subf %2, %7 : vector<512x64xf32>
    %9 = arith.mulf %8, %8 : vector<512x64xf32>
    %cst_5 = arith.constant dense<0.000000e+00> : vector<64xf32>
    %10 = vector.multi_reduction <add>, %9, %cst_5 [0] : vector<512x64xf32> to vector<64xf32>
    %11 = vector.shape_cast %10 : vector<64xf32> to vector<1x64xf32>
    %cst_6 = arith.constant 0.001953125 : f32
    %12 = vector.broadcast %cst_6 : f32 to vector<1x64xf32>
    %13 = arith.mulf %11, %12 : vector<1x64xf32>
    %cst_7 = arith.constant 0.000000e+00 : f32
    %14 = vector.broadcast %cst_7 : f32 to vector<1x64xf32>
    %15 = arith.maximumf %13, %14 : vector<1x64xf32>
    %c0_8 = arith.constant 0 : index
    %c0_9 = arith.constant 0 : index
    %16 = vector.load %arg3[%c0_8, %c0_9] : memref<1x64xf32, #tpu.memory_space<vmem>>, vector<1x64xf32>
    %cst_10 = arith.constant 9.99999974E-6 : f32
    %17 = vector.broadcast %cst_10 : f32 to vector<1x64xf32>
    %18 = arith.addf %15, %17 : vector<1x64xf32>
    %19 = math.rsqrt %18 : vector<1x64xf32>
    %20 = arith.mulf %16, %19 : vector<1x64xf32>
    %21 = vector.broadcast %20 : vector<1x64xf32> to vector<512x64xf32>
    %22 = arith.mulf %8, %21 : vector<512x64xf32>
    %c0_11 = arith.constant 0 : index
    %c0_12 = arith.constant 0 : index
    %23 = vector.load %arg4[%c0_11, %c0_12] : memref<1x64xf32, #tpu.memory_space<vmem>>, vector<1x64xf32>
    %24 = vector.broadcast %23 : vector<1x64xf32> to vector<512x64xf32>
    %25 = arith.addf %22, %24 : vector<512x64xf32>
    %cst_13 = arith.constant 0.000000e+00 : f32
    %26 = vector.broadcast %cst_13 : f32 to vector<512x64xf32>
    %27 = arith.cmpf oge, %25, %26 : vector<512x64xf32>
    %cst_14 = arith.constant 2.000000e-01 : f32
    %28 = vector.broadcast %cst_14 : f32 to vector<512x64xf32>
    %29 = arith.mulf %28, %25 : vector<512x64xf32>
    %30 = arith.select %27, %25, %29 : vector<512x64xi1>, vector<512x64xf32>
    %31 = arith.truncf %30 : vector<512x64xf32> to vector<512x64xbf16>
    %c0_15 = arith.constant 0 : index
    %c0_16 = arith.constant 0 : index
    %32 = vector.load %arg5[%c0_15, %c0_16] : memref<512x64xbf16, #tpu.memory_space<vmem>>, vector<512x64xbf16>
    tpu.vector_store %arg5[%c0_15, %c0_16], %31 {strides = array<i32>} : memref<512x64xbf16, #tpu.memory_space<vmem>>, vector<512x64xbf16>,
    return
  }
  func.func @transform_0(%arg0: i32) -> (i32, i32) {
    %c0_i32 = arith.constant 0 : i32
    %c0_i32_0 = arith.constant 0 : i32
    %c0_i32_1 = arith.constant 0 : i32
    return %c0_i32, %c0_i32_0 : i32, i32
  }
  func.func @transform_1(%arg0: i32) -> (i32, i32) {
    %c0_i32 = arith.constant 0 : i32
    %c0_i32_0 = arith.constant 0 : i32
    %c0_i32_1 = arith.constant 0 : i32
    return %c0_i32, %c0_i32_0 : i32, i32
  }
  func.func @transform_2(%arg0: i32) -> (i32, i32) {
    %c0_i32 = arith.constant 0 : i32
    %c0_i32_0 = arith.constant 0 : i32
    %c0_i32_1 = arith.constant 0 : i32
    return %c0_i32, %c0_i32_0 : i32, i32
  }
  func.func @transform_3(%arg0: i32) -> (i32, i32) {
    %c0_i32 = arith.constant 0 : i32
    %c0_i32_0 = arith.constant 0 : i32
    %c0_i32_1 = arith.constant 0 : i32
    return %c0_i32, %c0_i32_0 : i32, i32
  }
  func.func @transform_4(%arg0: i32) -> (i32, i32) {
    %c0_i32 = arith.constant 0 : i32
    %c0_i32_0 = arith.constant 0 : i32
    %c0_i32_1 = arith.constant 0 : i32
    return %c0_i32, %c0_i32_0 : i32, i32
  }
}

module attributes {stable_mosaic.version = 11 : i64} {
  func.func @_conv_bn_lrelu_kernel(%arg0: i32, %arg1: memref<128x1024xbf16, #tpu.memory_space<vmem>>, %arg2: memref<1024x128xbf16, #tpu.memory_space<vmem>>, %arg3: memref<1x128xf32, #tpu.memory_space<vmem>>, %arg4: memref<1x128xf32, #tpu.memory_space<vmem>>, %arg5: memref<128x128xbf16, #tpu.memory_space<vmem>>) attributes {dimension_semantics = [#tpu.dimension_semantics<arbitrary>], iteration_bounds = array<i64: 1>, scalar_prefetch = 0 : i64, scratch_operands = 0 : i64, tpu.core_type = #tpu.core_type<tc>, window_params = [{pipeline_mode = #tpu.pipeline_mode<synchronous>, transform_indices = @transform_0, window_bounds = array<i64: 128, 1024>}, {pipeline_mode = #tpu.pipeline_mode<synchronous>, transform_indices = @transform_1, window_bounds = array<i64: 1024, 128>}, {pipeline_mode = #tpu.pipeline_mode<synchronous>, transform_indices = @transform_2, window_bounds = array<i64: 1, 128>}, {pipeline_mode = #tpu.pipeline_mode<synchronous>, transform_indices = @transform_3, window_bounds = array<i64: 1, 128>}, {pipeline_mode = #tpu.pipeline_mode<synchronous>, transform_indices = @transform_4, window_bounds = array<i64: 128, 128>}]} {
    %c0 = arith.constant 0 : index
    %c0_0 = arith.constant 0 : index
    %0 = vector.load %arg1[%c0, %c0_0] : memref<128x1024xbf16, #tpu.memory_space<vmem>>, vector<128x1024xbf16>
    %c0_1 = arith.constant 0 : index
    %c0_2 = arith.constant 0 : index
    %1 = vector.load %arg2[%c0_1, %c0_2] : memref<1024x128xbf16, #tpu.memory_space<vmem>>, vector<1024x128xbf16>
    %cst = arith.constant dense<0.000000e+00> : vector<128x128xf32>
    %2 = tpu.matmul %0, %1, %cst {dimension_numbers = #tpu.dot_dimension_numbers<[1], [0], [0], [1], [0, 0, 1, 1], [], []>} : vector<128x1024xbf16>, vector<1024x128xbf16>, vector<128x128xf32> -> vector<128x128xf32>
    %cst_3 = arith.constant dense<0.000000e+00> : vector<128xf32>
    %3 = vector.multi_reduction <add>, %2, %cst_3 [0] : vector<128x128xf32> to vector<128xf32>
    %4 = vector.shape_cast %3 : vector<128xf32> to vector<1x128xf32>
    %cst_4 = arith.constant 7.812500e-03 : f32
    %5 = vector.broadcast %cst_4 : f32 to vector<1x128xf32>
    %6 = arith.mulf %4, %5 : vector<1x128xf32>
    %7 = vector.broadcast %6 : vector<1x128xf32> to vector<128x128xf32>
    %8 = arith.subf %2, %7 : vector<128x128xf32>
    %9 = arith.mulf %8, %8 : vector<128x128xf32>
    %cst_5 = arith.constant dense<0.000000e+00> : vector<128xf32>
    %10 = vector.multi_reduction <add>, %9, %cst_5 [0] : vector<128x128xf32> to vector<128xf32>
    %11 = vector.shape_cast %10 : vector<128xf32> to vector<1x128xf32>
    %cst_6 = arith.constant 7.812500e-03 : f32
    %12 = vector.broadcast %cst_6 : f32 to vector<1x128xf32>
    %13 = arith.mulf %11, %12 : vector<1x128xf32>
    %cst_7 = arith.constant 0.000000e+00 : f32
    %14 = vector.broadcast %cst_7 : f32 to vector<1x128xf32>
    %15 = arith.maximumf %13, %14 : vector<1x128xf32>
    %c0_8 = arith.constant 0 : index
    %c0_9 = arith.constant 0 : index
    %16 = vector.load %arg3[%c0_8, %c0_9] : memref<1x128xf32, #tpu.memory_space<vmem>>, vector<1x128xf32>
    %cst_10 = arith.constant 9.99999974E-6 : f32
    %17 = vector.broadcast %cst_10 : f32 to vector<1x128xf32>
    %18 = arith.addf %15, %17 : vector<1x128xf32>
    %19 = math.rsqrt %18 : vector<1x128xf32>
    %20 = arith.mulf %16, %19 : vector<1x128xf32>
    %21 = vector.broadcast %20 : vector<1x128xf32> to vector<128x128xf32>
    %22 = arith.mulf %8, %21 : vector<128x128xf32>
    %c0_11 = arith.constant 0 : index
    %c0_12 = arith.constant 0 : index
    %23 = vector.load %arg4[%c0_11, %c0_12] : memref<1x128xf32, #tpu.memory_space<vmem>>, vector<1x128xf32>
    %24 = vector.broadcast %23 : vector<1x128xf32> to vector<128x128xf32>
    %25 = arith.addf %22, %24 : vector<128x128xf32>
    %cst_13 = arith.constant 0.000000e+00 : f32
    %26 = vector.broadcast %cst_13 : f32 to vector<128x128xf32>
    %27 = arith.cmpf oge, %25, %26 : vector<128x128xf32>
    %cst_14 = arith.constant 2.000000e-01 : f32
    %28 = vector.broadcast %cst_14 : f32 to vector<128x128xf32>
    %29 = arith.mulf %28, %25 : vector<128x128xf32>
    %30 = arith.select %27, %25, %29 : vector<128x128xi1>, vector<128x128xf32>
    %31 = arith.truncf %30 : vector<128x128xf32> to vector<128x128xbf16>
    %c0_15 = arith.constant 0 : index
    %c0_16 = arith.constant 0 : index
    %32 = vector.load %arg5[%c0_15, %c0_16] : memref<128x128xbf16, #tpu.memory_space<vmem>>, vector<128x128xbf16>
    tpu.vector_store %arg5[%c0_15, %c0_16], %31 {strides = array<i32>} : memref<128x128xbf16, #tpu.memory_space<vmem>>, vector<128x128xbf16>,
    return
  }
  func.func @transform_0(%arg0: i32) -> (i32, i32) {
    %c0_i32 = arith.constant 0 : i32
    %c0_i32_0 = arith.constant 0 : i32
    %c0_i32_1 = arith.constant 0 : i32
    return %c0_i32, %c0_i32_0 : i32, i32
  }
  func.func @transform_1(%arg0: i32) -> (i32, i32) {
    %c0_i32 = arith.constant 0 : i32
    %c0_i32_0 = arith.constant 0 : i32
    %c0_i32_1 = arith.constant 0 : i32
    return %c0_i32, %c0_i32_0 : i32, i32
  }
  func.func @transform_2(%arg0: i32) -> (i32, i32) {
    %c0_i32 = arith.constant 0 : i32
    %c0_i32_0 = arith.constant 0 : i32
    %c0_i32_1 = arith.constant 0 : i32
    return %c0_i32, %c0_i32_0 : i32, i32
  }
  func.func @transform_3(%arg0: i32) -> (i32, i32) {
    %c0_i32 = arith.constant 0 : i32
    %c0_i32_0 = arith.constant 0 : i32
    %c0_i32_1 = arith.constant 0 : i32
    return %c0_i32, %c0_i32_0 : i32, i32
  }
  func.func @transform_4(%arg0: i32) -> (i32, i32) {
    %c0_i32 = arith.constant 0 : i32
    %c0_i32_0 = arith.constant 0 : i32
    %c0_i32_1 = arith.constant 0 : i32
    return %c0_i32, %c0_i32_0 : i32, i32
  }
}

module attributes {stable_mosaic.version = 11 : i64} {
  func.func @_conv_bn_lrelu_kernel(%arg0: i32, %arg1: memref<32x2048xbf16, #tpu.memory_space<vmem>>, %arg2: memref<2048x256xbf16, #tpu.memory_space<vmem>>, %arg3: memref<1x256xf32, #tpu.memory_space<vmem>>, %arg4: memref<1x256xf32, #tpu.memory_space<vmem>>, %arg5: memref<32x256xbf16, #tpu.memory_space<vmem>>) attributes {dimension_semantics = [#tpu.dimension_semantics<arbitrary>], iteration_bounds = array<i64: 1>, scalar_prefetch = 0 : i64, scratch_operands = 0 : i64, tpu.core_type = #tpu.core_type<tc>, window_params = [{pipeline_mode = #tpu.pipeline_mode<synchronous>, transform_indices = @transform_0, window_bounds = array<i64: 32, 2048>}, {pipeline_mode = #tpu.pipeline_mode<synchronous>, transform_indices = @transform_1, window_bounds = array<i64: 2048, 256>}, {pipeline_mode = #tpu.pipeline_mode<synchronous>, transform_indices = @transform_2, window_bounds = array<i64: 1, 256>}, {pipeline_mode = #tpu.pipeline_mode<synchronous>, transform_indices = @transform_3, window_bounds = array<i64: 1, 256>}, {pipeline_mode = #tpu.pipeline_mode<synchronous>, transform_indices = @transform_4, window_bounds = array<i64: 32, 256>}]} {
    %c0 = arith.constant 0 : index
    %c0_0 = arith.constant 0 : index
    %0 = vector.load %arg1[%c0, %c0_0] : memref<32x2048xbf16, #tpu.memory_space<vmem>>, vector<32x2048xbf16>
    %c0_1 = arith.constant 0 : index
    %c0_2 = arith.constant 0 : index
    %1 = vector.load %arg2[%c0_1, %c0_2] : memref<2048x256xbf16, #tpu.memory_space<vmem>>, vector<2048x256xbf16>
    %cst = arith.constant dense<0.000000e+00> : vector<32x256xf32>
    %2 = tpu.matmul %0, %1, %cst {dimension_numbers = #tpu.dot_dimension_numbers<[1], [0], [0], [1], [0, 0, 1, 1], [], []>} : vector<32x2048xbf16>, vector<2048x256xbf16>, vector<32x256xf32> -> vector<32x256xf32>
    %cst_3 = arith.constant dense<0.000000e+00> : vector<256xf32>
    %3 = vector.multi_reduction <add>, %2, %cst_3 [0] : vector<32x256xf32> to vector<256xf32>
    %4 = vector.shape_cast %3 : vector<256xf32> to vector<1x256xf32>
    %cst_4 = arith.constant 3.125000e-02 : f32
    %5 = vector.broadcast %cst_4 : f32 to vector<1x256xf32>
    %6 = arith.mulf %4, %5 : vector<1x256xf32>
    %7 = vector.broadcast %6 : vector<1x256xf32> to vector<32x256xf32>
    %8 = arith.subf %2, %7 : vector<32x256xf32>
    %9 = arith.mulf %8, %8 : vector<32x256xf32>
    %cst_5 = arith.constant dense<0.000000e+00> : vector<256xf32>
    %10 = vector.multi_reduction <add>, %9, %cst_5 [0] : vector<32x256xf32> to vector<256xf32>
    %11 = vector.shape_cast %10 : vector<256xf32> to vector<1x256xf32>
    %cst_6 = arith.constant 3.125000e-02 : f32
    %12 = vector.broadcast %cst_6 : f32 to vector<1x256xf32>
    %13 = arith.mulf %11, %12 : vector<1x256xf32>
    %cst_7 = arith.constant 0.000000e+00 : f32
    %14 = vector.broadcast %cst_7 : f32 to vector<1x256xf32>
    %15 = arith.maximumf %13, %14 : vector<1x256xf32>
    %c0_8 = arith.constant 0 : index
    %c0_9 = arith.constant 0 : index
    %16 = vector.load %arg3[%c0_8, %c0_9] : memref<1x256xf32, #tpu.memory_space<vmem>>, vector<1x256xf32>
    %cst_10 = arith.constant 9.99999974E-6 : f32
    %17 = vector.broadcast %cst_10 : f32 to vector<1x256xf32>
    %18 = arith.addf %15, %17 : vector<1x256xf32>
    %19 = math.rsqrt %18 : vector<1x256xf32>
    %20 = arith.mulf %16, %19 : vector<1x256xf32>
    %21 = vector.broadcast %20 : vector<1x256xf32> to vector<32x256xf32>
    %22 = arith.mulf %8, %21 : vector<32x256xf32>
    %c0_11 = arith.constant 0 : index
    %c0_12 = arith.constant 0 : index
    %23 = vector.load %arg4[%c0_11, %c0_12] : memref<1x256xf32, #tpu.memory_space<vmem>>, vector<1x256xf32>
    %24 = vector.broadcast %23 : vector<1x256xf32> to vector<32x256xf32>
    %25 = arith.addf %22, %24 : vector<32x256xf32>
    %cst_13 = arith.constant 0.000000e+00 : f32
    %26 = vector.broadcast %cst_13 : f32 to vector<32x256xf32>
    %27 = arith.cmpf oge, %25, %26 : vector<32x256xf32>
    %cst_14 = arith.constant 2.000000e-01 : f32
    %28 = vector.broadcast %cst_14 : f32 to vector<32x256xf32>
    %29 = arith.mulf %28, %25 : vector<32x256xf32>
    %30 = arith.select %27, %25, %29 : vector<32x256xi1>, vector<32x256xf32>
    %31 = arith.truncf %30 : vector<32x256xf32> to vector<32x256xbf16>
    %c0_15 = arith.constant 0 : index
    %c0_16 = arith.constant 0 : index
    %32 = vector.load %arg5[%c0_15, %c0_16] : memref<32x256xbf16, #tpu.memory_space<vmem>>, vector<32x256xbf16>
    tpu.vector_store %arg5[%c0_15, %c0_16], %31 {strides = array<i32>} : memref<32x256xbf16, #tpu.memory_space<vmem>>, vector<32x256xbf16>,
    return
  }
  func.func @transform_0(%arg0: i32) -> (i32, i32) {
    %c0_i32 = arith.constant 0 : i32
    %c0_i32_0 = arith.constant 0 : i32
    %c0_i32_1 = arith.constant 0 : i32
    return %c0_i32, %c0_i32_0 : i32, i32
  }
  func.func @transform_1(%arg0: i32) -> (i32, i32) {
    %c0_i32 = arith.constant 0 : i32
    %c0_i32_0 = arith.constant 0 : i32
    %c0_i32_1 = arith.constant 0 : i32
    return %c0_i32, %c0_i32_0 : i32, i32
  }
  func.func @transform_2(%arg0: i32) -> (i32, i32) {
    %c0_i32 = arith.constant 0 : i32
    %c0_i32_0 = arith.constant 0 : i32
    %c0_i32_1 = arith.constant 0 : i32
    return %c0_i32, %c0_i32_0 : i32, i32
  }
  func.func @transform_3(%arg0: i32) -> (i32, i32) {
    %c0_i32 = arith.constant 0 : i32
    %c0_i32_0 = arith.constant 0 : i32
    %c0_i32_1 = arith.constant 0 : i32
    return %c0_i32, %c0_i32_0 : i32, i32
  }
  func.func @transform_4(%arg0: i32) -> (i32, i32) {
    %c0_i32 = arith.constant 0 : i32
    %c0_i32_0 = arith.constant 0 : i32
    %c0_i32_1 = arith.constant 0 : i32
    return %c0_i32, %c0_i32_0 : i32, i32
  }
}

</mosaic_0001>

<bundles_post_ra>
// kernel: dnet_forward.4
= control target key start
LH: loop header
LB: loop body
LE: loop exit
PB: predicated region body
PF: predicated region fallthrough
CT: control target
= control target key end

     0   :  { %s2289_s9 = smov 0   ;;  %s2710_s0 = inlined_call_operand.vmem [shape: bf16[2048,48], index: 0, kind: input, shape index: {}]   ;;  %s2711_s1 = inlined_call_operand.vmem [shape: bf16[48,32], index: 1, kind: input, shape index: {}]   ;;  %s2712_s2 = inlined_call_operand.vmem [shape: bf16[2048,32], index: 2, kind: output, shape index: {}]  }
   0x1 LB: > { %s1839_s10 = sadd.s32 4294967295, %s2272_s9   ;;  %p1843_p0 = scmp.ge.s32.totalorder %s2272_s9, 1  ;;  %s2272_s9 = sphi %s2289_s9, %s12_s9  }
   0x2   : > { %p113_p1 = scmp.lt.s32.totalorder %s2272_s9, 3 }
   0x4   : > { %p114_p2 = pnand %p1843_p0, %p113_p1 }
   0x5   : > { %s1844_s13 = sshll.u32 (!%p114_p2), %s1839_s10, 7 }
   0x6   : > { %117 = sbr.rel (%p114_p2) target bundleno = 411 (0x19b), region = 28  ;;  %p136_p3 = scmp.lt.s32.totalorder (!%p114_p2), %s1844_s13, 255 }
   0xb   : > { %v2248_v0 = vld [vmem:[%s2711_s1 + $0x10] sm:$0xff]  ;;  %v2247_v1 = vld [vmem:[%s2711_s1 + $0x8] sm:$0xff]  ;;  %s2714_s13 = smov (!%p136_p3, %s1844_s13), 255  ;;  %v2246_v2 = vld [vmem:[%s2711_s1] sm:$0xff]  ;;  %vm620_vm0 = vcmask 392192   ;;  %vm1654_vm3 = vcmask 257024  }
   0xc   : > { %818 = vmatpush.bf16.msra.mxu0 %v2248_v0  ;;  %2249 = vmatpush.bf16.msra.mxu1 %v2248_v0  ;;  %s1845_s16 = sshll.u32 %s2714_s13, 2 }
   0xd   : > { %2250 = vmatpush.bf16.msra.mxu2 %v2248_v0  ;;  %2251 = vmatpush.bf16.msra.mxu3 %v2248_v0  ;;  %s2314_s21 = scalar_lea.vmem %s2710_s0, %s1845_s16  ;;  %s2389_s24 = scalar_lea.vmem %s2712_s2, %s1845_s16 }
   0xe   : > { %v2182_v3 = vld [vmem:[%s2314_s21] sm:$0xff]  ;;  %v2183_v7 = vld [vmem:[%s2314_s21 + $0x8] sm:$0xff]  ;;  %v2184_v11 = vld [vmem:[%s2314_s21 + $0x10] sm:$0xff] }
   0xf   : > { %v2198_v4 = vld [vmem:[%s2314_s21 + $0x80] sm:$0xff]  ;;  %v2199_v8 = vld [vmem:[%s2314_s21 + $0x88] sm:$0xff]  ;;  %v2200_v12 = vld [vmem:[%s2314_s21 + $0x90] sm:$0xff] }
  0x10   : > { %819 = vmatpush.bf16.msra.mxu0 %v2247_v1  ;;  %2252 = vmatpush.bf16.msra.mxu1 %v2247_v1  ;;  %v2214_v5 = vld [vmem:[%s2314_s21 + $0x100] sm:$0xff]  ;;  %v2215_v9 = vld [vmem:[%s2314_s21 + $0x108] sm:$0xff]  ;;  %v2216_v13 = vld [vmem:[%s2314_s21 + $0x110] sm:$0xff] }
  0x11   : > { %2253 = vmatpush.bf16.msra.mxu2 %v2247_v1  ;;  %2254 = vmatpush.bf16.msra.mxu3 %v2247_v1  ;;  %v2230_v6 = vld [vmem:[%s2314_s21 + $0x180] sm:$0xff]  ;;  %v2231_v10 = vld [vmem:[%s2314_s21 + $0x188] sm:$0xff]  ;;  %v2232_v14 = vld [vmem:[%s2314_s21 + $0x190] sm:$0xff] }
  0x12   : > { %v2185_v15 = vld [vmem:[%s2314_s21 + $0x18] sm:$0xff]  ;;  %v2186_v19 = vld [vmem:[%s2314_s21 + $0x20] sm:$0xff]  ;;  %v2187_v23 = vld [vmem:[%s2314_s21 + $0x28] sm:$0xff] }
  0x13   : > { %v2201_v16 = vld [vmem:[%s2314_s21 + $0x98] sm:$0xff]  ;;  %v2202_v20 = vld [vmem:[%s2314_s21 + $0xa0] sm:$0xff]  ;;  %v2203_v24 = vld [vmem:[%s2314_s21 + $0xa8] sm:$0xff] }
  0x14   : > { %820 = vmatpush.bf16.msra.mxu0 %v2246_v2  ;;  %2255 = vmatpush.bf16.msra.mxu1 %v2246_v2  ;;  %v2217_v17 = vld [vmem:[%s2314_s21 + $0x118] sm:$0xff]  ;;  %v2218_v21 = vld [vmem:[%s2314_s21 + $0x120] sm:$0xff]  ;;  %v2219_v25 = vld [vmem:[%s2314_s21 + $0x128] sm:$0xff] }
  0x15   : > { %2256 = vmatpush.bf16.msra.mxu2 %v2246_v2  ;;  %2257 = vmatpush.bf16.msra.mxu3 %v2246_v2  ;;  %v2233_v18 = vld [vmem:[%s2314_s21 + $0x198] sm:$0xff]  ;;  %v2234_v22 = vld [vmem:[%s2314_s21 + $0x1a0] sm:$0xff]  ;;  %v2235_v26 = vld [vmem:[%s2314_s21 + $0x1a8] sm:$0xff] }
  0x16   : > { %v2188_v27 = vld [vmem:[%s2314_s21 + $0x30] sm:$0xff]  ;;  %v2189_v31 = vld [vmem:[%s2314_s21 + $0x38] sm:$0xff]  ;;  %v2190_v35 = vld [vmem:[%s2314_s21 + $0x40] sm:$0xff] }
  0x17   : > { %2116 = vmatmul.msk.bf16.vlgmr.msra.gmra.mxu0 %vm620_vm0, %v2182_v3  ;;  %2132 = vmatmul.msk.bf16.vlgmr.msra.gmra.mxu1 %vm620_vm0, %v2198_v4  ;;  %v2204_v28 = vld [vmem:[%s2314_s21 + $0xb0] sm:$0xff]  ;;  %v2205_v32 = vld [vmem:[%s2314_s21 + $0xb8] sm:$0xff]  ;;  %v2206_v36 = vld [vmem:[%s2314_s21 + $0xc0] sm:$0xff] }
  0x18   : > { %2148 = vmatmul.msk.bf16.vlgmr.msra.gmra.mxu2 %vm620_vm0, %v2214_v5  ;;  %2164 = vmatmul.msk.bf16.vlgmr.msra.gmra.mxu3 %vm620_vm0, %v2230_v6  ;;  %v2220_v29 = vld [vmem:[%s2314_s21 + $0x130] sm:$0xff]  ;;  %v2221_v33 = vld [vmem:[%s2314_s21 + $0x138] sm:$0xff]  ;;  %v2222_v39 = vld [vmem:[%s2314_s21 + $0x140] sm:$0xff] }
  0x19   : > { %v2236_v30 = vld [vmem:[%s2314_s21 + $0x1b0] sm:$0xff]  ;;  %v2237_v34 = vld [vmem:[%s2314_s21 + $0x1b8] sm:$0xff]  ;;  %v2238_v40 = vld [vmem:[%s2314_s21 + $0x1c0] sm:$0xff] }
  0x1a   : > { %v2191_v63 = vld [vmem:[%s2314_s21 + $0x48] sm:$0xff] }
  0x1b   : > { %v2207_v2 = vld [vmem:[%s2314_s21 + $0xc8] sm:$0xff] }
  0x1c   : > { %v2223_v3 = vld [vmem:[%s2314_s21 + $0x148] sm:$0xff] }
  0x1d   : > { %v2239_v4 = vld [vmem:[%s2314_s21 + $0x1c8] sm:$0xff] }
  0x27   : > { %2117 = vmatmul.msk.bf16.gmra.mxu0 %vm620_vm0, %v2183_v7  ;;  %2133 = vmatmul.msk.bf16.gmra.mxu1 %vm620_vm0, %v2199_v8 }
  0x28   : > { %2149 = vmatmul.msk.bf16.gmra.mxu2 %vm620_vm0, %v2215_v9  ;;  %2165 = vmatmul.msk.bf16.gmra.mxu3 %vm620_vm0, %v2231_v10 }
  0x37   : > { %2118 = vmatmul.msk.bf16.gmra.mxu0 %vm620_vm0, %v2184_v11  ;;  %2134 = vmatmul.msk.bf16.gmra.mxu1 %vm620_vm0, %v2200_v12 }
  0x38   : > { %2150 = vmatmul.msk.bf16.gmra.mxu2 %vm620_vm0, %v2216_v13  ;;  %2166 = vmatmul.msk.bf16.gmra.mxu3 %vm620_vm0, %v2232_v14 }
  0x47   : > { %2119 = vmatmul.msk.bf16.gmra.mxu0 %vm620_vm0, %v2185_v15  ;;  %2135 = vmatmul.msk.bf16.gmra.mxu1 %vm620_vm0, %v2201_v16 }
  0x48   : > { %2151 = vmatmul.msk.bf16.gmra.mxu2 %vm620_vm0, %v2217_v17  ;;  %2167 = vmatmul.msk.bf16.gmra.mxu3 %vm620_vm0, %v2233_v18 }
  0x57   : > { %2120 = vmatmul.msk.bf16.gmra.mxu0 %vm620_vm0, %v2186_v19  ;;  %2136 = vmatmul.msk.bf16.gmra.mxu1 %vm620_vm0, %v2202_v20 }
  0x58   : > { %2152 = vmatmul.msk.bf16.gmra.mxu2 %vm620_vm0, %v2218_v21  ;;  %2168 = vmatmul.msk.bf16.gmra.mxu3 %vm620_vm0, %v2234_v22 }
  0x67   : > { %2121 = vmatmul.msk.bf16.gmra.mxu0 %vm620_vm0, %v2187_v23  ;;  %2137 = vmatmul.msk.bf16.gmra.mxu1 %vm620_vm0, %v2203_v24 }
  0x68   : > { %2153 = vmatmul.msk.bf16.gmra.mxu2 %vm620_vm0, %v2219_v25  ;;  %2169 = vmatmul.msk.bf16.gmra.mxu3 %vm620_vm0, %v2235_v26 }
  0x77   : > { %2122 = vmatmul.msk.bf16.gmra.mxu0 %vm620_vm0, %v2188_v27  ;;  %2138 = vmatmul.msk.bf16.gmra.mxu1 %vm620_vm0, %v2204_v28 }
  0x78   : > { %2154 = vmatmul.msk.bf16.gmra.mxu2 %vm620_vm0, %v2220_v29  ;;  %2170 = vmatmul.msk.bf16.gmra.mxu3 %vm620_vm0, %v2236_v30 }
  0x87   : > { %2123 = vmatmul.msk.bf16.gmra.mxu0 %vm620_vm0, %v2189_v31  ;;  %2139 = vmatmul.msk.bf16.gmra.mxu1 %vm620_vm0, %v2205_v32 }
  0x88   : > { %2155 = vmatmul.msk.bf16.gmra.mxu2 %vm620_vm0, %v2221_v33  ;;  %2171 = vmatmul.msk.bf16.gmra.mxu3 %vm620_vm0, %v2237_v34 }
  0x94   : > { %v822_v37 = vpop.f32.mrf.mxu0  ;;  %v902_v38 = vpop.f32.mrf.mxu1 }
  0x95   : > { %vm1142_vm1 = vcmp.ge.f32.partialorder %v822_v37, 0.0  ;;  %v1270_v41 = vmul.f32 0.2, %v822_v37  ;;  %vm1174_vm2 = vcmp.ge.f32.partialorder %v902_v38, 0.0  ;;  %v1302_v42 = vmul.f32 0.2, %v902_v38 }
  0x97   : > { %v1398_v43 = vsel %vm1142_vm1, %v822_v37, %v1270_v41  ;;  %v1430_v44 = vsel %vm1174_vm2, %v902_v38, %v1302_v42  ;;  %2124 = vmatmul.msk.bf16.gmra.mxu0 %vm620_vm0, %v2190_v35  ;;  %2140 = vmatmul.msk.bf16.gmra.mxu1 %vm620_vm0, %v2206_v36  ;;  %v2192_v35 = vld [vmem:[%s2314_s21 + $0x50] sm:$0xff] }
  0x98   : > { %v1526_v45 = vpack.c.bf16 %v1398_v43, %v1398_v43  ;;  %v1558_v46 = vpack.c.bf16 %v1430_v44, %v1430_v44  ;;  %2156 = vmatmul.msk.bf16.gmra.mxu2 %vm620_vm0, %v2222_v39  ;;  %2172 = vmatmul.msk.bf16.gmra.mxu3 %vm620_vm0, %v2238_v40  ;;  %v2208_v38 = vld [vmem:[%s2314_s21 + $0xd0] sm:$0xff] }
  0x99   : > { %v2224_v39 = vld [vmem:[%s2314_s21 + $0x150] sm:$0xff] }
  0x9a   : > { %1655 = vst.msk [vmem:[%s2389_s24] sm:$0xf] %vm1654_vm3, %v1526_v45  ;;  %v2240_v40 = vld [vmem:[%s2314_s21 + $0x1d0] sm:$0xff] }
  0x9b   : > { %1687 = vst.msk [vmem:[%s2389_s24 + $0x80] sm:$0xf] %vm1654_vm3, %v1558_v46  ;;  %v982_v47 = vpop.f32.mrf.mxu2  ;;  %v1062_v48 = vpop.f32.mrf.mxu3 }
  0x9c   : > { %vm1206_vm4 = vcmp.ge.f32.partialorder %v982_v47, 0.0  ;;  %v1334_v49 = vmul.f32 0.2, %v982_v47  ;;  %vm1238_vm5 = vcmp.ge.f32.partialorder %v1062_v48, 0.0  ;;  %v1366_v50 = vmul.f32 0.2, %v1062_v48  ;;  %v824_v51 = vpop.f32.mrf.mxu0  ;;  %v904_v52 = vpop.f32.mrf.mxu1 }
  0x9d   : > { %vm1143_vm6 = vcmp.ge.f32.partialorder %v824_v51, 0.0  ;;  %v1271_v53 = vmul.f32 0.2, %v824_v51  ;;  %vm1175_vm7 = vcmp.ge.f32.partialorder %v904_v52, 0.0  ;;  %v1303_v54 = vmul.f32 0.2, %v904_v52 }
  0x9e   : > { %v1462_v55 = vsel %vm1206_vm4, %v982_v47, %v1334_v49  ;;  %v1494_v56 = vsel %vm1238_vm5, %v1062_v48, %v1366_v50 }
  0x9f   : > { %v1590_v57 = vpack.c.bf16 %v1462_v55, %v1462_v55  ;;  %v1622_v58 = vpack.c.bf16 %v1494_v56, %v1494_v56  ;;  %v1399_v59 = vsel %vm1143_vm6, %v824_v51, %v1271_v53  ;;  %v1431_v60 = vsel %vm1175_vm7, %v904_v52, %v1303_v54 }
  0xa0   : > { %v1527_v61 = vpack.c.bf16 %v1399_v59, %v1399_v59  ;;  %v1559_v62 = vpack.c.bf16 %v1431_v60, %v1431_v60 }
  0xa1   : > { %1719 = vst.msk [vmem:[%s2389_s24 + $0x100] sm:$0xf] %vm1654_vm3, %v1590_v57 }
  0xa2   : > { %1751 = vst.msk [vmem:[%s2389_s24 + $0x180] sm:$0xf] %vm1654_vm3, %v1622_v58 }
  0xa3   : > { %1656 = vst.msk [vmem:[%s2389_s24 + $0x4] sm:$0xf] %vm1654_vm3, %v1527_v61  ;;  %v984_v0 = vpop.f32.mrf.mxu2  ;;  %v1064_v1 = vpop.f32.mrf.mxu3 }
  0xa4   : > { %1688 = vst.msk [vmem:[%s2389_s24 + $0x84] sm:$0xf] %vm1654_vm3, %v1559_v62  ;;  %vm1207_vm8 = vcmp.ge.f32.partialorder %v984_v0, 0.0  ;;  %v1335_v5 = vmul.f32 0.2, %v984_v0  ;;  %vm1239_vm9 = vcmp.ge.f32.partialorder %v1064_v1, 0.0  ;;  %v827_v6 = vpop.f32.mrf.mxu0  ;;  %v907_v7 = vpop.f32.mrf.mxu1 }
  0xa5   : > { %v1367_v8 = vmul.f32 0.2, %v1064_v1  ;;  %vm1144_vm10 = vcmp.ge.f32.partialorder %v827_v6, 0.0  ;;  %v1272_v9 = vmul.f32 0.2, %v827_v6  ;;  %vm1176_vm11 = vcmp.ge.f32.partialorder %v907_v7, 0.0 }
  0xa6   : > { %v1463_v10 = vsel %vm1207_vm8, %v984_v0, %v1335_v5  ;;  %v1304_v11 = vmul.f32 0.2, %v907_v7 }
  0xa7   : > { %v1591_v12 = vpack.c.bf16 %v1463_v10, %v1463_v10  ;;  %v1495_v13 = vsel %vm1239_vm9, %v1064_v1, %v1367_v8  ;;  %v1400_v14 = vsel %vm1144_vm10, %v827_v6, %v1272_v9  ;;  %2125 = vmatmul.msk.bf16.gmra.mxu0 %vm620_vm0, %v2191_v63  ;;  %2141 = vmatmul.msk.bf16.gmra.mxu1 %vm620_vm0, %v2207_v2  ;;  %v2209_v10 = vld [vmem:[%s2314_s21 + $0xd8] sm:$0xff] }
  0xa8   : > { %v1623_v15 = vpack.c.bf16 %v1495_v13, %v1495_v13  ;;  %v1528_v16 = vpack.c.bf16 %v1400_v14, %v1400_v14  ;;  %v1432_v17 = vsel %vm1176_vm11, %v907_v7, %v1304_v11  ;;  %2157 = vmatmul.msk.bf16.gmra.mxu2 %vm620_vm0, %v2223_v3  ;;  %2173 = vmatmul.msk.bf16.gmra.mxu3 %vm620_vm0, %v2239_v4  ;;  %v2193_v7 = vld [vmem:[%s2314_s21 + $0x58] sm:$0xff] }
  0xa9   : > { %1720 = vst.msk [vmem:[%s2389_s24 + $0x104] sm:$0xf] %vm1654_vm3, %v1591_v12  ;;  %v1560_v18 = vpack.c.bf16 %v1432_v17, %v1432_v17  ;;  %v2225_v11 = vld [vmem:[%s2314_s21 + $0x158] sm:$0xff] }
  0xaa   : > { %1752 = vst.msk [vmem:[%s2389_s24 + $0x184] sm:$0xf] %vm1654_vm3, %v1623_v15  ;;  %v2241_v12 = vld [vmem:[%s2314_s21 + $0x1d8] sm:$0xff] }
  0xab   : > { %1657 = vst.msk [vmem:[%s2389_s24 + $0x8] sm:$0xf] %vm1654_vm3, %v1528_v16  ;;  %v987_v19 = vpop.f32.mrf.mxu2  ;;  %v1067_v20 = vpop.f32.mrf.mxu3 }
  0xac   : > { %1689 = vst.msk [vmem:[%s2389_s24 + $0x88] sm:$0xf] %vm1654_vm3, %v1560_v18  ;;  %vm1208_vm12 = vcmp.ge.f32.partialorder %v987_v19, 0.0  ;;  %v1336_v21 = vmul.f32 0.2, %v987_v19  ;;  %vm1240_vm13 = vcmp.ge.f32.partialorder %v1067_v20, 0.0  ;;  %v829_v22 = vpop.f32.mrf.mxu0  ;;  %v909_v23 = vpop.f32.mrf.mxu1 }
  0xad   : > { %v1368_v24 = vmul.f32 0.2, %v1067_v20  ;;  %vm1145_vm14 = vcmp.ge.f32.partialorder %v829_v22, 0.0  ;;  %v1273_v25 = vmul.f32 0.2, %v829_v22  ;;  %vm1177_vm15 = vcmp.ge.f32.partialorder %v909_v23, 0.0 }
  0xae   : > { %v1464_v26 = vsel %vm1208_vm12, %v987_v19, %v1336_v21  ;;  %v1305_v27 = vmul.f32 0.2, %v909_v23 }
  0xaf   : > { %v1592_v28 = vpack.c.bf16 %v1464_v26, %v1464_v26  ;;  %v1496_v29 = vsel %vm1240_vm13, %v1067_v20, %v1368_v24  ;;  %v1401_v30 = vsel %vm1145_vm14, %v829_v22, %v1273_v25 }
  0xb0   : > { %v1624_v31 = vpack.c.bf16 %v1496_v29, %v1496_v29  ;;  %v1529_v32 = vpack.c.bf16 %v1401_v30, %v1401_v30  ;;  %v1433_v33 = vsel %vm1177_vm15, %v909_v23, %v1305_v27 }
  0xb1   : > { %1721 = vst.msk [vmem:[%s2389_s24 + $0x108] sm:$0xf] %vm1654_vm3, %v1592_v28  ;;  %v1561_v34 = vpack.c.bf16 %v1433_v33, %v1433_v33 }
  0xb2   : > { %1753 = vst.msk [vmem:[%s2389_s24 + $0x188] sm:$0xf] %vm1654_vm3, %v1624_v31 }
  0xb3   : > { %1658 = vst.msk [vmem:[%s2389_s24 + $0xc] sm:$0xf] %vm1654_vm3, %v1529_v32  ;;  %v989_v36 = vpop.f32.mrf.mxu2  ;;  %v1069_v37 = vpop.f32.mrf.mxu3 }
  0xb4   : > { %1690 = vst.msk [vmem:[%s2389_s24 + $0x8c] sm:$0xf] %vm1654_vm3, %v1561_v34  ;;  %vm1209_vm1 = vcmp.ge.f32.partialorder %v989_v36, 0.0  ;;  %v1337_v41 = vmul.f32 0.2, %v989_v36  ;;  %vm1241_vm2 = vcmp.ge.f32.partialorder %v1069_v37, 0.0  ;;  %v832_v42 = vpop.f32.mrf.mxu0  ;;  %v912_v43 = vpop.f32.mrf.mxu1 }
  0xb5   : > { %v1369_v44 = vmul.f32 0.2, %v1069_v37  ;;  %vm1146_vm4 = vcmp.ge.f32.partialorder %v832_v42, 0.0  ;;  %v1274_v45 = vmul.f32 0.2, %v832_v42  ;;  %vm1178_vm5 = vcmp.ge.f32.partialorder %v912_v43, 0.0 }
  0xb6   : > { %v1465_v46 = vsel %vm1209_vm1, %v989_v36, %v1337_v41  ;;  %v1306_v47 = vmul.f32 0.2, %v912_v43 }
  0xb7   : > { %v1593_v48 = vpack.c.bf16 %v1465_v46, %v1465_v46  ;;  %v1497_v49 = vsel %vm1241_vm2, %v1069_v37, %v1369_v44  ;;  %v1402_v50 = vsel %vm1146_vm4, %v832_v42, %v1274_v45  ;;  %2126 = vmatmul.msk.bf16.gmra.mxu0 %vm620_vm0, %v2192_v35  ;;  %2142 = vmatmul.msk.bf16.gmra.mxu1 %vm620_vm0, %v2208_v38  ;;  %v2210_v46 = vld [vmem:[%s2314_s21 + $0xe0] sm:$0xff] }
  0xb8   : > { %v1625_v51 = vpack.c.bf16 %v1497_v49, %v1497_v49  ;;  %v1530_v52 = vpack.c.bf16 %v1402_v50, %v1402_v50  ;;  %v1434_v53 = vsel %vm1178_vm5, %v912_v43, %v1306_v47  ;;  %2158 = vmatmul.msk.bf16.gmra.mxu2 %vm620_vm0, %v2224_v39  ;;  %2174 = vmatmul.msk.bf16.gmra.mxu3 %vm620_vm0, %v2240_v40  ;;  %v2194_v43 = vld [vmem:[%s2314_s21 + $0x60] sm:$0xff] }
  0xb9   : > { %1722 = vst.msk [vmem:[%s2389_s24 + $0x10c] sm:$0xf] %vm1654_vm3, %v1593_v48  ;;  %v1562_v54 = vpack.c.bf16 %v1434_v53, %v1434_v53  ;;  %v2226_v47 = vld [vmem:[%s2314_s21 + $0x160] sm:$0xff] }
  0xba   : > { %1754 = vst.msk [vmem:[%s2389_s24 + $0x18c] sm:$0xf] %vm1654_vm3, %v1625_v51  ;;  %v2242_v48 = vld [vmem:[%s2314_s21 + $0x1e0] sm:$0xff] }
  0xbb   : > { %1659 = vst.msk [vmem:[%s2389_s24 + $0x10] sm:$0xf] %vm1654_vm3, %v1530_v52  ;;  %v992_v55 = vpop.f32.mrf.mxu2  ;;  %v1072_v56 = vpop.f32.mrf.mxu3 }
  0xbc   : > { %1691 = vst.msk [vmem:[%s2389_s24 + $0x90] sm:$0xf] %vm1654_vm3, %v1562_v54  ;;  %vm1210_vm6 = vcmp.ge.f32.partialorder %v992_v55, 0.0  ;;  %v1338_v57 = vmul.f32 0.2, %v992_v55  ;;  %vm1242_vm7 = vcmp.ge.f32.partialorder %v1072_v56, 0.0  ;;  %v834_v58 = vpop.f32.mrf.mxu0  ;;  %v914_v59 = vpop.f32.mrf.mxu1 }
  0xbd   : > { %v1370_v60 = vmul.f32 0.2, %v1072_v56  ;;  %vm1147_vm8 = vcmp.ge.f32.partialorder %v834_v58, 0.0  ;;  %v1275_v61 = vmul.f32 0.2, %v834_v58  ;;  %vm1179_vm9 = vcmp.ge.f32.partialorder %v914_v59, 0.0 }
  0xbe   : > { %v1466_v62 = vsel %vm1210_vm6, %v992_v55, %v1338_v57  ;;  %v1307_v63 = vmul.f32 0.2, %v914_v59 }
  0xbf   : > { %v1594_v0 = vpack.c.bf16 %v1466_v62, %v1466_v62  ;;  %v1498_v1 = vsel %vm1242_vm7, %v1072_v56, %v1370_v60  ;;  %v1403_v2 = vsel %vm1147_vm8, %v834_v58, %v1275_v61 }
  0xc0   : > { %v1626_v3 = vpack.c.bf16 %v1498_v1, %v1498_v1  ;;  %v1531_v4 = vpack.c.bf16 %v1403_v2, %v1403_v2  ;;  %v1435_v5 = vsel %vm1179_vm9, %v914_v59, %v1307_v63 }
  0xc1   : > { %1723 = vst.msk [vmem:[%s2389_s24 + $0x110] sm:$0xf] %vm1654_vm3, %v1594_v0  ;;  %v1563_v6 = vpack.c.bf16 %v1435_v5, %v1435_v5 }
  0xc2   : > { %1755 = vst.msk [vmem:[%s2389_s24 + $0x190] sm:$0xf] %vm1654_vm3, %v1626_v3 }
  0xc3   : > { %1660 = vst.msk [vmem:[%s2389_s24 + $0x14] sm:$0xf] %vm1654_vm3, %v1531_v4  ;;  %v994_v8 = vpop.f32.mrf.mxu2  ;;  %v1074_v9 = vpop.f32.mrf.mxu3 }
  0xc4   : > { %1692 = vst.msk [vmem:[%s2389_s24 + $0x94] sm:$0xf] %vm1654_vm3, %v1563_v6  ;;  %vm1211_vm10 = vcmp.ge.f32.partialorder %v994_v8, 0.0  ;;  %v1339_v13 = vmul.f32 0.2, %v994_v8  ;;  %vm1243_vm11 = vcmp.ge.f32.partialorder %v1074_v9, 0.0  ;;  %v837_v14 = vpop.f32.mrf.mxu0  ;;  %v917_v15 = vpop.f32.mrf.mxu1 }
  0xc5   : > { %v1371_v16 = vmul.f32 0.2, %v1074_v9  ;;  %vm1148_vm12 = vcmp.ge.f32.partialorder %v837_v14, 0.0  ;;  %v1276_v17 = vmul.f32 0.2, %v837_v14  ;;  %vm1180_vm13 = vcmp.ge.f32.partialorder %v917_v15, 0.0 }
  0xc6   : > { %v1467_v18 = vsel %vm1211_vm10, %v994_v8, %v1339_v13  ;;  %v1308_v19 = vmul.f32 0.2, %v917_v15 }
  0xc7   : > { %v1595_v20 = vpack.c.bf16 %v1467_v18, %v1467_v18  ;;  %v1499_v21 = vsel %vm1243_vm11, %v1074_v9, %v1371_v16  ;;  %v1404_v22 = vsel %vm1148_vm12, %v837_v14, %v1276_v17  ;;  %2127 = vmatmul.msk.bf16.gmra.mxu0 %vm620_vm0, %v2193_v7  ;;  %2143 = vmatmul.msk.bf16.gmra.mxu1 %vm620_vm0, %v2209_v10  ;;  %v2211_v18 = vld [vmem:[%s2314_s21 + $0xe8] sm:$0xff] }
  0xc8   : > { %v1627_v23 = vpack.c.bf16 %v1499_v21, %v1499_v21  ;;  %v1532_v24 = vpack.c.bf16 %v1404_v22, %v1404_v22  ;;  %v1436_v25 = vsel %vm1180_vm13, %v917_v15, %v1308_v19  ;;  %2159 = vmatmul.msk.bf16.gmra.mxu2 %vm620_vm0, %v2225_v11  ;;  %2175 = vmatmul.msk.bf16.gmra.mxu3 %vm620_vm0, %v2241_v12  ;;  %v2195_v15 = vld [vmem:[%s2314_s21 + $0x68] sm:$0xff] }
  0xc9   : > { %1724 = vst.msk [vmem:[%s2389_s24 + $0x114] sm:$0xf] %vm1654_vm3, %v1595_v20  ;;  %v1564_v26 = vpack.c.bf16 %v1436_v25, %v1436_v25  ;;  %v2227_v19 = vld [vmem:[%s2314_s21 + $0x168] sm:$0xff] }
  0xca   : > { %1756 = vst.msk [vmem:[%s2389_s24 + $0x194] sm:$0xf] %vm1654_vm3, %v1627_v23  ;;  %v2243_v20 = vld [vmem:[%s2314_s21 + $0x1e8] sm:$0xff] }
  0xcb   : > { %1661 = vst.msk [vmem:[%s2389_s24 + $0x18] sm:$0xf] %vm1654_vm3, %v1532_v24  ;;  %v997_v27 = vpop.f32.mrf.mxu2  ;;  %v1077_v28 = vpop.f32.mrf.mxu3 }
  0xcc   : > { %1693 = vst.msk [vmem:[%s2389_s24 + $0x98] sm:$0xf] %vm1654_vm3, %v1564_v26  ;;  %vm1212_vm14 = vcmp.ge.f32.partialorder %v997_v27, 0.0  ;;  %v1340_v29 = vmul.f32 0.2, %v997_v27  ;;  %vm1244_vm15 = vcmp.ge.f32.partialorder %v1077_v28, 0.0  ;;  %v839_v30 = vpop.f32.mrf.mxu0  ;;  %v919_v31 = vpop.f32.mrf.mxu1 }
  0xcd   : > { %v1372_v32 = vmul.f32 0.2, %v1077_v28  ;;  %vm1149_vm1 = vcmp.ge.f32.partialorder %v839_v30, 0.0  ;;  %v1277_v33 = vmul.f32 0.2, %v839_v30  ;;  %vm1181_vm2 = vcmp.ge.f32.partialorder %v919_v31, 0.0 }
  0xce   : > { %v1468_v34 = vsel %vm1212_vm14, %v997_v27, %v1340_v29  ;;  %v1309_v35 = vmul.f32 0.2, %v919_v31 }
  0xcf   : > { %v1596_v36 = vpack.c.bf16 %v1468_v34, %v1468_v34  ;;  %v1500_v37 = vsel %vm1244_vm15, %v1077_v28, %v1372_v32  ;;  %v1405_v38 = vsel %vm1149_vm1, %v839_v30, %v1277_v33 }
  0xd0   : > { %v1628_v39 = vpack.c.bf16 %v1500_v37, %v1500_v37  ;;  %v1533_v40 = vpack.c.bf16 %v1405_v38, %v1405_v38  ;;  %v1437_v41 = vsel %vm1181_vm2, %v919_v31, %v1309_v35 }
  0xd1   : > { %1725 = vst.msk [vmem:[%s2389_s24 + $0x118] sm:$0xf] %vm1654_vm3, %v1596_v36  ;;  %v1565_v42 = vpack.c.bf16 %v1437_v41, %v1437_v41 }
  0xd2   : > { %1757 = vst.msk [vmem:[%s2389_s24 + $0x198] sm:$0xf] %vm1654_vm3, %v1628_v39 }
  0xd3   : > { %1662 = vst.msk [vmem:[%s2389_s24 + $0x1c] sm:$0xf] %vm1654_vm3, %v1533_v40  ;;  %v999_v44 = vpop.f32.mrf.mxu2  ;;  %v1079_v45 = vpop.f32.mrf.mxu3 }
  0xd4   : > { %1694 = vst.msk [vmem:[%s2389_s24 + $0x9c] sm:$0xf] %vm1654_vm3, %v1565_v42  ;;  %vm1213_vm4 = vcmp.ge.f32.partialorder %v999_v44, 0.0  ;;  %v1341_v49 = vmul.f32 0.2, %v999_v44  ;;  %vm1245_vm5 = vcmp.ge.f32.partialorder %v1079_v45, 0.0  ;;  %v842_v50 = vpop.f32.mrf.mxu0  ;;  %v922_v51 = vpop.f32.mrf.mxu1 }
  0xd5   : > { %v1373_v52 = vmul.f32 0.2, %v1079_v45  ;;  %vm1150_vm6 = vcmp.ge.f32.partialorder %v842_v50, 0.0  ;;  %v1278_v53 = vmul.f32 0.2, %v842_v50  ;;  %vm1182_vm7 = vcmp.ge.f32.partialorder %v922_v51, 0.0 }
  0xd6   : > { %v1469_v54 = vsel %vm1213_vm4, %v999_v44, %v1341_v49  ;;  %v1310_v55 = vmul.f32 0.2, %v922_v51 }
  0xd7   : > { %v1597_v56 = vpack.c.bf16 %v1469_v54, %v1469_v54  ;;  %v1501_v57 = vsel %vm1245_vm5, %v1079_v45, %v1373_v52  ;;  %v1406_v58 = vsel %vm1150_vm6, %v842_v50, %v1278_v53  ;;  %2128 = vmatmul.msk.bf16.gmra.mxu0 %vm620_vm0, %v2194_v43  ;;  %2144 = vmatmul.msk.bf16.gmra.mxu1 %vm620_vm0, %v2210_v46  ;;  %v2212_v54 = vld [vmem:[%s2314_s21 + $0xf0] sm:$0xff] }
  0xd8   : > { %v1629_v59 = vpack.c.bf16 %v1501_v57, %v1501_v57  ;;  %v1534_v60 = vpack.c.bf16 %v1406_v58, %v1406_v58  ;;  %v1438_v61 = vsel %vm1182_vm7, %v922_v51, %v1310_v55  ;;  %2160 = vmatmul.msk.bf16.gmra.mxu2 %vm620_vm0, %v2226_v47  ;;  %2176 = vmatmul.msk.bf16.gmra.mxu3 %vm620_vm0, %v2242_v48  ;;  %v2196_v51 = vld [vmem:[%s2314_s21 + $0x70] sm:$0xff] }
  0xd9   : > { %1726 = vst.msk [vmem:[%s2389_s24 + $0x11c] sm:$0xf] %vm1654_vm3, %v1597_v56  ;;  %v1566_v62 = vpack.c.bf16 %v1438_v61, %v1438_v61  ;;  %v2228_v55 = vld [vmem:[%s2314_s21 + $0x170] sm:$0xff] }
  0xda   : > { %1758 = vst.msk [vmem:[%s2389_s24 + $0x19c] sm:$0xf] %vm1654_vm3, %v1629_v59  ;;  %v2244_v56 = vld [vmem:[%s2314_s21 + $0x1f0] sm:$0xff] }
  0xdb   : > { %1663 = vst.msk [vmem:[%s2389_s24 + $0x20] sm:$0xf] %vm1654_vm3, %v1534_v60  ;;  %v1002_v63 = vpop.f32.mrf.mxu2  ;;  %v1082_v0 = vpop.f32.mrf.mxu3 }
  0xdc   : > { %1695 = vst.msk [vmem:[%s2389_s24 + $0xa0] sm:$0xf] %vm1654_vm3, %v1566_v62  ;;  %vm1214_vm8 = vcmp.ge.f32.partialorder %v1002_v63, 0.0  ;;  %v1342_v1 = vmul.f32 0.2, %v1002_v63  ;;  %vm1246_vm9 = vcmp.ge.f32.partialorder %v1082_v0, 0.0  ;;  %v844_v2 = vpop.f32.mrf.mxu0  ;;  %v924_v3 = vpop.f32.mrf.mxu1 }
  0xdd   : > { %v1374_v4 = vmul.f32 0.2, %v1082_v0  ;;  %vm1151_vm10 = vcmp.ge.f32.partialorder %v844_v2, 0.0  ;;  %v1279_v5 = vmul.f32 0.2, %v844_v2  ;;  %vm1183_vm11 = vcmp.ge.f32.partialorder %v924_v3, 0.0 }
  0xde   : > { %v1470_v6 = vsel %vm1214_vm8, %v1002_v63, %v1342_v1  ;;  %v1311_v7 = vmul.f32 0.2, %v924_v3 }
  0xdf   : > { %v1598_v8 = vpack.c.bf16 %v1470_v6, %v1470_v6  ;;  %v1502_v9 = vsel %vm1246_vm9, %v1082_v0, %v1374_v4  ;;  %v1407_v10 = vsel %vm1151_vm10, %v844_v2, %v1279_v5 }
  0xe0   : > { %v1630_v11 = vpack.c.bf16 %v1502_v9, %v1502_v9  ;;  %v1535_v12 = vpack.c.bf16 %v1407_v10, %v1407_v10  ;;  %v1439_v13 = vsel %vm1183_vm11, %v924_v3, %v1311_v7 }
  0xe1   : > { %1727 = vst.msk [vmem:[%s2389_s24 + $0x120] sm:$0xf] %vm1654_vm3, %v1598_v8  ;;  %v1567_v14 = vpack.c.bf16 %v1439_v13, %v1439_v13 }
  0xe2   : > { %1759 = vst.msk [vmem:[%s2389_s24 + $0x1a0] sm:$0xf] %vm1654_vm3, %v1630_v11 }
  0xe3   : > { %1664 = vst.msk [vmem:[%s2389_s24 + $0x24] sm:$0xf] %vm1654_vm3, %v1535_v12  ;;  %v1004_v16 = vpop.f32.mrf.mxu2  ;;  %v1084_v17 = vpop.f32.mrf.mxu3 }
  0xe4   : > { %1696 = vst.msk [vmem:[%s2389_s24 + $0xa4] sm:$0xf] %vm1654_vm3, %v1567_v14  ;;  %vm1215_vm12 = vcmp.ge.f32.partialorder %v1004_v16, 0.0  ;;  %v1343_v21 = vmul.f32 0.2, %v1004_v16  ;;  %vm1247_vm13 = vcmp.ge.f32.partialorder %v1084_v17, 0.0  ;;  %v847_v22 = vpop.f32.mrf.mxu0  ;;  %v927_v23 = vpop.f32.mrf.mxu1 }
  0xe5   : > { %v1375_v24 = vmul.f32 0.2, %v1084_v17  ;;  %vm1152_vm14 = vcmp.ge.f32.partialorder %v847_v22, 0.0  ;;  %v1280_v25 = vmul.f32 0.2, %v847_v22  ;;  %vm1184_vm15 = vcmp.ge.f32.partialorder %v927_v23, 0.0 }
  0xe6   : > { %v1471_v26 = vsel %vm1215_vm12, %v1004_v16, %v1343_v21  ;;  %v1312_v27 = vmul.f32 0.2, %v927_v23 }
  0xe7   : > { %v1599_v28 = vpack.c.bf16 %v1471_v26, %v1471_v26  ;;  %v1503_v29 = vsel %vm1247_vm13, %v1084_v17, %v1375_v24  ;;  %v1408_v30 = vsel %vm1152_vm14, %v847_v22, %v1280_v25  ;;  %2129 = vmatmul.msk.bf16.gmra.mxu0 %vm620_vm0, %v2195_v15  ;;  %2145 = vmatmul.msk.bf16.gmra.mxu1 %vm620_vm0, %v2211_v18  ;;  %v2213_v26 = vld [vmem:[%s2314_s21 + $0xf8] sm:$0xff] }
  0xe8   : > { %v1631_v31 = vpack.c.bf16 %v1503_v29, %v1503_v29  ;;  %v1536_v32 = vpack.c.bf16 %v1408_v30, %v1408_v30  ;;  %v1440_v33 = vsel %vm1184_vm15, %v927_v23, %v1312_v27  ;;  %2161 = vmatmul.msk.bf16.gmra.mxu2 %vm620_vm0, %v2227_v19  ;;  %2177 = vmatmul.msk.bf16.gmra.mxu3 %vm620_vm0, %v2243_v20  ;;  %v2197_v23 = vld [vmem:[%s2314_s21 + $0x78] sm:$0xff] }
  0xe9   : > { %1728 = vst.msk [vmem:[%s2389_s24 + $0x124] sm:$0xf] %vm1654_vm3, %v1599_v28  ;;  %v1568_v34 = vpack.c.bf16 %v1440_v33, %v1440_v33  ;;  %v2229_v27 = vld [vmem:[%s2314_s21 + $0x178] sm:$0xff] }
  0xea   : > { %1760 = vst.msk [vmem:[%s2389_s24 + $0x1a4] sm:$0xf] %vm1654_vm3, %v1631_v31  ;;  %v2245_v28 = vld [vmem:[%s2314_s21 + $0x1f8] sm:$0xff] }
  0xeb   : > { %1665 = vst.msk [vmem:[%s2389_s24 + $0x28] sm:$0xf] %vm1654_vm3, %v1536_v32  ;;  %v1007_v35 = vpop.f32.mrf.mxu2  ;;  %v1087_v36 = vpop.f32.mrf.mxu3 }
  0xec   : > { %1697 = vst.msk [vmem:[%s2389_s24 + $0xa8] sm:$0xf] %vm1654_vm3, %v1568_v34  ;;  %vm1216_vm1 = vcmp.ge.f32.partialorder %v1007_v35, 0.0  ;;  %v1344_v37 = vmul.f32 0.2, %v1007_v35  ;;  %vm1248_vm2 = vcmp.ge.f32.partialorder %v1087_v36, 0.0  ;;  %v849_v38 = vpop.f32.mrf.mxu0  ;;  %v929_v39 = vpop.f32.mrf.mxu1 }
  0xed   : > { %v1376_v40 = vmul.f32 0.2, %v1087_v36  ;;  %vm1153_vm4 = vcmp.ge.f32.partialorder %v849_v38, 0.0  ;;  %v1281_v41 = vmul.f32 0.2, %v849_v38  ;;  %vm1185_vm5 = vcmp.ge.f32.partialorder %v929_v39, 0.0 }
  0xee   : > { %v1472_v42 = vsel %vm1216_vm1, %v1007_v35, %v1344_v37  ;;  %v1313_v43 = vmul.f32 0.2, %v929_v39 }
  0xef   : > { %v1600_v44 = vpack.c.bf16 %v1472_v42, %v1472_v42  ;;  %v1504_v45 = vsel %vm1248_vm2, %v1087_v36, %v1376_v40  ;;  %v1409_v46 = vsel %vm1153_vm4, %v849_v38, %v1281_v41 }
  0xf0   : > { %v1632_v47 = vpack.c.bf16 %v1504_v45, %v1504_v45  ;;  %v1537_v48 = vpack.c.bf16 %v1409_v46, %v1409_v46  ;;  %v1441_v49 = vsel %vm1185_vm5, %v929_v39, %v1313_v43 }
  0xf1   : > { %1729 = vst.msk [vmem:[%s2389_s24 + $0x128] sm:$0xf] %vm1654_vm3, %v1600_v44  ;;  %v1569_v50 = vpack.c.bf16 %v1441_v49, %v1441_v49 }
  0xf2   : > { %1761 = vst.msk [vmem:[%s2389_s24 + $0x1a8] sm:$0xf] %vm1654_vm3, %v1632_v47 }
  0xf3   : > { %1666 = vst.msk [vmem:[%s2389_s24 + $0x2c] sm:$0xf] %vm1654_vm3, %v1537_v48  ;;  %v1009_v52 = vpop.f32.mrf.mxu2  ;;  %v1089_v53 = vpop.f32.mrf.mxu3 }
  0xf4   : > { %1698 = vst.msk [vmem:[%s2389_s24 + $0xac] sm:$0xf] %vm1654_vm3, %v1569_v50  ;;  %vm1217_vm6 = vcmp.ge.f32.partialorder %v1009_v52, 0.0  ;;  %v1345_v57 = vmul.f32 0.2, %v1009_v52  ;;  %vm1249_vm7 = vcmp.ge.f32.partialorder %v1089_v53, 0.0  ;;  %v852_v58 = vpop.f32.mrf.mxu0  ;;  %v932_v59 = vpop.f32.mrf.mxu1 }
  0xf5   : > { %v1377_v60 = vmul.f32 0.2, %v1089_v53  ;;  %vm1154_vm8 = vcmp.ge.f32.partialorder %v852_v58, 0.0  ;;  %v1282_v61 = vmul.f32 0.2, %v852_v58  ;;  %vm1186_vm9 = vcmp.ge.f32.partialorder %v932_v59, 0.0 }
  0xf6   : > { %v1473_v62 = vsel %vm1217_vm6, %v1009_v52, %v1345_v57  ;;  %v1314_v63 = vmul.f32 0.2, %v932_v59 }
  0xf7   : > { %v1601_v0 = vpack.c.bf16 %v1473_v62, %v1473_v62  ;;  %v1505_v1 = vsel %vm1249_vm7, %v1089_v53, %v1377_v60  ;;  %v1410_v2 = vsel %vm1154_vm8, %v852_v58, %v1282_v61  ;;  %2130 = vmatmul.msk.bf16.gmra.mxu0 %vm620_vm0, %v2196_v51  ;;  %2146 = vmatmul.msk.bf16.gmra.mxu1 %vm620_vm0, %v2212_v54 }
  0xf8   : > { %v1633_v3 = vpack.c.bf16 %v1505_v1, %v1505_v1  ;;  %v1538_v4 = vpack.c.bf16 %v1410_v2, %v1410_v2  ;;  %v1442_v5 = vsel %vm1186_vm9, %v932_v59, %v1314_v63  ;;  %2162 = vmatmul.msk.bf16.gmra.mxu2 %vm620_vm0, %v2228_v55  ;;  %2178 = vmatmul.msk.bf16.gmra.mxu3 %vm620_vm0, %v2244_v56 }
  0xf9   : > { %1730 = vst.msk [vmem:[%s2389_s24 + $0x12c] sm:$0xf] %vm1654_vm3, %v1601_v0  ;;  %v1570_v6 = vpack.c.bf16 %v1442_v5, %v1442_v5 }
  0xfa   : > { %1762 = vst.msk [vmem:[%s2389_s24 + $0x1ac] sm:$0xf] %vm1654_vm3, %v1633_v3 }
  0xfb   : > { %1667 = vst.msk [vmem:[%s2389_s24 + $0x30] sm:$0xf] %vm1654_vm3, %v1538_v4  ;;  %v1012_v7 = vpop.f32.mrf.mxu2  ;;  %v1092_v8 = vpop.f32.mrf.mxu3 }
  0xfc   : > { %1699 = vst.msk [vmem:[%s2389_s24 + $0xb0] sm:$0xf] %vm1654_vm3, %v1570_v6  ;;  %vm1218_vm10 = vcmp.ge.f32.partialorder %v1012_v7, 0.0  ;;  %v1346_v9 = vmul.f32 0.2, %v1012_v7  ;;  %vm1250_vm11 = vcmp.ge.f32.partialorder %v1092_v8, 0.0  ;;  %v854_v10 = vpop.f32.mrf.mxu0  ;;  %v934_v11 = vpop.f32.mrf.mxu1 }
  0xfd   : > { %v1378_v12 = vmul.f32 0.2, %v1092_v8  ;;  %vm1155_vm12 = vcmp.ge.f32.partialorder %v854_v10, 0.0  ;;  %v1283_v13 = vmul.f32 0.2, %v854_v10  ;;  %vm1187_vm13 = vcmp.ge.f32.partialorder %v934_v11, 0.0 }
  0xfe   : > { %v1474_v14 = vsel %vm1218_vm10, %v1012_v7, %v1346_v9  ;;  %v1315_v15 = vmul.f32 0.2, %v934_v11 }
  0xff   : > { %v1602_v16 = vpack.c.bf16 %v1474_v14, %v1474_v14  ;;  %v1506_v17 = vsel %vm1250_vm11, %v1092_v8, %v1378_v12  ;;  %v1411_v18 = vsel %vm1155_vm12, %v854_v10, %v1283_v13 }
 0x100   : > { %v1634_v19 = vpack.c.bf16 %v1506_v17, %v1506_v17  ;;  %v1539_v20 = vpack.c.bf16 %v1411_v18, %v1411_v18  ;;  %v1443_v21 = vsel %vm1187_vm13, %v934_v11, %v1315_v15 }
 0x101   : > { %1731 = vst.msk [vmem:[%s2389_s24 + $0x130] sm:$0xf] %vm1654_vm3, %v1602_v16  ;;  %v1571_v22 = vpack.c.bf16 %v1443_v21, %v1443_v21 }
 0x102   : > { %1763 = vst.msk [vmem:[%s2389_s24 + $0x1b0] sm:$0xf] %vm1654_vm3, %v1634_v19 }
 0x103   : > { %1668 = vst.msk [vmem:[%s2389_s24 + $0x34] sm:$0xf] %vm1654_vm3, %v1539_v20  ;;  %v1014_v24 = vpop.f32.mrf.mxu2  ;;  %v1094_v25 = vpop.f32.mrf.mxu3 }
 0x104   : > { %1700 = vst.msk [vmem:[%s2389_s24 + $0xb4] sm:$0xf] %vm1654_vm3, %v1571_v22  ;;  %vm1219_vm14 = vcmp.ge.f32.partialorder %v1014_v24, 0.0  ;;  %v1347_v29 = vmul.f32 0.2, %v1014_v24  ;;  %vm1251_vm15 = vcmp.ge.f32.partialorder %v1094_v25, 0.0  ;;  %v857_v30 = vpop.f32.mrf.mxu0  ;;  %v937_v31 = vpop.f32.mrf.mxu1 }
 0x105   : > { %v1379_v32 = vmul.f32 0.2, %v1094_v25  ;;  %vm1156_vm1 = vcmp.ge.f32.partialorder %v857_v30, 0.0  ;;  %v1284_v33 = vmul.f32 0.2, %v857_v30  ;;  %vm1188_vm2 = vcmp.ge.f32.partialorder %v937_v31, 0.0 }
 0x106   : > { %v1475_v34 = vsel %vm1219_vm14, %v1014_v24, %v1347_v29  ;;  %v1316_v35 = vmul.f32 0.2, %v937_v31 }
 0x107   : > { %v1603_v36 = vpack.c.bf16 %v1475_v34, %v1475_v34  ;;  %v1507_v37 = vsel %vm1251_vm15, %v1094_v25, %v1379_v32  ;;  %v1412_v38 = vsel %vm1156_vm1, %v857_v30, %v1284_v33  ;;  %2131 = vmatmul.msk.bf16.gmra.mxu0 %vm620_vm0, %v2197_v23  ;;  %2147 = vmatmul.msk.bf16.gmra.mxu1 %vm620_vm0, %v2213_v26 }
 0x108   : > { %v1635_v39 = vpack.c.bf16 %v1507_v37, %v1507_v37  ;;  %v1540_v40 = vpack.c.bf16 %v1412_v38, %v1412_v38  ;;  %v1444_v41 = vsel %vm1188_vm2, %v937_v31, %v1316_v35  ;;  %2163 = vmatmul.msk.bf16.gmra.mxu2 %vm620_vm0, %v2229_v27  ;;  %2179 = vmatmul.msk.bf16.gmra.mxu3 %vm620_vm0, %v2245_v28 }
 0x109   : > { %1732 = vst.msk [vmem:[%s2389_s24 + $0x134] sm:$0xf] %vm1654_vm3, %v1603_v36  ;;  %v1572_v42 = vpack.c.bf16 %v1444_v41, %v1444_v41 }
 0x10a   : > { %1764 = vst.msk [vmem:[%s2389_s24 + $0x1b4] sm:$0xf] %vm1654_vm3, %v1635_v39 }
 0x10b   : > { %1669 = vst.msk [vmem:[%s2389_s24 + $0x38] sm:$0xf] %vm1654_vm3, %v1540_v40  ;;  %v1017_v43 = vpop.f32.mrf.mxu2  ;;  %v1097_v44 = vpop.f32.mrf.mxu3 }
 0x10c   : > { %1701 = vst.msk [vmem:[%s2389_s24 + $0xb8] sm:$0xf] %vm1654_vm3, %v1572_v42  ;;  %vm1220_vm4 = vcmp.ge.f32.partialorder %v1017_v43, 0.0  ;;  %v1348_v45 = vmul.f32 0.2, %v1017_v43  ;;  %vm1252_vm5 = vcmp.ge.f32.partialorder %v1097_v44, 0.0  ;;  %v859_v46 = vpop.f32.mrf.mxu0  ;;  %v939_v47 = vpop.f32.mrf.mxu1 }
 0x10d   : > { %v1380_v48 = vmul.f32 0.2, %v1097_v44  ;;  %vm1157_vm0 = vcmp.ge.f32.partialorder %v859_v46, 0.0  ;;  %v1285_v49 = vmul.f32 0.2, %v859_v46  ;;  %vm1189_vm6 = vcmp.ge.f32.partialorder %v939_v47, 0.0 }
 0x10e   : > { %v1476_v50 = vsel %vm1220_vm4, %v1017_v43, %v1348_v45  ;;  %v1317_v51 = vmul.f32 0.2, %v939_v47 }
 0x10f   : > { %v1604_v52 = vpack.c.bf16 %v1476_v50, %v1476_v50  ;;  %v1508_v53 = vsel %vm1252_vm5, %v1097_v44, %v1380_v48  ;;  %v1413_v54 = vsel %vm1157_vm0, %v859_v46, %v1285_v49 }
 0x110   : > { %v1636_v55 = vpack.c.bf16 %v1508_v53, %v1508_v53  ;;  %v1541_v56 = vpack.c.bf16 %v1413_v54, %v1413_v54  ;;  %v1445_v57 = vsel %vm1189_vm6, %v939_v47, %v1317_v51 }
 0x111   : > { %1733 = vst.msk [vmem:[%s2389_s24 + $0x138] sm:$0xf] %vm1654_vm3, %v1604_v52  ;;  %v1573_v58 = vpack.c.bf16 %v1445_v57, %v1445_v57 }
 0x112   : > { %1765 = vst.msk [vmem:[%s2389_s24 + $0x1b8] sm:$0xf] %vm1654_vm3, %v1636_v55 }
 0x113   : > { %1670 = vst.msk [vmem:[%s2389_s24 + $0x3c] sm:$0xf] %vm1654_vm3, %v1541_v56  ;;  %v1019_v59 = vpop.f32.mrf.mxu2  ;;  %v1099_v60 = vpop.f32.mrf.mxu3 }
 0x114   : > { %1702 = vst.msk [vmem:[%s2389_s24 + $0xbc] sm:$0xf] %vm1654_vm3, %v1573_v58  ;;  %vm1221_vm7 = vcmp.ge.f32.partialorder %v1019_v59, 0.0  ;;  %v1349_v61 = vmul.f32 0.2, %v1019_v59  ;;  %vm1253_vm8 = vcmp.ge.f32.partialorder %v1099_v60, 0.0  ;;  %v862_v62 = vpop.f32.mrf.mxu0  ;;  %v942_v63 = vpop.f32.mrf.mxu1 }
 0x115   : > { %v1381_v0 = vmul.f32 0.2, %v1099_v60  ;;  %vm1158_vm9 = vcmp.ge.f32.partialorder %v862_v62, 0.0  ;;  %v1286_v1 = vmul.f32 0.2, %v862_v62  ;;  %vm1190_vm10 = vcmp.ge.f32.partialorder %v942_v63, 0.0 }
 0x116   : > { %v1477_v2 = vsel %vm1221_vm7, %v1019_v59, %v1349_v61  ;;  %v1318_v3 = vmul.f32 0.2, %v942_v63 }
 0x117   : > { %v1605_v4 = vpack.c.bf16 %v1477_v2, %v1477_v2  ;;  %v1509_v5 = vsel %vm1253_vm8, %v1099_v60, %v1381_v0  ;;  %v1414_v6 = vsel %vm1158_vm9, %v862_v62, %v1286_v1 }
 0x118   : > { %v1637_v7 = vpack.c.bf16 %v1509_v5, %v1509_v5  ;;  %v1542_v8 = vpack.c.bf16 %v1414_v6, %v1414_v6  ;;  %v1446_v9 = vsel %vm1190_vm10, %v942_v63, %v1318_v3 }
 0x119   : > { %1734 = vst.msk [vmem:[%s2389_s24 + $0x13c] sm:$0xf] %vm1654_vm3, %v1605_v4  ;;  %v1574_v10 = vpack.c.bf16 %v1446_v9, %v1446_v9 }
 0x11a   : > { %1766 = vst.msk [vmem:[%s2389_s24 + $0x1bc] sm:$0xf] %vm1654_vm3, %v1637_v7 }
 0x11b   : > { %1671 = vst.msk [vmem:[%s2389_s24 + $0x40] sm:$0xf] %vm1654_vm3, %v1542_v8  ;;  %v1022_v11 = vpop.f32.mrf.mxu2  ;;  %v1102_v12 = vpop.f32.mrf.mxu3 }
 0x11c   : > { %1703 = vst.msk [vmem:[%s2389_s24 + $0xc0] sm:$0xf] %vm1654_vm3, %v1574_v10  ;;  %vm1222_vm11 = vcmp.ge.f32.partialorder %v1022_v11, 0.0  ;;  %v1350_v13 = vmul.f32 0.2, %v1022_v11  ;;  %vm1254_vm12 = vcmp.ge.f32.partialorder %v1102_v12, 0.0  ;;  %v864_v14 = vpop.f32.mrf.mxu0  ;;  %v944_v15 = vpop.f32.mrf.mxu1 }
 0x11d   : > { %v1382_v16 = vmul.f32 0.2, %v1102_v12  ;;  %vm1159_vm13 = vcmp.ge.f32.partialorder %v864_v14, 0.0  ;;  %v1287_v17 = vmul.f32 0.2, %v864_v14  ;;  %vm1191_vm14 = vcmp.ge.f32.partialorder %v944_v15, 0.0 }
 0x11e   : > { %v1478_v18 = vsel %vm1222_vm11, %v1022_v11, %v1350_v13  ;;  %v1319_v19 = vmul.f32 0.2, %v944_v15 }
 0x11f   : > { %v1606_v20 = vpack.c.bf16 %v1478_v18, %v1478_v18  ;;  %v1510_v21 = vsel %vm1254_vm12, %v1102_v12, %v1382_v16  ;;  %v1415_v22 = vsel %vm1159_vm13, %v864_v14, %v1287_v17 }
 0x120   : > { %v1638_v23 = vpack.c.bf16 %v1510_v21, %v1510_v21  ;;  %v1543_v24 = vpack.c.bf16 %v1415_v22, %v1415_v22  ;;  %v1447_v25 = vsel %vm1191_vm14, %v944_v15, %v1319_v19 }
 0x121   : > { %1735 = vst.msk [vmem:[%s2389_s24 + $0x140] sm:$0xf] %vm1654_vm3, %v1606_v20  ;;  %v1575_v26 = vpack.c.bf16 %v1447_v25, %v1447_v25 }
 0x122   : > { %1767 = vst.msk [vmem:[%s2389_s24 + $0x1c0] sm:$0xf] %vm1654_vm3, %v1638_v23 }
 0x123   : > { %1672 = vst.msk [vmem:[%s2389_s24 + $0x44] sm:$0xf] %vm1654_vm3, %v1543_v24  ;;  %v1024_v27 = vpop.f32.mrf.mxu2  ;;  %v1104_v28 = vpop.f32.mrf.mxu3 }
 0x124   : > { %1704 = vst.msk [vmem:[%s2389_s24 + $0xc4] sm:$0xf] %vm1654_vm3, %v1575_v26  ;;  %vm1223_vm15 = vcmp.ge.f32.partialorder %v1024_v27, 0.0  ;;  %v1351_v29 = vmul.f32 0.2, %v1024_v27  ;;  %vm1255_vm1 = vcmp.ge.f32.partialorder %v1104_v28, 0.0  ;;  %v867_v30 = vpop.f32.mrf.mxu0  ;;  %v947_v31 = vpop.f32.mrf.mxu1 }
 0x125   : > { %v1383_v32 = vmul.f32 0.2, %v1104_v28  ;;  %vm1160_vm2 = vcmp.ge.f32.partialorder %v867_v30, 0.0  ;;  %v1288_v33 = vmul.f32 0.2, %v867_v30  ;;  %vm1192_vm4 = vcmp.ge.f32.partialorder %v947_v31, 0.0 }
 0x126   : > { %v1479_v34 = vsel %vm1223_vm15, %v1024_v27, %v1351_v29  ;;  %v1320_v35 = vmul.f32 0.2, %v947_v31 }
 0x127   : > { %v1607_v36 = vpack.c.bf16 %v1479_v34, %v1479_v34  ;;  %v1511_v37 = vsel %vm1255_vm1, %v1104_v28, %v1383_v32  ;;  %v1416_v38 = vsel %vm1160_vm2, %v867_v30, %v1288_v33 }
 0x128   : > { %v1639_v39 = vpack.c.bf16 %v1511_v37, %v1511_v37  ;;  %v1544_v40 = vpack.c.bf16 %v1416_v38, %v1416_v38  ;;  %v1448_v41 = vsel %vm1192_vm4, %v947_v31, %v1320_v35 }
 0x129   : > { %1736 = vst.msk [vmem:[%s2389_s24 + $0x144] sm:$0xf] %vm1654_vm3, %v1607_v36  ;;  %v1576_v42 = vpack.c.bf16 %v1448_v41, %v1448_v41 }
 0x12a   : > { %1768 = vst.msk [vmem:[%s2389_s24 + $0x1c4] sm:$0xf] %vm1654_vm3, %v1639_v39 }
 0x12b   : > { %1673 = vst.msk [vmem:[%s2389_s24 + $0x48] sm:$0xf] %vm1654_vm3, %v1544_v40  ;;  %v1027_v43 = vpop.f32.mrf.mxu2  ;;  %v1107_v44 = vpop.f32.mrf.mxu3 }
 0x12c   : > { %1705 = vst.msk [vmem:[%s2389_s24 + $0xc8] sm:$0xf] %vm1654_vm3, %v1576_v42  ;;  %vm1224_vm5 = vcmp.ge.f32.partialorder %v1027_v43, 0.0  ;;  %v1352_v45 = vmul.f32 0.2, %v1027_v43  ;;  %vm1256_vm0 = vcmp.ge.f32.partialorder %v1107_v44, 0.0  ;;  %v869_v46 = vpop.f32.mrf.mxu0  ;;  %v949_v47 = vpop.f32.mrf.mxu1 }
 0x12d   : > { %v1384_v48 = vmul.f32 0.2, %v1107_v44  ;;  %vm1161_vm6 = vcmp.ge.f32.partialorder %v869_v46, 0.0  ;;  %v1289_v49 = vmul.f32 0.2, %v869_v46  ;;  %vm1193_vm7 = vcmp.ge.f32.partialorder %v949_v47, 0.0 }
 0x12e   : > { %v1480_v50 = vsel %vm1224_vm5, %v1027_v43, %v1352_v45  ;;  %v1321_v51 = vmul.f32 0.2, %v949_v47 }
 0x12f   : > { %v1608_v52 = vpack.c.bf16 %v1480_v50, %v1480_v50  ;;  %v1512_v53 = vsel %vm1256_vm0, %v1107_v44, %v1384_v48  ;;  %v1417_v54 = vsel %vm1161_vm6, %v869_v46, %v1289_v49 }
 0x130   : > { %v1640_v55 = vpack.c.bf16 %v1512_v53, %v1512_v53  ;;  %v1545_v56 = vpack.c.bf16 %v1417_v54, %v1417_v54  ;;  %v1449_v57 = vsel %vm1193_vm7, %v949_v47, %v1321_v51 }
 0x131   : > { %1737 = vst.msk [vmem:[%s2389_s24 + $0x148] sm:$0xf] %vm1654_vm3, %v1608_v52  ;;  %v1577_v58 = vpack.c.bf16 %v1449_v57, %v1449_v57 }
 0x132   : > { %1769 = vst.msk [vmem:[%s2389_s24 + $0x1c8] sm:$0xf] %vm1654_vm3, %v1640_v55 }
 0x133   : > { %1674 = vst.msk [vmem:[%s2389_s24 + $0x4c] sm:$0xf] %vm1654_vm3, %v1545_v56  ;;  %v1029_v59 = vpop.f32.mrf.mxu2  ;;  %v1109_v60 = vpop.f32.mrf.mxu3 }
 0x134   : > { %1706 = vst.msk [vmem:[%s2389_s24 + $0xcc] sm:$0xf] %vm1654_vm3, %v1577_v58  ;;  %vm1225_vm8 = vcmp.ge.f32.partialorder %v1029_v59, 0.0  ;;  %v1353_v61 = vmul.f32 0.2, %v1029_v59  ;;  %vm1257_vm9 = vcmp.ge.f32.partialorder %v1109_v60, 0.0  ;;  %v872_v62 = vpop.f32.mrf.mxu0  ;;  %v952_v63 = vpop.f32.mrf.mxu1 }
 0x135   : > { %v1385_v0 = vmul.f32 0.2, %v1109_v60  ;;  %vm1162_vm10 = vcmp.ge.f32.partialorder %v872_v62, 0.0  ;;  %v1290_v1 = vmul.f32 0.2, %v872_v62  ;;  %vm1194_vm11 = vcmp.ge.f32.partialorder %v952_v63, 0.0 }
 0x136   : > { %v1481_v2 = vsel %vm1225_vm8, %v1029_v59, %v1353_v61  ;;  %v1322_v3 = vmul.f32 0.2, %v952_v63 }
 0x137   : > { %v1609_v4 = vpack.c.bf16 %v1481_v2, %v1481_v2  ;;  %v1513_v5 = vsel %vm1257_vm9, %v1109_v60, %v1385_v0  ;;  %v1418_v6 = vsel %vm1162_vm10, %v872_v62, %v1290_v1 }
 0x138   : > { %v1641_v7 = vpack.c.bf16 %v1513_v5, %v1513_v5  ;;  %v1546_v8 = vpack.c.bf16 %v1418_v6, %v1418_v6  ;;  %v1450_v9 = vsel %vm1194_vm11, %v952_v63, %v1322_v3 }
 0x139   : > { %1738 = vst.msk [vmem:[%s2389_s24 + $0x14c] sm:$0xf] %vm1654_vm3, %v1609_v4  ;;  %v1578_v10 = vpack.c.bf16 %v1450_v9, %v1450_v9 }
 0x13a   : > { %1770 = vst.msk [vmem:[%s2389_s24 + $0x1cc] sm:$0xf] %vm1654_vm3, %v1641_v7 }
 0x13b   : > { %1675 = vst.msk [vmem:[%s2389_s24 + $0x50] sm:$0xf] %vm1654_vm3, %v1546_v8  ;;  %v1032_v11 = vpop.f32.mrf.mxu2  ;;  %v1112_v12 = vpop.f32.mrf.mxu3 }
 0x13c   : > { %1707 = vst.msk [vmem:[%s2389_s24 + $0xd0] sm:$0xf] %vm1654_vm3, %v1578_v10  ;;  %vm1226_vm12 = vcmp.ge.f32.partialorder %v1032_v11, 0.0  ;;  %v1354_v13 = vmul.f32 0.2, %v1032_v11  ;;  %vm1258_vm13 = vcmp.ge.f32.partialorder %v1112_v12, 0.0  ;;  %v874_v14 = vpop.f32.mrf.mxu0  ;;  %v954_v15 = vpop.f32.mrf.mxu1 }
 0x13d   : > { %v1386_v16 = vmul.f32 0.2, %v1112_v12  ;;  %vm1163_vm14 = vcmp.ge.f32.partialorder %v874_v14, 0.0  ;;  %v1291_v17 = vmul.f32 0.2, %v874_v14  ;;  %vm1195_vm15 = vcmp.ge.f32.partialorder %v954_v15, 0.0 }
 0x13e   : > { %v1482_v18 = vsel %vm1226_vm12, %v1032_v11, %v1354_v13  ;;  %v1323_v19 = vmul.f32 0.2, %v954_v15 }
 0x13f   : > { %v1610_v20 = vpack.c.bf16 %v1482_v18, %v1482_v18  ;;  %v1514_v21 = vsel %vm1258_vm13, %v1112_v12, %v1386_v16  ;;  %v1419_v22 = vsel %vm1163_vm14, %v874_v14, %v1291_v17 }
 0x140   : > { %v1642_v23 = vpack.c.bf16 %v1514_v21, %v1514_v21  ;;  %v1547_v24 = vpack.c.bf16 %v1419_v22, %v1419_v22  ;;  %v1451_v25 = vsel %vm1195_vm15, %v954_v15, %v1323_v19 }
 0x141   : > { %1739 = vst.msk [vmem:[%s2389_s24 + $0x150] sm:$0xf] %vm1654_vm3, %v1610_v20  ;;  %v1579_v26 = vpack.c.bf16 %v1451_v25, %v1451_v25 }
 0x142   : > { %1771 = vst.msk [vmem:[%s2389_s24 + $0x1d0] sm:$0xf] %vm1654_vm3, %v1642_v23 }
 0x143   : > { %1676 = vst.msk [vmem:[%s2389_s24 + $0x54] sm:$0xf] %vm1654_vm3, %v1547_v24  ;;  %v1034_v27 = vpop.f32.mrf.mxu2  ;;  %v1114_v28 = vpop.f32.mrf.mxu3 }
 0x144   : > { %1708 = vst.msk [vmem:[%s2389_s24 + $0xd4] sm:$0xf] %vm1654_vm3, %v1579_v26  ;;  %vm1227_vm1 = vcmp.ge.f32.partialorder %v1034_v27, 0.0  ;;  %v1355_v29 = vmul.f32 0.2, %v1034_v27  ;;  %vm1259_vm2 = vcmp.ge.f32.partialorder %v1114_v28, 0.0  ;;  %v877_v30 = vpop.f32.mrf.mxu0  ;;  %v957_v31 = vpop.f32.mrf.mxu1 }
 0x145   : > { %v1387_v32 = vmul.f32 0.2, %v1114_v28  ;;  %vm1164_vm4 = vcmp.ge.f32.partialorder %v877_v30, 0.0  ;;  %v1292_v33 = vmul.f32 0.2, %v877_v30  ;;  %vm1196_vm5 = vcmp.ge.f32.partialorder %v957_v31, 0.0 }
 0x146   : > { %v1483_v34 = vsel %vm1227_vm1, %v1034_v27, %v1355_v29  ;;  %v1324_v35 = vmul.f32 0.2, %v957_v31 }
 0x147   : > { %v1611_v36 = vpack.c.bf16 %v1483_v34, %v1483_v34  ;;  %v1515_v37 = vsel %vm1259_vm2, %v1114_v28, %v1387_v32  ;;  %v1420_v38 = vsel %vm1164_vm4, %v877_v30, %v1292_v33 }
 0x148   : > { %v1643_v39 = vpack.c.bf16 %v1515_v37, %v1515_v37  ;;  %v1548_v40 = vpack.c.bf16 %v1420_v38, %v1420_v38  ;;  %v1452_v41 = vsel %vm1196_vm5, %v957_v31, %v1324_v35 }
 0x149   : > { %1740 = vst.msk [vmem:[%s2389_s24 + $0x154] sm:$0xf] %vm1654_vm3, %v1611_v36  ;;  %v1580_v42 = vpack.c.bf16 %v1452_v41, %v1452_v41 }
 0x14a   : > { %1772 = vst.msk [vmem:[%s2389_s24 + $0x1d4] sm:$0xf] %vm1654_vm3, %v1643_v39 }
 0x14b   : > { %1677 = vst.msk [vmem:[%s2389_s24 + $0x58] sm:$0xf] %vm1654_vm3, %v1548_v40  ;;  %v1037_v43 = vpop.f32.mrf.mxu2  ;;  %v1117_v44 = vpop.f32.mrf.mxu3 }
 0x14c   : > { %1709 = vst.msk [vmem:[%s2389_s24 + $0xd8] sm:$0xf] %vm1654_vm3, %v1580_v42  ;;  %vm1228_vm0 = vcmp.ge.f32.partialorder %v1037_v43, 0.0  ;;  %v1356_v45 = vmul.f32 0.2, %v1037_v43  ;;  %vm1260_vm6 = vcmp.ge.f32.partialorder %v1117_v44, 0.0  ;;  %v879_v46 = vpop.f32.mrf.mxu0  ;;  %v959_v47 = vpop.f32.mrf.mxu1 }
 0x14d   : > { %v1388_v48 = vmul.f32 0.2, %v1117_v44  ;;  %vm1165_vm7 = vcmp.ge.f32.partialorder %v879_v46, 0.0  ;;  %v1293_v49 = vmul.f32 0.2, %v879_v46  ;;  %vm1197_vm8 = vcmp.ge.f32.partialorder %v959_v47, 0.0 }
 0x14e   : > { %v1484_v50 = vsel %vm1228_vm0, %v1037_v43, %v1356_v45  ;;  %v1325_v51 = vmul.f32 0.2, %v959_v47 }
 0x14f   : > { %v1612_v52 = vpack.c.bf16 %v1484_v50, %v1484_v50  ;;  %v1516_v53 = vsel %vm1260_vm6, %v1117_v44, %v1388_v48  ;;  %v1421_v54 = vsel %vm1165_vm7, %v879_v46, %v1293_v49 }
 0x150   : > { %v1644_v55 = vpack.c.bf16 %v1516_v53, %v1516_v53  ;;  %v1549_v56 = vpack.c.bf16 %v1421_v54, %v1421_v54  ;;  %v1453_v57 = vsel %vm1197_vm8, %v959_v47, %v1325_v51 }
 0x151   : > { %1741 = vst.msk [vmem:[%s2389_s24 + $0x158] sm:$0xf] %vm1654_vm3, %v1612_v52  ;;  %v1581_v58 = vpack.c.bf16 %v1453_v57, %v1453_v57 }
 0x152   : > { %1773 = vst.msk [vmem:[%s2389_s24 + $0x1d8] sm:$0xf] %vm1654_vm3, %v1644_v55 }
 0x153   : > { %1678 = vst.msk [vmem:[%s2389_s24 + $0x5c] sm:$0xf] %vm1654_vm3, %v1549_v56  ;;  %v1039_v59 = vpop.f32.mrf.mxu2  ;;  %v1119_v60 = vpop.f32.mrf.mxu3 }
 0x154   : > { %1710 = vst.msk [vmem:[%s2389_s24 + $0xdc] sm:$0xf] %vm1654_vm3, %v1581_v58  ;;  %vm1229_vm9 = vcmp.ge.f32.partialorder %v1039_v59, 0.0  ;;  %v1357_v61 = vmul.f32 0.2, %v1039_v59  ;;  %vm1261_vm10 = vcmp.ge.f32.partialorder %v1119_v60, 0.0  ;;  %v882_v62 = vpop.f32.mrf.mxu0  ;;  %v962_v63 = vpop.f32.mrf.mxu1 }
 0x155   : > { %v1389_v0 = vmul.f32 0.2, %v1119_v60  ;;  %vm1166_vm11 = vcmp.ge.f32.partialorder %v882_v62, 0.0  ;;  %v1294_v1 = vmul.f32 0.2, %v882_v62  ;;  %vm1198_vm12 = vcmp.ge.f32.partialorder %v962_v63, 0.0 }
 0x156   : > { %v1485_v2 = vsel %vm1229_vm9, %v1039_v59, %v1357_v61  ;;  %v1326_v3 = vmul.f32 0.2, %v962_v63 }
 0x157   : > { %v1613_v4 = vpack.c.bf16 %v1485_v2, %v1485_v2  ;;  %v1517_v5 = vsel %vm1261_vm10, %v1119_v60, %v1389_v0  ;;  %v1422_v6 = vsel %vm1166_vm11, %v882_v62, %v1294_v1 }
 0x158   : > { %v1645_v7 = vpack.c.bf16 %v1517_v5, %v1517_v5  ;;  %v1550_v8 = vpack.c.bf16 %v1422_v6, %v1422_v6  ;;  %v1454_v9 = vsel %vm1198_vm12, %v962_v63, %v1326_v3 }
 0x159   : > { %1742 = vst.msk [vmem:[%s2389_s24 + $0x15c] sm:$0xf] %vm1654_vm3, %v1613_v4  ;;  %v1582_v10 = vpack.c.bf16 %v1454_v9, %v1454_v9 }
 0x15a   : > { %1774 = vst.msk [vmem:[%s2389_s24 + $0x1dc] sm:$0xf] %vm1654_vm3, %v1645_v7 }
 0x15b   : > { %1679 = vst.msk [vmem:[%s2389_s24 + $0x60] sm:$0xf] %vm1654_vm3, %v1550_v8  ;;  %v1042_v11 = vpop.f32.mrf.mxu2  ;;  %v1122_v12 = vpop.f32.mrf.mxu3 }
 0x15c   : > { %1711 = vst.msk [vmem:[%s2389_s24 + $0xe0] sm:$0xf] %vm1654_vm3, %v1582_v10  ;;  %vm1230_vm13 = vcmp.ge.f32.partialorder %v1042_v11, 0.0  ;;  %v1358_v13 = vmul.f32 0.2, %v1042_v11  ;;  %vm1262_vm14 = vcmp.ge.f32.partialorder %v1122_v12, 0.0  ;;  %v884_v14 = vpop.f32.mrf.mxu0  ;;  %v964_v15 = vpop.f32.mrf.mxu1 }
 0x15d   : > { %v1390_v16 = vmul.f32 0.2, %v1122_v12  ;;  %vm1167_vm15 = vcmp.ge.f32.partialorder %v884_v14, 0.0  ;;  %v1295_v17 = vmul.f32 0.2, %v884_v14  ;;  %vm1199_vm1 = vcmp.ge.f32.partialorder %v964_v15, 0.0 }
 0x15e   : > { %v1486_v18 = vsel %vm1230_vm13, %v1042_v11, %v1358_v13  ;;  %v1327_v19 = vmul.f32 0.2, %v964_v15 }
 0x15f   : > { %v1614_v20 = vpack.c.bf16 %v1486_v18, %v1486_v18  ;;  %v1518_v21 = vsel %vm1262_vm14, %v1122_v12, %v1390_v16  ;;  %v1423_v22 = vsel %vm1167_vm15, %v884_v14, %v1295_v17 }
 0x160   : > { %v1646_v23 = vpack.c.bf16 %v1518_v21, %v1518_v21  ;;  %v1551_v24 = vpack.c.bf16 %v1423_v22, %v1423_v22  ;;  %v1455_v25 = vsel %vm1199_vm1, %v964_v15, %v1327_v19 }
 0x161   : > { %1743 = vst.msk [vmem:[%s2389_s24 + $0x160] sm:$0xf] %vm1654_vm3, %v1614_v20  ;;  %v1583_v26 = vpack.c.bf16 %v1455_v25, %v1455_v25 }
 0x162   : > { %1775 = vst.msk [vmem:[%s2389_s24 + $0x1e0] sm:$0xf] %vm1654_vm3, %v1646_v23 }
 0x163   : > { %1680 = vst.msk [vmem:[%s2389_s24 + $0x64] sm:$0xf] %vm1654_vm3, %v1551_v24  ;;  %v1044_v27 = vpop.f32.mrf.mxu2  ;;  %v1124_v28 = vpop.f32.mrf.mxu3 }
 0x164   : > { %1712 = vst.msk [vmem:[%s2389_s24 + $0xe4] sm:$0xf] %vm1654_vm3, %v1583_v26  ;;  %vm1231_vm2 = vcmp.ge.f32.partialorder %v1044_v27, 0.0  ;;  %v1359_v29 = vmul.f32 0.2, %v1044_v27  ;;  %vm1263_vm4 = vcmp.ge.f32.partialorder %v1124_v28, 0.0  ;;  %v887_v30 = vpop.f32.mrf.mxu0  ;;  %v967_v31 = vpop.f32.mrf.mxu1 }
 0x165   : > { %v1391_v32 = vmul.f32 0.2, %v1124_v28  ;;  %vm1168_vm5 = vcmp.ge.f32.partialorder %v887_v30, 0.0  ;;  %v1296_v33 = vmul.f32 0.2, %v887_v30  ;;  %vm1200_vm0 = vcmp.ge.f32.partialorder %v967_v31, 0.0 }
 0x166   : > { %v1487_v34 = vsel %vm1231_vm2, %v1044_v27, %v1359_v29  ;;  %v1328_v35 = vmul.f32 0.2, %v967_v31 }
 0x167   : > { %v1615_v36 = vpack.c.bf16 %v1487_v34, %v1487_v34  ;;  %v1519_v37 = vsel %vm1263_vm4, %v1124_v28, %v1391_v32  ;;  %v1424_v38 = vsel %vm1168_vm5, %v887_v30, %v1296_v33 }
 0x168   : > { %v1647_v39 = vpack.c.bf16 %v1519_v37, %v1519_v37  ;;  %v1552_v40 = vpack.c.bf16 %v1424_v38, %v1424_v38  ;;  %v1456_v41 = vsel %vm1200_vm0, %v967_v31, %v1328_v35 }
 0x169   : > { %1744 = vst.msk [vmem:[%s2389_s24 + $0x164] sm:$0xf] %vm1654_vm3, %v1615_v36  ;;  %v1584_v42 = vpack.c.bf16 %v1456_v41, %v1456_v41 }
 0x16a   : > { %1776 = vst.msk [vmem:[%s2389_s24 + $0x1e4] sm:$0xf] %vm1654_vm3, %v1647_v39 }
 0x16b   : > { %1681 = vst.msk [vmem:[%s2389_s24 + $0x68] sm:$0xf] %vm1654_vm3, %v1552_v40  ;;  %v1047_v43 = vpop.f32.mrf.mxu2  ;;  %v1127_v44 = vpop.f32.mrf.mxu3 }
 0x16c   : > { %1713 = vst.msk [vmem:[%s2389_s24 + $0xe8] sm:$0xf] %vm1654_vm3, %v1584_v42  ;;  %vm1232_vm6 = vcmp.ge.f32.partialorder %v1047_v43, 0.0  ;;  %v1360_v45 = vmul.f32 0.2, %v1047_v43  ;;  %vm1264_vm7 = vcmp.ge.f32.partialorder %v1127_v44, 0.0  ;;  %v889_v46 = vpop.f32.mrf.mxu0  ;;  %v969_v47 = vpop.f32.mrf.mxu1 }
 0x16d   : > { %v1392_v48 = vmul.f32 0.2, %v1127_v44  ;;  %vm1169_vm8 = vcmp.ge.f32.partialorder %v889_v46, 0.0  ;;  %v1297_v49 = vmul.f32 0.2, %v889_v46  ;;  %vm1201_vm9 = vcmp.ge.f32.partialorder %v969_v47, 0.0 }
 0x16e   : > { %v1488_v50 = vsel %vm1232_vm6, %v1047_v43, %v1360_v45  ;;  %v1329_v51 = vmul.f32 0.2, %v969_v47 }
 0x16f   : > { %v1616_v52 = vpack.c.bf16 %v1488_v50, %v1488_v50  ;;  %v1520_v53 = vsel %vm1264_vm7, %v1127_v44, %v1392_v48  ;;  %v1425_v54 = vsel %vm1169_vm8, %v889_v46, %v1297_v49 }
 0x170   : > { %v1648_v55 = vpack.c.bf16 %v1520_v53, %v1520_v53  ;;  %v1553_v56 = vpack.c.bf16 %v1425_v54, %v1425_v54  ;;  %v1457_v57 = vsel %vm1201_vm9, %v969_v47, %v1329_v51 }
 0x171   : > { %1745 = vst.msk [vmem:[%s2389_s24 + $0x168] sm:$0xf] %vm1654_vm3, %v1616_v52  ;;  %v1585_v58 = vpack.c.bf16 %v1457_v57, %v1457_v57 }
 0x172   : > { %1777 = vst.msk [vmem:[%s2389_s24 + $0x1e8] sm:$0xf] %vm1654_vm3, %v1648_v55 }
 0x173   : > { %1682 = vst.msk [vmem:[%s2389_s24 + $0x6c] sm:$0xf] %vm1654_vm3, %v1553_v56  ;;  %v1049_v59 = vpop.f32.mrf.mxu2  ;;  %v1129_v60 = vpop.f32.mrf.mxu3 }
 0x174   : > { %1714 = vst.msk [vmem:[%s2389_s24 + $0xec] sm:$0xf] %vm1654_vm3, %v1585_v58  ;;  %vm1233_vm10 = vcmp.ge.f32.partialorder %v1049_v59, 0.0  ;;  %v1361_v61 = vmul.f32 0.2, %v1049_v59  ;;  %vm1265_vm11 = vcmp.ge.f32.partialorder %v1129_v60, 0.0  ;;  %v892_v62 = vpop.f32.mrf.mxu0  ;;  %v972_v63 = vpop.f32.mrf.mxu1 }
 0x175   : > { %v1393_v0 = vmul.f32 0.2, %v1129_v60  ;;  %vm1170_vm12 = vcmp.ge.f32.partialorder %v892_v62, 0.0  ;;  %v1298_v1 = vmul.f32 0.2, %v892_v62  ;;  %vm1202_vm13 = vcmp.ge.f32.partialorder %v972_v63, 0.0 }
 0x176   : > { %v1489_v2 = vsel %vm1233_vm10, %v1049_v59, %v1361_v61  ;;  %v1330_v3 = vmul.f32 0.2, %v972_v63 }
 0x177   : > { %v1617_v4 = vpack.c.bf16 %v1489_v2, %v1489_v2  ;;  %v1521_v5 = vsel %vm1265_vm11, %v1129_v60, %v1393_v0  ;;  %v1426_v6 = vsel %vm1170_vm12, %v892_v62, %v1298_v1 }
 0x178   : > { %v1649_v7 = vpack.c.bf16 %v1521_v5, %v1521_v5  ;;  %v1554_v8 = vpack.c.bf16 %v1426_v6, %v1426_v6  ;;  %v1458_v9 = vsel %vm1202_vm13, %v972_v63, %v1330_v3 }
 0x179   : > { %1746 = vst.msk [vmem:[%s2389_s24 + $0x16c] sm:$0xf] %vm1654_vm3, %v1617_v4  ;;  %v1586_v10 = vpack.c.bf16 %v1458_v9, %v1458_v9 }
 0x17a   : > { %1778 = vst.msk [vmem:[%s2389_s24 + $0x1ec] sm:$0xf] %vm1654_vm3, %v1649_v7 }
 0x17b   : > { %1683 = vst.msk [vmem:[%s2389_s24 + $0x70] sm:$0xf] %vm1654_vm3, %v1554_v8  ;;  %v1052_v11 = vpop.f32.mrf.mxu2  ;;  %v1132_v12 = vpop.f32.mrf.mxu3 }
 0x17c   : > { %1715 = vst.msk [vmem:[%s2389_s24 + $0xf0] sm:$0xf] %vm1654_vm3, %v1586_v10  ;;  %vm1234_vm14 = vcmp.ge.f32.partialorder %v1052_v11, 0.0  ;;  %v1362_v13 = vmul.f32 0.2, %v1052_v11  ;;  %vm1266_vm15 = vcmp.ge.f32.partialorder %v1132_v12, 0.0  ;;  %v894_v14 = vpop.f32.mrf.mxu0  ;;  %v974_v15 = vpop.f32.mrf.mxu1 }
 0x17d   : > { %v1394_v16 = vmul.f32 0.2, %v1132_v12  ;;  %vm1171_vm1 = vcmp.ge.f32.partialorder %v894_v14, 0.0  ;;  %v1299_v17 = vmul.f32 0.2, %v894_v14  ;;  %vm1203_vm2 = vcmp.ge.f32.partialorder %v974_v15, 0.0 }
 0x17e   : > { %v1490_v18 = vsel %vm1234_vm14, %v1052_v11, %v1362_v13  ;;  %v1331_v19 = vmul.f32 0.2, %v974_v15 }
 0x17f   : > { %v1618_v20 = vpack.c.bf16 %v1490_v18, %v1490_v18  ;;  %v1522_v21 = vsel %vm1266_vm15, %v1132_v12, %v1394_v16  ;;  %v1427_v22 = vsel %vm1171_vm1, %v894_v14, %v1299_v17 }
 0x180   : > { %v1650_v23 = vpack.c.bf16 %v1522_v21, %v1522_v21  ;;  %v1555_v24 = vpack.c.bf16 %v1427_v22, %v1427_v22  ;;  %v1459_v25 = vsel %vm1203_vm2, %v974_v15, %v1331_v19 }
 0x181   : > { %1747 = vst.msk [vmem:[%s2389_s24 + $0x170] sm:$0xf] %vm1654_vm3, %v1618_v20  ;;  %v1587_v26 = vpack.c.bf16 %v1459_v25, %v1459_v25 }
 0x182   : > { %1779 = vst.msk [vmem:[%s2389_s24 + $0x1f0] sm:$0xf] %vm1654_vm3, %v1650_v23 }
 0x183   : > { %1684 = vst.msk [vmem:[%s2389_s24 + $0x74] sm:$0xf] %vm1654_vm3, %v1555_v24  ;;  %v1054_v27 = vpop.f32.mrf.mxu2  ;;  %v1134_v28 = vpop.f32.mrf.mxu3 }
 0x184   : > { %1716 = vst.msk [vmem:[%s2389_s24 + $0xf4] sm:$0xf] %vm1654_vm3, %v1587_v26  ;;  %vm1235_vm4 = vcmp.ge.f32.partialorder %v1054_v27, 0.0  ;;  %v1363_v29 = vmul.f32 0.2, %v1054_v27  ;;  %vm1267_vm5 = vcmp.ge.f32.partialorder %v1134_v28, 0.0  ;;  %v897_v30 = vpop.f32.mrf.mxu0  ;;  %v977_v31 = vpop.f32.mrf.mxu1 }
 0x185   : > { %v1395_v32 = vmul.f32 0.2, %v1134_v28  ;;  %vm1172_vm0 = vcmp.ge.f32.partialorder %v897_v30, 0.0  ;;  %v1300_v33 = vmul.f32 0.2, %v897_v30  ;;  %vm1204_vm6 = vcmp.ge.f32.partialorder %v977_v31, 0.0 }
 0x186   : > { %v1491_v34 = vsel %vm1235_vm4, %v1054_v27, %v1363_v29  ;;  %v1332_v35 = vmul.f32 0.2, %v977_v31 }
 0x187   : > { %v1619_v36 = vpack.c.bf16 %v1491_v34, %v1491_v34  ;;  %v1523_v37 = vsel %vm1267_vm5, %v1134_v28, %v1395_v32  ;;  %v1428_v38 = vsel %vm1172_vm0, %v897_v30, %v1300_v33 }
 0x188   : > { %v1651_v39 = vpack.c.bf16 %v1523_v37, %v1523_v37  ;;  %v1556_v40 = vpack.c.bf16 %v1428_v38, %v1428_v38  ;;  %v1460_v41 = vsel %vm1204_vm6, %v977_v31, %v1332_v35 }
 0x189   : > { %1748 = vst.msk [vmem:[%s2389_s24 + $0x174] sm:$0xf] %vm1654_vm3, %v1619_v36  ;;  %v1588_v42 = vpack.c.bf16 %v1460_v41, %v1460_v41 }
 0x18a   : > { %1780 = vst.msk [vmem:[%s2389_s24 + $0x1f4] sm:$0xf] %vm1654_vm3, %v1651_v39 }
 0x18b   : > { %1685 = vst.msk [vmem:[%s2389_s24 + $0x78] sm:$0xf] %vm1654_vm3, %v1556_v40  ;;  %v1057_v43 = vpop.f32.mrf.mxu2  ;;  %v1137_v44 = vpop.f32.mrf.mxu3 }
 0x18c   : > { %1717 = vst.msk [vmem:[%s2389_s24 + $0xf8] sm:$0xf] %vm1654_vm3, %v1588_v42  ;;  %vm1236_vm7 = vcmp.ge.f32.partialorder %v1057_v43, 0.0  ;;  %v1364_v45 = vmul.f32 0.2, %v1057_v43  ;;  %vm1268_vm8 = vcmp.ge.f32.partialorder %v1137_v44, 0.0  ;;  %v899_v46 = vpop.f32.mrf.mxu0  ;;  %v979_v47 = vpop.f32.mrf.mxu1 }
 0x18d   : > { %v1396_v48 = vmul.f32 0.2, %v1137_v44  ;;  %vm1173_vm9 = vcmp.ge.f32.partialorder %v899_v46, 0.0  ;;  %v1301_v49 = vmul.f32 0.2, %v899_v46  ;;  %vm1205_vm10 = vcmp.ge.f32.partialorder %v979_v47, 0.0 }
 0x18e   : > { %v1492_v50 = vsel %vm1236_vm7, %v1057_v43, %v1364_v45  ;;  %v1333_v51 = vmul.f32 0.2, %v979_v47 }
 0x18f   : > { %v1620_v52 = vpack.c.bf16 %v1492_v50, %v1492_v50  ;;  %v1524_v53 = vsel %vm1268_vm8, %v1137_v44, %v1396_v48  ;;  %v1429_v54 = vsel %vm1173_vm9, %v899_v46, %v1301_v49 }
 0x190   : > { %v1652_v55 = vpack.c.bf16 %v1524_v53, %v1524_v53  ;;  %v1557_v56 = vpack.c.bf16 %v1429_v54, %v1429_v54  ;;  %v1461_v57 = vsel %vm1205_vm10, %v979_v47, %v1333_v51 }
 0x191   : > { %1749 = vst.msk [vmem:[%s2389_s24 + $0x178] sm:$0xf] %vm1654_vm3, %v1620_v52  ;;  %v1589_v58 = vpack.c.bf16 %v1461_v57, %v1461_v57 }
 0x192   : > { %1781 = vst.msk [vmem:[%s2389_s24 + $0x1f8] sm:$0xf] %vm1654_vm3, %v1652_v55 }
 0x193   : > { %1686 = vst.msk [vmem:[%s2389_s24 + $0x7c] sm:$0xf] %vm1654_vm3, %v1557_v56  ;;  %v1059_v59 = vpop.f32.mrf.mxu2  ;;  %v1139_v60 = vpop.f32.mrf.mxu3 }
 0x194   : > { %1718 = vst.msk [vmem:[%s2389_s24 + $0xfc] sm:$0xf] %vm1654_vm3, %v1589_v58  ;;  %vm1237_vm11 = vcmp.ge.f32.partialorder %v1059_v59, 0.0  ;;  %v1365_v61 = vmul.f32 0.2, %v1059_v59  ;;  %vm1269_vm12 = vcmp.ge.f32.partialorder %v1139_v60, 0.0 }
 0x195   : > { %v1397_v62 = vmul.f32 0.2, %v1139_v60 }
 0x196   : > { %v1493_v63 = vsel %vm1237_vm11, %v1059_v59, %v1365_v61 }
 0x197   : > { %v1621_v0 = vpack.c.bf16 %v1493_v63, %v1493_v63  ;;  %v1525_v1 = vsel %vm1269_vm12, %v1139_v60, %v1397_v62 }
 0x198   : > { %v1653_v2 = vpack.c.bf16 %v1525_v1, %v1525_v1 }
 0x199   : > { %1750 = vst.msk [vmem:[%s2389_s24 + $0x17c] sm:$0xf] %vm1654_vm3, %v1621_v0 }
 0x19a   : > { %1782 = vst.msk [vmem:[%s2389_s24 + $0x1fc] sm:$0xf] %vm1654_vm3, %v1653_v2 }
 0x19b PF: > { %s12_s9 = sadd.s32 1, %s2272_s9  }
 0x19c   : > { %p9_p4 = scmp.ge.s32.totalorder %s12_s9, 4  }
 0x19e   :  { %11 = sbr.rel (!%p9_p4) target bundleno = 1 (0x1), region = 58 }

// kernel: dnet_forward.5
= control target key start
LH: loop header
LB: loop body
LE: loop exit
PB: predicated region body
PF: predicated region fallthrough
CT: control target
= control target key end

     0   :  { %vm1717_vm0 = vcmask 523264   ;;  %vm2519_vm14 = vcmask 519168   ;;  %s6097_s1 = inlined_call_operand.vmem [shape: bf16[512,64], index: 1, kind: input, shape index: {}]   ;;  %s6098_s0 = inlined_call_operand.vmem [shape: bf16[512,512], index: 0, kind: input, shape index: {}]   ;;  %s6099_s3 = inlined_call_operand.vmem [shape: f32[1,64], index: 3, kind: input, shape index: {}]   ;;  %s6100_s2 = inlined_call_operand.vmem [shape: f32[1,64], index: 2, kind: input, shape index: {}]   ;;  %s6101_s4 = inlined_call_operand.vmem [shape: bf16[512,64], index: 4, kind: output, shape index: {}]  }
   0x1   :  { %v3363_v0 = vld [vmem:[%s6097_s1 + $0x38] sm:$0xff]  ;;  %v3362_v4 = vld [vmem:[%s6097_s1 + $0x30] sm:$0xff]  ;;  %v3361_v8 = vld [vmem:[%s6097_s1 + $0x28] sm:$0xff] }
   0x2   :  { %v3371_v1 = vld [vmem:[%s6097_s1 + $0x78] sm:$0xff]  ;;  %1041 = vmatpush.bf16.msra.mxu0 %v3363_v0  ;;  %v3370_v5 = vld [vmem:[%s6097_s1 + $0x70] sm:$0xff]  ;;  %v3369_v9 = vld [vmem:[%s6097_s1 + $0x68] sm:$0xff] }
   0x3   :  { %v3379_v2 = vld [vmem:[%s6097_s1 + $0xb8] sm:$0xff]  ;;  %1210 = vmatpush.bf16.msra.mxu1 %v3371_v1  ;;  %v3378_v6 = vld [vmem:[%s6097_s1 + $0xb0] sm:$0xff]  ;;  %v3377_v10 = vld [vmem:[%s6097_s1 + $0xa8] sm:$0xff] }
   0x4   :  { %v3387_v3 = vld [vmem:[%s6097_s1 + $0xf8] sm:$0xff]  ;;  %1379 = vmatpush.bf16.msra.mxu2 %v3379_v2  ;;  %v3386_v7 = vld [vmem:[%s6097_s1 + $0xf0] sm:$0xff]  ;;  %v3385_v11 = vld [vmem:[%s6097_s1 + $0xe8] sm:$0xff] }
   0x5   :  { %1548 = vmatpush.bf16.msra.mxu3 %v3387_v3  ;;  %v3360_v12 = vld [vmem:[%s6097_s1 + $0x20] sm:$0xff]  ;;  %v3359_v16 = vld [vmem:[%s6097_s1 + $0x18] sm:$0xff]  ;;  %v3358_v20 = vld [vmem:[%s6097_s1 + $0x10] sm:$0xff] }
   0x6   :  { %1042 = vmatpush.bf16.msra.mxu0 %v3362_v4  ;;  %v3368_v13 = vld [vmem:[%s6097_s1 + $0x60] sm:$0xff]  ;;  %v3367_v17 = vld [vmem:[%s6097_s1 + $0x58] sm:$0xff]  ;;  %v3366_v21 = vld [vmem:[%s6097_s1 + $0x50] sm:$0xff] }
   0x7   :  { %1211 = vmatpush.bf16.msra.mxu1 %v3370_v5  ;;  %v3376_v14 = vld [vmem:[%s6097_s1 + $0xa0] sm:$0xff]  ;;  %v3375_v18 = vld [vmem:[%s6097_s1 + $0x98] sm:$0xff]  ;;  %v3374_v22 = vld [vmem:[%s6097_s1 + $0x90] sm:$0xff] }
   0x8   :  { %1380 = vmatpush.bf16.msra.mxu2 %v3378_v6  ;;  %v3384_v15 = vld [vmem:[%s6097_s1 + $0xe0] sm:$0xff]  ;;  %v3383_v19 = vld [vmem:[%s6097_s1 + $0xd8] sm:$0xff]  ;;  %v3382_v23 = vld [vmem:[%s6097_s1 + $0xd0] sm:$0xff] }
   0x9   :  { %1549 = vmatpush.bf16.msra.mxu3 %v3386_v7  ;;  %v3357_v24 = vld [vmem:[%s6097_s1 + $0x8] sm:$0xff]  ;;  %v3356_v28 = vld [vmem:[%s6097_s1] sm:$0xff]  ;;  %v3230_v33 = vld [vmem:[%s6098_s0 + $0xc] sm:$0xf0] }
   0xa   :  { %1043 = vmatpush.bf16.msra.mxu0 %v3361_v8  ;;  %v3365_v25 = vld [vmem:[%s6097_s1 + $0x48] sm:$0xff]  ;;  %v3364_v29 = vld [vmem:[%s6097_s1 + $0x40] sm:$0xff]  ;;  %v2592_v35 = vld [vmem:[%s6098_s0 + $0x10] sm:$0xf0] }
   0xb   :  { %1212 = vmatpush.bf16.msra.mxu1 %v3369_v9  ;;  %v3373_v26 = vld [vmem:[%s6097_s1 + $0x88] sm:$0xff]  ;;  %v3372_v30 = vld [vmem:[%s6097_s1 + $0x80] sm:$0xff]  ;;  %v3231_v37 = vld [vmem:[%s6098_s0 + $0x14] sm:$0xf0] }
   0xc   :  { %1381 = vmatpush.bf16.msra.mxu2 %v3377_v10  ;;  %v3381_v27 = vld [vmem:[%s6097_s1 + $0xc8] sm:$0xff]  ;;  %v3380_v31 = vld [vmem:[%s6097_s1 + $0xc0] sm:$0xff]  ;;  %v2600_v39 = vld [vmem:[%s6098_s0 + $0x18] sm:$0xf0] }
   0xd   :  { %1550 = vmatpush.bf16.msra.mxu3 %v3385_v11  ;;  %v2590_v32 = vld [vmem:[%s6098_s0] sm:$0xf]  ;;  %v3228_v34 = vld [vmem:[%s6098_s0 + $0x4] sm:$0xf]  ;;  %v2598_v36 = vld [vmem:[%s6098_s0 + $0x8] sm:$0xf] }
   0xe   :  { %1044 = vmatpush.bf16.msra.mxu0 %v3360_v12  ;;  %v3229_v38 = vld [vmem:[%s6098_s0 + $0xc] sm:$0xf]  ;;  %v2591_v40 = vor.u32 %v3230_v33, %v2590_v32  ;;  %v2595_v41 = vor.u32 %v3228_v34, %v2592_v35  ;;  %v2599_v42 = vor.u32 %v3231_v37, %v2598_v36  ;;  %v2606_v44 = vld [vmem:[%s6098_s0 + $0x20] sm:$0xf]  ;;  %v3234_v45 = vld [vmem:[%s6098_s0 + $0x2c] sm:$0xf0] }
   0xf   :  { %1213 = vmatpush.bf16.msra.mxu1 %v3368_v13  ;;  %v2603_v43 = vor.u32 %v3229_v38, %v2600_v39  ;;  %v3232_v46 = vld [vmem:[%s6098_s0 + $0x24] sm:$0xf]  ;;  %v2608_v47 = vld [vmem:[%s6098_s0 + $0x30] sm:$0xf0]  ;;  %v2614_v48 = vld [vmem:[%s6098_s0 + $0x28] sm:$0xf]  ;;  %v2607_v52 = vor.u32 %v3234_v45, %v2606_v44 }
  0x10   :  { %1382 = vmatpush.bf16.msra.mxu2 %v3376_v14  ;;  %v3235_v49 = vld [vmem:[%s6098_s0 + $0x34] sm:$0xf0]  ;;  %v3233_v50 = vld [vmem:[%s6098_s0 + $0x2c] sm:$0xf]  ;;  %v2616_v51 = vld [vmem:[%s6098_s0 + $0x38] sm:$0xf0]  ;;  %v2611_v53 = vor.u32 %v3232_v46, %v2608_v47 }
  0x11   :  { %1551 = vmatpush.bf16.msra.mxu3 %v3384_v15  ;;  %v2615_v54 = vor.u32 %v3235_v49, %v2614_v48  ;;  %v2619_v55 = vor.u32 %v3233_v50, %v2616_v51  ;;  %v2622_v56 = vld [vmem:[%s6098_s0 + $0x40] sm:$0xf]  ;;  %v3238_v57 = vld [vmem:[%s6098_s0 + $0x4c] sm:$0xf0]  ;;  %v3236_v58 = vld [vmem:[%s6098_s0 + $0x44] sm:$0xf] }
  0x12   :  { %1045 = vmatpush.bf16.msra.mxu0 %v3359_v16  ;;  %v2624_v59 = vld [vmem:[%s6098_s0 + $0x50] sm:$0xf0]  ;;  %v2630_v60 = vld [vmem:[%s6098_s0 + $0x48] sm:$0xf]  ;;  %v3239_v61 = vld [vmem:[%s6098_s0 + $0x54] sm:$0xf0]  ;;  %v2623_v0 = vor.u32 %v3238_v57, %v2622_v56 }
  0x13   :  { %1214 = vmatpush.bf16.msra.mxu1 %v3367_v17  ;;  %v3237_v62 = vld [vmem:[%s6098_s0 + $0x4c] sm:$0xf]  ;;  %v2632_v63 = vld [vmem:[%s6098_s0 + $0x58] sm:$0xf0]  ;;  %v2627_v1 = vor.u32 %v3236_v58, %v2624_v59  ;;  %v2631_v2 = vor.u32 %v3239_v61, %v2630_v60  ;;  %v2638_v4 = vld [vmem:[%s6098_s0 + $0x60] sm:$0xf] }
  0x14   :  { %1383 = vmatpush.bf16.msra.mxu2 %v3375_v18  ;;  %v2635_v3 = vor.u32 %v3237_v62, %v2632_v63  ;;  %v3242_v5 = vld [vmem:[%s6098_s0 + $0x6c] sm:$0xf0]  ;;  %v3240_v6 = vld [vmem:[%s6098_s0 + $0x64] sm:$0xf]  ;;  %v2640_v7 = vld [vmem:[%s6098_s0 + $0x70] sm:$0xf0] }
  0x15   :  { %1552 = vmatpush.bf16.msra.mxu3 %v3383_v19  ;;  %v2646_v8 = vld [vmem:[%s6098_s0 + $0x68] sm:$0xf]  ;;  %v3243_v9 = vld [vmem:[%s6098_s0 + $0x74] sm:$0xf0]  ;;  %v3241_v10 = vld [vmem:[%s6098_s0 + $0x6c] sm:$0xf]  ;;  %v2639_v12 = vor.u32 %v3242_v5, %v2638_v4  ;;  %v2643_v13 = vor.u32 %v3240_v6, %v2640_v7 }
  0x16   :  { %1046 = vmatpush.bf16.msra.mxu0 %v3358_v20  ;;  %v2648_v11 = vld [vmem:[%s6098_s0 + $0x78] sm:$0xf0]  ;;  %v2647_v14 = vor.u32 %v3243_v9, %v2646_v8  ;;  %v2654_v16 = vld [vmem:[%s6098_s0 + $0x80] sm:$0xf]  ;;  %v3246_v17 = vld [vmem:[%s6098_s0 + $0x8c] sm:$0xf0] }
  0x17   :  { %1215 = vmatpush.bf16.msra.mxu1 %v3366_v21  ;;  %v2651_v15 = vor.u32 %v3241_v10, %v2648_v11  ;;  %v3244_v18 = vld [vmem:[%s6098_s0 + $0x84] sm:$0xf]  ;;  %v2656_v19 = vld [vmem:[%s6098_s0 + $0x90] sm:$0xf0]  ;;  %v2662_v20 = vld [vmem:[%s6098_s0 + $0x88] sm:$0xf] }
  0x18   :  { %1384 = vmatpush.bf16.msra.mxu2 %v3374_v22  ;;  %v3247_v21 = vld [vmem:[%s6098_s0 + $0x94] sm:$0xf0]  ;;  %v3245_v22 = vld [vmem:[%s6098_s0 + $0x8c] sm:$0xf]  ;;  %v2678_v32 = vld [vmem:[%s6098_s0 + $0xa8] sm:$0xf] }
  0x19   :  { %1553 = vmatpush.bf16.msra.mxu3 %v3382_v23  ;;  %v2664_v23 = vld [vmem:[%s6098_s0 + $0x98] sm:$0xf0]  ;;  %v3251_v33 = vld [vmem:[%s6098_s0 + $0xb4] sm:$0xf0]  ;;  %v3249_v34 = vld [vmem:[%s6098_s0 + $0xac] sm:$0xf] }
  0x1a   :  { %1047 = vmatpush.bf16.msra.mxu0 %v3357_v24  ;;  %v2655_v24 = vor.u32 %v3246_v17, %v2654_v16  ;;  %v2680_v35 = vld [vmem:[%s6098_s0 + $0xb8] sm:$0xf0]  ;;  %v2679_v38 = vor.u32 %v3251_v33, %v2678_v32  ;;  %v2694_v44 = vld [vmem:[%s6098_s0 + $0xc8] sm:$0xf]  ;;  %v3255_v45 = vld [vmem:[%s6098_s0 + $0xd4] sm:$0xf0] }
  0x1b   :  { %1216 = vmatpush.bf16.msra.mxu1 %v3365_v25  ;;  %v2659_v25 = vor.u32 %v3244_v18, %v2656_v19  ;;  %v2683_v39 = vor.u32 %v3249_v34, %v2680_v35  ;;  %v3253_v46 = vld [vmem:[%s6098_s0 + $0xcc] sm:$0xf]  ;;  %v2696_v47 = vld [vmem:[%s6098_s0 + $0xd8] sm:$0xf0]  ;;  %v2695_v50 = vor.u32 %v3255_v45, %v2694_v44  ;;  %v2710_v56 = vld [vmem:[%s6098_s0 + $0xe8] sm:$0xf] }
  0x1c   :  { %1385 = vmatpush.bf16.msra.mxu2 %v3373_v26  ;;  %v2663_v26 = vor.u32 %v3247_v21, %v2662_v20  ;;  %v2699_v51 = vor.u32 %v3253_v46, %v2696_v47  ;;  %v3259_v57 = vld [vmem:[%s6098_s0 + $0xf4] sm:$0xf0]  ;;  %v3257_v58 = vld [vmem:[%s6098_s0 + $0xec] sm:$0xf]  ;;  %v2712_v59 = vld [vmem:[%s6098_s0 + $0xf8] sm:$0xf0] }
  0x1d   :  { %1554 = vmatpush.bf16.msra.mxu3 %v3381_v27  ;;  %v2667_v27 = vor.u32 %v3245_v22, %v2664_v23  ;;  %v2711_v62 = vor.u32 %v3259_v57, %v2710_v56  ;;  %v2715_v63 = vor.u32 %v3257_v58, %v2712_v59  ;;  %v2726_v4 = vld [vmem:[%s6098_s0 + $0x108] sm:$0xf]  ;;  %v3263_v5 = vld [vmem:[%s6098_s0 + $0x114] sm:$0xf0]  ;;  %v3261_v6 = vld [vmem:[%s6098_s0 + $0x10c] sm:$0xf] }
  0x1e   :  { %1048 = vmatpush.bf16.msra.mxu0 %v3356_v28  ;;  %v2670_v28 = vld [vmem:[%s6098_s0 + $0xa0] sm:$0xf]  ;;  %v2728_v7 = vld [vmem:[%s6098_s0 + $0x118] sm:$0xf0]  ;;  %v3266_v23 = vld [vmem:[%s6098_s0 + $0x12c] sm:$0xf0] }
  0x1f   :  { %1217 = vmatpush.bf16.msra.mxu1 %v3364_v29  ;;  %v3250_v29 = vld [vmem:[%s6098_s0 + $0xac] sm:$0xf0]  ;;  %v2734_v22 = vld [vmem:[%s6098_s0 + $0x120] sm:$0xf] }
  0x20   :  { %1386 = vmatpush.bf16.msra.mxu2 %v3372_v30  ;;  %v3248_v30 = vld [vmem:[%s6098_s0 + $0xa4] sm:$0xf]  ;;  %v2671_v36 = vor.u32 %v3250_v29, %v2670_v28  ;;  %v3265_v28 = vld [vmem:[%s6098_s0 + $0x12c] sm:$0xf]  ;;  %v2744_v29 = vld [vmem:[%s6098_s0 + $0x138] sm:$0xf0]  ;;  %v2735_v32 = vor.u32 %v3266_v23, %v2734_v22 }
  0x21   :  { %1555 = vmatpush.bf16.msra.mxu3 %v3380_v31  ;;  %1049 = vmatmul.bf16.vlgmr.msra.gmra.mxu0 %v2591_v40  ;;  %v2672_v31 = vld [vmem:[%s6098_s0 + $0xb0] sm:$0xf0]  ;;  %v2686_v40 = vld [vmem:[%s6098_s0 + $0xc0] sm:$0xf] }
  0x22   :  { %1218 = vmatmul.bf16.vlgmr.msra.gmra.mxu1 %v2595_v41  ;;  %v2675_v37 = vor.u32 %v3248_v30, %v2672_v31  ;;  %v3254_v41 = vld [vmem:[%s6098_s0 + $0xcc] sm:$0xf0] }
  0x23   :  { %1387 = vmatmul.bf16.vlgmr.msra.gmra.mxu2 %v2599_v42  ;;  %v3252_v42 = vld [vmem:[%s6098_s0 + $0xc4] sm:$0xf]  ;;  %v2687_v48 = vor.u32 %v3254_v41, %v2686_v40 }
  0x24   :  { %1556 = vmatmul.bf16.vlgmr.msra.gmra.mxu3 %v2603_v43  ;;  %v2688_v43 = vld [vmem:[%s6098_s0 + $0xd0] sm:$0xf0] }
  0x25   :  { %v2691_v49 = vor.u32 %v3252_v42, %v2688_v43 }
  0x31   :  { %1054 = vmatmul.bf16.gmra.mxu0 %v2607_v52  ;;  %v2702_v52 = vld [vmem:[%s6098_s0 + $0xe0] sm:$0xf] }
  0x32   :  { %1223 = vmatmul.bf16.gmra.mxu1 %v2611_v53  ;;  %v3258_v53 = vld [vmem:[%s6098_s0 + $0xec] sm:$0xf0] }
  0x33   :  { %1392 = vmatmul.bf16.gmra.mxu2 %v2615_v54  ;;  %v3256_v54 = vld [vmem:[%s6098_s0 + $0xe4] sm:$0xf]  ;;  %v2703_v60 = vor.u32 %v3258_v53, %v2702_v52  ;;  %v2758_v52 = vld [vmem:[%s6098_s0 + $0x148] sm:$0xf]  ;;  %v3271_v53 = vld [vmem:[%s6098_s0 + $0x154] sm:$0xf0] }
  0x34   :  { %1561 = vmatmul.bf16.gmra.mxu3 %v2619_v55  ;;  %v2704_v55 = vld [vmem:[%s6098_s0 + $0xf0] sm:$0xf0] }
  0x35   :  { %v2707_v61 = vor.u32 %v3256_v54, %v2704_v55  ;;  %v3269_v54 = vld [vmem:[%s6098_s0 + $0x14c] sm:$0xf]  ;;  %v2760_v55 = vld [vmem:[%s6098_s0 + $0x158] sm:$0xf0] }
  0x41   :  { %1059 = vmatmul.bf16.gmra.mxu0 %v2623_v0  ;;  %v2718_v0 = vld [vmem:[%s6098_s0 + $0x100] sm:$0xf] }
  0x42   :  { %1228 = vmatmul.bf16.gmra.mxu1 %v2627_v1  ;;  %v3262_v1 = vld [vmem:[%s6098_s0 + $0x10c] sm:$0xf0] }
  0x43   :  { %1397 = vmatmul.bf16.gmra.mxu2 %v2631_v2  ;;  %v3260_v2 = vld [vmem:[%s6098_s0 + $0x104] sm:$0xf]  ;;  %v2719_v8 = vor.u32 %v3262_v1, %v2718_v0  ;;  %v2763_v0 = vor.u32 %v3269_v54, %v2760_v55 }
  0x44   :  { %1566 = vmatmul.bf16.gmra.mxu3 %v2635_v3  ;;  %v2720_v3 = vld [vmem:[%s6098_s0 + $0x110] sm:$0xf0] }
  0x45   :  { %v2723_v9 = vor.u32 %v3260_v2, %v2720_v3 }
  0x51   :  { %1064 = vmatmul.bf16.gmra.mxu0 %v2639_v12  ;;  %v2727_v12 = vor.u32 %v3263_v5, %v2726_v4 }
  0x52   :  { %1233 = vmatmul.bf16.gmra.mxu1 %v2643_v13  ;;  %v2731_v13 = vor.u32 %v3261_v6, %v2728_v7 }
  0x53   :  { %1402 = vmatmul.bf16.gmra.mxu2 %v2647_v14 }
  0x54   :  { %1571 = vmatmul.bf16.gmra.mxu3 %v2651_v15 }
  0x61   :  { %1069 = vmatmul.bf16.gmra.mxu0 %v2655_v24  ;;  %v3264_v24 = vld [vmem:[%s6098_s0 + $0x124] sm:$0xf] }
  0x62   :  { %1238 = vmatmul.bf16.gmra.mxu1 %v2659_v25  ;;  %v2736_v25 = vld [vmem:[%s6098_s0 + $0x130] sm:$0xf0] }
  0x63   :  { %1407 = vmatmul.bf16.gmra.mxu2 %v2663_v26  ;;  %v2742_v26 = vld [vmem:[%s6098_s0 + $0x128] sm:$0xf]  ;;  %v2739_v33 = vor.u32 %v3264_v24, %v2736_v25 }
  0x64   :  { %1576 = vmatmul.bf16.gmra.mxu3 %v2667_v27  ;;  %v3267_v27 = vld [vmem:[%s6098_s0 + $0x134] sm:$0xf0] }
  0x71   :  { %1074 = vmatmul.bf16.gmra.mxu0 %v2671_v36 }
  0x72   :  { %1243 = vmatmul.bf16.gmra.mxu1 %v2675_v37  ;;  %v2743_v37 = vor.u32 %v3267_v27, %v2742_v26 }
  0x73   :  { %1412 = vmatmul.bf16.gmra.mxu2 %v2679_v38  ;;  %v2747_v38 = vor.u32 %v3265_v28, %v2744_v29 }
  0x74   :  { %1581 = vmatmul.bf16.gmra.mxu3 %v2683_v39 }
  0x81   :  { %1079 = vmatmul.bf16.gmra.mxu0 %v2687_v48  ;;  %v2750_v48 = vld [vmem:[%s6098_s0 + $0x140] sm:$0xf] }
  0x82   :  { %1248 = vmatmul.bf16.gmra.mxu1 %v2691_v49  ;;  %v3270_v49 = vld [vmem:[%s6098_s0 + $0x14c] sm:$0xf0] }
  0x83   :  { %1417 = vmatmul.bf16.gmra.mxu2 %v2695_v50  ;;  %v3268_v50 = vld [vmem:[%s6098_s0 + $0x144] sm:$0xf]  ;;  %v2751_v58 = vor.u32 %v3270_v49, %v2750_v48 }
  0x84   :  { %1586 = vmatmul.bf16.gmra.mxu3 %v2699_v51  ;;  %v2752_v51 = vld [vmem:[%s6098_s0 + $0x150] sm:$0xf0] }
  0x85   :  { %v2755_v59 = vor.u32 %v3268_v50, %v2752_v51 }
  0x91   :  { %1084 = vmatmul.bf16.gmra.mxu0 %v2703_v60 }
  0x92   :  { %1253 = vmatmul.bf16.gmra.mxu1 %v2707_v61 }
  0x93   :  { %1422 = vmatmul.bf16.gmra.mxu2 %v2711_v62 }
  0x94   :  { %1591 = vmatmul.bf16.gmra.mxu3 %v2715_v63  ;;  %v2759_v63 = vor.u32 %v3271_v53, %v2758_v52 }
  0x9e   :  { %v1050_v10 = vpop.f32.mrf.mxu0 }
  0x9f   :  { %v1219_v11 = vpop.f32.mrf.mxu1 }
  0xa0   :  { %v1220_v14 = vadd.f32 %v1219_v11, %v1050_v10  ;;  %v2766_v10 = vld [vmem:[%s6098_s0 + $0x160] sm:$0xf]  ;;  %v3274_v11 = vld [vmem:[%s6098_s0 + $0x16c] sm:$0xf0] }
  0xa1   :  { %1089 = vmatmul.bf16.gmra.mxu0 %v2719_v8 }
  0xa2   :  { %1258 = vmatmul.bf16.gmra.mxu1 %v2723_v9 }
  0xa3   :  { %1427 = vmatmul.bf16.gmra.mxu2 %v2727_v12  ;;  %v3272_v12 = vld [vmem:[%s6098_s0 + $0x164] sm:$0xf] }
  0xa4   :  { %1596 = vmatmul.bf16.gmra.mxu3 %v2731_v13  ;;  %v2768_v13 = vld [vmem:[%s6098_s0 + $0x170] sm:$0xf0] }
  0xa5   :  { %v2771_v22 = vor.u32 %v3272_v12, %v2768_v13 }
  0xa6   :  { %v1388_v15 = vpop.f32.mrf.mxu2  ;;  %v1052_v18 = vpop.f32.mrf.mxu0 }
  0xa7   :  { %v1557_v16 = vpop.f32.mrf.mxu3  ;;  %v1389_v17 = vadd.f32 %v1388_v15, %v1220_v14  ;;  %v1221_v19 = vpop.f32.mrf.mxu1  ;;  %v2774_v14 = vld [vmem:[%s6098_s0 + $0x168] sm:$0xf]  ;;  %v3275_v15 = vld [vmem:[%s6098_s0 + $0x174] sm:$0xf0] }
  0xa8   :  { %v1222_v20 = vadd.f32 %v1221_v19, %v1052_v18  ;;  %v2775_v26 = vor.u32 %v3275_v15, %v2774_v14 }
  0xa9   :  { %v3728_v21 = vadd.f32 %v1557_v16, %v1389_v17  ;;  %v3273_v16 = vld [vmem:[%s6098_s0 + $0x16c] sm:$0xf]  ;;  %v2776_v17 = vld [vmem:[%s6098_s0 + $0x178] sm:$0xf0] }
  0xaa   :  { %v2779_v27 = vor.u32 %v3273_v16, %v2776_v17 }
  0xae   :  { %v1390_v30 = vpop.f32.mrf.mxu2  ;;  %v1055_v35 = vpop.f32.mrf.mxu0 }
  0xaf   :  { %v1559_v31 = vpop.f32.mrf.mxu3  ;;  %v1391_v34 = vadd.f32 %v1390_v30, %v1222_v20  ;;  %v1224_v36 = vpop.f32.mrf.mxu1  ;;  %v2767_v20 = vor.u32 %v3274_v11, %v2766_v10  ;;  %v2808_v10 = vld [vmem:[%s6098_s0 + $0x1b8] sm:$0xf0] }
  0xb0   :  { %v1225_v39 = vadd.f32 %v1224_v36, %v1055_v35 }
  0xb1   :  { %v3754_v40 = vadd.f32 %v1559_v31, %v1391_v34  ;;  %1094 = vmatmul.bf16.gmra.mxu0 %v2735_v32 }
  0xb2   :  { %1263 = vmatmul.bf16.gmra.mxu1 %v2739_v33 }
  0xb3   :  { %1432 = vmatmul.bf16.gmra.mxu2 %v2743_v37  ;;  %v2782_v37 = vld [vmem:[%s6098_s0 + $0x180] sm:$0xf] }
  0xb4   :  { %1601 = vmatmul.bf16.gmra.mxu3 %v2747_v38  ;;  %v3278_v38 = vld [vmem:[%s6098_s0 + $0x18c] sm:$0xf0] }
  0xb5   :  { %v2783_v49 = vor.u32 %v3278_v38, %v2782_v37  ;;  %v3287_v37 = vld [vmem:[%s6098_s0 + $0x1d4] sm:$0xf0]  ;;  %v3285_v38 = vld [vmem:[%s6098_s0 + $0x1cc] sm:$0xf] }
  0xb6   :  { %v1393_v41 = vpop.f32.mrf.mxu2  ;;  %v1057_v44 = vpop.f32.mrf.mxu0 }
  0xb7   :  { %v1562_v42 = vpop.f32.mrf.mxu3  ;;  %v1394_v43 = vadd.f32 %v1393_v41, %v1225_v39  ;;  %v1226_v45 = vpop.f32.mrf.mxu1  ;;  %v3276_v39 = vld [vmem:[%s6098_s0 + $0x184] sm:$0xf]  ;;  %v2784_v41 = vld [vmem:[%s6098_s0 + $0x190] sm:$0xf0] }
  0xb8   :  { %v1227_v46 = vadd.f32 %v1226_v45, %v1057_v44  ;;  %v3277_v44 = vld [vmem:[%s6098_s0 + $0x18c] sm:$0xf]  ;;  %v2792_v45 = vld [vmem:[%s6098_s0 + $0x198] sm:$0xf0]  ;;  %v2787_v50 = vor.u32 %v3276_v39, %v2784_v41 }
  0xb9   :  { %v3756_v47 = vadd.f32 %v1562_v42, %v1394_v43  ;;  %v2790_v42 = vld [vmem:[%s6098_s0 + $0x188] sm:$0xf]  ;;  %v3279_v43 = vld [vmem:[%s6098_s0 + $0x194] sm:$0xf0]  ;;  %v2795_v55 = vor.u32 %v3277_v44, %v2792_v45  ;;  %v2824_v39 = vld [vmem:[%s6098_s0 + $0x1d8] sm:$0xf0] }
  0xba   :  { %v2791_v54 = vor.u32 %v3279_v43, %v2790_v42 }
  0xbe   :  { %v1395_v56 = vpop.f32.mrf.mxu2  ;;  %v1060_v61 = vpop.f32.mrf.mxu0 }
  0xbf   :  { %v1564_v57 = vpop.f32.mrf.mxu3  ;;  %v1396_v60 = vadd.f32 %v1395_v56, %v1227_v46  ;;  %v1229_v62 = vpop.f32.mrf.mxu1 }
  0xc0   :  { %v1230_v1 = vadd.f32 %v1229_v62, %v1060_v61 }
  0xc1   :  { %v3782_v2 = vadd.f32 %v1564_v57, %v1396_v60  ;;  %1099 = vmatmul.bf16.gmra.mxu0 %v2751_v58 }
  0xc2   :  { %1268 = vmatmul.bf16.gmra.mxu1 %v2755_v59 }
  0xc3   :  { %1437 = vmatmul.bf16.gmra.mxu2 %v2759_v63 }
  0xc4   :  { %1606 = vmatmul.bf16.gmra.mxu3 %v2763_v0 }
  0xc6   :  { %v1398_v3 = vpop.f32.mrf.mxu2  ;;  %v1062_v6 = vpop.f32.mrf.mxu0 }
  0xc7   :  { %v1567_v4 = vpop.f32.mrf.mxu3  ;;  %v1399_v5 = vadd.f32 %v1398_v3, %v1230_v1  ;;  %v1231_v7 = vpop.f32.mrf.mxu1  ;;  %v2798_v1 = vld [vmem:[%s6098_s0 + $0x1a0] sm:$0xf]  ;;  %v3282_v3 = vld [vmem:[%s6098_s0 + $0x1ac] sm:$0xf0] }
  0xc8   :  { %v1232_v8 = vadd.f32 %v1231_v7, %v1062_v6  ;;  %v2806_v6 = vld [vmem:[%s6098_s0 + $0x1a8] sm:$0xf]  ;;  %v3283_v7 = vld [vmem:[%s6098_s0 + $0x1b4] sm:$0xf0]  ;;  %v2799_v13 = vor.u32 %v3282_v3, %v2798_v1  ;;  %v2832_v1 = vld [vmem:[%s6098_s0 + $0x1f0] sm:$0xf0] }
  0xc9   :  { %v3784_v9 = vadd.f32 %v1567_v4, %v1399_v5  ;;  %v3280_v4 = vld [vmem:[%s6098_s0 + $0x1a4] sm:$0xf]  ;;  %v2800_v5 = vld [vmem:[%s6098_s0 + $0x1b0] sm:$0xf0]  ;;  %v2838_v3 = vld [vmem:[%s6098_s0 + $0x1e8] sm:$0xf] }
  0xca   :  { %v2803_v14 = vor.u32 %v3280_v4, %v2800_v5  ;;  %v3291_v4 = vld [vmem:[%s6098_s0 + $0x1f4] sm:$0xf0]  ;;  %v3289_v5 = vld [vmem:[%s6098_s0 + $0x1ec] sm:$0xf] }
  0xce   :  { %v1400_v18 = vpop.f32.mrf.mxu2  ;;  %v1065_v24 = vpop.f32.mrf.mxu0 }
  0xcf   :  { %v1569_v19 = vpop.f32.mrf.mxu3  ;;  %v1401_v23 = vadd.f32 %v1400_v18, %v1232_v8  ;;  %v1234_v25 = vpop.f32.mrf.mxu1  ;;  %v3281_v8 = vld [vmem:[%s6098_s0 + $0x1ac] sm:$0xf]  ;;  %v2807_v18 = vor.u32 %v3283_v7, %v2806_v6  ;;  %v2840_v6 = vld [vmem:[%s6098_s0 + $0x1f8] sm:$0xf0] }
  0xd0   :  { %v1235_v28 = vadd.f32 %v1234_v25, %v1065_v24 }
  0xd1   :  { %v3810_v29 = vadd.f32 %v1569_v19, %v1401_v23  ;;  %1104 = vmatmul.bf16.gmra.mxu0 %v2767_v20  ;;  %v2811_v19 = vor.u32 %v3281_v8, %v2808_v10 }
  0xd2   :  { %1273 = vmatmul.bf16.gmra.mxu1 %v2771_v22 }
  0xd3   :  { %1442 = vmatmul.bf16.gmra.mxu2 %v2775_v26 }
  0xd4   :  { %1611 = vmatmul.bf16.gmra.mxu3 %v2779_v27 }
  0xd6   :  { %v1403_v30 = vpop.f32.mrf.mxu2  ;;  %v1067_v33 = vpop.f32.mrf.mxu0 }
  0xd7   :  { %v1572_v31 = vpop.f32.mrf.mxu3  ;;  %v1404_v32 = vadd.f32 %v1403_v30, %v1235_v28  ;;  %v1236_v34 = vpop.f32.mrf.mxu1 }
  0xd8   :  { %v1237_v35 = vadd.f32 %v1236_v34, %v1067_v33  ;;  %v3284_v33 = vld [vmem:[%s6098_s0 + $0x1c4] sm:$0xf]  ;;  %v2816_v34 = vld [vmem:[%s6098_s0 + $0x1d0] sm:$0xf0] }
  0xd9   :  { %v3812_v36 = vadd.f32 %v1572_v31, %v1404_v32  ;;  %v2814_v31 = vld [vmem:[%s6098_s0 + $0x1c0] sm:$0xf]  ;;  %v3286_v32 = vld [vmem:[%s6098_s0 + $0x1cc] sm:$0xf0]  ;;  %v2819_v44 = vor.u32 %v3284_v33, %v2816_v34  ;;  %v2848_v33 = vld [vmem:[%s6098_s0 + $0x210] sm:$0xf0] }
  0xda   :  { %v2815_v43 = vor.u32 %v3286_v32, %v2814_v31  ;;  %v3294_v31 = vld [vmem:[%s6098_s0 + $0x20c] sm:$0xf0]  ;;  %v3292_v32 = vld [vmem:[%s6098_s0 + $0x204] sm:$0xf]  ;;  %v2854_v34 = vld [vmem:[%s6098_s0 + $0x208] sm:$0xf] }
  0xde   :  { %v1405_v46 = vpop.f32.mrf.mxu2  ;;  %v1070_v52 = vpop.f32.mrf.mxu0 }
  0xdf   :  { %v1574_v48 = vpop.f32.mrf.mxu3  ;;  %v1406_v51 = vadd.f32 %v1405_v46, %v1237_v35  ;;  %v1239_v53 = vpop.f32.mrf.mxu1  ;;  %v2822_v35 = vld [vmem:[%s6098_s0 + $0x1c8] sm:$0xf] }
  0xe0   :  { %v1240_v56 = vadd.f32 %v1239_v53, %v1070_v52 }
  0xe1   :  { %v3838_v57 = vadd.f32 %v1574_v48, %v1406_v51  ;;  %1109 = vmatmul.bf16.gmra.mxu0 %v2783_v49  ;;  %v2823_v49 = vor.u32 %v3287_v37, %v2822_v35  ;;  %v3295_v35 = vld [vmem:[%s6098_s0 + $0x214] sm:$0xf0]  ;;  %v3293_v37 = vld [vmem:[%s6098_s0 + $0x20c] sm:$0xf] }
  0xe2   :  { %1278 = vmatmul.bf16.gmra.mxu1 %v2787_v50  ;;  %v2827_v50 = vor.u32 %v3285_v38, %v2824_v39  ;;  %v2856_v38 = vld [vmem:[%s6098_s0 + $0x218] sm:$0xf0] }
  0xe3   :  { %1447 = vmatmul.bf16.gmra.mxu2 %v2791_v54 }
  0xe4   :  { %1616 = vmatmul.bf16.gmra.mxu3 %v2795_v55 }
  0xe6   :  { %v1408_v58 = vpop.f32.mrf.mxu2  ;;  %v1072_v61 = vpop.f32.mrf.mxu0 }
  0xe7   :  { %v1577_v59 = vpop.f32.mrf.mxu3  ;;  %v1409_v60 = vadd.f32 %v1408_v58, %v1240_v56  ;;  %v1241_v62 = vpop.f32.mrf.mxu1 }
  0xe8   :  { %v1242_v63 = vadd.f32 %v1241_v62, %v1072_v61  ;;  %v2830_v61 = vld [vmem:[%s6098_s0 + $0x1e0] sm:$0xf]  ;;  %v3290_v62 = vld [vmem:[%s6098_s0 + $0x1ec] sm:$0xf0] }
  0xe9   :  { %v3840_v0 = vadd.f32 %v1577_v59, %v1409_v60  ;;  %v2831_v10 = vor.u32 %v3290_v62, %v2830_v61  ;;  %v2862_v62 = vld [vmem:[%s6098_s0 + $0x220] sm:$0xf] }
  0xee   :  { %v1410_v11 = vpop.f32.mrf.mxu2  ;;  %v1075_v16 = vpop.f32.mrf.mxu0 }
  0xef   :  { %v1579_v12 = vpop.f32.mrf.mxu3  ;;  %v1411_v15 = vadd.f32 %v1410_v11, %v1242_v63  ;;  %v1244_v17 = vpop.f32.mrf.mxu1  ;;  %v3288_v63 = vld [vmem:[%s6098_s0 + $0x1e4] sm:$0xf] }
  0xf0   :  { %v1245_v20 = vadd.f32 %v1244_v17, %v1075_v16  ;;  %v2835_v11 = vor.u32 %v3288_v63, %v2832_v1  ;;  %v2843_v16 = vor.u32 %v3289_v5, %v2840_v6  ;;  %v3298_v63 = vld [vmem:[%s6098_s0 + $0x22c] sm:$0xf0]  ;;  %v3296_v1 = vld [vmem:[%s6098_s0 + $0x224] sm:$0xf]  ;;  %v3299_v5 = vld [vmem:[%s6098_s0 + $0x234] sm:$0xf0] }
  0xf1   :  { %v3866_v22 = vadd.f32 %v1579_v12, %v1411_v15  ;;  %1114 = vmatmul.bf16.gmra.mxu0 %v2799_v13  ;;  %v2839_v15 = vor.u32 %v3291_v4, %v2838_v3  ;;  %v2864_v3 = vld [vmem:[%s6098_s0 + $0x230] sm:$0xf0]  ;;  %v2870_v4 = vld [vmem:[%s6098_s0 + $0x228] sm:$0xf]  ;;  %v3297_v6 = vld [vmem:[%s6098_s0 + $0x22c] sm:$0xf] }
  0xf2   :  { %1283 = vmatmul.bf16.gmra.mxu1 %v2803_v14 }
  0xf3   :  { %1452 = vmatmul.bf16.gmra.mxu2 %v2807_v18 }
  0xf4   :  { %1621 = vmatmul.bf16.gmra.mxu3 %v2811_v19 }
  0xf6   :  { %v1413_v23 = vpop.f32.mrf.mxu2  ;;  %v1077_v26 = vpop.f32.mrf.mxu0 }
  0xf7   :  { %v1582_v24 = vpop.f32.mrf.mxu3  ;;  %v1414_v25 = vadd.f32 %v1413_v23, %v1245_v20  ;;  %v1246_v27 = vpop.f32.mrf.mxu1 }
  0xf8   :  { %v1247_v28 = vadd.f32 %v1246_v27, %v1077_v26 }
  0xf9   :  { %v3868_v30 = vadd.f32 %v1582_v24, %v1414_v25 }
  0xfe   :  { %v1415_v41 = vpop.f32.mrf.mxu2  ;;  %v1080_v46 = vpop.f32.mrf.mxu0 }
  0xff   :  { %v1584_v42 = vpop.f32.mrf.mxu3  ;;  %v1416_v45 = vadd.f32 %v1415_v41, %v1247_v28  ;;  %v1249_v48 = vpop.f32.mrf.mxu1  ;;  %v2846_v28 = vld [vmem:[%s6098_s0 + $0x200] sm:$0xf] }
 0x100   :  { %v1250_v51 = vadd.f32 %v1249_v48, %v1080_v46  ;;  %v2855_v48 = vor.u32 %v3295_v35, %v2854_v34  ;;  %v3302_v34 = vld [vmem:[%s6098_s0 + $0x24c] sm:$0xf0]  ;;  %v3300_v35 = vld [vmem:[%s6098_s0 + $0x244] sm:$0xf] }
 0x101   :  { %v3894_v52 = vadd.f32 %v1584_v42, %v1416_v45  ;;  %1119 = vmatmul.bf16.gmra.mxu0 %v2815_v43  ;;  %v2847_v42 = vor.u32 %v3294_v31, %v2846_v28  ;;  %v2851_v43 = vor.u32 %v3292_v32, %v2848_v33  ;;  %v2878_v33 = vld [vmem:[%s6098_s0 + $0x240] sm:$0xf] }
 0x102   :  { %1288 = vmatmul.bf16.gmra.mxu1 %v2819_v44 }
 0x103   :  { %1457 = vmatmul.bf16.gmra.mxu2 %v2823_v49  ;;  %v2859_v49 = vor.u32 %v3293_v37, %v2856_v38  ;;  %v2880_v37 = vld [vmem:[%s6098_s0 + $0x250] sm:$0xf0]  ;;  %v2886_v38 = vld [vmem:[%s6098_s0 + $0x248] sm:$0xf] }
 0x104   :  { %1626 = vmatmul.bf16.gmra.mxu3 %v2827_v50 }
 0x106   :  { %v1418_v53 = vpop.f32.mrf.mxu2  ;;  %v1082_v56 = vpop.f32.mrf.mxu0 }
 0x107   :  { %v1587_v54 = vpop.f32.mrf.mxu3  ;;  %v1419_v55 = vadd.f32 %v1418_v53, %v1250_v51  ;;  %v1251_v58 = vpop.f32.mrf.mxu1 }
 0x108   :  { %v1252_v59 = vadd.f32 %v1251_v58, %v1082_v56 }
 0x109   :  { %v3896_v60 = vadd.f32 %v1587_v54, %v1419_v55 }
 0x10e   :  { %v1420_v7 = vpop.f32.mrf.mxu2  ;;  %v1085_v13 = vpop.f32.mrf.mxu0 }
 0x10f   :  { %v1589_v8 = vpop.f32.mrf.mxu3  ;;  %v1421_v12 = vadd.f32 %v1420_v7, %v1252_v59  ;;  %v1254_v14 = vpop.f32.mrf.mxu1  ;;  %v2872_v7 = vld [vmem:[%s6098_s0 + $0x238] sm:$0xf0] }
 0x110   :  { %v1255_v17 = vadd.f32 %v1254_v14, %v1085_v13 }
 0x111   :  { %v3922_v18 = vadd.f32 %v1589_v8, %v1421_v12  ;;  %1124 = vmatmul.bf16.gmra.mxu0 %v2831_v10  ;;  %v2867_v12 = vor.u32 %v3296_v1, %v2864_v3 }
 0x112   :  { %1293 = vmatmul.bf16.gmra.mxu1 %v2835_v11  ;;  %v2863_v11 = vor.u32 %v3298_v63, %v2862_v62 }
 0x113   :  { %6172 = vst [vmem:[#allocation2_spill] sm:$0xff] %v3922_v18  ;;  %1462 = vmatmul.bf16.gmra.mxu2 %v2839_v15 }
 0x114   :  { %1631 = vmatmul.bf16.gmra.mxu3 %v2843_v16  ;;  %v2871_v16 = vor.u32 %v3299_v5, %v2870_v4  ;;  %v2894_v5 = vld [vmem:[%s6098_s0 + $0x260] sm:$0xf] }
 0x116   :  { %v1423_v19 = vpop.f32.mrf.mxu2  ;;  %v1087_v24 = vpop.f32.mrf.mxu0 }
 0x117   :  { %v1592_v20 = vpop.f32.mrf.mxu3  ;;  %v1424_v23 = vadd.f32 %v1423_v19, %v1255_v17  ;;  %v1256_v25 = vpop.f32.mrf.mxu1  ;;  %v2875_v17 = vor.u32 %v3297_v6, %v2872_v7  ;;  %v3306_v6 = vld [vmem:[%s6098_s0 + $0x26c] sm:$0xf0]  ;;  %v3304_v7 = vld [vmem:[%s6098_s0 + $0x264] sm:$0xf] }
 0x118   :  { %v1257_v26 = vadd.f32 %v1256_v25, %v1087_v24 }
 0x119   :  { %v3924_v27 = vadd.f32 %v1592_v20, %v1424_v23 }
 0x11b   :  { %6173 = vst [vmem:[#allocation3_spill] sm:$0xff] %v3924_v27 }
 0x11e   :  { %v1425_v39 = vpop.f32.mrf.mxu2  ;;  %v1090_v45 = vpop.f32.mrf.mxu0 }
 0x11f   :  { %v1594_v41 = vpop.f32.mrf.mxu3  ;;  %v1426_v44 = vadd.f32 %v1425_v39, %v1257_v26  ;;  %v1259_v46 = vpop.f32.mrf.mxu1  ;;  %v3303_v39 = vld [vmem:[%s6098_s0 + $0x254] sm:$0xf0] }
 0x120   :  { %v1260_v50 = vadd.f32 %v1259_v46, %v1090_v45  ;;  %v2879_v45 = vor.u32 %v3302_v34, %v2878_v33  ;;  %v2883_v46 = vor.u32 %v3300_v35, %v2880_v37 }
 0x121   :  { %v3950_v51 = vadd.f32 %v1594_v41, %v1426_v44  ;;  %1129 = vmatmul.bf16.gmra.mxu0 %v2847_v42  ;;  %v3301_v41 = vld [vmem:[%s6098_s0 + $0x24c] sm:$0xf]  ;;  %v2888_v42 = vld [vmem:[%s6098_s0 + $0x258] sm:$0xf0] }
 0x122   :  { %1298 = vmatmul.bf16.gmra.mxu1 %v2851_v43 }
 0x123   :  { %6174 = vst [vmem:[#allocation4_spill] sm:$0xff] %v3950_v51  ;;  %1467 = vmatmul.bf16.gmra.mxu2 %v2855_v48 }
 0x124   :  { %1636 = vmatmul.bf16.gmra.mxu3 %v2859_v49 }
 0x126   :  { %v1428_v53 = vpop.f32.mrf.mxu2  ;;  %v1092_v56 = vpop.f32.mrf.mxu0 }
 0x127   :  { %v1597_v54 = vpop.f32.mrf.mxu3  ;;  %v1429_v55 = vadd.f32 %v1428_v53, %v1260_v50  ;;  %v1261_v58 = vpop.f32.mrf.mxu1  ;;  %v2887_v53 = vor.u32 %v3303_v39, %v2886_v38 }
 0x128   :  { %v1262_v59 = vadd.f32 %v1261_v58, %v1092_v56 }
 0x129   :  { %v3952_v61 = vadd.f32 %v1597_v54, %v1429_v55  ;;  %v2891_v54 = vor.u32 %v3301_v41, %v2888_v42  ;;  %v2910_v42 = vld [vmem:[%s6098_s0 + $0x280] sm:$0xf] }
 0x12b   :  { %6175 = vst [vmem:[#allocation5_spill] sm:$0xff] %v3952_v61 }
 0x12e   :  { %v1430_v8 = vpop.f32.mrf.mxu2  ;;  %v1095_v14 = vpop.f32.mrf.mxu0 }
 0x12f   :  { %v1599_v10 = vpop.f32.mrf.mxu3  ;;  %v1431_v13 = vadd.f32 %v1430_v8, %v1262_v59  ;;  %v1264_v15 = vpop.f32.mrf.mxu1  ;;  %v2896_v8 = vld [vmem:[%s6098_s0 + $0x270] sm:$0xf0] }
 0x130   :  { %v1265_v19 = vadd.f32 %v1264_v15, %v1095_v14 }
 0x131   :  { %v3978_v20 = vadd.f32 %v1599_v10, %v1431_v13  ;;  %1134 = vmatmul.bf16.gmra.mxu0 %v2863_v11  ;;  %v2902_v10 = vld [vmem:[%s6098_s0 + $0x268] sm:$0xf]  ;;  %v3307_v11 = vld [vmem:[%s6098_s0 + $0x274] sm:$0xf0]  ;;  %v2904_v13 = vld [vmem:[%s6098_s0 + $0x278] sm:$0xf0] }
 0x132   :  { %1303 = vmatmul.bf16.gmra.mxu1 %v2867_v12  ;;  %v3305_v12 = vld [vmem:[%s6098_s0 + $0x26c] sm:$0xf] }
 0x133   :  { %6176 = vst [vmem:[#allocation6_spill] sm:$0xff] %v3978_v20  ;;  %1472 = vmatmul.bf16.gmra.mxu2 %v2871_v16  ;;  %v2895_v16 = vor.u32 %v3306_v6, %v2894_v5 }
 0x134   :  { %1641 = vmatmul.bf16.gmra.mxu3 %v2875_v17  ;;  %v2899_v17 = vor.u32 %v3304_v7, %v2896_v8 }
 0x136   :  { %v1433_v23 = vpop.f32.mrf.mxu2  ;;  %v1097_v26 = vpop.f32.mrf.mxu0 }
 0x137   :  { %v1602_v24 = vpop.f32.mrf.mxu3  ;;  %v1434_v25 = vadd.f32 %v1433_v23, %v1265_v19  ;;  %v1266_v28 = vpop.f32.mrf.mxu1 }
 0x138   :  { %v1267_v31 = vadd.f32 %v1266_v28, %v1097_v26  ;;  %v2907_v26 = vor.u32 %v3305_v12, %v2904_v13 }
 0x139   :  { %v3980_v32 = vadd.f32 %v1602_v24, %v1434_v25  ;;  %v2903_v25 = vor.u32 %v3307_v11, %v2902_v10 }
 0x13b   :  { %6177 = vst [vmem:[#allocation7_spill] sm:$0xff] %v3980_v32 }
 0x13e   :  { %v1435_v43 = vpop.f32.mrf.mxu2  ;;  %v1100_v49 = vpop.f32.mrf.mxu0 }
 0x13f   :  { %v1604_v44 = vpop.f32.mrf.mxu3  ;;  %v1436_v48 = vadd.f32 %v1435_v43, %v1267_v31  ;;  %v1269_v50 = vpop.f32.mrf.mxu1  ;;  %v3310_v43 = vld [vmem:[%s6098_s0 + $0x28c] sm:$0xf0] }
 0x140   :  { %v1270_v55 = vadd.f32 %v1269_v50, %v1100_v49  ;;  %v3309_v49 = vld [vmem:[%s6098_s0 + $0x28c] sm:$0xf]  ;;  %v2920_v50 = vld [vmem:[%s6098_s0 + $0x298] sm:$0xf0] }
 0x141   :  { %v4006_v56 = vadd.f32 %v1604_v44, %v1436_v48  ;;  %1139 = vmatmul.bf16.gmra.mxu0 %v2879_v45  ;;  %v3308_v44 = vld [vmem:[%s6098_s0 + $0x284] sm:$0xf]  ;;  %v2912_v45 = vld [vmem:[%s6098_s0 + $0x290] sm:$0xf0]  ;;  %v3311_v48 = vld [vmem:[%s6098_s0 + $0x294] sm:$0xf0] }
 0x142   :  { %1308 = vmatmul.bf16.gmra.mxu1 %v2883_v46  ;;  %v2918_v46 = vld [vmem:[%s6098_s0 + $0x288] sm:$0xf] }
 0x143   :  { %6178 = vst [vmem:[#allocation8_spill] sm:$0xff] %v4006_v56  ;;  %1477 = vmatmul.bf16.gmra.mxu2 %v2887_v53 }
 0x144   :  { %1646 = vmatmul.bf16.gmra.mxu3 %v2891_v54 }
 0x146   :  { %v1438_v58 = vpop.f32.mrf.mxu2  ;;  %v1102_v63 = vpop.f32.mrf.mxu0 }
 0x147   :  { %v1607_v59 = vpop.f32.mrf.mxu3  ;;  %v1439_v62 = vadd.f32 %v1438_v58, %v1270_v55  ;;  %v1271_v1 = vpop.f32.mrf.mxu1  ;;  %v2911_v55 = vor.u32 %v3310_v43, %v2910_v42  ;;  %v2915_v58 = vor.u32 %v3308_v44, %v2912_v45 }
 0x148   :  { %v1272_v3 = vadd.f32 %v1271_v1, %v1102_v63  ;;  %v2919_v1 = vor.u32 %v3311_v48, %v2918_v46 }
 0x149   :  { %v4008_v4 = vadd.f32 %v1607_v59, %v1439_v62 }
 0x14b   :  { %6179 = vst [vmem:[#allocation9_spill] sm:$0xff] %v4008_v4 }
 0x14e   :  { %v1440_v14 = vpop.f32.mrf.mxu2  ;;  %v1105_v23 = vpop.f32.mrf.mxu0 }
 0x14f   :  { %v1609_v15 = vpop.f32.mrf.mxu3  ;;  %v1441_v19 = vadd.f32 %v1440_v14, %v1272_v3  ;;  %v1274_v24 = vpop.f32.mrf.mxu1  ;;  %v2923_v3 = vor.u32 %v3309_v49, %v2920_v50 }
 0x150   :  { %v1275_v28 = vadd.f32 %v1274_v24, %v1105_v23  ;;  %v2934_v23 = vld [vmem:[%s6098_s0 + $0x2a8] sm:$0xf]  ;;  %v3315_v24 = vld [vmem:[%s6098_s0 + $0x2b4] sm:$0xf0] }
 0x151   :  { %v4034_v31 = vadd.f32 %v1609_v15, %v1441_v19  ;;  %1144 = vmatmul.bf16.gmra.mxu0 %v2895_v16  ;;  %v2926_v15 = vld [vmem:[%s6098_s0 + $0x2a0] sm:$0xf]  ;;  %v3314_v16 = vld [vmem:[%s6098_s0 + $0x2ac] sm:$0xf0]  ;;  %v2928_v19 = vld [vmem:[%s6098_s0 + $0x2b0] sm:$0xf0]  ;;  %v2935_v42 = vor.u32 %v3315_v24, %v2934_v23 }
 0x152   :  { %1313 = vmatmul.bf16.gmra.mxu1 %v2899_v17  ;;  %v3312_v17 = vld [vmem:[%s6098_s0 + $0x2a4] sm:$0xf] }
 0x153   :  { %6180 = vst [vmem:[#allocation10_spill] sm:$0xff] %v4034_v31  ;;  %1482 = vmatmul.bf16.gmra.mxu2 %v2903_v25  ;;  %v3313_v25 = vld [vmem:[%s6098_s0 + $0x2ac] sm:$0xf] }
 0x154   :  { %1651 = vmatmul.bf16.gmra.mxu3 %v2907_v26  ;;  %v2936_v26 = vld [vmem:[%s6098_s0 + $0x2b8] sm:$0xf0] }
 0x155   :  { %v2939_v43 = vor.u32 %v3313_v25, %v2936_v26 }
 0x156   :  { %v1443_v33 = vpop.f32.mrf.mxu2  ;;  %v1107_v37 = vpop.f32.mrf.mxu0 }
 0x157   :  { %v1612_v34 = vpop.f32.mrf.mxu3  ;;  %v1444_v35 = vadd.f32 %v1443_v33, %v1275_v28  ;;  %v1276_v38 = vpop.f32.mrf.mxu1 }
 0x158   :  { %v1277_v39 = vadd.f32 %v1276_v38, %v1107_v37 }
 0x159   :  { %v4036_v41 = vadd.f32 %v1612_v34, %v1444_v35  ;;  %v2927_v34 = vor.u32 %v3314_v16, %v2926_v15  ;;  %v2931_v35 = vor.u32 %v3312_v17, %v2928_v19 }
 0x15b   :  { %6181 = vst [vmem:[#allocation11_spill] sm:$0xff] %v4036_v41 }
 0x15e   :  { %v1445_v53 = vpop.f32.mrf.mxu2  ;;  %v1110_v62 = vpop.f32.mrf.mxu0 }
 0x15f   :  { %v1614_v54 = vpop.f32.mrf.mxu3  ;;  %v1446_v59 = vadd.f32 %v1445_v53, %v1277_v39  ;;  %v1279_v63 = vpop.f32.mrf.mxu1 }
 0x160   :  { %v1280_v5 = vadd.f32 %v1279_v63, %v1110_v62  ;;  %v3316_v62 = vld [vmem:[%s6098_s0 + $0x2c4] sm:$0xf]  ;;  %v2944_v63 = vld [vmem:[%s6098_s0 + $0x2d0] sm:$0xf0] }
 0x161   :  { %v4062_v6 = vadd.f32 %v1614_v54, %v1446_v59  ;;  %1149 = vmatmul.bf16.gmra.mxu0 %v2911_v55  ;;  %v3318_v59 = vld [vmem:[%s6098_s0 + $0x2cc] sm:$0xf0] }
 0x162   :  { %1318 = vmatmul.bf16.gmra.mxu1 %v2915_v58  ;;  %v2942_v58 = vld [vmem:[%s6098_s0 + $0x2c0] sm:$0xf] }
 0x163   :  { %6182 = vst [vmem:[#allocation12_spill] sm:$0xff] %v4062_v6  ;;  %1487 = vmatmul.bf16.gmra.mxu2 %v2919_v1  ;;  %v2950_v1 = vld [vmem:[%s6098_s0 + $0x2c8] sm:$0xf] }
 0x164   :  { %1656 = vmatmul.bf16.gmra.mxu3 %v2923_v3  ;;  %v3319_v3 = vld [vmem:[%s6098_s0 + $0x2d4] sm:$0xf0] }
 0x165   :  { %v2951_v17 = vor.u32 %v3319_v3, %v2950_v1 }
 0x166   :  { %v1448_v7 = vpop.f32.mrf.mxu2  ;;  %v1112_v11 = vpop.f32.mrf.mxu0 }
 0x167   :  { %v1617_v8 = vpop.f32.mrf.mxu3  ;;  %v1449_v10 = vadd.f32 %v1448_v7, %v1280_v5  ;;  %v1281_v12 = vpop.f32.mrf.mxu1  ;;  %v3317_v5 = vld [vmem:[%s6098_s0 + $0x2cc] sm:$0xf]  ;;  %v2952_v7 = vld [vmem:[%s6098_s0 + $0x2d8] sm:$0xf0] }
 0x168   :  { %v1282_v13 = vadd.f32 %v1281_v12, %v1112_v11  ;;  %v2943_v11 = vor.u32 %v3318_v59, %v2942_v58  ;;  %v2947_v12 = vor.u32 %v3316_v62, %v2944_v63  ;;  %v2955_v19 = vor.u32 %v3317_v5, %v2952_v7 }
 0x169   :  { %v4064_v14 = vadd.f32 %v1617_v8, %v1449_v10 }
 0x16b   :  { %6183 = vst [vmem:[#allocation13_spill] sm:$0xff] %v4064_v14 }
 0x16e   :  { %v1450_v28 = vpop.f32.mrf.mxu2  ;;  %v1115_v38 = vpop.f32.mrf.mxu0 }
 0x16f   :  { %v1619_v33 = vpop.f32.mrf.mxu3  ;;  %v1451_v37 = vadd.f32 %v1450_v28, %v1282_v13  ;;  %v1284_v39 = vpop.f32.mrf.mxu1 }
 0x170   :  { %v1285_v44 = vadd.f32 %v1284_v39, %v1115_v38  ;;  %v2958_v38 = vld [vmem:[%s6098_s0 + $0x2e0] sm:$0xf]  ;;  %v3322_v39 = vld [vmem:[%s6098_s0 + $0x2ec] sm:$0xf0] }
 0x171   :  { %v4090_v45 = vadd.f32 %v1619_v33, %v1451_v37  ;;  %1154 = vmatmul.bf16.gmra.mxu0 %v2927_v34 }
 0x172   :  { %1323 = vmatmul.bf16.gmra.mxu1 %v2931_v35 }
 0x173   :  { %6184 = vst [vmem:[#allocation14_spill] sm:$0xff] %v4090_v45  ;;  %1492 = vmatmul.bf16.gmra.mxu2 %v2935_v42  ;;  %v3320_v42 = vld [vmem:[%s6098_s0 + $0x2e4] sm:$0xf] }
 0x174   :  { %1661 = vmatmul.bf16.gmra.mxu3 %v2939_v43  ;;  %v2960_v43 = vld [vmem:[%s6098_s0 + $0x2f0] sm:$0xf0] }
 0x175   :  { %v2963_v58 = vor.u32 %v3320_v42, %v2960_v43 }
 0x176   :  { %v1453_v46 = vpop.f32.mrf.mxu2  ;;  %v1117_v50 = vpop.f32.mrf.mxu0 }
 0x177   :  { %v1622_v48 = vpop.f32.mrf.mxu3  ;;  %v1454_v49 = vadd.f32 %v1453_v46, %v1285_v44  ;;  %v1286_v53 = vpop.f32.mrf.mxu1  ;;  %v2966_v44 = vld [vmem:[%s6098_s0 + $0x2e8] sm:$0xf]  ;;  %v3323_v46 = vld [vmem:[%s6098_s0 + $0x2f4] sm:$0xf0] }
 0x178   :  { %v1287_v54 = vadd.f32 %v1286_v53, %v1117_v50  ;;  %v2967_v1 = vor.u32 %v3323_v46, %v2966_v44 }
 0x179   :  { %v4092_v55 = vadd.f32 %v1622_v48, %v1454_v49  ;;  %v3321_v48 = vld [vmem:[%s6098_s0 + $0x2ec] sm:$0xf]  ;;  %v2968_v49 = vld [vmem:[%s6098_s0 + $0x2f8] sm:$0xf0] }
 0x17a   :  { %v2971_v3 = vor.u32 %v3321_v48, %v2968_v49 }
 0x17b   :  { %6185 = vst [vmem:[#allocation15_spill] sm:$0xff] %v4092_v55 }
 0x17e   :  { %v1455_v8 = vpop.f32.mrf.mxu2  ;;  %v1120_v15 = vpop.f32.mrf.mxu0 }
 0x17f   :  { %v1624_v10 = vpop.f32.mrf.mxu3  ;;  %v1456_v13 = vadd.f32 %v1455_v8, %v1287_v54  ;;  %v1289_v16 = vpop.f32.mrf.mxu1  ;;  %v2959_v54 = vor.u32 %v3322_v39, %v2958_v38 }
 0x180   :  { %v1290_v23 = vadd.f32 %v1289_v16, %v1120_v15 }
 0x181   :  { %v4118_v24 = vadd.f32 %v1624_v10, %v1456_v13  ;;  %1159 = vmatmul.bf16.gmra.mxu0 %v2943_v11 }
 0x182   :  { %1328 = vmatmul.bf16.gmra.mxu1 %v2947_v12 }
 0x183   :  { %6186 = vst [vmem:[#allocation16_spill] sm:$0xff] %v4118_v24  ;;  %1497 = vmatmul.bf16.gmra.mxu2 %v2951_v17  ;;  %v2974_v17 = vld [vmem:[%s6098_s0 + $0x300] sm:$0xf] }
 0x184   :  { %1666 = vmatmul.bf16.gmra.mxu3 %v2955_v19  ;;  %v3326_v19 = vld [vmem:[%s6098_s0 + $0x30c] sm:$0xf0] }
 0x185   :  { %v2975_v39 = vor.u32 %v3326_v19, %v2974_v17  ;;  %v3000_v17 = vld [vmem:[%s6098_s0 + $0x338] sm:$0xf0] }
 0x186   :  { %v1458_v25 = vpop.f32.mrf.mxu2  ;;  %v1122_v33 = vpop.f32.mrf.mxu0 }
 0x187   :  { %v1627_v26 = vpop.f32.mrf.mxu3  ;;  %v1459_v28 = vadd.f32 %v1458_v25, %v1290_v23  ;;  %v1291_v34 = vpop.f32.mrf.mxu1  ;;  %v3324_v23 = vld [vmem:[%s6098_s0 + $0x304] sm:$0xf]  ;;  %v2976_v25 = vld [vmem:[%s6098_s0 + $0x310] sm:$0xf0] }
 0x188   :  { %v1292_v35 = vadd.f32 %v1291_v34, %v1122_v33  ;;  %v3325_v33 = vld [vmem:[%s6098_s0 + $0x30c] sm:$0xf]  ;;  %v2984_v34 = vld [vmem:[%s6098_s0 + $0x318] sm:$0xf0]  ;;  %v2979_v42 = vor.u32 %v3324_v23, %v2976_v25 }
 0x189   :  { %v4120_v37 = vadd.f32 %v1627_v26, %v1459_v28  ;;  %v2982_v26 = vld [vmem:[%s6098_s0 + $0x308] sm:$0xf]  ;;  %v3327_v28 = vld [vmem:[%s6098_s0 + $0x314] sm:$0xf0]  ;;  %v2987_v49 = vor.u32 %v3325_v33, %v2984_v34 }
 0x18a   :  { %v2983_v48 = vor.u32 %v3327_v28, %v2982_v26 }
 0x18b   :  { %6187 = vst [vmem:[#allocation17_spill] sm:$0xff] %v4120_v37 }
 0x18e   :  { %v1460_v50 = vpop.f32.mrf.mxu2  ;;  %v1125_v62 = vpop.f32.mrf.mxu0 }
 0x18f   :  { %v1629_v53 = vpop.f32.mrf.mxu3  ;;  %v1461_v59 = vadd.f32 %v1460_v50, %v1292_v35  ;;  %v1294_v63 = vpop.f32.mrf.mxu1 }
 0x190   :  { %v1295_v5 = vadd.f32 %v1294_v63, %v1125_v62 }
 0x191   :  { %v4146_v7 = vadd.f32 %v1629_v53, %v1461_v59  ;;  %1164 = vmatmul.bf16.gmra.mxu0 %v2959_v54 }
 0x192   :  { %1333 = vmatmul.bf16.gmra.mxu1 %v2963_v58 }
 0x193   :  { %6188 = vst [vmem:[#allocation18_spill] sm:$0xff] %v4146_v7  ;;  %1502 = vmatmul.bf16.gmra.mxu2 %v2967_v1 }
 0x194   :  { %1671 = vmatmul.bf16.gmra.mxu3 %v2971_v3 }
 0x196   :  { %v1463_v8 = vpop.f32.mrf.mxu2  ;;  %v1127_v12 = vpop.f32.mrf.mxu0 }
 0x197   :  { %v1632_v10 = vpop.f32.mrf.mxu3  ;;  %v1464_v11 = vadd.f32 %v1463_v8, %v1295_v5  ;;  %v1296_v13 = vpop.f32.mrf.mxu1  ;;  %v2990_v5 = vld [vmem:[%s6098_s0 + $0x320] sm:$0xf]  ;;  %v3330_v8 = vld [vmem:[%s6098_s0 + $0x32c] sm:$0xf0] }
 0x198   :  { %v1297_v15 = vadd.f32 %v1296_v13, %v1127_v12  ;;  %v2998_v12 = vld [vmem:[%s6098_s0 + $0x328] sm:$0xf]  ;;  %v3331_v13 = vld [vmem:[%s6098_s0 + $0x334] sm:$0xf0]  ;;  %v2991_v25 = vor.u32 %v3330_v8, %v2990_v5  ;;  %v3333_v8 = vld [vmem:[%s6098_s0 + $0x34c] sm:$0xf] }
 0x199   :  { %v4148_v16 = vadd.f32 %v1632_v10, %v1464_v11  ;;  %v3328_v10 = vld [vmem:[%s6098_s0 + $0x324] sm:$0xf]  ;;  %v2992_v11 = vld [vmem:[%s6098_s0 + $0x330] sm:$0xf0]  ;;  %v3335_v5 = vld [vmem:[%s6098_s0 + $0x354] sm:$0xf0] }
 0x19a   :  { %v2995_v26 = vor.u32 %v3328_v10, %v2992_v11  ;;  %v3016_v10 = vld [vmem:[%s6098_s0 + $0x358] sm:$0xf0] }
 0x19b   :  { %6189 = vst [vmem:[#allocation19_spill] sm:$0xff] %v4148_v16 }
 0x19e   :  { %v1465_v35 = vpop.f32.mrf.mxu2  ;;  %v1130_v44 = vpop.f32.mrf.mxu0 }
 0x19f   :  { %v1634_v38 = vpop.f32.mrf.mxu3  ;;  %v1466_v43 = vadd.f32 %v1465_v35, %v1297_v15  ;;  %v1299_v46 = vpop.f32.mrf.mxu1  ;;  %v3329_v15 = vld [vmem:[%s6098_s0 + $0x32c] sm:$0xf]  ;;  %v2999_v35 = vor.u32 %v3331_v13, %v2998_v12 }
 0x1a0   :  { %v1300_v50 = vadd.f32 %v1299_v46, %v1130_v44 }
 0x1a1   :  { %v4174_v53 = vadd.f32 %v1634_v38, %v1466_v43  ;;  %1169 = vmatmul.bf16.gmra.mxu0 %v2975_v39  ;;  %v3003_v38 = vor.u32 %v3329_v15, %v3000_v17 }
 0x1a2   :  { %1338 = vmatmul.bf16.gmra.mxu1 %v2979_v42 }
 0x1a3   :  { %6190 = vst [vmem:[#allocation20_spill] sm:$0xff] %v4174_v53  ;;  %1507 = vmatmul.bf16.gmra.mxu2 %v2983_v48 }
 0x1a4   :  { %1676 = vmatmul.bf16.gmra.mxu3 %v2987_v49 }
 0x1a6   :  { %v1468_v54 = vpop.f32.mrf.mxu2  ;;  %v1132_v62 = vpop.f32.mrf.mxu0 }
 0x1a7   :  { %v1637_v58 = vpop.f32.mrf.mxu3  ;;  %v1469_v59 = vadd.f32 %v1468_v54, %v1300_v50  ;;  %v1301_v63 = vpop.f32.mrf.mxu1 }
 0x1a8   :  { %v1302_v1 = vadd.f32 %v1301_v63, %v1132_v62  ;;  %v3332_v62 = vld [vmem:[%s6098_s0 + $0x344] sm:$0xf]  ;;  %v3008_v63 = vld [vmem:[%s6098_s0 + $0x350] sm:$0xf0] }
 0x1a9   :  { %v4176_v3 = vadd.f32 %v1637_v58, %v1469_v59  ;;  %v3006_v58 = vld [vmem:[%s6098_s0 + $0x340] sm:$0xf]  ;;  %v3334_v59 = vld [vmem:[%s6098_s0 + $0x34c] sm:$0xf0]  ;;  %v3011_v15 = vor.u32 %v3332_v62, %v3008_v63  ;;  %v3339_v62 = vld [vmem:[%s6098_s0 + $0x374] sm:$0xf0] }
 0x1aa   :  { %v3007_v13 = vor.u32 %v3334_v59, %v3006_v58  ;;  %v3024_v58 = vld [vmem:[%s6098_s0 + $0x370] sm:$0xf0]  ;;  %v3030_v59 = vld [vmem:[%s6098_s0 + $0x368] sm:$0xf]  ;;  %v3337_v63 = vld [vmem:[%s6098_s0 + $0x36c] sm:$0xf] }
 0x1ab   :  { %6191 = vst [vmem:[#allocation21_spill] sm:$0xff] %v4176_v3 }
 0x1ae   :  { %v1470_v19 = vpop.f32.mrf.mxu2  ;;  %v1135_v33 = vpop.f32.mrf.mxu0 }
 0x1af   :  { %v1639_v23 = vpop.f32.mrf.mxu3  ;;  %v1471_v28 = vadd.f32 %v1470_v19, %v1302_v1  ;;  %v1304_v34 = vpop.f32.mrf.mxu1  ;;  %v3014_v1 = vld [vmem:[%s6098_s0 + $0x348] sm:$0xf] }
 0x1b0   :  { %v1305_v39 = vadd.f32 %v1304_v34, %v1135_v33 }
 0x1b1   :  { %v4202_v42 = vadd.f32 %v1639_v23, %v1471_v28  ;;  %1174 = vmatmul.bf16.gmra.mxu0 %v2991_v25  ;;  %v3015_v25 = vor.u32 %v3335_v5, %v3014_v1  ;;  %v3032_v1 = vld [vmem:[%s6098_s0 + $0x378] sm:$0xf0] }
 0x1b2   :  { %1343 = vmatmul.bf16.gmra.mxu1 %v2995_v26  ;;  %v3019_v26 = vor.u32 %v3333_v8, %v3016_v10 }
 0x1b3   :  { %6192 = vst [vmem:[#allocation22_spill] sm:$0xff] %v4202_v42  ;;  %1512 = vmatmul.bf16.gmra.mxu2 %v2999_v35 }
 0x1b4   :  { %1681 = vmatmul.bf16.gmra.mxu3 %v3003_v38 }
 0x1b6   :  { %v1473_v43 = vpop.f32.mrf.mxu2  ;;  %v1137_v48 = vpop.f32.mrf.mxu0 }
 0x1b7   :  { %v1642_v44 = vpop.f32.mrf.mxu3  ;;  %v1474_v46 = vadd.f32 %v1473_v43, %v1305_v39  ;;  %v1306_v49 = vpop.f32.mrf.mxu1 }
 0x1b8   :  { %v1307_v50 = vadd.f32 %v1306_v49, %v1137_v48  ;;  %v3022_v48 = vld [vmem:[%s6098_s0 + $0x360] sm:$0xf]  ;;  %v3338_v49 = vld [vmem:[%s6098_s0 + $0x36c] sm:$0xf0] }
 0x1b9   :  { %v4204_v54 = vadd.f32 %v1642_v44, %v1474_v46  ;;  %v3023_v10 = vor.u32 %v3338_v49, %v3022_v48  ;;  %v3342_v48 = vld [vmem:[%s6098_s0 + $0x38c] sm:$0xf0]  ;;  %v3340_v49 = vld [vmem:[%s6098_s0 + $0x384] sm:$0xf] }
 0x1bb   :  { %6193 = vst [vmem:[#allocation23_spill] sm:$0xff] %v4204_v54 }
 0x1be   :  { %v1475_v11 = vpop.f32.mrf.mxu2  ;;  %v1140_v19 = vpop.f32.mrf.mxu0 }
 0x1bf   :  { %v1644_v12 = vpop.f32.mrf.mxu3  ;;  %v1476_v17 = vadd.f32 %v1475_v11, %v1307_v50  ;;  %v1309_v23 = vpop.f32.mrf.mxu1  ;;  %v3336_v50 = vld [vmem:[%s6098_s0 + $0x364] sm:$0xf] }
 0x1c0   :  { %v1310_v28 = vadd.f32 %v1309_v23, %v1140_v19  ;;  %v3027_v11 = vor.u32 %v3336_v50, %v3024_v58  ;;  %v3035_v19 = vor.u32 %v3337_v63, %v3032_v1  ;;  %v3040_v50 = vld [vmem:[%s6098_s0 + $0x390] sm:$0xf0]  ;;  %v3046_v58 = vld [vmem:[%s6098_s0 + $0x388] sm:$0xf]  ;;  %v3048_v63 = vld [vmem:[%s6098_s0 + $0x398] sm:$0xf0] }
 0x1c1   :  { %v4230_v33 = vadd.f32 %v1644_v12, %v1476_v17  ;;  %1179 = vmatmul.bf16.gmra.mxu0 %v3007_v13  ;;  %v3031_v17 = vor.u32 %v3339_v62, %v3030_v59  ;;  %v3343_v59 = vld [vmem:[%s6098_s0 + $0x394] sm:$0xf0]  ;;  %v3341_v62 = vld [vmem:[%s6098_s0 + $0x38c] sm:$0xf] }
 0x1c2   :  { %1348 = vmatmul.bf16.gmra.mxu1 %v3011_v15 }
 0x1c3   :  { %6194 = vst [vmem:[#allocation24_spill] sm:$0xff] %v4230_v33  ;;  %1517 = vmatmul.bf16.gmra.mxu2 %v3015_v25 }
 0x1c4   :  { %1686 = vmatmul.bf16.gmra.mxu3 %v3019_v26 }
 0x1c6   :  { %v1478_v34 = vpop.f32.mrf.mxu2  ;;  %v1142_v39 = vpop.f32.mrf.mxu0 }
 0x1c7   :  { %v1647_v35 = vpop.f32.mrf.mxu3  ;;  %v1479_v38 = vadd.f32 %v1478_v34, %v1310_v28  ;;  %v1311_v43 = vpop.f32.mrf.mxu1 }
 0x1c8   :  { %v1312_v44 = vadd.f32 %v1311_v43, %v1142_v39 }
 0x1c9   :  { %v4232_v46 = vadd.f32 %v1647_v35, %v1479_v38 }
 0x1cb   :  { %6195 = vst [vmem:[#allocation25_spill] sm:$0xff] %v4232_v46 }
 0x1ce   :  { %v1480_v5 = vpop.f32.mrf.mxu2  ;;  %v1145_v13 = vpop.f32.mrf.mxu0 }
 0x1cf   :  { %v1649_v8 = vpop.f32.mrf.mxu3  ;;  %v1481_v12 = vadd.f32 %v1480_v5, %v1312_v44  ;;  %v1314_v15 = vpop.f32.mrf.mxu1  ;;  %v3038_v44 = vld [vmem:[%s6098_s0 + $0x380] sm:$0xf] }
 0x1d0   :  { %v1315_v23 = vadd.f32 %v1314_v15, %v1145_v13  ;;  %v3047_v15 = vor.u32 %v3343_v59, %v3046_v58  ;;  %v3062_v58 = vld [vmem:[%s6098_s0 + $0x3a8] sm:$0xf]  ;;  %v3347_v59 = vld [vmem:[%s6098_s0 + $0x3b4] sm:$0xf0] }
 0x1d1   :  { %v4258_v25 = vadd.f32 %v1649_v8, %v1481_v12  ;;  %1184 = vmatmul.bf16.gmra.mxu0 %v3023_v10  ;;  %v3039_v8 = vor.u32 %v3342_v48, %v3038_v44  ;;  %v3043_v10 = vor.u32 %v3340_v49, %v3040_v50  ;;  %v3346_v48 = vld [vmem:[%s6098_s0 + $0x3ac] sm:$0xf0]  ;;  %v3344_v49 = vld [vmem:[%s6098_s0 + $0x3a4] sm:$0xf]  ;;  %v3056_v50 = vld [vmem:[%s6098_s0 + $0x3b0] sm:$0xf0] }
 0x1d2   :  { %1353 = vmatmul.bf16.gmra.mxu1 %v3027_v11 }
 0x1d3   :  { %6196 = vst [vmem:[#allocation26_spill] sm:$0xff] %v4258_v25  ;;  %1522 = vmatmul.bf16.gmra.mxu2 %v3031_v17  ;;  %v3051_v17 = vor.u32 %v3341_v62, %v3048_v63  ;;  %v3345_v62 = vld [vmem:[%s6098_s0 + $0x3ac] sm:$0xf]  ;;  %v3064_v63 = vld [vmem:[%s6098_s0 + $0x3b8] sm:$0xf0] }
 0x1d4   :  { %1691 = vmatmul.bf16.gmra.mxu3 %v3035_v19 }
 0x1d6   :  { %v1483_v26 = vpop.f32.mrf.mxu2  ;;  %v1147_v35 = vpop.f32.mrf.mxu0 }
 0x1d7   :  { %v1652_v28 = vpop.f32.mrf.mxu3  ;;  %v1484_v34 = vadd.f32 %v1483_v26, %v1315_v23  ;;  %v1316_v38 = vpop.f32.mrf.mxu1 }
 0x1d8   :  { %v1317_v39 = vadd.f32 %v1316_v38, %v1147_v35 }
 0x1d9   :  { %v4260_v43 = vadd.f32 %v1652_v28, %v1484_v34 }
 0x1db   :  { %6197 = vst [vmem:[#allocation27_spill] sm:$0xff] %v4260_v43 }
 0x1de   :  { %v1485_v1 = vpop.f32.mrf.mxu2  ;;  %v1150_v12 = vpop.f32.mrf.mxu0 }
 0x1df   :  { %v1654_v5 = vpop.f32.mrf.mxu3  ;;  %v1486_v11 = vadd.f32 %v1485_v1, %v1317_v39  ;;  %v1319_v13 = vpop.f32.mrf.mxu1  ;;  %v3054_v39 = vld [vmem:[%s6098_s0 + $0x3a0] sm:$0xf] }
 0x1e0   :  { %v1320_v19 = vadd.f32 %v1319_v13, %v1150_v12 }
 0x1e1   :  { %v4286_v23 = vadd.f32 %v1654_v5, %v1486_v11  ;;  %1189 = vmatmul.bf16.gmra.mxu0 %v3039_v8  ;;  %v3055_v8 = vor.u32 %v3346_v48, %v3054_v39  ;;  %v3350_v48 = vld [vmem:[%s6098_s0 + $0x3cc] sm:$0xf0] }
 0x1e2   :  { %1358 = vmatmul.bf16.gmra.mxu1 %v3043_v10  ;;  %v3059_v10 = vor.u32 %v3344_v49, %v3056_v50  ;;  %v3348_v49 = vld [vmem:[%s6098_s0 + $0x3c4] sm:$0xf]  ;;  %v3072_v50 = vld [vmem:[%s6098_s0 + $0x3d0] sm:$0xf0] }
 0x1e3   :  { %6198 = vst [vmem:[#allocation28_spill] sm:$0xff] %v4286_v23  ;;  %1527 = vmatmul.bf16.gmra.mxu2 %v3047_v15  ;;  %v3063_v15 = vor.u32 %v3347_v59, %v3062_v58  ;;  %v3351_v58 = vld [vmem:[%s6098_s0 + $0x3d4] sm:$0xf0]  ;;  %v3349_v59 = vld [vmem:[%s6098_s0 + $0x3cc] sm:$0xf] }
 0x1e4   :  { %1696 = vmatmul.bf16.gmra.mxu3 %v3051_v17  ;;  %v3067_v17 = vor.u32 %v3345_v62, %v3064_v63  ;;  %v3080_v62 = vld [vmem:[%s6098_s0 + $0x3d8] sm:$0xf0] }
 0x1e6   :  { %v1488_v26 = vpop.f32.mrf.mxu2  ;;  %v1152_v35 = vpop.f32.mrf.mxu0 }
 0x1e7   :  { %v1657_v28 = vpop.f32.mrf.mxu3  ;;  %v1489_v34 = vadd.f32 %v1488_v26, %v1320_v19  ;;  %v1321_v38 = vpop.f32.mrf.mxu1 }
 0x1e8   :  { %v1322_v43 = vadd.f32 %v1321_v38, %v1152_v35 }
 0x1e9   :  { %v4288_v44 = vadd.f32 %v1657_v28, %v1489_v34 }
 0x1eb   :  { %6199 = vst [vmem:[#allocation29_spill] sm:$0xff] %v4288_v44 }
 0x1ee   :  { %v1490_v1 = vpop.f32.mrf.mxu2  ;;  %v1155_v12 = vpop.f32.mrf.mxu0 }
 0x1ef   :  { %v1659_v5 = vpop.f32.mrf.mxu3  ;;  %v1491_v11 = vadd.f32 %v1490_v1, %v1322_v43  ;;  %v1324_v13 = vpop.f32.mrf.mxu1  ;;  %v3070_v43 = vld [vmem:[%s6098_s0 + $0x3c0] sm:$0xf] }
 0x1f0   :  { %v1325_v19 = vadd.f32 %v1324_v13, %v1155_v12 }
 0x1f1   :  { %v4314_v26 = vadd.f32 %v1659_v5, %v1491_v11  ;;  %1194 = vmatmul.bf16.gmra.mxu0 %v3055_v8  ;;  %v3071_v5 = vor.u32 %v3350_v48, %v3070_v43  ;;  %v3075_v8 = vor.u32 %v3348_v49, %v3072_v50  ;;  %v3354_v48 = vld [vmem:[%s6098_s0 + $0x3ec] sm:$0xf0]  ;;  %v3352_v49 = vld [vmem:[%s6098_s0 + $0x3e4] sm:$0xf]  ;;  %v3088_v50 = vld [vmem:[%s6098_s0 + $0x3f0] sm:$0xf0] }
 0x1f2   :  { %1363 = vmatmul.bf16.gmra.mxu1 %v3059_v10 }
 0x1f3   :  { %6200 = vst [vmem:[#allocation30_spill] sm:$0xff] %v4314_v26  ;;  %1532 = vmatmul.bf16.gmra.mxu2 %v3063_v15  ;;  %v3083_v15 = vor.u32 %v3349_v59, %v3080_v62  ;;  %v3096_v59 = vld [vmem:[%s6098_s0 + $0x3f8] sm:$0xf0] }
 0x1f4   :  { %1701 = vmatmul.bf16.gmra.mxu3 %v3067_v17 }
 0x1f6   :  { %v1493_v28 = vpop.f32.mrf.mxu2  ;;  %v1157_v38 = vpop.f32.mrf.mxu0 }
 0x1f7   :  { %v1662_v34 = vpop.f32.mrf.mxu3  ;;  %v1494_v35 = vadd.f32 %v1493_v28, %v1325_v19  ;;  %v1326_v44 = vpop.f32.mrf.mxu1 }
 0x1f8   :  { %v1327_v23 = vadd.f32 %v1326_v44, %v1157_v38  ;;  %v3078_v44 = vld [vmem:[%s6098_s0 + $0x3c8] sm:$0xf] }
 0x1f9   :  { %v4316_v39 = vadd.f32 %v1662_v34, %v1494_v35  ;;  %v3079_v13 = vor.u32 %v3351_v58, %v3078_v44  ;;  %v3355_v44 = vld [vmem:[%s6098_s0 + $0x3f4] sm:$0xf0]  ;;  %v3353_v58 = vld [vmem:[%s6098_s0 + $0x3ec] sm:$0xf] }
 0x1fb   :  { %6201 = vst [vmem:[#allocation31_spill] sm:$0xff] %v4316_v39 }
 0x1fe   :  { %v1495_v63 = vpop.f32.mrf.mxu2  ;;  %v1160_v11 = vpop.f32.mrf.mxu0 }
 0x1ff   :  { %v1664_v1 = vpop.f32.mrf.mxu3  ;;  %v1496_v10 = vadd.f32 %v1495_v63, %v1327_v23  ;;  %v1329_v12 = vpop.f32.mrf.mxu1  ;;  %v3086_v23 = vld [vmem:[%s6098_s0 + $0x3e0] sm:$0xf] }
 0x200   :  { %v1330_v17 = vadd.f32 %v1329_v12, %v1160_v11 }
 0x201   :  { %v4342_v19 = vadd.f32 %v1664_v1, %v1496_v10  ;;  %1199 = vmatmul.bf16.gmra.mxu0 %v3071_v5  ;;  %v3087_v1 = vor.u32 %v3354_v48, %v3086_v23  ;;  %v3091_v5 = vor.u32 %v3352_v49, %v3088_v50 }
 0x202   :  { %1368 = vmatmul.bf16.gmra.mxu1 %v3075_v8 }
 0x203   :  { %6202 = vst [vmem:[#allocation32_spill] sm:$0xff] %v4342_v19  ;;  %1537 = vmatmul.bf16.gmra.mxu2 %v3079_v13  ;;  %v3099_v13 = vor.u32 %v3353_v58, %v3096_v59  ;;  %v1719_v59 = vsel %vm1717_vm0, %v3754_v40, 0.0 }
 0x204   :  { %1706 = vmatmul.bf16.gmra.mxu3 %v3083_v15 }
 0x206   :  { %v1498_v28 = vpop.f32.mrf.mxu2  ;;  %v1162_v38 = vpop.f32.mrf.mxu0 }
 0x207   :  { %v1667_v34 = vpop.f32.mrf.mxu3  ;;  %v1499_v35 = vadd.f32 %v1498_v28, %v1330_v17  ;;  %v1331_v39 = vpop.f32.mrf.mxu1 }
 0x208   :  { %v1332_v26 = vadd.f32 %v1331_v39, %v1162_v38  ;;  %v3094_v39 = vld [vmem:[%s6098_s0 + $0x3e8] sm:$0xf] }
 0x209   :  { %v4344_v43 = vadd.f32 %v1667_v34, %v1499_v35  ;;  %v3095_v12 = vor.u32 %v3355_v44, %v3094_v39 }
 0x20b   :  { %6203 = vst [vmem:[#allocation33_spill] sm:$0xff] %v4344_v43 }
 0x20e   :  { %v1500_v62 = vpop.f32.mrf.mxu2  ;;  %v1165_v10 = vpop.f32.mrf.mxu0 }
 0x20f   :  { %v1669_v63 = vpop.f32.mrf.mxu3  ;;  %v1501_v8 = vadd.f32 %v1500_v62, %v1332_v26  ;;  %v1334_v11 = vpop.f32.mrf.mxu1 }
 0x210   :  { %v1335_v15 = vadd.f32 %v1334_v11, %v1165_v10 }
 0x211   :  { %v4370_v17 = vadd.f32 %v1669_v63, %v1501_v8  ;;  %1204 = vmatmul.bf16.gmra.mxu0 %v3087_v1  ;;  %v1718_v1 = vsel %vm1717_vm0, %v3728_v21, 0.0 }
 0x212   :  { %1373 = vmatmul.bf16.gmra.mxu1 %v3091_v5  ;;  %v1720_v10 = vadd.f32 %v1719_v59, %v1718_v1 }
 0x213   :  { %6204 = vst [vmem:[#allocation34_spill] sm:$0xff] %v4370_v17  ;;  %1542 = vmatmul.bf16.gmra.mxu2 %v3095_v12  ;;  %v1723_v12 = vsel %vm1717_vm0, %v3782_v2, 0.0 }
 0x214   :  { %1711 = vmatmul.bf16.gmra.mxu3 %v3099_v13 }
 0x216   :  { %v1503_v28 = vpop.f32.mrf.mxu2  ;;  %v1167_v38 = vpop.f32.mrf.mxu0 }
 0x217   :  { %v1672_v34 = vpop.f32.mrf.mxu3  ;;  %v1504_v35 = vadd.f32 %v1503_v28, %v1335_v15  ;;  %v1336_v43 = vpop.f32.mrf.mxu1  ;;  %v1725_v28 = vsel %vm1717_vm0, %v3784_v9, 0.0 }
 0x218   :  { %v1337_v19 = vadd.f32 %v1336_v43, %v1167_v38  ;;  %v1721_v43 = vsel %vm1717_vm0, %v3756_v47, 0.0 }
 0x219   :  { %v4372_v23 = vadd.f32 %v1672_v34, %v1504_v35  ;;  %v1722_v15 = vadd.f32 %v1721_v43, %v1720_v10  ;;  %v1727_v35 = vsel %vm1717_vm0, %v3810_v29, 0.0 }
 0x21b   :  { %6205 = vst [vmem:[#allocation35_spill] sm:$0xff] %v4372_v23  ;;  %v1724_v34 = vadd.f32 %v1723_v12, %v1722_v15  ;;  %v1737_v15 = vsel %vm1717_vm0, %v3868_v30, 0.0 }
 0x21d   :  { %v1726_v38 = vadd.f32 %v1725_v28, %v1724_v34 }
 0x21e   :  { %v1505_v26 = vpop.f32.mrf.mxu2  ;;  %v1170_v50 = vpop.f32.mrf.mxu0 }
 0x21f   :  { %v1674_v48 = vpop.f32.mrf.mxu3  ;;  %v1506_v49 = vadd.f32 %v1505_v26, %v1337_v19  ;;  %v1339_v39 = vpop.f32.mrf.mxu1  ;;  %v1728_v59 = vadd.f32 %v1727_v35, %v1726_v38 }
 0x220   :  { %v1340_v44 = vadd.f32 %v1339_v39, %v1170_v50 }
 0x221   :  { %v4374_v58 = vadd.f32 %v1674_v48, %v1506_v49  ;;  %v1729_v49 = vsel %vm1717_vm0, %v3812_v36, 0.0 }
 0x222   :  { %v1730_v43 = vadd.f32 %v1729_v49, %v1728_v59  ;;  %v1743_v59 = vsel %vm1717_vm0, %v3922_v18, 0.0 }
 0x223   :  { %6206 = vst [vmem:[#allocation36_spill] sm:$0xff] %v4374_v58 }
 0x226   :  { %v1508_v62 = vpop.f32.mrf.mxu2  ;;  %v1172_v8 = vpop.f32.mrf.mxu0 }
 0x227   :  { %v1677_v63 = vpop.f32.mrf.mxu3  ;;  %v1509_v5 = vadd.f32 %v1508_v62, %v1340_v44  ;;  %v1341_v19 = vpop.f32.mrf.mxu1 }
 0x228   :  { %v1342_v11 = vadd.f32 %v1341_v19, %v1172_v8  ;;  %v1735_v19 = vsel %vm1717_vm0, %v3866_v22, 0.0 }
 0x229   :  { %v4384_v13 = vadd.f32 %v1677_v63, %v1509_v5  ;;  %v1731_v63 = vsel %vm1717_vm0, %v3838_v57, 0.0  ;;  %v1733_v5 = vsel %vm1717_vm0, %v3840_v0, 0.0 }
 0x22a   :  { %v1732_v8 = vadd.f32 %v1731_v63, %v1730_v43 }
 0x22c   :  { %v1734_v10 = vadd.f32 %v1733_v5, %v1732_v8  ;;  %v1745_v5 = vsel %vm1717_vm0, %v3924_v27, 0.0 }
 0x22e   :  { %v1510_v26 = vpop.f32.mrf.mxu2  ;;  %v1175_v39 = vpop.f32.mrf.mxu0  ;;  %v1736_v38 = vadd.f32 %v1735_v19, %v1734_v10 }
 0x22f   :  { %v1679_v48 = vpop.f32.mrf.mxu3  ;;  %v1511_v50 = vadd.f32 %v1510_v26, %v1342_v11  ;;  %v1344_v44 = vpop.f32.mrf.mxu1 }
 0x230   :  { %v1345_v62 = vadd.f32 %v1344_v44, %v1175_v39  ;;  %v1741_v39 = vsel %vm1717_vm0, %v3896_v60, 0.0 }
 0x231   :  { %v4394_v1 = vadd.f32 %v1679_v48, %v1511_v50  ;;  %v1739_v48 = vsel %vm1717_vm0, %v3894_v52, 0.0  ;;  %v1738_v50 = vadd.f32 %v1737_v15, %v1736_v38  ;;  %v1747_v15 = vsel %vm1717_vm0, %v3950_v51, 0.0  ;;  %v6212_v51 = vld [vmem:[#allocation32_spill] sm:$0xff] }
 0x233   :  { %v1740_v44 = vadd.f32 %v1739_v48, %v1738_v50  ;;  %v1751_v48 = vsel %vm1717_vm0, %v3978_v20, 0.0  ;;  %v6211_v20 = vld [vmem:[#allocation31_spill] sm:$0xff] }
 0x235   :  { %v1742_v63 = vadd.f32 %v1741_v39, %v1740_v44  ;;  %v1753_v44 = vsel %vm1717_vm0, %v3980_v32, 0.0 }
 0x236   :  { %v1513_v12 = vpop.f32.mrf.mxu2  ;;  %v1177_v34 = vpop.f32.mrf.mxu0 }
 0x237   :  { %v1682_v11 = vpop.f32.mrf.mxu3  ;;  %v1514_v28 = vadd.f32 %v1513_v12, %v1345_v62  ;;  %v1346_v35 = vpop.f32.mrf.mxu1  ;;  %v1744_v12 = vadd.f32 %v1743_v59, %v1742_v63 }
 0x238   :  { %v1347_v26 = vadd.f32 %v1346_v35, %v1177_v34  ;;  %v1749_v35 = vsel %vm1717_vm0, %v3952_v61, 0.0 }
 0x239   :  { %v4404_v49 = vadd.f32 %v1682_v11, %v1514_v28  ;;  %v1746_v34 = vadd.f32 %v1745_v5, %v1744_v12  ;;  %v1755_v5 = vsel %vm1717_vm0, %v4006_v56, 0.0  ;;  %v6208_v56 = vld [vmem:[#allocation28_spill] sm:$0xff] }
 0x23b   :  { %v1748_v38 = vadd.f32 %v1747_v15, %v1746_v34  ;;  %v1759_v15 = vsel %vm1717_vm0, %v4034_v31, 0.0 }
 0x23d   :  { %v1750_v50 = vadd.f32 %v1749_v35, %v1748_v38  ;;  %v1761_v38 = vsel %vm1717_vm0, %v4036_v41, 0.0  ;;  %v1769_v41 = vsel %vm1717_vm0, %v4092_v55, 0.0 }
 0x23e   :  { %v1515_v43 = vpop.f32.mrf.mxu2  ;;  %v1180_v19 = vpop.f32.mrf.mxu0 }
 0x23f   :  { %v1684_v62 = vpop.f32.mrf.mxu3  ;;  %v1516_v8 = vadd.f32 %v1515_v43, %v1347_v26  ;;  %v1349_v10 = vpop.f32.mrf.mxu1 }
 0x240   :  { %v1350_v11 = vadd.f32 %v1349_v10, %v1180_v19  ;;  %v1757_v10 = vsel %vm1717_vm0, %v4008_v4, 0.0 }
 0x241   :  { %v4414_v28 = vadd.f32 %v1684_v62, %v1516_v8  ;;  %v1752_v62 = vadd.f32 %v1751_v48, %v1750_v50 }
 0x243   :  { %v1754_v19 = vadd.f32 %v1753_v44, %v1752_v62 }
 0x245   :  { %v1756_v12 = vadd.f32 %v1755_v5, %v1754_v19  ;;  %v1767_v5 = vsel %vm1717_vm0, %v4090_v45, 0.0 }
 0x246   :  { %v1518_v39 = vpop.f32.mrf.mxu2  ;;  %v4422_v63 = vpop.f32.mrf.mxu0 }
 0x247   :  { %v1687_v26 = vpop.f32.mrf.mxu3  ;;  %v1519_v59 = vadd.f32 %v1518_v39, %v1350_v11  ;;  %v4424_v43 = vpop.f32.mrf.mxu1  ;;  %v1758_v34 = vadd.f32 %v1757_v10, %v1756_v12 }
 0x249   :  { %v4428_v8 = vadd.f32 %v1687_v26, %v1519_v59  ;;  %v1760_v39 = vadd.f32 %v1759_v15, %v1758_v34  ;;  %v1763_v26 = vsel %vm1717_vm0, %v4062_v6, 0.0  ;;  %v1765_v59 = vsel %vm1717_vm0, %v4064_v14, 0.0 }
 0x24a   :  { %v1777_v6 = vsel %vm1717_vm0, %v4148_v16, 0.0  ;;  %v1785_v16 = vsel %vm1717_vm0, %v4204_v54, 0.0  ;;  %v6207_v54 = vld [vmem:[#allocation27_spill] sm:$0xff] }
 0x24b   :  { %v1762_v44 = vadd.f32 %v1761_v38, %v1760_v39  ;;  %v1771_v39 = vsel %vm1717_vm0, %v4118_v24, 0.0  ;;  %v1793_v24 = vsel %vm1717_vm0, %v6207_v54, 0.0  ;;  %v1801_v54 = vsel %vm1717_vm0, %v6211_v20, 0.0 }
 0x24c   :  { %v1809_v20 = vsel %vm1717_vm0, %v4372_v23, 0.0 }
 0x24d   :  { %v1764_v62 = vadd.f32 %v1763_v26, %v1762_v44  ;;  %v1773_v44 = vsel %vm1717_vm0, %v4120_v37, 0.0 }
 0x24e   :  { %v4434_v11 = vpop.f32.mrf.mxu2  ;;  %v4440_v48 = vpop.f32.mrf.mxu0 }
 0x24f   :  { %v4436_v35 = vpop.f32.mrf.mxu3  ;;  %v4442_v50 = vpop.f32.mrf.mxu1  ;;  %v1766_v19 = vadd.f32 %v1765_v59, %v1764_v62  ;;  %v1775_v62 = vsel %vm1717_vm0, %v4146_v7, 0.0 }
 0x251   :  { %v1768_v38 = vadd.f32 %v1767_v5, %v1766_v19 }
 0x253   :  { %v1770_v26 = vadd.f32 %v1769_v41, %v1768_v38  ;;  %v1779_v41 = vsel %vm1717_vm0, %v4174_v53, 0.0 }
 0x255   :  { %v1772_v59 = vadd.f32 %v1771_v39, %v1770_v26  ;;  %v1781_v39 = vsel %vm1717_vm0, %v4176_v3, 0.0 }
 0x256   :  { %v4450_v10 = vpop.f32.mrf.mxu2  ;;  %v4456_v15 = vpop.f32.mrf.mxu0 }
 0x257   :  { %v4452_v12 = vpop.f32.mrf.mxu3  ;;  %v4458_v34 = vpop.f32.mrf.mxu1  ;;  %v1774_v45 = vadd.f32 %v1773_v44, %v1772_v59  ;;  %v1783_v44 = vsel %vm1717_vm0, %v4202_v42, 0.0 }
 0x259   :  { %v1776_v31 = vadd.f32 %v1775_v62, %v1774_v45 }
 0x25b   :  { %v1778_v38 = vadd.f32 %v1777_v6, %v1776_v31  ;;  %v1787_v6 = vsel %vm1717_vm0, %v4230_v33, 0.0  ;;  %v6209_v33 = vld [vmem:[#allocation29_spill] sm:$0xff] }
 0x25d   :  { %v1780_v26 = vadd.f32 %v1779_v41, %v1778_v38  ;;  %v1789_v38 = vsel %vm1717_vm0, %v4232_v46, 0.0  ;;  %v6210_v46 = vld [vmem:[#allocation30_spill] sm:$0xff] }
 0x25e   :  { %v4466_v14 = vpop.f32.mrf.mxu2  ;;  %v1190_v5 = vpop.f32.mrf.mxu0 }
 0x25f   :  { %v4468_v55 = vpop.f32.mrf.mxu3  ;;  %v1359_v19 = vpop.f32.mrf.mxu1  ;;  %v1782_v59 = vadd.f32 %v1781_v39, %v1780_v26  ;;  %v1791_v26 = vsel %vm1717_vm0, %v4258_v25, 0.0 }
 0x261   :  { %v1784_v31 = vadd.f32 %v1783_v44, %v1782_v59 }
 0x263   :  { %v1786_v41 = vadd.f32 %v1785_v16, %v1784_v31  ;;  %v1795_v16 = vsel %vm1717_vm0, %v6208_v56, 0.0  ;;  %v6213_v56 = vld [vmem:[#allocation33_spill] sm:$0xff] }
 0x265   :  { %v1788_v39 = vadd.f32 %v1787_v6, %v1786_v41  ;;  %v1797_v6 = vsel %vm1717_vm0, %v6209_v33, 0.0 }
 0x266   :  { %v4478_v7 = vpop.f32.mrf.mxu2  ;;  %v4484_v45 = vpop.f32.mrf.mxu0 }
 0x267   :  { %v4480_v37 = vpop.f32.mrf.mxu3  ;;  %v4486_v62 = vpop.f32.mrf.mxu1  ;;  %v1790_v42 = vadd.f32 %v1789_v38, %v1788_v39  ;;  %v1799_v38 = vsel %vm1717_vm0, %v6210_v46, 0.0 }
 0x269   :  { %v1792_v59 = vadd.f32 %v1791_v26, %v1790_v42 }
 0x26b   :  { %v1794_v31 = vadd.f32 %v1793_v24, %v1792_v59  ;;  %v1803_v24 = vsel %vm1717_vm0, %v6212_v51, 0.0 }
 0x26d   :  { %v1796_v41 = vadd.f32 %v1795_v16, %v1794_v31  ;;  %v1805_v16 = vsel %vm1717_vm0, %v6213_v56, 0.0 }
 0x26e   :  { %v1530_v3 = vpop.f32.mrf.mxu2  ;;  %v1195_v4 = vpop.f32.mrf.mxu0 }
 0x26f   :  { %v4494_v53 = vpop.f32.mrf.mxu3  ;;  %v1364_v44 = vpop.f32.mrf.mxu1  ;;  %v1798_v39 = vadd.f32 %v1797_v6, %v1796_v41  ;;  %v1807_v6 = vsel %vm1717_vm0, %v4370_v17, 0.0 }
 0x271   :  { %v1800_v26 = vadd.f32 %v1799_v38, %v1798_v39  ;;  %v1811_v39 = vsel %vm1717_vm0, %v4374_v58, 0.0 }
 0x273   :  { %v1802_v59 = vadd.f32 %v1801_v54, %v1800_v26  ;;  %v1813_v26 = vsel %vm1717_vm0, %v4384_v13, 0.0 }
 0x275   :  { %v1804_v31 = vadd.f32 %v1803_v24, %v1802_v59  ;;  %v1352_v24 = vadd.f32 %v4424_v43, %v4422_v63  ;;  %v1355_v59 = vadd.f32 %v4442_v50, %v4440_v48  ;;  %v1357_v63 = vadd.f32 %v4458_v34, %v4456_v15 }
 0x276   :  { %v1533_v25 = vpop.f32.mrf.mxu2  ;;  %v1197_v61 = vpop.f32.mrf.mxu0  ;;  %v1362_v15 = vadd.f32 %v4486_v62, %v4484_v45  ;;  %v1365_v34 = vadd.f32 %v1364_v44, %v1195_v4 }
 0x277   :  { %v4504_v32 = vpop.f32.mrf.mxu3  ;;  %v1366_v42 = vpop.f32.mrf.mxu1  ;;  %v1806_v41 = vadd.f32 %v1805_v16, %v1804_v31  ;;  %v1815_v31 = vsel %vm1717_vm0, %v4394_v1, 0.0  ;;  %v1521_v23 = vadd.f32 %v4434_v11, %v1352_v24 }
 0x278   :  { %v1367_v45 = vadd.f32 %v1366_v42, %v1197_v61 }
 0x279   :  { %v1808_v38 = vadd.f32 %v1807_v6, %v1806_v41  ;;  %v1360_v41 = vadd.f32 %v1359_v19, %v1190_v5  ;;  %v4535_v11 = vadd.f32 %v4436_v35, %v1521_v23  ;;  %v1526_v5 = vadd.f32 %v4466_v14, %v1357_v63 }
 0x27a   :  { %v1531_v14 = vadd.f32 %v1530_v3, %v1362_v15 }
 0x27b   :  { %v1810_v54 = vadd.f32 %v1809_v20, %v1808_v38  ;;  %v1817_v20 = vsel %vm1717_vm0, %v4404_v49, 0.0  ;;  %v1524_v38 = vadd.f32 %v4450_v10, %v1355_v59  ;;  %v1821_v10 = vsel %vm1717_vm0, %v4428_v8, 0.0 }
 0x27c   :  { %v1823_v23 = vsel %vm1717_vm0, %v4535_v11, 0.0  ;;  %v4549_v35 = vadd.f32 %v4468_v55, %v1526_v5  ;;  %v4559_v3 = vadd.f32 %v4494_v53, %v1531_v14 }
 0x27d   :  { %v1812_v16 = vadd.f32 %v1811_v39, %v1810_v54  ;;  %v1819_v39 = vsel %vm1717_vm0, %v4414_v28, 0.0  ;;  %v1529_v54 = vadd.f32 %v4478_v7, %v1360_v41 }
 0x27e   :  { %v1535_v46 = vpop.f32.mrf.mxu2  ;;  %v1200_v27 = vpop.f32.mrf.mxu0  ;;  %v1827_v55 = vsel %vm1717_vm0, %v4549_v35, 0.0  ;;  %v1831_v42 = vsel %vm1717_vm0, %v4559_v3, 0.0 }
 0x27f   :  { %v1704_v33 = vpop.f32.mrf.mxu3  ;;  %v1369_v18 = vpop.f32.mrf.mxu1  ;;  %v1814_v6 = vadd.f32 %v1813_v26, %v1812_v16  ;;  %v4542_v26 = vadd.f32 %v4452_v12, %v1524_v38  ;;  %v4552_v7 = vadd.f32 %v4480_v37, %v1529_v54 }
 0x280   :  { %v1370_v4 = vadd.f32 %v1369_v18, %v1200_v27 }
 0x281   :  { %v1816_v50 = vadd.f32 %v1815_v31, %v1814_v6  ;;  %v1825_v12 = vsel %vm1717_vm0, %v4542_v26, 0.0  ;;  %v1534_v6 = vadd.f32 %v1533_v25, %v1365_v34  ;;  %v1829_v38 = vsel %vm1717_vm0, %v4552_v7, 0.0 }
 0x283   :  { %v1818_v19 = vadd.f32 %v1817_v20, %v1816_v50  ;;  %v1536_v20 = vadd.f32 %v1535_v46, %v1367_v45  ;;  %v4564_v63 = vadd.f32 %v4504_v32, %v1534_v6 }
 0x285   :  { %v1820_v24 = vadd.f32 %v1819_v39, %v1818_v19  ;;  %v1705_v50 = vadd.f32 %v1704_v33, %v1536_v20  ;;  %v1833_v46 = vsel %vm1717_vm0, %v4564_v63, 0.0 }
 0x286   :  { %v1538_v17 = vpop.f32.mrf.mxu2  ;;  %v1202_v43 = vpop.f32.mrf.mxu0 }
 0x287   :  { %v1707_v58 = vpop.f32.mrf.mxu3  ;;  %v1371_v48 = vpop.f32.mrf.mxu1  ;;  %v1822_v59 = vadd.f32 %v1821_v10, %v1820_v24  ;;  %v1539_v25 = vadd.f32 %v1538_v17, %v1370_v4  ;;  %v1835_v32 = vsel %vm1717_vm0, %v1705_v50, 0.0 }
 0x288   :  { %v1372_v61 = vadd.f32 %v1371_v48, %v1202_v43 }
 0x289   :  { %v1824_v62 = vadd.f32 %v1823_v23, %v1822_v59  ;;  %v1708_v54 = vadd.f32 %v1707_v58, %v1539_v25 }
 0x28b   :  { %v1826_v37 = vadd.f32 %v1825_v12, %v1824_v62  ;;  %v1837_v24 = vsel %vm1717_vm0, %v1708_v54, 0.0 }
 0x28d   :  { %v1828_v27 = vadd.f32 %v1827_v55, %v1826_v37 }
 0x28e   :  { %v1540_v16 = vpop.f32.mrf.mxu2  ;;  %v1205_v44 = vpop.f32.mrf.mxu0 }
 0x28f   :  { %v1709_v31 = vpop.f32.mrf.mxu3  ;;  %v1374_v41 = vpop.f32.mrf.mxu1  ;;  %v1541_v39 = vadd.f32 %v1540_v16, %v1372_v61  ;;  %v1830_v5 = vadd.f32 %v1829_v38, %v1828_v27 }
 0x290   :  { %v1375_v18 = vadd.f32 %v1374_v41, %v1205_v44 }
 0x291   :  { %v1832_v15 = vadd.f32 %v1831_v42, %v1830_v5  ;;  %v1710_v17 = vadd.f32 %v1709_v31, %v1541_v39 }
 0x293   :  { %v1834_v43 = vadd.f32 %v1833_v46, %v1832_v15  ;;  %v1839_v14 = vsel %vm1717_vm0, %v1710_v17, 0.0 }
 0x295   :  { %v1836_v33 = vadd.f32 %v1835_v32, %v1834_v43 }
 0x296   :  { %v1543_v53 = vpop.f32.mrf.mxu2  ;;  %v1207_v48 = vpop.f32.mrf.mxu0 }
 0x297   :  { %v1712_v19 = vpop.f32.mrf.mxu3  ;;  %v1544_v10 = vadd.f32 %v1543_v53, %v1375_v18  ;;  %v1376_v34 = vpop.f32.mrf.mxu1  ;;  %v1838_v16 = vadd.f32 %v1837_v24, %v1836_v33 }
 0x298   :  { %v1377_v59 = vadd.f32 %v1376_v34, %v1207_v48 }
 0x299   :  { %v1713_v23 = vadd.f32 %v1712_v19, %v1544_v10  ;;  %v1840_v45 = vadd.f32 %v1839_v14, %v1838_v16 }
 0x29b   :  { %v1841_v6 = vsel %vm1717_vm0, %v1713_v23, 0.0 }
 0x29c   :  { %v1842_v44 = vadd.f32 %v1841_v6, %v1840_v45 }
 0x29e   :  { %v1545_v12 = vpop.f32.mrf.mxu2 }
 0x29f   :  { %v1546_v58 = vadd.f32 %v1545_v12, %v1377_v59  ;;  %v1714_v4 = vpop.f32.mrf.mxu3 }
 0x2a1   :  { %v1715_v62 = vadd.f32 %v1714_v4, %v1546_v58 }
 0x2a3   :  { %v1843_v31 = vsel %vm1717_vm0, %v1715_v62, 0.0 }
 0x2a4   :  { %v1844_v41 = vadd.f32 %v1843_v31, %v1842_v44 }
 0x2a6   :  { %v1845_v55 = vrot.slane %v1844_v41, 4 }
 0x2a8   :  { %v1846_v20 = vadd.f32 %v1845_v55, %v1844_v41 }
 0x2aa   :  { %v1847_v37 = vrot.slane %v1846_v20, 2 }
 0x2ac   :  { %v1848_v38 = vadd.f32 %v1847_v37, %v1846_v20 }
 0x2ae   :  { %v1849_v25 = vrot.slane %v1848_v38, 1 }
 0x2b0   :  { %v1850_v61 = vadd.f32 %v1849_v25, %v1848_v38  ;;  %v6218_v25 = vld [vmem:[#allocation2_spill] sm:$0xff] }
 0x2b2   :  { %v4575_v18 = vmul.f32 0.001953125, %v1850_v61 }
 0x2b4   :  { %v4578_v27 = vsub.f32 %v1705_v50, %v4575_v18  ;;  %v4581_v42 = vsub.f32 %v1708_v54, %v4575_v18  ;;  %v4584_v39 = vsub.f32 %v1710_v17, %v4575_v18  ;;  %v4587_v5 = vsub.f32 %v1713_v23, %v4575_v18 }
 0x2b5   :  { %v4590_v53 = vsub.f32 %v1715_v62, %v4575_v18  ;;  %v4594_v19 = vsub.f32 %v3728_v21, %v4575_v18  ;;  %v4598_v50 = vsub.f32 %v3754_v40, %v4575_v18  ;;  %v4602_v46 = vsub.f32 %v3756_v47, %v4575_v18 }
 0x2b6   :  { %6214 = vst [vmem:[#allocation32_spill] sm:$0xff] %v4578_v27  ;;  %v4606_v54 = vsub.f32 %v3782_v2, %v4575_v18  ;;  %v4614_v21 = vsub.f32 %v3784_v9, %v4575_v18  ;;  %v4620_v47 = vsub.f32 %v3810_v29, %v4575_v18  ;;  %v4628_v48 = vsub.f32 %v3812_v36, %v4575_v18 }
 0x2b7   :  { %6215 = vst [vmem:[#allocation33_spill] sm:$0xff] %v4581_v42  ;;  %v1916_v10 = vmul.f32 %v4594_v19, %v4594_v19  ;;  %v1917_v15 = vmul.f32 %v4598_v50, %v4598_v50  ;;  %v1918_v40 = vmul.f32 %v4602_v46, %v4602_v46  ;;  %v4635_v29 = vsub.f32 %v3838_v57, %v4575_v18 }
 0x2b8   :  { %6216 = vst [vmem:[#allocation37_spill] sm:$0xff] %v4584_v39  ;;  %v1919_v2 = vmul.f32 %v4606_v54, %v4606_v54  ;;  %v1920_v9 = vmul.f32 %v4614_v21, %v4614_v21  ;;  %v1921_v23 = vmul.f32 %v4620_v47, %v4620_v47  ;;  %v4642_v36 = vsub.f32 %v3840_v0, %v4575_v18 }
 0x2b9   :  { %6217 = vst [vmem:[#allocation38_spill] sm:$0xff] %v4587_v5  ;;  %v1980_v32 = vsel %vm1717_vm0, %v1916_v10, 0.0  ;;  %v1981_v17 = vsel %vm1717_vm0, %v1917_v15, 0.0  ;;  %v1983_v34 = vsel %vm1717_vm0, %v1918_v40, 0.0  ;;  %v1922_v59 = vmul.f32 %v4628_v48, %v4628_v48  ;;  %v6219_v40 = vld [vmem:[#allocation3_spill] sm:$0xff] }
 0x2ba   :  { %v1982_v43 = vadd.f32 %v1981_v17, %v1980_v32  ;;  %v1985_v33 = vsel %vm1717_vm0, %v1919_v2, 0.0  ;;  %v1987_v16 = vsel %vm1717_vm0, %v1920_v9, 0.0  ;;  %v4649_v57 = vsub.f32 %v3866_v22, %v4575_v18 }
 0x2bb   :  { %v1923_v6 = vmul.f32 %v4635_v29, %v4635_v29  ;;  %v1989_v58 = vsel %vm1717_vm0, %v1921_v23, 0.0  ;;  %v4656_v0 = vsub.f32 %v3868_v30, %v4575_v18  ;;  %v1924_v4 = vmul.f32 %v4642_v36, %v4642_v36 }
 0x2bc   :  { %v1984_v24 = vadd.f32 %v1983_v34, %v1982_v43  ;;  %v1991_v62 = vsel %vm1717_vm0, %v1922_v59, 0.0  ;;  %v4663_v22 = vsub.f32 %v3894_v52, %v4575_v18  ;;  %v1925_v31 = vmul.f32 %v4649_v57, %v4649_v57  ;;  %v6220_v43 = vld [vmem:[#allocation4_spill] sm:$0xff] }
 0x2bd   :  { %v1993_v41 = vsel %vm1717_vm0, %v1923_v6, 0.0  ;;  %v4670_v30 = vsub.f32 %v3896_v60, %v4575_v18  ;;  %v1926_v20 = vmul.f32 %v4656_v0, %v4656_v0  ;;  %v1995_v37 = vsel %vm1717_vm0, %v1924_v4, 0.0  ;;  %v6222_v6 = vld [vmem:[#allocation6_spill] sm:$0xff] }
 0x2be   :  { %v1986_v14 = vadd.f32 %v1985_v33, %v1984_v24  ;;  %v4677_v52 = vsub.f32 %v6218_v25, %v4575_v18  ;;  %v1927_v61 = vmul.f32 %v4663_v22, %v4663_v22  ;;  %v1997_v10 = vsel %vm1717_vm0, %v1925_v31, 0.0  ;;  %v6221_v33 = vld [vmem:[#allocation5_spill] sm:$0xff] }
 0x2bf   :  { %v4684_v60 = vsub.f32 %v6219_v40, %v4575_v18  ;;  %v1928_v2 = vmul.f32 %v4670_v30, %v4670_v30  ;;  %v1999_v32 = vsel %vm1717_vm0, %v1926_v20, 0.0  ;;  %v4691_v9 = vsub.f32 %v6220_v43, %v4575_v18  ;;  %v6226_v43 = vld [vmem:[#allocation10_spill] sm:$0xff] }
 0x2c0   :  { %v1988_v12 = vadd.f32 %v1987_v16, %v1986_v14  ;;  %v1929_v34 = vmul.f32 %v4677_v52, %v4677_v52  ;;  %v2001_v24 = vsel %vm1717_vm0, %v1927_v61, 0.0  ;;  %v4698_v14 = vsub.f32 %v6221_v33, %v4575_v18 }
 0x2c1   :  { %v1930_v59 = vmul.f32 %v4684_v60, %v4684_v60  ;;  %v2003_v16 = vsel %vm1717_vm0, %v1928_v2, 0.0 }
 0x2c2   :  { %v1990_v45 = vadd.f32 %v1989_v58, %v1988_v12  ;;  %v4705_v58 = vsub.f32 %v6222_v6, %v4575_v18  ;;  %v2005_v4 = vsel %vm1717_vm0, %v1929_v34, 0.0  ;;  %v4733_v34 = vsub.f32 %v6226_v43, %v4575_v18 }
 0x2c4   :  { %v1992_v44 = vadd.f32 %v1991_v62, %v1990_v45  ;;  %v1931_v45 = vmul.f32 %v4691_v9, %v4691_v9  ;;  %v1933_v25 = vmul.f32 %v4705_v58, %v4705_v58 }
 0x2c6   :  { %v1994_v55 = vadd.f32 %v1993_v41, %v1992_v44  ;;  %v6223_v44 = vld [vmem:[#allocation7_spill] sm:$0xff]  ;;  %v1932_v41 = vmul.f32 %v4698_v14, %v4698_v14  ;;  %v2009_v61 = vsel %vm1717_vm0, %v1931_v45, 0.0 }
 0x2c7   :  { %v4712_v31 = vsub.f32 %v6223_v44, %v4575_v18  ;;  %v1937_v44 = vmul.f32 %v4733_v34, %v4733_v34 }
 0x2c8   :  { %v1996_v38 = vadd.f32 %v1995_v37, %v1994_v55  ;;  %v2007_v55 = vsel %vm1717_vm0, %v1930_v59, 0.0  ;;  %v6224_v37 = vld [vmem:[#allocation8_spill] sm:$0xff]  ;;  %v6227_v59 = vld [vmem:[#allocation11_spill] sm:$0xff] }
 0x2c9   :  { %v1934_v2 = vmul.f32 %v4712_v31, %v4712_v31 }
 0x2ca   :  { %v1998_v15 = vadd.f32 %v1997_v10, %v1996_v38  ;;  %v4719_v38 = vsub.f32 %v6224_v37, %v4575_v18 }
 0x2cb   :  { %v2015_v6 = vsel %vm1717_vm0, %v1934_v2, 0.0 }
 0x2cc   :  { %v2000_v17 = vadd.f32 %v1999_v32, %v1998_v15  ;;  %v6225_v15 = vld [vmem:[#allocation9_spill] sm:$0xff]  ;;  %v2011_v32 = vsel %vm1717_vm0, %v1932_v41, 0.0 }
 0x2cd   :  { %v4726_v40 = vsub.f32 %v6225_v15, %v4575_v18  ;;  %v6230_v15 = vld [vmem:[#allocation14_spill] sm:$0xff] }
 0x2ce   :  { %v2002_v23 = vadd.f32 %v2001_v24, %v2000_v17  ;;  %v1935_v24 = vmul.f32 %v4719_v38, %v4719_v38  ;;  %v4761_v2 = vsub.f32 %v6230_v15, %v4575_v18  ;;  %v6234_v15 = vld [vmem:[#allocation18_spill] sm:$0xff] }
 0x2d0   :  { %v2004_v12 = vadd.f32 %v2003_v16, %v2002_v23  ;;  %v2013_v23 = vsel %vm1717_vm0, %v1933_v25, 0.0  ;;  %v4740_v16 = vsub.f32 %v6227_v59, %v4575_v18  ;;  %v2017_v41 = vsel %vm1717_vm0, %v1935_v24, 0.0  ;;  %v6231_v24 = vld [vmem:[#allocation15_spill] sm:$0xff] }
 0x2d2   :  { %v2006_v62 = vadd.f32 %v2005_v4, %v2004_v12  ;;  %v1936_v12 = vmul.f32 %v4726_v40, %v4726_v40  ;;  %v6228_v4 = vld [vmem:[#allocation12_spill] sm:$0xff]  ;;  %v1938_v25 = vmul.f32 %v4740_v16, %v4740_v16 }
 0x2d4   :  { %v2008_v20 = vadd.f32 %v2007_v55, %v2006_v62  ;;  %v4747_v62 = vsub.f32 %v6228_v4, %v4575_v18  ;;  %v2023_v59 = vsel %vm1717_vm0, %v1938_v25, 0.0  ;;  %v1941_v4 = vmul.f32 %v4761_v2, %v4761_v2 }
 0x2d6   :  { %v2010_v10 = vadd.f32 %v2009_v61, %v2008_v20  ;;  %v6229_v20 = vld [vmem:[#allocation13_spill] sm:$0xff]  ;;  %v2019_v61 = vsel %vm1717_vm0, %v1936_v12, 0.0 }
 0x2d7   :  { %v4754_v37 = vsub.f32 %v6229_v20, %v4575_v18 }
 0x2d8   :  { %v2012_v17 = vadd.f32 %v2011_v32, %v2010_v10  ;;  %v1939_v32 = vmul.f32 %v4747_v62, %v4747_v62 }
 0x2da   :  { %v2014_v33 = vadd.f32 %v2013_v23, %v2012_v17  ;;  %v2021_v17 = vsel %vm1717_vm0, %v1937_v44, 0.0  ;;  %v4768_v23 = vsub.f32 %v6231_v24, %v4575_v18  ;;  %v2025_v44 = vsel %vm1717_vm0, %v1939_v32, 0.0 }
 0x2db   :  { %v2029_v32 = vsel %vm1717_vm0, %v1941_v4, 0.0 }
 0x2dc   :  { %v2016_v45 = vadd.f32 %v2015_v6, %v2014_v33  ;;  %v1940_v33 = vmul.f32 %v4754_v37, %v4754_v37  ;;  %v6232_v6 = vld [vmem:[#allocation16_spill] sm:$0xff] }
 0x2de   :  { %v2018_v55 = vadd.f32 %v2017_v41, %v2016_v45  ;;  %v4775_v45 = vsub.f32 %v6232_v6, %v4575_v18  ;;  %v2027_v25 = vsel %vm1717_vm0, %v1940_v33, 0.0 }
 0x2e0   :  { %v2020_v10 = vadd.f32 %v2019_v61, %v2018_v55  ;;  %v6233_v55 = vld [vmem:[#allocation17_spill] sm:$0xff]  ;;  %v1942_v61 = vmul.f32 %v4768_v23, %v4768_v23 }
 0x2e1   :  { %v4782_v20 = vsub.f32 %v6233_v55, %v4575_v18 }
 0x2e2   :  { %v2022_v43 = vadd.f32 %v2021_v17, %v2020_v10  ;;  %v4789_v17 = vsub.f32 %v6234_v15, %v4575_v18  ;;  %v2031_v33 = vsel %vm1717_vm0, %v1942_v61, 0.0  ;;  %v6240_v15 = vld [vmem:[#allocation21_spill] sm:$0xff] }
 0x2e3   :  { %v1944_v6 = vmul.f32 %v4782_v20, %v4782_v20 }
 0x2e4   :  { %v2024_v12 = vadd.f32 %v2023_v59, %v2022_v43  ;;  %6235 = vst [vmem:[#allocation2_spill] sm:$0xff] %v4789_v17  ;;  %v1943_v43 = vmul.f32 %v4775_v45, %v4775_v45  ;;  %v6236_v59 = vld [vmem:[#allocation19_spill] sm:$0xff] }
 0x2e5   :  { %v2035_v61 = vsel %vm1717_vm0, %v1944_v6, 0.0 }
 0x2e6   :  { %v2026_v41 = vadd.f32 %v2025_v44, %v2024_v12  ;;  %v4796_v12 = vsub.f32 %v6236_v59, %v4575_v18  ;;  %v2033_v4 = vsel %vm1717_vm0, %v1943_v43, 0.0 }
 0x2e8   :  { %v2028_v10 = vadd.f32 %v2027_v25, %v2026_v41  ;;  %6237 = vst [vmem:[#allocation3_spill] sm:$0xff] %v4796_v12  ;;  %v6238_v41 = vld [vmem:[#allocation20_spill] sm:$0xff]  ;;  %v1945_v25 = vmul.f32 %v4789_v17, %v4789_v17  ;;  %v1946_v59 = vmul.f32 %v4796_v12, %v4796_v12 }
 0x2e9   :  { %v4803_v55 = vsub.f32 %v6238_v41, %v4575_v18 }
 0x2ea   :  { %v2030_v24 = vadd.f32 %v2029_v32, %v2028_v10  ;;  %v4810_v32 = vsub.f32 %v6240_v15, %v4575_v18  ;;  %v2037_v43 = vsel %vm1717_vm0, %v1945_v25, 0.0  ;;  %v2039_v6 = vsel %vm1717_vm0, %v1946_v59, 0.0 }
 0x2eb   :  { %6239 = vst [vmem:[#allocation4_spill] sm:$0xff] %v4803_v55  ;;  %v1947_v17 = vmul.f32 %v4803_v55, %v4803_v55 }
 0x2ec   :  { %v2032_v44 = vadd.f32 %v2031_v33, %v2030_v24  ;;  %6241 = vst [vmem:[#allocation5_spill] sm:$0xff] %v4810_v32  ;;  %v6242_v33 = vld [vmem:[#allocation22_spill] sm:$0xff]  ;;  %v1948_v12 = vmul.f32 %v4810_v32, %v4810_v32 }
 0x2ed   :  { %v4817_v41 = vsub.f32 %v6242_v33, %v4575_v18  ;;  %v2041_v25 = vsel %vm1717_vm0, %v1947_v17, 0.0 }
 0x2ee   :  { %v2034_v10 = vadd.f32 %v2033_v4, %v2032_v44  ;;  %v6244_v4 = vld [vmem:[#allocation23_spill] sm:$0xff]  ;;  %v2043_v59 = vsel %vm1717_vm0, %v1948_v12, 0.0 }
 0x2ef   :  { %6243 = vst [vmem:[#allocation6_spill] sm:$0xff] %v4817_v41  ;;  %v4824_v15 = vsub.f32 %v6244_v4, %v4575_v18  ;;  %v1949_v55 = vmul.f32 %v4817_v41, %v4817_v41 }
 0x2f0   :  { %v2036_v24 = vadd.f32 %v2035_v61, %v2034_v10  ;;  %v6246_v61 = vld [vmem:[#allocation24_spill] sm:$0xff] }
 0x2f1   :  { %6245 = vst [vmem:[#allocation7_spill] sm:$0xff] %v4824_v15  ;;  %v4831_v33 = vsub.f32 %v6246_v61, %v4575_v18  ;;  %v1950_v32 = vmul.f32 %v4824_v15, %v4824_v15  ;;  %v2045_v17 = vsel %vm1717_vm0, %v1949_v55, 0.0 }
 0x2f2   :  { %v2038_v44 = vadd.f32 %v2037_v43, %v2036_v24  ;;  %v6248_v43 = vld [vmem:[#allocation25_spill] sm:$0xff] }
 0x2f3   :  { %6247 = vst [vmem:[#allocation8_spill] sm:$0xff] %v4831_v33  ;;  %v4838_v4 = vsub.f32 %v6248_v43, %v4575_v18  ;;  %v1951_v41 = vmul.f32 %v4831_v33, %v4831_v33  ;;  %v2047_v12 = vsel %vm1717_vm0, %v1950_v32, 0.0 }
 0x2f4   :  { %v2040_v10 = vadd.f32 %v2039_v6, %v2038_v44  ;;  %v6250_v6 = vld [vmem:[#allocation26_spill] sm:$0xff] }
 0x2f5   :  { %6249 = vst [vmem:[#allocation9_spill] sm:$0xff] %v4838_v4  ;;  %v4845_v61 = vsub.f32 %v6250_v6, %v4575_v18  ;;  %v1952_v15 = vmul.f32 %v4838_v4, %v4838_v4  ;;  %v2049_v55 = vsel %vm1717_vm0, %v1951_v41, 0.0 }
 0x2f6   :  { %v2042_v24 = vadd.f32 %v2041_v25, %v2040_v10  ;;  %v6252_v25 = vld [vmem:[#allocation27_spill] sm:$0xff] }
 0x2f7   :  { %6251 = vst [vmem:[#allocation10_spill] sm:$0xff] %v4845_v61  ;;  %v4852_v43 = vsub.f32 %v6252_v25, %v4575_v18  ;;  %v1953_v33 = vmul.f32 %v4845_v61, %v4845_v61  ;;  %v2051_v32 = vsel %vm1717_vm0, %v1952_v15, 0.0 }
 0x2f8   :  { %v2044_v44 = vadd.f32 %v2043_v59, %v2042_v24  ;;  %v6254_v59 = vld [vmem:[#allocation28_spill] sm:$0xff] }
 0x2f9   :  { %6253 = vst [vmem:[#allocation11_spill] sm:$0xff] %v4852_v43  ;;  %v4859_v6 = vsub.f32 %v6254_v59, %v4575_v18  ;;  %v1954_v4 = vmul.f32 %v4852_v43, %v4852_v43  ;;  %v2053_v41 = vsel %vm1717_vm0, %v1953_v33, 0.0 }
 0x2fa   :  { %v2046_v10 = vadd.f32 %v2045_v17, %v2044_v44  ;;  %v6255_v17 = vld [vmem:[#allocation29_spill] sm:$0xff] }
 0x2fb   :  { %v4866_v25 = vsub.f32 %v6255_v17, %v4575_v18  ;;  %v1955_v61 = vmul.f32 %v4859_v6, %v4859_v6  ;;  %v2055_v15 = vsel %vm1717_vm0, %v1954_v4, 0.0 }
 0x2fc   :  { %v2048_v24 = vadd.f32 %v2047_v12, %v2046_v10  ;;  %v6256_v12 = vld [vmem:[#allocation30_spill] sm:$0xff] }
 0x2fd   :  { %v4873_v59 = vsub.f32 %v6256_v12, %v4575_v18  ;;  %v1956_v43 = vmul.f32 %v4866_v25, %v4866_v25  ;;  %v2057_v33 = vsel %vm1717_vm0, %v1955_v61, 0.0 }
 0x2fe   :  { %v2050_v44 = vadd.f32 %v2049_v55, %v2048_v24  ;;  %v6258_v55 = vld [vmem:[#allocation31_spill] sm:$0xff] }
 0x2ff   :  { %6257 = vst [vmem:[#allocation12_spill] sm:$0xff] %v4873_v59  ;;  %v4880_v17 = vsub.f32 %v6258_v55, %v4575_v18  ;;  %v1957_v12 = vmul.f32 %v4873_v59, %v4873_v59  ;;  %v2059_v4 = vsel %vm1717_vm0, %v1956_v43, 0.0 }
 0x300   :  { %v2052_v10 = vadd.f32 %v2051_v32, %v2050_v44  ;;  %v4887_v32 = vsub.f32 %v6212_v51, %v4575_v18 }
 0x301   :  { %6259 = vst [vmem:[#allocation13_spill] sm:$0xff] %v4880_v17  ;;  %v1958_v55 = vmul.f32 %v4880_v17, %v4880_v17  ;;  %v2061_v61 = vsel %vm1717_vm0, %v1957_v12, 0.0 }
 0x302   :  { %v2054_v24 = vadd.f32 %v2053_v41, %v2052_v10  ;;  %6260 = vst [vmem:[#allocation14_spill] sm:$0xff] %v4887_v32  ;;  %v4894_v41 = vsub.f32 %v6213_v56, %v4575_v18  ;;  %v1959_v59 = vmul.f32 %v4887_v32, %v4887_v32 }
 0x303   :  { %v2063_v43 = vsel %vm1717_vm0, %v1958_v55, 0.0 }
 0x304   :  { %v2056_v44 = vadd.f32 %v2055_v15, %v2054_v24  ;;  %v6261_v15 = vld [vmem:[#allocation34_spill] sm:$0xff]  ;;  %v1960_v17 = vmul.f32 %v4894_v41, %v4894_v41  ;;  %v2065_v12 = vsel %vm1717_vm0, %v1959_v59, 0.0 }
 0x305   :  { %v4901_v51 = vsub.f32 %v6261_v15, %v4575_v18 }
 0x306   :  { %v2058_v10 = vadd.f32 %v2057_v33, %v2056_v44  ;;  %v6262_v33 = vld [vmem:[#allocation35_spill] sm:$0xff]  ;;  %v2067_v55 = vsel %vm1717_vm0, %v1960_v17, 0.0 }
 0x307   :  { %v4908_v56 = vsub.f32 %v6262_v33, %v4575_v18  ;;  %v1961_v32 = vmul.f32 %v4901_v51, %v4901_v51 }
 0x308   :  { %v2060_v24 = vadd.f32 %v2059_v4, %v2058_v10  ;;  %v6263_v4 = vld [vmem:[#allocation36_spill] sm:$0xff] }
 0x309   :  { %v4915_v15 = vsub.f32 %v6263_v4, %v4575_v18  ;;  %v1962_v33 = vmul.f32 %v4908_v56, %v4908_v56  ;;  %v2069_v59 = vsel %vm1717_vm0, %v1961_v32, 0.0 }
 0x30a   :  { %v2062_v44 = vadd.f32 %v2061_v61, %v2060_v24  ;;  %v4922_v61 = vsub.f32 %v4384_v13, %v4575_v18  ;;  %v4936_v13 = vsub.f32 %v4404_v49, %v4575_v18  ;;  %v4950_v49 = vsub.f32 %v4428_v8, %v4575_v18 }
 0x30b   :  { %v1963_v4 = vmul.f32 %v4915_v15, %v4915_v15  ;;  %v2071_v17 = vsel %vm1717_vm0, %v1962_v33, 0.0  ;;  %v4964_v8 = vsub.f32 %v4542_v26, %v4575_v18  ;;  %v4978_v26 = vsub.f32 %v4552_v7, %v4575_v18 }
 0x30c   :  { %v2064_v10 = vadd.f32 %v2063_v43, %v2062_v44  ;;  %v4929_v43 = vsub.f32 %v4394_v1, %v4575_v18  ;;  %v4943_v1 = vsub.f32 %v4414_v28, %v4575_v18  ;;  %v4957_v28 = vsub.f32 %v4535_v11, %v4575_v18 }
 0x30d   :  { %v2073_v32 = vsel %vm1717_vm0, %v1963_v4, 0.0  ;;  %6264 = vst [vmem:[#allocation15_spill] sm:$0xff] %v4964_v8  ;;  %v4971_v11 = vsub.f32 %v4549_v35, %v4575_v18  ;;  %v4985_v35 = vsub.f32 %v4559_v3, %v4575_v18  ;;  %v4992_v7 = vsub.f32 %v4564_v63, %v4575_v18 }
 0x30e   :  { %v2066_v24 = vadd.f32 %v2065_v12, %v2064_v10  ;;  %v1964_v12 = vmul.f32 %v4922_v61, %v4922_v61  ;;  %6265 = vst [vmem:[#allocation16_spill] sm:$0xff] %v4978_v26  ;;  %v1975_v63 = vmul.f32 %v4578_v27, %v4578_v27 }
 0x30f   :  { %6266 = vst [vmem:[#allocation17_spill] sm:$0xff] %v4985_v35  ;;  %v1973_v3 = vmul.f32 %v4985_v35, %v4985_v35 }
 0x310   :  { %v2068_v44 = vadd.f32 %v2067_v55, %v2066_v24  ;;  %v1965_v55 = vmul.f32 %v4929_v43, %v4929_v43  ;;  %v2075_v33 = vsel %vm1717_vm0, %v1964_v12, 0.0  ;;  %6267 = vst [vmem:[#allocation18_spill] sm:$0xff] %v4992_v7 }
 0x311   :  { %v2093_v18 = vsel %vm1717_vm0, %v1973_v3, 0.0  ;;  %v1979_v3 = vmul.f32 %v4590_v53, %v4590_v53 }
 0x312   :  { %v2070_v10 = vadd.f32 %v2069_v59, %v2068_v44  ;;  %v1966_v59 = vmul.f32 %v4936_v13, %v4936_v13  ;;  %v2077_v4 = vsel %vm1717_vm0, %v1965_v55, 0.0 }
 0x314   :  { %v2072_v24 = vadd.f32 %v2071_v17, %v2070_v10  ;;  %v1967_v17 = vmul.f32 %v4943_v1, %v4943_v1  ;;  %v2079_v12 = vsel %vm1717_vm0, %v1966_v59, 0.0 }
 0x316   :  { %v2074_v44 = vadd.f32 %v2073_v32, %v2072_v24  ;;  %v1968_v32 = vmul.f32 %v4950_v49, %v4950_v49  ;;  %v2081_v55 = vsel %vm1717_vm0, %v1967_v17, 0.0 }
 0x318   :  { %v2076_v10 = vadd.f32 %v2075_v33, %v2074_v44  ;;  %v1969_v33 = vmul.f32 %v4957_v28, %v4957_v28  ;;  %v2083_v59 = vsel %vm1717_vm0, %v1968_v32, 0.0 }
 0x31a   :  { %v2078_v24 = vadd.f32 %v2077_v4, %v2076_v10  ;;  %v1970_v4 = vmul.f32 %v4964_v8, %v4964_v8  ;;  %v2085_v17 = vsel %vm1717_vm0, %v1969_v33, 0.0  ;;  %v1974_v33 = vmul.f32 %v4992_v7, %v4992_v7 }
 0x31c   :  { %v2080_v44 = vadd.f32 %v2079_v12, %v2078_v24  ;;  %v1971_v12 = vmul.f32 %v4971_v11, %v4971_v11  ;;  %v2087_v32 = vsel %vm1717_vm0, %v1970_v4, 0.0  ;;  %v1976_v4 = vmul.f32 %v4581_v42, %v4581_v42 }
 0x31e   :  { %v2082_v10 = vadd.f32 %v2081_v55, %v2080_v44  ;;  %v1972_v55 = vmul.f32 %v4978_v26, %v4978_v26 }
 0x320   :  { %v2084_v24 = vadd.f32 %v2083_v59, %v2082_v10  ;;  %v2089_v59 = vsel %vm1717_vm0, %v1971_v12, 0.0  ;;  %v1977_v12 = vmul.f32 %v4584_v39, %v4584_v39 }
 0x322   :  { %v2086_v44 = vadd.f32 %v2085_v17, %v2084_v24  ;;  %v2091_v24 = vsel %vm1717_vm0, %v1972_v55, 0.0  ;;  %v2099_v55 = vsel %vm1717_vm0, %v1976_v4, 0.0 }
 0x324   :  { %v2088_v10 = vadd.f32 %v2087_v32, %v2086_v44  ;;  %v2095_v44 = vsel %vm1717_vm0, %v1974_v33, 0.0 }
 0x326   :  { %v2090_v8 = vadd.f32 %v2089_v59, %v2088_v10  ;;  %v2097_v10 = vsel %vm1717_vm0, %v1975_v63, 0.0 }
 0x328   :  { %v2092_v17 = vadd.f32 %v2091_v24, %v2090_v8  ;;  %v1978_v8 = vmul.f32 %v4587_v5, %v4587_v5 }
 0x32a   :  { %v2094_v26 = vadd.f32 %v2093_v18, %v2092_v17  ;;  %v2101_v17 = vsel %vm1717_vm0, %v1977_v12, 0.0 }
 0x32c   :  { %v2096_v32 = vadd.f32 %v2095_v44, %v2094_v26  ;;  %v2103_v26 = vsel %vm1717_vm0, %v1978_v8, 0.0  ;;  %v2105_v44 = vsel %vm1717_vm0, %v1979_v3, 0.0 }
 0x32e   :  { %v2098_v59 = vadd.f32 %v2097_v10, %v2096_v32 }
 0x330   :  { %v2100_v24 = vadd.f32 %v2099_v55, %v2098_v59 }
 0x332   :  { %v2102_v18 = vadd.f32 %v2101_v17, %v2100_v24 }
 0x334   :  { %v2104_v33 = vadd.f32 %v2103_v26, %v2102_v18 }
 0x336   :  { %v2106_v39 = vadd.f32 %v2105_v44, %v2104_v33 }
 0x338   :  { %v2107_v63 = vrot.slane %v2106_v39, 4 }
 0x33a   :  { %v2108_v32 = vadd.f32 %v2107_v63, %v2106_v39  ;;  %v2115_v39 = vld [vmem:[%s6100_s2] sm:$0x1] }
 0x33b   :  { %v6269_v63 = vld [vmem:[#allocation2_spill] sm:$0xff] }
 0x33c   :  { %v2109_v10 = vrot.slane %v2108_v32, 2 }
 0x33e   :  { %v2110_v42 = vadd.f32 %v2109_v10, %v2108_v32  ;;  %v6270_v32 = vld [vmem:[#allocation3_spill] sm:$0xff]  ;;  %v6271_v10 = vld [vmem:[#allocation4_spill] sm:$0xff] }
 0x340   :  { %v2111_v5 = vrot.slane %v2110_v42, 1 }
 0x342   :  { %v2112_v27 = vadd.f32 %v2111_v5, %v2110_v42  ;;  %v5030_v5 = vld [vmem:[%s6099_s3] ss:$0 sm:$0xff] }
 0x344   :  { %v2113_v4 = vmul.f32 0.001953125, %v2112_v27 }
 0x346   :  { %v2114_v59 = vmax.f32 %v2113_v4, 0.0  ;;  %v6272_v4 = vld [vmem:[#allocation5_spill] sm:$0xff] }
 0x348   :  { %v2116_v55 = vadd.f32 1e-05, %v2114_v59  ;;  %v6273_v59 = vld [vmem:[#allocation6_spill] sm:$0xff] }
 0x34a   :  { %3389 = vrsqrt.f32 %v2116_v55  ;;  %vm2123_vm2 = vweird.f32 %v2116_v55 }
 0x350   :  { %v3390_v7 = vpop.eup %3389 }
 0x351   :  { %v2118_v35 = vmul.f32 %v3390_v7, %v2116_v55  ;;  %vm2124_vm1 = vweird.f32 %v3390_v7  ;;  %v6274_v55 = vld [vmem:[#allocation7_spill] sm:$0xff] }
 0x352   :  { %vm2125_vm3 = vmor %vm2123_vm2, %vm2124_vm1 }
 0x353   :  { %v2119_v12 = vmul.f32 %v3390_v7, %v2118_v35 }
 0x355   :  { %v2120_v24 = vmul.f32 0.5, %v2119_v12 }
 0x357   :  { %v2121_v17 = vsub.f32 1.5, %v2120_v24  ;;  %v6275_v24 = vld [vmem:[#allocation8_spill] sm:$0xff] }
 0x359   :  { %v2122_v8 = vmul.f32 %v3390_v7, %v2121_v17 }
 0x35b   :  { %v2126_v3 = vsel %vm2125_vm3, %v3390_v7, %v2122_v8  ;;  %v6276_v8 = vld [vmem:[#allocation9_spill] sm:$0xff] }
 0x35c   :  { %v2127_v18 = vmul.f32 %v2126_v3, %v2115_v39  ;;  %v6277_v3 = vld [vmem:[#allocation10_spill] sm:$0xff] }
 0x35e   :  { %v5023_v42 = vperm.slane %v2127_v18, 0 }
 0x360   :  { %v2194_v27 = vmul.f32 %v5023_v42, %v4590_v53  ;;  %v5037_v26 = vmul.f32 %v5023_v42, %v4594_v19  ;;  %v5041_v7 = vmul.f32 %v5023_v42, %v4598_v50  ;;  %v5045_v33 = vmul.f32 %v5023_v42, %v4602_v46 }
 0x361   :  { %v5049_v53 = vmul.f32 %v5023_v42, %v4606_v54  ;;  %v5053_v44 = vmul.f32 %v5023_v42, %v4614_v21  ;;  %v5057_v19 = vmul.f32 %v5023_v42, %v4620_v47  ;;  %v5061_v50 = vmul.f32 %v5023_v42, %v4628_v48 }
 0x362   :  { %v5033_v35 = vadd.f32 %v5030_v5, %v2194_v27  ;;  %v5065_v46 = vmul.f32 %v5023_v42, %v4635_v29  ;;  %v5069_v54 = vmul.f32 %v5023_v42, %v4642_v36  ;;  %v5073_v21 = vmul.f32 %v5023_v42, %v4649_v57  ;;  %v6278_v27 = vld [vmem:[#allocation11_spill] sm:$0xff] }
 0x363   :  { %v5077_v47 = vmul.f32 %v5023_v42, %v4656_v0  ;;  %v5081_v48 = vmul.f32 %v5023_v42, %v4663_v22  ;;  %v5085_v29 = vmul.f32 %v5023_v42, %v4670_v30  ;;  %v5089_v36 = vmul.f32 %v5023_v42, %v4677_v52 }
 0x364   :  { %6268 = vst [vmem:[#allocation19_spill] sm:$0xff] %v5033_v35  ;;  %v5093_v57 = vmul.f32 %v5023_v42, %v4684_v60  ;;  %v5097_v0 = vmul.f32 %v5023_v42, %v4691_v9  ;;  %v5101_v22 = vmul.f32 %v5023_v42, %v4698_v14  ;;  %v5105_v30 = vmul.f32 %v5023_v42, %v4705_v58  ;;  %v6288_v35 = vld [vmem:[#allocation16_spill] sm:$0xff] }
 0x365   :  { %v5109_v52 = vmul.f32 %v5023_v42, %v4712_v31  ;;  %v5113_v60 = vmul.f32 %v5023_v42, %v4719_v38  ;;  %v5117_v9 = vmul.f32 %v5023_v42, %v4726_v40  ;;  %v5121_v14 = vmul.f32 %v5023_v42, %v4733_v34 }
 0x366   :  { %v5125_v58 = vmul.f32 %v5023_v42, %v4740_v16  ;;  %v5129_v31 = vmul.f32 %v5023_v42, %v4747_v62  ;;  %v5133_v38 = vmul.f32 %v5023_v42, %v4754_v37  ;;  %v5137_v40 = vmul.f32 %v5023_v42, %v4761_v2 }
 0x367   :  { %v5141_v34 = vmul.f32 %v5023_v42, %v4768_v23  ;;  %v5145_v16 = vmul.f32 %v5023_v42, %v4775_v45  ;;  %v5149_v62 = vmul.f32 %v5023_v42, %v4782_v20  ;;  %v5153_v37 = vmul.f32 %v5023_v42, %v6269_v63 }
 0x368   :  { %v5157_v2 = vmul.f32 %v5023_v42, %v6270_v32  ;;  %v5161_v23 = vmul.f32 %v5023_v42, %v6271_v10  ;;  %v5165_v45 = vmul.f32 %v5023_v42, %v6272_v4  ;;  %v5169_v20 = vmul.f32 %v5023_v42, %v6273_v59  ;;  %v6279_v4 = vld [vmem:[#allocation12_spill] sm:$0xff] }
 0x369   :  { %v5173_v12 = vmul.f32 %v5023_v42, %v6274_v55  ;;  %v5177_v17 = vmul.f32 %v5023_v42, %v6275_v24  ;;  %v5181_v39 = vmul.f32 %v5023_v42, %v6276_v8  ;;  %v5185_v18 = vmul.f32 %v5023_v42, %v6277_v3  ;;  %v6280_v55 = vld [vmem:[#allocation13_spill] sm:$0xff]  ;;  %v6281_v8 = vld [vmem:[#allocation14_spill] sm:$0xff] }
 0x36a   :  { %v5189_v63 = vmul.f32 %v5023_v42, %v6278_v27  ;;  %v5193_v32 = vmul.f32 %v5023_v42, %v4859_v6  ;;  %v5197_v10 = vmul.f32 %v5023_v42, %v4866_v25  ;;  %v5201_v59 = vmul.f32 %v5023_v42, %v6279_v4 }
 0x36b   :  { %v5205_v24 = vmul.f32 %v5023_v42, %v6280_v55  ;;  %v5209_v3 = vmul.f32 %v5023_v42, %v6281_v8  ;;  %v5213_v6 = vmul.f32 %v5023_v42, %v4894_v41  ;;  %v5217_v25 = vmul.f32 %v5023_v42, %v4901_v51  ;;  %v6285_v8 = vld [vmem:[#allocation15_spill] sm:$0xff] }
 0x36c   :  { %v5221_v27 = vmul.f32 %v5023_v42, %v4908_v56  ;;  %v5225_v4 = vmul.f32 %v5023_v42, %v4915_v15  ;;  %v5229_v55 = vmul.f32 %v5023_v42, %v4922_v61  ;;  %v5233_v41 = vmul.f32 %v5023_v42, %v4929_v43 }
 0x36d   :  { %v5237_v51 = vmul.f32 %v5023_v42, %v4936_v13  ;;  %v5241_v56 = vmul.f32 %v5023_v42, %v4943_v1  ;;  %v5245_v15 = vmul.f32 %v5023_v42, %v4950_v49  ;;  %v5249_v61 = vmul.f32 %v5023_v42, %v4957_v28 }
 0x36e   :  { %v5253_v43 = vmul.f32 %v5023_v42, %v6285_v8  ;;  %v5257_v13 = vmul.f32 %v5023_v42, %v4971_v11  ;;  %v5261_v1 = vmul.f32 %v5023_v42, %v6288_v35 }
 0x36f   :  { %6282 = vst [vmem:[#allocation20_spill] sm:$0xff] %v5241_v56  ;;  %v6290_v56 = vld [vmem:[#allocation17_spill] sm:$0xff] }
 0x370   :  { %6283 = vst [vmem:[#allocation21_spill] sm:$0xff] %v5245_v15  ;;  %v5265_v49 = vmul.f32 %v5023_v42, %v6290_v56  ;;  %v6291_v15 = vld [vmem:[#allocation18_spill] sm:$0xff] }
 0x371   :  { %6284 = vst [vmem:[#allocation22_spill] sm:$0xff] %v5249_v61  ;;  %v5269_v28 = vmul.f32 %v5023_v42, %v6291_v15  ;;  %v6292_v61 = vld [vmem:[#allocation32_spill] sm:$0xff]  ;;  %v5289_v15 = vadd.f32 %v5030_v5, %v5037_v26  ;;  %v5309_v26 = vadd.f32 %v5030_v5, %v5057_v19  ;;  %v5329_v19 = vadd.f32 %v5030_v5, %v5077_v47 }
 0x372   :  { %6286 = vst [vmem:[#allocation23_spill] sm:$0xff] %v5253_v43  ;;  %v5273_v8 = vmul.f32 %v5023_v42, %v6292_v61  ;;  %v6293_v43 = vld [vmem:[#allocation33_spill] sm:$0xff]  ;;  %v5293_v61 = vadd.f32 %v5030_v5, %v5041_v7  ;;  %v5313_v7 = vadd.f32 %v5030_v5, %v5061_v50  ;;  %v5333_v50 = vadd.f32 %v5030_v5, %v5081_v48 }
 0x373   :  { %6287 = vst [vmem:[#allocation24_spill] sm:$0xff] %v5257_v13  ;;  %v5277_v11 = vmul.f32 %v5023_v42, %v6293_v43  ;;  %v6294_v13 = vld [vmem:[#allocation37_spill] sm:$0xff]  ;;  %v5297_v43 = vadd.f32 %v5030_v5, %v5045_v33  ;;  %v5317_v33 = vadd.f32 %v5030_v5, %v5065_v46  ;;  %v5337_v46 = vadd.f32 %v5030_v5, %v5085_v29 }
 0x374   :  { %6289 = vst [vmem:[#allocation25_spill] sm:$0xff] %v5261_v1  ;;  %v5281_v35 = vmul.f32 %v5023_v42, %v6294_v13  ;;  %v6295_v1 = vld [vmem:[#allocation38_spill] sm:$0xff]  ;;  %v5301_v13 = vadd.f32 %v5030_v5, %v5049_v53  ;;  %v5321_v53 = vadd.f32 %v5030_v5, %v5069_v54  ;;  %v5341_v54 = vadd.f32 %v5030_v5, %v5089_v36 }
 0x375   :  { %v5285_v56 = vmul.f32 %v5023_v42, %v6295_v1  ;;  %v5305_v42 = vadd.f32 %v5030_v5, %v5053_v44  ;;  %v5325_v44 = vadd.f32 %v5030_v5, %v5073_v21  ;;  %v5345_v21 = vadd.f32 %v5030_v5, %v5093_v57 }
 0x376   :  { %v5349_v47 = vadd.f32 %v5030_v5, %v5097_v0  ;;  %v5353_v48 = vadd.f32 %v5030_v5, %v5101_v22  ;;  %v5357_v29 = vadd.f32 %v5030_v5, %v5105_v30  ;;  %v5361_v36 = vadd.f32 %v5030_v5, %v5109_v52  ;;  %v6301_v1 = vld [vmem:[#allocation20_spill] sm:$0xff] }
 0x377   :  { %v5365_v57 = vadd.f32 %v5030_v5, %v5113_v60  ;;  %v5369_v0 = vadd.f32 %v5030_v5, %v5117_v9  ;;  %v5373_v22 = vadd.f32 %v5030_v5, %v5121_v14  ;;  %v5377_v30 = vadd.f32 %v5030_v5, %v5125_v58 }
 0x378   :  { %v5381_v52 = vadd.f32 %v5030_v5, %v5129_v31  ;;  %v5385_v60 = vadd.f32 %v5030_v5, %v5133_v38  ;;  %v5389_v9 = vadd.f32 %v5030_v5, %v5137_v40  ;;  %v5393_v14 = vadd.f32 %v5030_v5, %v5141_v34 }
 0x379   :  { %v5397_v58 = vadd.f32 %v5030_v5, %v5145_v16  ;;  %v5401_v31 = vadd.f32 %v5030_v5, %v5149_v62  ;;  %v5405_v38 = vadd.f32 %v5030_v5, %v5153_v37  ;;  %v5409_v40 = vadd.f32 %v5030_v5, %v5157_v2 }
 0x37a   :  { %v5413_v34 = vadd.f32 %v5030_v5, %v5161_v23  ;;  %v5417_v16 = vadd.f32 %v5030_v5, %v5165_v45  ;;  %v5421_v62 = vadd.f32 %v5030_v5, %v5169_v20  ;;  %v5425_v37 = vadd.f32 %v5030_v5, %v5173_v12 }
 0x37b   :  { %v5429_v2 = vadd.f32 %v5030_v5, %v5177_v17  ;;  %v5433_v23 = vadd.f32 %v5030_v5, %v5181_v39  ;;  %v5437_v45 = vadd.f32 %v5030_v5, %v5185_v18  ;;  %v5441_v20 = vadd.f32 %v5030_v5, %v5189_v63 }
 0x37c   :  { %v5445_v12 = vadd.f32 %v5030_v5, %v5193_v32  ;;  %v5449_v17 = vadd.f32 %v5030_v5, %v5197_v10  ;;  %v5453_v39 = vadd.f32 %v5030_v5, %v5201_v59  ;;  %v5457_v18 = vadd.f32 %v5030_v5, %v5205_v24 }
 0x37d   :  { %v5461_v63 = vadd.f32 %v5030_v5, %v5209_v3  ;;  %v5465_v32 = vadd.f32 %v5030_v5, %v5213_v6  ;;  %v5469_v10 = vadd.f32 %v5030_v5, %v5217_v25  ;;  %v5473_v59 = vadd.f32 %v5030_v5, %v5221_v27 }
 0x37e   :  { %v5477_v24 = vadd.f32 %v5030_v5, %v5225_v4  ;;  %v5481_v3 = vadd.f32 %v5030_v5, %v5229_v55  ;;  %v5485_v6 = vadd.f32 %v5030_v5, %v5233_v41  ;;  %v5489_v25 = vadd.f32 %v5030_v5, %v5237_v51  ;;  %v6306_v51 = vld [vmem:[#allocation24_spill] sm:$0xff] }
 0x37f   :  { %6296 = vst [vmem:[#allocation26_spill] sm:$0xff] %v5473_v59  ;;  %v5493_v27 = vadd.f32 %v5030_v5, %v6301_v1  ;;  %v6303_v59 = vld [vmem:[#allocation21_spill] sm:$0xff]  ;;  %vm2263_vm4 = vcmp.ge.f32.partialorder %v5289_v15, 0.0  ;;  %vm2264_vm5 = vcmp.ge.f32.partialorder %v5293_v61, 0.0  ;;  %vm2265_vm6 = vcmp.ge.f32.partialorder %v5297_v43, 0.0 }
 0x380   :  { %6297 = vst [vmem:[#allocation27_spill] sm:$0xff] %v5477_v24  ;;  %v5497_v4 = vadd.f32 %v5030_v5, %v6303_v59  ;;  %v6304_v24 = vld [vmem:[#allocation22_spill] sm:$0xff]  ;;  %v6307_v1 = vld [vmem:[#allocation25_spill] sm:$0xff]  ;;  %v2328_v59 = vmul.f32 0.2, %v5293_v61  ;;  %vm2266_vm7 = vcmp.ge.f32.partialorder %v5301_v13, 0.0 }
 0x381   :  { %6298 = vst [vmem:[#allocation28_spill] sm:$0xff] %v5481_v3  ;;  %v5501_v55 = vadd.f32 %v5030_v5, %v6304_v24  ;;  %v6305_v3 = vld [vmem:[#allocation23_spill] sm:$0xff]  ;;  %v5520_v24 = vadd.f32 %v5030_v5, %v5265_v49  ;;  %v2330_v49 = vmul.f32 0.2, %v5301_v13  ;;  %vm2267_vm8 = vcmp.ge.f32.partialorder %v5305_v42, 0.0 }
 0x382   :  { %6299 = vst [vmem:[#allocation29_spill] sm:$0xff] %v5485_v6  ;;  %v5505_v41 = vadd.f32 %v5030_v5, %v6305_v3  ;;  %v2327_v6 = vmul.f32 0.2, %v5289_v15  ;;  %v5524_v3 = vadd.f32 %v5030_v5, %v5269_v28  ;;  %v5540_v28 = vadd.f32 %v5030_v5, %v5281_v35 }
 0x383   :  { %6300 = vst [vmem:[#allocation30_spill] sm:$0xff] %v5489_v25  ;;  %v5510_v25 = vadd.f32 %v5030_v5, %v6306_v51  ;;  %v2329_v51 = vmul.f32 0.2, %v5297_v43  ;;  %vm2268_vm9 = vcmp.ge.f32.partialorder %v5309_v26, 0.0  ;;  %vm2269_vm10 = vcmp.ge.f32.partialorder %v5313_v7, 0.0 }
 0x384   :  { %6302 = vst [vmem:[#allocation31_spill] sm:$0xff] %v5493_v27  ;;  %v5514_v27 = vadd.f32 %v5030_v5, %v6307_v1  ;;  %v5530_v1 = vadd.f32 %v5030_v5, %v5273_v8  ;;  %v5547_v8 = vadd.f32 %v5030_v5, %v5285_v56  ;;  %v2333_v35 = vmul.f32 0.2, %v5313_v7 }
 0x385   :  { %6309 = vst [vmem:[#allocation35_spill] sm:$0xff] %v5520_v24  ;;  %v2391_v24 = vsel %vm2263_vm4, %v5289_v15, %v2327_v6  ;;  %vm2270_vm11 = vcmp.ge.f32.partialorder %v5317_v33, 0.0  ;;  %v2334_v15 = vmul.f32 0.2, %v5317_v33  ;;  %vm2271_vm12 = vcmp.ge.f32.partialorder %v5321_v53, 0.0 }
 0x386   :  { %6308 = vst [vmem:[#allocation34_spill] sm:$0xff] %v5514_v27  ;;  %v5534_v27 = vadd.f32 %v5030_v5, %v5277_v11  ;;  %v2332_v11 = vmul.f32 0.2, %v5309_v26  ;;  %v2394_v5 = vsel %vm2266_vm7, %v5301_v13, %v2330_v49  ;;  %v2455_v56 = vpack.c.bf16 %v2391_v24, %v2391_v24 }
 0x387   :  { %6310 = vst [vmem:[#allocation36_spill] sm:$0xff] %v5524_v3  ;;  %v2331_v3 = vmul.f32 0.2, %v5305_v42  ;;  %v2335_v6 = vmul.f32 0.2, %v5321_v53  ;;  %vm2272_vm13 = vcmp.ge.f32.partialorder %v5325_v44, 0.0  ;;  %v2397_v13 = vsel %vm2269_vm10, %v5313_v7, %v2333_v35 }
 0x388   :  { %6311 = vst [vmem:[#allocation2_spill] sm:$0xff] %v5530_v1  ;;  %v2337_v1 = vmul.f32 0.2, %v5329_v19  ;;  %v2458_v24 = vpack.c.bf16 %v2394_v5, %v2394_v5  ;;  %vm2273_vm15 = vcmp.ge.f32.partialorder %v5329_v19, 0.0  ;;  %vm2274_vm0 = vcmp.ge.f32.partialorder %v5333_v50, 0.0 }
 0x389   :  { %6312 = vst [vmem:[#allocation3_spill] sm:$0xff] %v5534_v27  ;;  %v2392_v27 = vsel %vm2264_vm5, %v5293_v61, %v2328_v59  ;;  %v2395_v61 = vsel %vm2267_vm8, %v5305_v42, %v2331_v3  ;;  %v2338_v42 = vmul.f32 0.2, %v5333_v50  ;;  %v2399_v7 = vsel %vm2271_vm12, %v5321_v53, %v2335_v6 }
 0x38a   :  { %6313 = vst [vmem:[#allocation4_spill] sm:$0xff] %v5540_v28  ;;  %v2393_v28 = vsel %vm2265_vm6, %v5297_v43, %v2329_v51  ;;  %v2456_v59 = vpack.c.bf16 %v2392_v27, %v2392_v27  ;;  %v2396_v43 = vsel %vm2268_vm9, %v5309_v26, %v2332_v11  ;;  %v2398_v27 = vsel %vm2270_vm11, %v5317_v33, %v2334_v15 }
 0x38b   :  { %6314 = vst [vmem:[#allocation5_spill] sm:$0xff] %v5547_v8  ;;  %v2336_v8 = vmul.f32 0.2, %v5325_v44  ;;  %v2457_v51 = vpack.c.bf16 %v2393_v28, %v2393_v28  ;;  %v2459_v3 = vpack.c.bf16 %v2395_v61, %v2395_v61  ;;  %v2339_v26 = vmul.f32 0.2, %v5337_v46 }
 0x38c   :  { %2520 = vst.msk [vmem:[%s6101_s4] sm:$0xf] %vm2519_vm14, %v2455_v56  ;;  %v2460_v49 = vpack.c.bf16 %v2396_v43, %v2396_v43  ;;  %vm2275_vm1 = vcmp.ge.f32.partialorder %v5337_v46, 0.0  ;;  %v2340_v33 = vmul.f32 0.2, %v5341_v54  ;;  %v2461_v11 = vpack.c.bf16 %v2397_v13, %v2397_v13 }
 0x38d   :  { %2521 = vst.msk [vmem:[%s6101_s4 + $0x4] sm:$0xf] %vm2519_vm14, %v2456_v59  ;;  %v2400_v28 = vsel %vm2272_vm13, %v5325_v44, %v2336_v8  ;;  %vm2276_vm2 = vcmp.ge.f32.partialorder %v5341_v54, 0.0  ;;  %v2341_v53 = vmul.f32 0.2, %v5345_v21  ;;  %v2401_v35 = vsel %vm2273_vm15, %v5329_v19, %v2337_v1 }
 0x38e   :  { %2522 = vst.msk [vmem:[%s6101_s4 + $0x8] sm:$0xf] %vm2519_vm14, %v2457_v51  ;;  %v2462_v15 = vpack.c.bf16 %v2398_v27, %v2398_v27  ;;  %vm2277_vm3 = vcmp.ge.f32.partialorder %v5345_v21, 0.0  ;;  %v2342_v44 = vmul.f32 0.2, %v5349_v47  ;;  %v2402_v8 = vsel %vm2274_vm0, %v5333_v50, %v2338_v42 }
 0x38f   :  { %2523 = vst.msk [vmem:[%s6101_s4 + $0xc] sm:$0xf] %vm2519_vm14, %v2458_v24  ;;  %v2463_v5 = vpack.c.bf16 %v2399_v7, %v2399_v7  ;;  %vm2278_vm4 = vcmp.ge.f32.partialorder %v5349_v47, 0.0  ;;  %v2343_v19 = vmul.f32 0.2, %v5353_v48  ;;  %v2403_v1 = vsel %vm2275_vm1, %v5337_v46, %v2339_v26 }
 0x390   :  { %2524 = vst.msk [vmem:[%s6101_s4 + $0x10] sm:$0xf] %vm2519_vm14, %v2459_v3  ;;  %v2464_v56 = vpack.c.bf16 %v2400_v28, %v2400_v28  ;;  %vm2279_vm5 = vcmp.ge.f32.partialorder %v5353_v48, 0.0  ;;  %v2344_v50 = vmul.f32 0.2, %v5357_v29  ;;  %v2404_v6 = vsel %vm2276_vm2, %v5341_v54, %v2340_v33 }
 0x391   :  { %2525 = vst.msk [vmem:[%s6101_s4 + $0x14] sm:$0xf] %vm2519_vm14, %v2460_v49  ;;  %v2465_v61 = vpack.c.bf16 %v2401_v35, %v2401_v35  ;;  %vm2280_vm6 = vcmp.ge.f32.partialorder %v5357_v29, 0.0  ;;  %v2345_v46 = vmul.f32 0.2, %v5361_v36  ;;  %v2405_v59 = vsel %vm2277_vm3, %v5345_v21, %v2341_v53 }
 0x392   :  { %2526 = vst.msk [vmem:[%s6101_s4 + $0x18] sm:$0xf] %vm2519_vm14, %v2461_v11  ;;  %v2466_v43 = vpack.c.bf16 %v2402_v8, %v2402_v8  ;;  %vm2281_vm7 = vcmp.ge.f32.partialorder %v5361_v36, 0.0  ;;  %v2346_v54 = vmul.f32 0.2, %v5365_v57  ;;  %v2406_v51 = vsel %vm2278_vm4, %v5349_v47, %v2342_v44 }
 0x393   :  { %2527 = vst.msk [vmem:[%s6101_s4 + $0x1c] sm:$0xf] %vm2519_vm14, %v2462_v15  ;;  %v2467_v13 = vpack.c.bf16 %v2403_v1, %v2403_v1  ;;  %vm2282_vm8 = vcmp.ge.f32.partialorder %v5365_v57, 0.0  ;;  %v2347_v21 = vmul.f32 0.2, %v5369_v0  ;;  %v2407_v24 = vsel %vm2279_vm5, %v5353_v48, %v2343_v19 }
 0x394   :  { %2528 = vst.msk [vmem:[%s6101_s4 + $0x20] sm:$0xf] %vm2519_vm14, %v2463_v5  ;;  %v2468_v42 = vpack.c.bf16 %v2404_v6, %v2404_v6  ;;  %vm2283_vm9 = vcmp.ge.f32.partialorder %v5369_v0, 0.0  ;;  %v2348_v47 = vmul.f32 0.2, %v5373_v22  ;;  %v2408_v27 = vsel %vm2280_vm6, %v5357_v29, %v2344_v50 }
 0x395   :  { %2529 = vst.msk [vmem:[%s6101_s4 + $0x24] sm:$0xf] %vm2519_vm14, %v2464_v56  ;;  %v2469_v3 = vpack.c.bf16 %v2405_v59, %v2405_v59  ;;  %vm2284_vm10 = vcmp.ge.f32.partialorder %v5373_v22, 0.0  ;;  %v2349_v48 = vmul.f32 0.2, %v5377_v30  ;;  %v2409_v26 = vsel %vm2281_vm7, %v5361_v36, %v2345_v46 }
 0x396   :  { %2530 = vst.msk [vmem:[%s6101_s4 + $0x28] sm:$0xf] %vm2519_vm14, %v2465_v61  ;;  %v2470_v7 = vpack.c.bf16 %v2406_v51, %v2406_v51  ;;  %vm2285_vm11 = vcmp.ge.f32.partialorder %v5377_v30, 0.0  ;;  %v2350_v29 = vmul.f32 0.2, %v5381_v52  ;;  %v2410_v49 = vsel %vm2282_vm8, %v5365_v57, %v2346_v54 }
 0x397   :  { %2531 = vst.msk [vmem:[%s6101_s4 + $0x2c] sm:$0xf] %vm2519_vm14, %v2466_v43  ;;  %v2471_v33 = vpack.c.bf16 %v2407_v24, %v2407_v24  ;;  %vm2286_vm12 = vcmp.ge.f32.partialorder %v5381_v52, 0.0  ;;  %v2351_v36 = vmul.f32 0.2, %v5385_v60  ;;  %v2411_v28 = vsel %vm2283_vm9, %v5369_v0, %v2347_v21 }
 0x398   :  { %2532 = vst.msk [vmem:[%s6101_s4 + $0x30] sm:$0xf] %vm2519_vm14, %v2467_v13  ;;  %v2472_v11 = vpack.c.bf16 %v2408_v27, %v2408_v27  ;;  %vm2287_vm13 = vcmp.ge.f32.partialorder %v5385_v60, 0.0  ;;  %v2352_v57 = vmul.f32 0.2, %v5389_v9  ;;  %v2412_v53 = vsel %vm2284_vm10, %v5373_v22, %v2348_v47 }
 0x399   :  { %2533 = vst.msk [vmem:[%s6101_s4 + $0x34] sm:$0xf] %vm2519_vm14, %v2468_v42  ;;  %v2473_v35 = vpack.c.bf16 %v2409_v26, %v2409_v26  ;;  %vm2288_vm15 = vcmp.ge.f32.partialorder %v5389_v9, 0.0  ;;  %v2353_v0 = vmul.f32 0.2, %v5393_v14  ;;  %v2413_v15 = vsel %vm2285_vm11, %v5377_v30, %v2349_v48 }
 0x39a   :  { %2534 = vst.msk [vmem:[%s6101_s4 + $0x38] sm:$0xf] %vm2519_vm14, %v2469_v3  ;;  %v2474_v44 = vpack.c.bf16 %v2410_v49, %v2410_v49  ;;  %vm2289_vm0 = vcmp.ge.f32.partialorder %v5393_v14, 0.0  ;;  %v2354_v22 = vmul.f32 0.2, %v5397_v58  ;;  %v2414_v8 = vsel %vm2286_vm12, %v5381_v52, %v2350_v29 }
 0x39b   :  { %2535 = vst.msk [vmem:[%s6101_s4 + $0x3c] sm:$0xf] %vm2519_vm14, %v2470_v7  ;;  %v2475_v5 = vpack.c.bf16 %v2411_v28, %v2411_v28  ;;  %vm2290_vm1 = vcmp.ge.f32.partialorder %v5397_v58, 0.0  ;;  %v2355_v30 = vmul.f32 0.2, %v5401_v31  ;;  %v2415_v19 = vsel %vm2287_vm13, %v5385_v60, %v2351_v36 }
 0x39c   :  { %2536 = vst.msk [vmem:[%s6101_s4 + $0x40] sm:$0xf] %vm2519_vm14, %v2471_v33  ;;  %v2476_v1 = vpack.c.bf16 %v2412_v53, %v2412_v53  ;;  %vm2291_vm2 = vcmp.ge.f32.partialorder %v5401_v31, 0.0  ;;  %v2356_v52 = vmul.f32 0.2, %v5405_v38  ;;  %v2416_v56 = vsel %vm2288_vm15, %v5389_v9, %v2352_v57 }
 0x39d   :  { %2537 = vst.msk [vmem:[%s6101_s4 + $0x44] sm:$0xf] %vm2519_vm14, %v2472_v11  ;;  %v2477_v50 = vpack.c.bf16 %v2413_v15, %v2413_v15  ;;  %vm2292_vm3 = vcmp.ge.f32.partialorder %v5405_v38, 0.0  ;;  %v2357_v60 = vmul.f32 0.2, %v5409_v40  ;;  %v2417_v6 = vsel %vm2289_vm0, %v5393_v14, %v2353_v0 }
 0x39e   :  { %2538 = vst.msk [vmem:[%s6101_s4 + $0x48] sm:$0xf] %vm2519_vm14, %v2473_v35  ;;  %v2478_v61 = vpack.c.bf16 %v2414_v8, %v2414_v8  ;;  %vm2293_vm4 = vcmp.ge.f32.partialorder %v5409_v40, 0.0  ;;  %v2358_v9 = vmul.f32 0.2, %v5413_v34  ;;  %v2418_v46 = vsel %vm2290_vm1, %v5397_v58, %v2354_v22 }
 0x39f   :  { %2539 = vst.msk [vmem:[%s6101_s4 + $0x4c] sm:$0xf] %vm2519_vm14, %v2474_v44  ;;  %v2479_v59 = vpack.c.bf16 %v2415_v19, %v2415_v19  ;;  %vm2294_vm5 = vcmp.ge.f32.partialorder %v5413_v34, 0.0  ;;  %v2359_v14 = vmul.f32 0.2, %v5417_v16  ;;  %v2419_v43 = vsel %vm2291_vm2, %v5401_v31, %v2355_v30 }
 0x3a0   :  { %2540 = vst.msk [vmem:[%s6101_s4 + $0x50] sm:$0xf] %vm2519_vm14, %v2475_v5  ;;  %v2480_v54 = vpack.c.bf16 %v2416_v56, %v2416_v56  ;;  %vm2295_vm6 = vcmp.ge.f32.partialorder %v5417_v16, 0.0  ;;  %v2360_v58 = vmul.f32 0.2, %v5421_v62  ;;  %v2420_v51 = vsel %vm2292_vm3, %v5405_v38, %v2356_v52 }
 0x3a1   :  { %2541 = vst.msk [vmem:[%s6101_s4 + $0x54] sm:$0xf] %vm2519_vm14, %v2476_v1  ;;  %v2481_v13 = vpack.c.bf16 %v2417_v6, %v2417_v6  ;;  %vm2296_vm7 = vcmp.ge.f32.partialorder %v5421_v62, 0.0  ;;  %v2361_v31 = vmul.f32 0.2, %v5425_v37  ;;  %v2421_v21 = vsel %vm2293_vm4, %v5409_v40, %v2357_v60 }
 0x3a2   :  { %2542 = vst.msk [vmem:[%s6101_s4 + $0x58] sm:$0xf] %vm2519_vm14, %v2477_v50  ;;  %v2482_v24 = vpack.c.bf16 %v2418_v46, %v2418_v46  ;;  %vm2297_vm8 = vcmp.ge.f32.partialorder %v5425_v37, 0.0  ;;  %v2362_v38 = vmul.f32 0.2, %v5429_v2  ;;  %v2422_v42 = vsel %vm2294_vm5, %v5413_v34, %v2358_v9 }
 0x3a3   :  { %2543 = vst.msk [vmem:[%s6101_s4 + $0x5c] sm:$0xf] %vm2519_vm14, %v2478_v61  ;;  %v2483_v47 = vpack.c.bf16 %v2419_v43, %v2419_v43  ;;  %vm2298_vm9 = vcmp.ge.f32.partialorder %v5429_v2, 0.0  ;;  %v2363_v40 = vmul.f32 0.2, %v5433_v23  ;;  %v2423_v27 = vsel %vm2295_vm6, %v5417_v16, %v2359_v14 }
 0x3a4   :  { %2544 = vst.msk [vmem:[%s6101_s4 + $0x60] sm:$0xf] %vm2519_vm14, %v2479_v59  ;;  %v2484_v3 = vpack.c.bf16 %v2420_v51, %v2420_v51  ;;  %vm2299_vm10 = vcmp.ge.f32.partialorder %v5433_v23, 0.0  ;;  %v2364_v34 = vmul.f32 0.2, %v5437_v45  ;;  %v2424_v48 = vsel %vm2296_vm7, %v5421_v62, %v2360_v58 }
 0x3a5   :  { %2545 = vst.msk [vmem:[%s6101_s4 + $0x64] sm:$0xf] %vm2519_vm14, %v2480_v54  ;;  %v2485_v26 = vpack.c.bf16 %v2421_v21, %v2421_v21  ;;  %vm2300_vm11 = vcmp.ge.f32.partialorder %v5437_v45, 0.0  ;;  %v2365_v16 = vmul.f32 0.2, %v5441_v20  ;;  %v2425_v7 = vsel %vm2297_vm8, %v5425_v37, %v2361_v31 }
 0x3a6   :  { %2546 = vst.msk [vmem:[%s6101_s4 + $0x68] sm:$0xf] %vm2519_vm14, %v2481_v13  ;;  %v2486_v29 = vpack.c.bf16 %v2422_v42, %v2422_v42  ;;  %vm2301_vm12 = vcmp.ge.f32.partialorder %v5441_v20, 0.0  ;;  %v2366_v62 = vmul.f32 0.2, %v5445_v12  ;;  %v2426_v49 = vsel %vm2298_vm9, %v5429_v2, %v2362_v38 }
 0x3a7   :  { %2547 = vst.msk [vmem:[%s6101_s4 + $0x6c] sm:$0xf] %vm2519_vm14, %v2482_v24  ;;  %v2487_v33 = vpack.c.bf16 %v2423_v27, %v2423_v27  ;;  %vm2302_vm13 = vcmp.ge.f32.partialorder %v5445_v12, 0.0  ;;  %v2367_v37 = vmul.f32 0.2, %v5449_v17  ;;  %v2427_v36 = vsel %vm2299_vm10, %v5433_v23, %v2363_v40 }
 0x3a8   :  { %2548 = vst.msk [vmem:[%s6101_s4 + $0x70] sm:$0xf] %vm2519_vm14, %v2483_v47  ;;  %v2488_v28 = vpack.c.bf16 %v2424_v48, %v2424_v48  ;;  %vm2303_vm15 = vcmp.ge.f32.partialorder %v5449_v17, 0.0  ;;  %v2368_v2 = vmul.f32 0.2, %v5453_v39  ;;  %v2428_v11 = vsel %vm2300_vm11, %v5437_v45, %v2364_v34 }
 0x3a9   :  { %2549 = vst.msk [vmem:[%s6101_s4 + $0x74] sm:$0xf] %vm2519_vm14, %v2484_v3  ;;  %v2489_v57 = vpack.c.bf16 %v2425_v7, %v2425_v7  ;;  %vm2304_vm0 = vcmp.ge.f32.partialorder %v5453_v39, 0.0  ;;  %v2369_v23 = vmul.f32 0.2, %v5457_v18  ;;  %v2429_v53 = vsel %vm2301_vm12, %v5441_v20, %v2365_v16  ;;  %v6321_v16 = vld [vmem:[#allocation34_spill] sm:$0xff] }
 0x3aa   :  { %2550 = vst.msk [vmem:[%s6101_s4 + $0x78] sm:$0xf] %vm2519_vm14, %v2485_v26  ;;  %v2490_v35 = vpack.c.bf16 %v2426_v49, %v2426_v49  ;;  %vm2305_vm1 = vcmp.ge.f32.partialorder %v5457_v18, 0.0  ;;  %v2370_v45 = vmul.f32 0.2, %v5461_v63  ;;  %v2430_v0 = vsel %vm2302_vm13, %v5445_v12, %v2366_v62  ;;  %v6322_v49 = vld [vmem:[#allocation35_spill] sm:$0xff] }
 0x3ab   :  { %2551 = vst.msk [vmem:[%s6101_s4 + $0x7c] sm:$0xf] %vm2519_vm14, %v2486_v29  ;;  %v2491_v15 = vpack.c.bf16 %v2427_v36, %v2427_v36  ;;  %vm2306_vm2 = vcmp.ge.f32.partialorder %v5461_v63, 0.0  ;;  %v2371_v20 = vmul.f32 0.2, %v5465_v32  ;;  %v2431_v44 = vsel %vm2303_vm15, %v5449_v17, %v2367_v37  ;;  %v6315_v17 = vld [vmem:[#allocation26_spill] sm:$0xff] }
 0x3ac   :  { %2552 = vst.msk [vmem:[%s6101_s4 + $0x80] sm:$0xf] %vm2519_vm14, %v2487_v33  ;;  %v2492_v22 = vpack.c.bf16 %v2428_v11, %v2428_v11  ;;  %vm2307_vm3 = vcmp.ge.f32.partialorder %v5465_v32, 0.0  ;;  %v2372_v12 = vmul.f32 0.2, %v5469_v10  ;;  %v2432_v8 = vsel %vm2304_vm0, %v5453_v39, %v2368_v2  ;;  %v6316_v39 = vld [vmem:[#allocation27_spill] sm:$0xff] }
 0x3ad   :  { %2553 = vst.msk [vmem:[%s6101_s4 + $0x84] sm:$0xf] %vm2519_vm14, %v2488_v28  ;;  %v2493_v5 = vpack.c.bf16 %v2429_v53, %v2429_v53  ;;  %vm2308_vm4 = vcmp.ge.f32.partialorder %v5469_v10, 0.0  ;;  %v2373_v30 = vmul.f32 0.2, %v6315_v17  ;;  %v2433_v19 = vsel %vm2305_vm1, %v5457_v18, %v2369_v23  ;;  %v6317_v18 = vld [vmem:[#allocation28_spill] sm:$0xff] }
 0x3ae   :  { %2554 = vst.msk [vmem:[%s6101_s4 + $0x88] sm:$0xf] %vm2519_vm14, %v2489_v57  ;;  %v2494_v1 = vpack.c.bf16 %v2430_v0, %v2430_v0  ;;  %vm2309_vm5 = vcmp.ge.f32.partialorder %v6315_v17, 0.0  ;;  %v2374_v52 = vmul.f32 0.2, %v6316_v39  ;;  %v2434_v56 = vsel %vm2306_vm2, %v5461_v63, %v2370_v45  ;;  %v6318_v63 = vld [vmem:[#allocation29_spill] sm:$0xff] }
 0x3af   :  { %2555 = vst.msk [vmem:[%s6101_s4 + $0x8c] sm:$0xf] %vm2519_vm14, %v2490_v35  ;;  %v2495_v50 = vpack.c.bf16 %v2431_v44, %v2431_v44  ;;  %vm2310_vm6 = vcmp.ge.f32.partialorder %v6316_v39, 0.0  ;;  %v2375_v60 = vmul.f32 0.2, %v6317_v18  ;;  %v2435_v6 = vsel %vm2307_vm3, %v5465_v32, %v2371_v20  ;;  %v6319_v32 = vld [vmem:[#allocation30_spill] sm:$0xff] }
 0x3b0   :  { %2556 = vst.msk [vmem:[%s6101_s4 + $0x90] sm:$0xf] %vm2519_vm14, %v2491_v15  ;;  %v2496_v61 = vpack.c.bf16 %v2432_v8, %v2432_v8  ;;  %vm2311_vm7 = vcmp.ge.f32.partialorder %v6317_v18, 0.0  ;;  %v2376_v9 = vmul.f32 0.2, %v6318_v63  ;;  %v2436_v46 = vsel %vm2308_vm4, %v5469_v10, %v2372_v12  ;;  %v6320_v10 = vld [vmem:[#allocation31_spill] sm:$0xff] }
 0x3b1   :  { %2557 = vst.msk [vmem:[%s6101_s4 + $0x94] sm:$0xf] %vm2519_vm14, %v2492_v22  ;;  %v2497_v59 = vpack.c.bf16 %v2433_v19, %v2433_v19  ;;  %vm2312_vm8 = vcmp.ge.f32.partialorder %v6318_v63, 0.0  ;;  %v2377_v14 = vmul.f32 0.2, %v6319_v32  ;;  %v2437_v43 = vsel %vm2309_vm5, %v6315_v17, %v2373_v30  ;;  %v6327_v22 = vld [vmem:[#allocation5_spill] sm:$0xff] }
 0x3b2   :  { %2558 = vst.msk [vmem:[%s6101_s4 + $0x98] sm:$0xf] %vm2519_vm14, %v2493_v5  ;;  %v2498_v54 = vpack.c.bf16 %v2434_v56, %v2434_v56  ;;  %vm2313_vm9 = vcmp.ge.f32.partialorder %v6319_v32, 0.0  ;;  %v2378_v58 = vmul.f32 0.2, %v6320_v10  ;;  %v2438_v51 = vsel %vm2310_vm6, %v6316_v39, %v2374_v52  ;;  %v6328_v17 = vld [vmem:[#allocation19_spill] sm:$0xff] }
 0x3b3   :  { %2559 = vst.msk [vmem:[%s6101_s4 + $0x9c] sm:$0xf] %vm2519_vm14, %v2494_v1  ;;  %v2499_v13 = vpack.c.bf16 %v2435_v6, %v2435_v6  ;;  %vm2314_vm10 = vcmp.ge.f32.partialorder %v6320_v10, 0.0  ;;  %v2379_v31 = vmul.f32 0.2, %v5497_v4  ;;  %v2439_v21 = vsel %vm2311_vm7, %v6317_v18, %v2375_v60 }
 0x3b4   :  { %2560 = vst.msk [vmem:[%s6101_s4 + $0xa0] sm:$0xf] %vm2519_vm14, %v2495_v50  ;;  %v2500_v24 = vpack.c.bf16 %v2436_v46, %v2436_v46  ;;  %vm2315_vm11 = vcmp.ge.f32.partialorder %v5497_v4, 0.0  ;;  %v2380_v38 = vmul.f32 0.2, %v5501_v55  ;;  %v2440_v42 = vsel %vm2312_vm8, %v6318_v63, %v2376_v9 }
 0x3b5   :  { %2561 = vst.msk [vmem:[%s6101_s4 + $0xa4] sm:$0xf] %vm2519_vm14, %v2496_v61  ;;  %v2501_v47 = vpack.c.bf16 %v2437_v43, %v2437_v43  ;;  %vm2316_vm12 = vcmp.ge.f32.partialorder %v5501_v55, 0.0  ;;  %v2381_v40 = vmul.f32 0.2, %v5505_v41  ;;  %v2441_v27 = vsel %vm2313_vm9, %v6319_v32, %v2377_v14 }
 0x3b6   :  { %2562 = vst.msk [vmem:[%s6101_s4 + $0xa8] sm:$0xf] %vm2519_vm14, %v2497_v59  ;;  %v2502_v3 = vpack.c.bf16 %v2438_v51, %v2438_v51  ;;  %vm2317_vm13 = vcmp.ge.f32.partialorder %v5505_v41, 0.0  ;;  %v2382_v34 = vmul.f32 0.2, %v5510_v25  ;;  %v2442_v48 = vsel %vm2314_vm10, %v6320_v10, %v2378_v58 }
 0x3b7   :  { %2563 = vst.msk [vmem:[%s6101_s4 + $0xac] sm:$0xf] %vm2519_vm14, %v2498_v54  ;;  %v2503_v26 = vpack.c.bf16 %v2439_v21, %v2439_v21  ;;  %vm2318_vm15 = vcmp.ge.f32.partialorder %v5510_v25, 0.0  ;;  %v2383_v7 = vmul.f32 0.2, %v6321_v16  ;;  %v2443_v29 = vsel %vm2315_vm11, %v5497_v4, %v2379_v31  ;;  %v6323_v4 = vld [vmem:[#allocation36_spill] sm:$0xff] }
 0x3b8   :  { %2564 = vst.msk [vmem:[%s6101_s4 + $0xb0] sm:$0xf] %vm2519_vm14, %v2499_v13  ;;  %v2504_v62 = vpack.c.bf16 %v2440_v42, %v2440_v42  ;;  %vm2319_vm0 = vcmp.ge.f32.partialorder %v6321_v16, 0.0  ;;  %v2384_v33 = vmul.f32 0.2, %v6322_v49  ;;  %v2444_v37 = vsel %vm2316_vm12, %v5501_v55, %v2380_v38  ;;  %v6324_v55 = vld [vmem:[#allocation2_spill] sm:$0xff] }
 0x3b9   :  { %2565 = vst.msk [vmem:[%s6101_s4 + $0xb4] sm:$0xf] %vm2519_vm14, %v2500_v24  ;;  %v2505_v36 = vpack.c.bf16 %v2441_v27, %v2441_v27  ;;  %vm2320_vm1 = vcmp.ge.f32.partialorder %v6322_v49, 0.0  ;;  %v2385_v28 = vmul.f32 0.2, %v6323_v4  ;;  %v2445_v2 = vsel %vm2317_vm13, %v5505_v41, %v2381_v40  ;;  %v6325_v41 = vld [vmem:[#allocation3_spill] sm:$0xff] }
 0x3ba   :  { %2566 = vst.msk [vmem:[%s6101_s4 + $0xb8] sm:$0xf] %vm2519_vm14, %v2501_v47  ;;  %v2506_v11 = vpack.c.bf16 %v2442_v48, %v2442_v48  ;;  %vm2321_vm2 = vcmp.ge.f32.partialorder %v6323_v4, 0.0  ;;  %v2386_v57 = vmul.f32 0.2, %v6324_v55  ;;  %v2446_v23 = vsel %vm2318_vm15, %v5510_v25, %v2382_v34  ;;  %v6326_v25 = vld [vmem:[#allocation4_spill] sm:$0xff] }
 0x3bb   :  { %2567 = vst.msk [vmem:[%s6101_s4 + $0xbc] sm:$0xf] %vm2519_vm14, %v2502_v3  ;;  %v2507_v53 = vpack.c.bf16 %v2443_v29, %v2443_v29  ;;  %vm2322_vm3 = vcmp.ge.f32.partialorder %v6324_v55, 0.0  ;;  %v2387_v35 = vmul.f32 0.2, %v6325_v41  ;;  %v2447_v45 = vsel %vm2319_vm0, %v6321_v16, %v2383_v7 }
 0x3bc   :  { %2568 = vst.msk [vmem:[%s6101_s4 + $0xc0] sm:$0xf] %vm2519_vm14, %v2503_v26  ;;  %v2508_v0 = vpack.c.bf16 %v2444_v37, %v2444_v37  ;;  %vm2323_vm4 = vcmp.ge.f32.partialorder %v6325_v41, 0.0  ;;  %v2388_v15 = vmul.f32 0.2, %v6326_v25  ;;  %v2448_v20 = vsel %vm2320_vm1, %v6322_v49, %v2384_v33 }
 0x3bd   :  { %2569 = vst.msk [vmem:[%s6101_s4 + $0xc4] sm:$0xf] %vm2519_vm14, %v2504_v62  ;;  %v2509_v44 = vpack.c.bf16 %v2445_v2, %v2445_v2  ;;  %vm2324_vm5 = vcmp.ge.f32.partialorder %v6326_v25, 0.0  ;;  %v2389_v12 = vmul.f32 0.2, %v6327_v22  ;;  %v2449_v8 = vsel %vm2321_vm2, %v6323_v4, %v2385_v28 }
 0x3be   :  { %2570 = vst.msk [vmem:[%s6101_s4 + $0xc8] sm:$0xf] %vm2519_vm14, %v2505_v36  ;;  %v2510_v5 = vpack.c.bf16 %v2446_v23, %v2446_v23  ;;  %vm2325_vm6 = vcmp.ge.f32.partialorder %v6327_v22, 0.0  ;;  %v2390_v30 = vmul.f32 0.2, %v6328_v17  ;;  %v2450_v19 = vsel %vm2322_vm3, %v6324_v55, %v2386_v57 }
 0x3bf   :  { %2571 = vst.msk [vmem:[%s6101_s4 + $0xcc] sm:$0xf] %vm2519_vm14, %v2506_v11  ;;  %v2511_v1 = vpack.c.bf16 %v2447_v45, %v2447_v45  ;;  %vm2326_vm7 = vcmp.ge.f32.partialorder %v6328_v17, 0.0  ;;  %v2451_v39 = vsel %vm2323_vm4, %v6325_v41, %v2387_v35  ;;  %v2512_v52 = vpack.c.bf16 %v2448_v20, %v2448_v20 }
 0x3c0   :  { %2572 = vst.msk [vmem:[%s6101_s4 + $0xd0] sm:$0xf] %vm2519_vm14, %v2507_v53  ;;  %v2452_v56 = vsel %vm2324_vm5, %v6326_v25, %v2388_v15  ;;  %v2513_v50 = vpack.c.bf16 %v2449_v8, %v2449_v8  ;;  %v2453_v18 = vsel %vm2325_vm6, %v6327_v22, %v2389_v12  ;;  %v2514_v60 = vpack.c.bf16 %v2450_v19, %v2450_v19 }
 0x3c1   :  { %2573 = vst.msk [vmem:[%s6101_s4 + $0xd4] sm:$0xf] %vm2519_vm14, %v2508_v0  ;;  %v2454_v6 = vsel %vm2326_vm7, %v6328_v17, %v2390_v30  ;;  %v2515_v61 = vpack.c.bf16 %v2451_v39, %v2451_v39  ;;  %v2516_v63 = vpack.c.bf16 %v2452_v56, %v2452_v56  ;;  %v2517_v9 = vpack.c.bf16 %v2453_v18, %v2453_v18 }
 0x3c2   :  { %2574 = vst.msk [vmem:[%s6101_s4 + $0xd8] sm:$0xf] %vm2519_vm14, %v2509_v44  ;;  %v2518_v46 = vpack.c.bf16 %v2454_v6, %v2454_v6 }
 0x3c3   :  { %2575 = vst.msk [vmem:[%s6101_s4 + $0xdc] sm:$0xf] %vm2519_vm14, %v2510_v5 }
 0x3c4   :  { %2576 = vst.msk [vmem:[%s6101_s4 + $0xe0] sm:$0xf] %vm2519_vm14, %v2511_v1 }
 0x3c5   :  { %2577 = vst.msk [vmem:[%s6101_s4 + $0xe4] sm:$0xf] %vm2519_vm14, %v2512_v52 }
 0x3c6   :  { %2578 = vst.msk [vmem:[%s6101_s4 + $0xe8] sm:$0xf] %vm2519_vm14, %v2513_v50 }
 0x3c7   :  { %2579 = vst.msk [vmem:[%s6101_s4 + $0xec] sm:$0xf] %vm2519_vm14, %v2514_v60 }
 0x3c8   :  { %2580 = vst.msk [vmem:[%s6101_s4 + $0xf0] sm:$0xf] %vm2519_vm14, %v2515_v61 }
 0x3c9   :  { %2581 = vst.msk [vmem:[%s6101_s4 + $0xf4] sm:$0xf] %vm2519_vm14, %v2516_v63 }
 0x3ca   :  { %2582 = vst.msk [vmem:[%s6101_s4 + $0xf8] sm:$0xf] %vm2519_vm14, %v2517_v9 }
 0x3cb   :  { %2583 = vst.msk [vmem:[%s6101_s4 + $0xfc] sm:$0xf] %vm2519_vm14, %v2518_v46 }

// kernel: dnet_forward.6
= control target key start
LH: loop header
LB: loop body
LE: loop exit
PB: predicated region body
PF: predicated region fallthrough
CT: control target
= control target key end

     0   :  { %s3023_s1 = inlined_call_operand.vmem [shape: bf16[1024,128], index: 1, kind: input, shape index: {}]   ;;  %s3024_s0 = inlined_call_operand.vmem [shape: bf16[128,1024], index: 0, kind: input, shape index: {}]   ;;  %s3025_s3 = inlined_call_operand.vmem [shape: f32[1,128], index: 3, kind: input, shape index: {}]   ;;  %s3026_s2 = inlined_call_operand.vmem [shape: f32[1,128], index: 2, kind: input, shape index: {}]   ;;  %s3027_s4 = inlined_call_operand.vmem [shape: bf16[128,128], index: 4, kind: output, shape index: {}]  }
   0x1   :  { %v2101_v0 = vld [vmem:[%s3023_s1 + $0x38] sm:$0xff]  ;;  %v2100_v4 = vld [vmem:[%s3023_s1 + $0x30] sm:$0xff]  ;;  %v2099_v8 = vld [vmem:[%s3023_s1 + $0x28] sm:$0xff] }
   0x2   :  { %v2109_v1 = vld [vmem:[%s3023_s1 + $0x78] sm:$0xff]  ;;  %913 = vmatpush.bf16.msra.mxu0 %v2101_v0  ;;  %v2108_v5 = vld [vmem:[%s3023_s1 + $0x70] sm:$0xff]  ;;  %v2107_v9 = vld [vmem:[%s3023_s1 + $0x68] sm:$0xff] }
   0x3   :  { %v2117_v2 = vld [vmem:[%s3023_s1 + $0xb8] sm:$0xff]  ;;  %962 = vmatpush.bf16.msra.mxu1 %v2109_v1  ;;  %v2116_v6 = vld [vmem:[%s3023_s1 + $0xb0] sm:$0xff]  ;;  %v2115_v10 = vld [vmem:[%s3023_s1 + $0xa8] sm:$0xff] }
   0x4   :  { %v2125_v3 = vld [vmem:[%s3023_s1 + $0xf8] sm:$0xff]  ;;  %1011 = vmatpush.bf16.msra.mxu2 %v2117_v2  ;;  %v2124_v7 = vld [vmem:[%s3023_s1 + $0xf0] sm:$0xff]  ;;  %v2123_v11 = vld [vmem:[%s3023_s1 + $0xe8] sm:$0xff] }
   0x5   :  { %1060 = vmatpush.bf16.msra.mxu3 %v2125_v3  ;;  %v2098_v12 = vld [vmem:[%s3023_s1 + $0x20] sm:$0xff]  ;;  %v2097_v16 = vld [vmem:[%s3023_s1 + $0x18] sm:$0xff]  ;;  %v2096_v20 = vld [vmem:[%s3023_s1 + $0x10] sm:$0xff] }
   0x6   :  { %914 = vmatpush.bf16.msra.mxu0 %v2100_v4  ;;  %v2106_v13 = vld [vmem:[%s3023_s1 + $0x60] sm:$0xff]  ;;  %v2105_v17 = vld [vmem:[%s3023_s1 + $0x58] sm:$0xff]  ;;  %v2104_v21 = vld [vmem:[%s3023_s1 + $0x50] sm:$0xff] }
   0x7   :  { %963 = vmatpush.bf16.msra.mxu1 %v2108_v5  ;;  %v2114_v14 = vld [vmem:[%s3023_s1 + $0xa0] sm:$0xff]  ;;  %v2113_v18 = vld [vmem:[%s3023_s1 + $0x98] sm:$0xff]  ;;  %v2112_v22 = vld [vmem:[%s3023_s1 + $0x90] sm:$0xff] }
   0x8   :  { %1012 = vmatpush.bf16.msra.mxu2 %v2116_v6  ;;  %v2122_v15 = vld [vmem:[%s3023_s1 + $0xe0] sm:$0xff]  ;;  %v2121_v19 = vld [vmem:[%s3023_s1 + $0xd8] sm:$0xff]  ;;  %v2120_v23 = vld [vmem:[%s3023_s1 + $0xd0] sm:$0xff] }
   0x9   :  { %1061 = vmatpush.bf16.msra.mxu3 %v2124_v7  ;;  %v2095_v24 = vld [vmem:[%s3023_s1 + $0x8] sm:$0xff]  ;;  %v2094_v28 = vld [vmem:[%s3023_s1] sm:$0xff]  ;;  %v2149_v40 = vld [vmem:[%s3023_s1 + $0x1b8] sm:$0xff] }
   0xa   :  { %915 = vmatpush.bf16.msra.mxu0 %v2099_v8  ;;  %v2103_v25 = vld [vmem:[%s3023_s1 + $0x48] sm:$0xff]  ;;  %v2102_v29 = vld [vmem:[%s3023_s1 + $0x40] sm:$0xff]  ;;  %v2133_v41 = vld [vmem:[%s3023_s1 + $0x138] sm:$0xff] }
   0xb   :  { %964 = vmatpush.bf16.msra.mxu1 %v2107_v9  ;;  %v2111_v26 = vld [vmem:[%s3023_s1 + $0x88] sm:$0xff]  ;;  %v2110_v30 = vld [vmem:[%s3023_s1 + $0x80] sm:$0xff]  ;;  %v2157_v46 = vld [vmem:[%s3023_s1 + $0x1f8] sm:$0xff] }
   0xc   :  { %1013 = vmatpush.bf16.msra.mxu2 %v2115_v10  ;;  %v2119_v27 = vld [vmem:[%s3023_s1 + $0xc8] sm:$0xff]  ;;  %v2118_v31 = vld [vmem:[%s3023_s1 + $0xc0] sm:$0xff]  ;;  %v2141_v47 = vld [vmem:[%s3023_s1 + $0x178] sm:$0xff] }
   0xd   :  { %1062 = vmatpush.bf16.msra.mxu3 %v2123_v11  ;;  %v1520_v32 = vld [vmem:[%s3024_s0] sm:$0xf]  ;;  %v2030_v34 = vld [vmem:[%s3024_s0 + $0x4] sm:$0xf]  ;;  %v1528_v36 = vld [vmem:[%s3024_s0 + $0x8] sm:$0xf] }
   0xe   :  { %916 = vmatpush.bf16.msra.mxu0 %v2098_v12  ;;  %v2034_v33 = vld [vmem:[%s3024_s0 + $0x1c] sm:$0xf0]  ;;  %v1522_v35 = vld [vmem:[%s3024_s0 + $0x20] sm:$0xf0]  ;;  %v2035_v37 = vld [vmem:[%s3024_s0 + $0x24] sm:$0xf0] }
   0xf   :  { %965 = vmatpush.bf16.msra.mxu1 %v2106_v13  ;;  %v2031_v38 = vld [vmem:[%s3024_s0 + $0xc] sm:$0xf]  ;;  %v1521_v42 = vor.u32 %v2034_v33, %v1520_v32  ;;  %v1525_v43 = vor.u32 %v2030_v34, %v1522_v35  ;;  %v1529_v44 = vor.u32 %v2035_v37, %v1528_v36  ;;  %v2148_v48 = vld [vmem:[%s3023_s1 + $0x1b0] sm:$0xff]  ;;  %v1552_v56 = vld [vmem:[%s3024_s0 + $0x40] sm:$0xf] }
  0x10   :  { %1014 = vmatpush.bf16.msra.mxu2 %v2114_v14  ;;  %v1530_v39 = vld [vmem:[%s3024_s0 + $0x28] sm:$0xf0]  ;;  %v2132_v49 = vld [vmem:[%s3023_s1 + $0x130] sm:$0xff]  ;;  %v2042_v57 = vld [vmem:[%s3024_s0 + $0x5c] sm:$0xf0] }
  0x11   :  { %1063 = vmatpush.bf16.msra.mxu3 %v2122_v15  ;;  %v1533_v45 = vor.u32 %v2031_v38, %v1530_v39  ;;  %v2156_v50 = vld [vmem:[%s3023_s1 + $0x1f0] sm:$0xff]  ;;  %v2147_v52 = vld [vmem:[%s3023_s1 + $0x1a8] sm:$0xff]  ;;  %v2038_v58 = vld [vmem:[%s3024_s0 + $0x44] sm:$0xf]  ;;  %v1553_v0 = vor.u32 %v2042_v57, %v1552_v56 }
  0x12   :  { %917 = vmatpush.bf16.msra.mxu0 %v2097_v16  ;;  %v2140_v51 = vld [vmem:[%s3023_s1 + $0x170] sm:$0xff]  ;;  %v2131_v53 = vld [vmem:[%s3023_s1 + $0x128] sm:$0xff]  ;;  %v1554_v59 = vld [vmem:[%s3024_s0 + $0x60] sm:$0xf0] }
  0x13   :  { %966 = vmatpush.bf16.msra.mxu1 %v2105_v17  ;;  %v2155_v54 = vld [vmem:[%s3023_s1 + $0x1e8] sm:$0xff]  ;;  %v1557_v1 = vor.u32 %v2038_v58, %v1554_v59  ;;  %v2146_v4 = vld [vmem:[%s3023_s1 + $0x1a0] sm:$0xff]  ;;  %v2144_v36 = vld [vmem:[%s3023_s1 + $0x190] sm:$0xff] }
  0x14   :  { %1015 = vmatpush.bf16.msra.mxu2 %v2113_v18  ;;  %v2139_v55 = vld [vmem:[%s3023_s1 + $0x168] sm:$0xff]  ;;  %v2130_v5 = vld [vmem:[%s3023_s1 + $0x120] sm:$0xff]  ;;  %v2128_v37 = vld [vmem:[%s3023_s1 + $0x110] sm:$0xff] }
  0x15   :  { %1064 = vmatpush.bf16.msra.mxu3 %v2121_v19  ;;  %v1560_v60 = vld [vmem:[%s3024_s0 + $0x48] sm:$0xf]  ;;  %v2039_v62 = vld [vmem:[%s3024_s0 + $0x4c] sm:$0xf]  ;;  %v2154_v6 = vld [vmem:[%s3023_s1 + $0x1e0] sm:$0xff] }
  0x16   :  { %918 = vmatpush.bf16.msra.mxu0 %v2096_v20  ;;  %v2043_v61 = vld [vmem:[%s3024_s0 + $0x64] sm:$0xf0]  ;;  %v1562_v63 = vld [vmem:[%s3024_s0 + $0x68] sm:$0xf0]  ;;  %v2138_v7 = vld [vmem:[%s3023_s1 + $0x160] sm:$0xff] }
  0x17   :  { %967 = vmatpush.bf16.msra.mxu1 %v2104_v21  ;;  %v1561_v2 = vor.u32 %v2043_v61, %v1560_v60  ;;  %v1565_v3 = vor.u32 %v2039_v62, %v1562_v63  ;;  %v1584_v8 = vld [vmem:[%s3024_s0 + $0x80] sm:$0xf]  ;;  %v2046_v10 = vld [vmem:[%s3024_s0 + $0x84] sm:$0xf]  ;;  %v1592_v12 = vld [vmem:[%s3024_s0 + $0x88] sm:$0xf] }
  0x18   :  { %1016 = vmatpush.bf16.msra.mxu2 %v2112_v22  ;;  %v2050_v9 = vld [vmem:[%s3024_s0 + $0x9c] sm:$0xf0]  ;;  %v1586_v11 = vld [vmem:[%s3024_s0 + $0xa0] sm:$0xf0]  ;;  %v2051_v13 = vld [vmem:[%s3024_s0 + $0xa4] sm:$0xf0] }
  0x19   :  { %1065 = vmatpush.bf16.msra.mxu3 %v2120_v23  ;;  %v2047_v14 = vld [vmem:[%s3024_s0 + $0x8c] sm:$0xf]  ;;  %v1585_v16 = vor.u32 %v2050_v9, %v1584_v8  ;;  %v1589_v17 = vor.u32 %v2046_v10, %v1586_v11  ;;  %v1593_v18 = vor.u32 %v2051_v13, %v1592_v12  ;;  %v2145_v20 = vld [vmem:[%s3023_s1 + $0x198] sm:$0xff]  ;;  %v2152_v38 = vld [vmem:[%s3023_s1 + $0x1d0] sm:$0xff] }
  0x1a   :  { %919 = vmatpush.bf16.msra.mxu0 %v2095_v24  ;;  %v1594_v15 = vld [vmem:[%s3024_s0 + $0xa8] sm:$0xf0]  ;;  %v2129_v21 = vld [vmem:[%s3023_s1 + $0x118] sm:$0xff]  ;;  %v1616_v24 = vld [vmem:[%s3024_s0 + $0xc0] sm:$0xf] }
  0x1b   :  { %968 = vmatpush.bf16.msra.mxu1 %v2103_v25  ;;  %v1597_v19 = vor.u32 %v2047_v14, %v1594_v15  ;;  %v2153_v22 = vld [vmem:[%s3023_s1 + $0x1d8] sm:$0xff]  ;;  %v2058_v25 = vld [vmem:[%s3024_s0 + $0xdc] sm:$0xf0]  ;;  %v2136_v39 = vld [vmem:[%s3023_s1 + $0x150] sm:$0xff] }
  0x1c   :  { %1017 = vmatpush.bf16.msra.mxu2 %v2111_v26  ;;  %v2137_v23 = vld [vmem:[%s3023_s1 + $0x158] sm:$0xff]  ;;  %v2054_v26 = vld [vmem:[%s3024_s0 + $0xc4] sm:$0xf]  ;;  %v1617_v32 = vor.u32 %v2058_v25, %v1616_v24  ;;  %v1680_v56 = vld [vmem:[%s3024_s0 + $0x140] sm:$0xf] }
  0x1d   :  { %1066 = vmatpush.bf16.msra.mxu3 %v2119_v27  ;;  %v1618_v27 = vld [vmem:[%s3024_s0 + $0xe0] sm:$0xf0]  ;;  %v2074_v57 = vld [vmem:[%s3024_s0 + $0x15c] sm:$0xf0]  ;;  %v1688_v60 = vld [vmem:[%s3024_s0 + $0x148] sm:$0xf] }
  0x1e   :  { %920 = vmatpush.bf16.msra.mxu0 %v2094_v28  ;;  %v1624_v28 = vld [vmem:[%s3024_s0 + $0xc8] sm:$0xf]  ;;  %v1621_v33 = vor.u32 %v2054_v26, %v1618_v27  ;;  %v2070_v58 = vld [vmem:[%s3024_s0 + $0x144] sm:$0xf]  ;;  %v2071_v62 = vld [vmem:[%s3024_s0 + $0x14c] sm:$0xf] }
  0x1f   :  { %969 = vmatpush.bf16.msra.mxu1 %v2102_v29  ;;  %v2059_v29 = vld [vmem:[%s3024_s0 + $0xe4] sm:$0xf0]  ;;  %v1682_v59 = vld [vmem:[%s3024_s0 + $0x160] sm:$0xf0]  ;;  %v1690_v63 = vld [vmem:[%s3024_s0 + $0x168] sm:$0xf0] }
  0x20   :  { %1018 = vmatpush.bf16.msra.mxu2 %v2110_v30  ;;  %v2055_v30 = vld [vmem:[%s3024_s0 + $0xcc] sm:$0xf]  ;;  %v1625_v34 = vor.u32 %v2059_v29, %v1624_v28  ;;  %v2075_v61 = vld [vmem:[%s3024_s0 + $0x164] sm:$0xf0]  ;;  %v1712_v8 = vld [vmem:[%s3024_s0 + $0x180] sm:$0xf] }
  0x21   :  { %1067 = vmatpush.bf16.msra.mxu3 %v2118_v31  ;;  %921 = vmatmul.bf16.vlgmr.msra.gmra.mxu0 %v1521_v42  ;;  %v1626_v31 = vld [vmem:[%s3024_s0 + $0xe8] sm:$0xf0]  ;;  %v2062_v42 = vld [vmem:[%s3024_s0 + $0x104] sm:$0xf]  ;;  %v2082_v9 = vld [vmem:[%s3024_s0 + $0x19c] sm:$0xf0] }
  0x22   :  { %1109 = vmatpush.bf16.msrb.mxu0 %v2133_v41  ;;  %970 = vmatmul.bf16.vlgmr.msra.gmra.mxu1 %v1525_v43  ;;  %v1629_v35 = vor.u32 %v2055_v30, %v1626_v31  ;;  %v2066_v41 = vld [vmem:[%s3024_s0 + $0x11c] sm:$0xf0]  ;;  %v1650_v43 = vld [vmem:[%s3024_s0 + $0x120] sm:$0xf0]  ;;  %v1720_v12 = vld [vmem:[%s3024_s0 + $0x188] sm:$0xf] }
  0x23   :  { %1019 = vmatmul.bf16.vlgmr.msra.gmra.mxu2 %v1529_v44  ;;  %1158 = vmatpush.bf16.msrb.mxu1 %v2141_v47  ;;  %v1656_v44 = vld [vmem:[%s3024_s0 + $0x108] sm:$0xf]  ;;  %v1658_v47 = vld [vmem:[%s3024_s0 + $0x128] sm:$0xf0]  ;;  %v2078_v10 = vld [vmem:[%s3024_s0 + $0x184] sm:$0xf] }
  0x24   :  { %1207 = vmatpush.bf16.msrb.mxu2 %v2149_v40  ;;  %1068 = vmatmul.bf16.vlgmr.msra.gmra.mxu3 %v1533_v45  ;;  %v1648_v40 = vld [vmem:[%s3024_s0 + $0x100] sm:$0xf]  ;;  %v2067_v45 = vld [vmem:[%s3024_s0 + $0x124] sm:$0xf0]  ;;  %v1714_v11 = vld [vmem:[%s3024_s0 + $0x1a0] sm:$0xf0] }
  0x25   :  { %1256 = vmatpush.bf16.msrb.mxu3 %v2157_v46  ;;  %v2063_v46 = vld [vmem:[%s3024_s0 + $0x10c] sm:$0xf]  ;;  %v2083_v13 = vld [vmem:[%s3024_s0 + $0x1a4] sm:$0xf0] }
  0x26   :  { %1110 = vmatpush.bf16.msrb.mxu0 %v2132_v49  ;;  %v1653_v49 = vor.u32 %v2062_v42, %v1650_v43  ;;  %v2079_v14 = vld [vmem:[%s3024_s0 + $0x18c] sm:$0xf]  ;;  %v1752_v24 = vld [vmem:[%s3024_s0 + $0x1c8] sm:$0xf] }
  0x27   :  { %1159 = vmatpush.bf16.msrb.mxu1 %v2140_v51  ;;  %v1661_v51 = vor.u32 %v2063_v46, %v1658_v47  ;;  %v1722_v15 = vld [vmem:[%s3024_s0 + $0x1a8] sm:$0xf0]  ;;  %v2091_v25 = vld [vmem:[%s3024_s0 + $0x1e4] sm:$0xf0] }
  0x28   :  { %1208 = vmatpush.bf16.msrb.mxu2 %v2148_v48  ;;  %v1649_v48 = vor.u32 %v2066_v41, %v1648_v40  ;;  %v2087_v26 = vld [vmem:[%s3024_s0 + $0x1cc] sm:$0xf]  ;;  %v1753_v30 = vor.u32 %v2091_v25, %v1752_v24 }
  0x29   :  { %1257 = vmatpush.bf16.msrb.mxu3 %v2156_v50  ;;  %v1657_v50 = vor.u32 %v2067_v45, %v1656_v44  ;;  %v1754_v27 = vld [vmem:[%s3024_s0 + $0x1e8] sm:$0xf0] }
  0x2a   :  { %1111 = vmatpush.bf16.msrb.mxu0 %v2131_v53  ;;  %v2127_v53 = vld [vmem:[%s3023_s1 + $0x108] sm:$0xff]  ;;  %v1757_v31 = vor.u32 %v2087_v26, %v1754_v27 }
  0x2b   :  { %1160 = vmatpush.bf16.msrb.mxu1 %v2139_v55  ;;  %v2135_v55 = vld [vmem:[%s3023_s1 + $0x148] sm:$0xff] }
  0x2c   :  { %1209 = vmatpush.bf16.msrb.mxu2 %v2147_v52  ;;  %v2143_v52 = vld [vmem:[%s3023_s1 + $0x188] sm:$0xff] }
  0x2d   :  { %1258 = vmatpush.bf16.msrb.mxu3 %v2155_v54  ;;  %v2151_v54 = vld [vmem:[%s3023_s1 + $0x1c8] sm:$0xff] }
  0x2e   :  { %1112 = vmatpush.bf16.msrb.mxu0 %v2130_v5  ;;  %v2126_v5 = vld [vmem:[%s3023_s1 + $0x100] sm:$0xff] }
  0x2f   :  { %1161 = vmatpush.bf16.msrb.mxu1 %v2138_v7  ;;  %v2134_v7 = vld [vmem:[%s3023_s1 + $0x140] sm:$0xff] }
  0x30   :  { %1210 = vmatpush.bf16.msrb.mxu2 %v2146_v4  ;;  %v2142_v4 = vld [vmem:[%s3023_s1 + $0x180] sm:$0xff] }
  0x31   :  { %926 = vmatmul.bf16.gmra.mxu0 %v1553_v0  ;;  %1259 = vmatpush.bf16.msrb.mxu3 %v2154_v6  ;;  %v1681_v0 = vor.u32 %v2074_v57, %v1680_v56  ;;  %v2150_v6 = vld [vmem:[%s3023_s1 + $0x1c0] sm:$0xff]  ;;  %v2040_v56 = vld [vmem:[%s3024_s0 + $0x54] sm:$0xf] }
  0x32   :  { %975 = vmatmul.bf16.gmra.mxu1 %v1557_v1  ;;  %1113 = vmatpush.bf16.msrb.mxu0 %v2129_v21  ;;  %v1685_v1 = vor.u32 %v2070_v58, %v1682_v59  ;;  %v2090_v21 = vld [vmem:[%s3024_s0 + $0x1dc] sm:$0xf0]  ;;  %v1570_v57 = vld [vmem:[%s3024_s0 + $0x70] sm:$0xf0]  ;;  %v1576_v58 = vld [vmem:[%s3024_s0 + $0x58] sm:$0xf] }
  0x33   :  { %1024 = vmatmul.bf16.gmra.mxu2 %v1561_v2  ;;  %1162 = vmatpush.bf16.msrb.mxu1 %v2137_v23  ;;  %v1689_v2 = vor.u32 %v2075_v61, %v1688_v60  ;;  %v1746_v23 = vld [vmem:[%s3024_s0 + $0x1e0] sm:$0xf0]  ;;  %v2045_v59 = vld [vmem:[%s3024_s0 + $0x74] sm:$0xf0]  ;;  %v2041_v60 = vld [vmem:[%s3024_s0 + $0x5c] sm:$0xf] }
  0x34   :  { %1073 = vmatmul.bf16.gmra.mxu3 %v1565_v3  ;;  %1211 = vmatpush.bf16.msrb.mxu2 %v2145_v20  ;;  %v1693_v3 = vor.u32 %v2071_v62, %v1690_v63  ;;  %v1744_v20 = vld [vmem:[%s3024_s0 + $0x1c0] sm:$0xf]  ;;  %v1578_v61 = vld [vmem:[%s3024_s0 + $0x78] sm:$0xf0] }
  0x35   :  { %1260 = vmatpush.bf16.msrb.mxu3 %v2153_v22  ;;  %v2086_v22 = vld [vmem:[%s3024_s0 + $0x1c4] sm:$0xf]  ;;  %v1745_v28 = vor.u32 %v2090_v21, %v1744_v20  ;;  %v1608_v20 = vld [vmem:[%s3024_s0 + $0x98] sm:$0xf] }
  0x36   :  { %1114 = vmatpush.bf16.msrb.mxu0 %v2128_v37  ;;  %v1749_v29 = vor.u32 %v2086_v22, %v1746_v23  ;;  %v2037_v37 = vld [vmem:[%s3024_s0 + $0x34] sm:$0xf0]  ;;  %v2049_v22 = vld [vmem:[%s3024_s0 + $0x9c] sm:$0xf] }
  0x37   :  { %1163 = vmatpush.bf16.msrb.mxu1 %v2136_v39  ;;  %v1546_v39 = vld [vmem:[%s3024_s0 + $0x38] sm:$0xf0]  ;;  %v2053_v21 = vld [vmem:[%s3024_s0 + $0xb4] sm:$0xf0] }
  0x38   :  { %1212 = vmatpush.bf16.msrb.mxu2 %v2144_v36  ;;  %v1544_v36 = vld [vmem:[%s3024_s0 + $0x18] sm:$0xf]  ;;  %v1610_v23 = vld [vmem:[%s3024_s0 + $0xb8] sm:$0xf0] }
  0x39   :  { %1261 = vmatpush.bf16.msrb.mxu3 %v2152_v38  ;;  %v2033_v38 = vld [vmem:[%s3024_s0 + $0x1c] sm:$0xf]  ;;  %v1545_v44 = vor.u32 %v2037_v37, %v1544_v36 }
  0x3a   :  { %1115 = vmatpush.bf16.msrb.mxu0 %v2127_v53  ;;  %v1549_v45 = vor.u32 %v2033_v38, %v1546_v39 }
  0x3b   :  { %1164 = vmatpush.bf16.msrb.mxu1 %v2135_v55  ;;  %v2044_v55 = vld [vmem:[%s3024_s0 + $0x6c] sm:$0xf0] }
  0x3c   :  { %1213 = vmatpush.bf16.msrb.mxu2 %v2143_v52 }
  0x3d   :  { %1262 = vmatpush.bf16.msrb.mxu3 %v2151_v54  ;;  %v1568_v54 = vld [vmem:[%s3024_s0 + $0x50] sm:$0xf] }
  0x3e   :  { %1116 = vmatpush.bf16.msrb.mxu0 %v2126_v5  ;;  %v1577_v5 = vor.u32 %v2045_v59, %v1576_v58 }
  0x3f   :  { %1165 = vmatpush.bf16.msrb.mxu1 %v2134_v7 }
  0x40   :  { %1214 = vmatpush.bf16.msrb.mxu2 %v2142_v4 }
  0x41   :  { %931 = vmatmul.bf16.gmra.mxu0 %v1585_v16  ;;  %1263 = vmatpush.bf16.msrb.mxu3 %v2150_v6  ;;  %v1713_v16 = vor.u32 %v2082_v9, %v1712_v8  ;;  %v1581_v6 = vor.u32 %v2041_v60, %v1578_v61 }
  0x42   :  { %980 = vmatmul.bf16.gmra.mxu1 %v1589_v17  ;;  %v1717_v17 = vor.u32 %v2078_v10, %v1714_v11 }
  0x43   :  { %1029 = vmatmul.bf16.gmra.mxu2 %v1593_v18  ;;  %v1721_v18 = vor.u32 %v2083_v13, %v1720_v12 }
  0x44   :  { %1078 = vmatmul.bf16.gmra.mxu3 %v1597_v19  ;;  %v1725_v19 = vor.u32 %v2079_v14, %v1722_v15 }
  0x51   :  { %936 = vmatmul.bf16.gmra.mxu0 %v1617_v32  ;;  %v1536_v32 = vld [vmem:[%s3024_s0 + $0x10] sm:$0xf] }
  0x52   :  { %985 = vmatmul.bf16.gmra.mxu1 %v1621_v33  ;;  %v2036_v33 = vld [vmem:[%s3024_s0 + $0x2c] sm:$0xf0] }
  0x53   :  { %1034 = vmatmul.bf16.gmra.mxu2 %v1625_v34  ;;  %v2032_v34 = vld [vmem:[%s3024_s0 + $0x14] sm:$0xf]  ;;  %v1537_v40 = vor.u32 %v2036_v33, %v1536_v32  ;;  %v1613_v32 = vor.u32 %v2049_v22, %v1610_v23 }
  0x54   :  { %1083 = vmatmul.bf16.gmra.mxu3 %v1629_v35  ;;  %v1538_v35 = vld [vmem:[%s3024_s0 + $0x30] sm:$0xf0] }
  0x55   :  { %v1541_v41 = vor.u32 %v2032_v34, %v1538_v35 }
  0x61   :  { %941 = vmatmul.bf16.gmra.mxu0 %v1649_v48 }
  0x62   :  { %990 = vmatmul.bf16.gmra.mxu1 %v1653_v49 }
  0x63   :  { %1039 = vmatmul.bf16.gmra.mxu2 %v1657_v50 }
  0x64   :  { %1088 = vmatmul.bf16.gmra.mxu3 %v1661_v51 }
  0x71   :  { %946 = vmatmul.bf16.gmra.mxu0 %v1681_v0  ;;  %v1569_v0 = vor.u32 %v2044_v55, %v1568_v54 }
  0x72   :  { %995 = vmatmul.bf16.gmra.mxu1 %v1685_v1  ;;  %v1573_v1 = vor.u32 %v2040_v56, %v1570_v57 }
  0x73   :  { %1044 = vmatmul.bf16.gmra.mxu2 %v1689_v2 }
  0x74   :  { %1093 = vmatmul.bf16.gmra.mxu3 %v1693_v3 }
  0x81   :  { %951 = vmatmul.bf16.gmra.mxu0 %v1713_v16  ;;  %v1600_v16 = vld [vmem:[%s3024_s0 + $0x90] sm:$0xf] }
  0x82   :  { %1000 = vmatmul.bf16.gmra.mxu1 %v1717_v17  ;;  %v2052_v17 = vld [vmem:[%s3024_s0 + $0xac] sm:$0xf0] }
  0x83   :  { %1049 = vmatmul.bf16.gmra.mxu2 %v1721_v18  ;;  %v2048_v18 = vld [vmem:[%s3024_s0 + $0x94] sm:$0xf]  ;;  %v1601_v26 = vor.u32 %v2052_v17, %v1600_v16 }
  0x84   :  { %1098 = vmatmul.bf16.gmra.mxu3 %v1725_v19  ;;  %v1602_v19 = vld [vmem:[%s3024_s0 + $0xb0] sm:$0xf0] }
  0x85   :  { %v1605_v27 = vor.u32 %v2048_v18, %v1602_v19 }
  0x91   :  { %956 = vmatmul.bf16.gmra.mxu0 %v1745_v28 }
  0x92   :  { %1005 = vmatmul.bf16.gmra.mxu1 %v1749_v29 }
  0x93   :  { %1054 = vmatmul.bf16.gmra.mxu2 %v1753_v30 }
  0x94   :  { %1103 = vmatmul.bf16.gmra.mxu3 %v1757_v31  ;;  %v1609_v31 = vor.u32 %v2053_v21, %v1608_v20 }
  0x9e   :  { %v922_v42 = vpop.f32.mrf.mxu0 }
  0x9f   :  { %v971_v43 = vpop.f32.mrf.mxu1 }
  0xa0   :  { %v972_v46 = vadd.f32 %v971_v43, %v922_v42  ;;  %v1632_v42 = vld [vmem:[%s3024_s0 + $0xd0] sm:$0xf] }
  0xa1   :  { %1117 = vmatmul.bf16.vlgmr.msrb.gmra.mxu0 %v1537_v40  ;;  %v2060_v43 = vld [vmem:[%s3024_s0 + $0xec] sm:$0xf0] }
  0xa2   :  { %1166 = vmatmul.bf16.vlgmr.msrb.gmra.mxu1 %v1541_v41 }
  0xa3   :  { %1215 = vmatmul.bf16.vlgmr.msrb.gmra.mxu2 %v1545_v44  ;;  %v2056_v44 = vld [vmem:[%s3024_s0 + $0xd4] sm:$0xf] }
  0xa4   :  { %1264 = vmatmul.bf16.vlgmr.msrb.gmra.mxu3 %v1549_v45  ;;  %v1634_v45 = vld [vmem:[%s3024_s0 + $0xf0] sm:$0xf0] }
  0xa5   :  { %v1637_v54 = vor.u32 %v2056_v44, %v1634_v45 }
  0xa6   :  { %v1020_v47 = vpop.f32.mrf.mxu2  ;;  %v924_v50 = vpop.f32.mrf.mxu0 }
  0xa7   :  { %v1069_v48 = vpop.f32.mrf.mxu3  ;;  %v1021_v49 = vadd.f32 %v1020_v47, %v972_v46  ;;  %v973_v51 = vpop.f32.mrf.mxu1  ;;  %v1640_v46 = vld [vmem:[%s3024_s0 + $0xd8] sm:$0xf] }
  0xa8   :  { %v974_v52 = vadd.f32 %v973_v51, %v924_v50  ;;  %v2061_v47 = vld [vmem:[%s3024_s0 + $0xf4] sm:$0xf0] }
  0xa9   :  { %v2641_v53 = vadd.f32 %v1069_v48, %v1021_v49  ;;  %v2057_v48 = vld [vmem:[%s3024_s0 + $0xdc] sm:$0xf]  ;;  %v1641_v58 = vor.u32 %v2061_v47, %v1640_v46 }
  0xaa   :  { %v1642_v49 = vld [vmem:[%s3024_s0 + $0xf8] sm:$0xf0] }
  0xab   :  { %v1645_v59 = vor.u32 %v2057_v48, %v1642_v49 }
  0xae   :  { %v1022_v62 = vpop.f32.mrf.mxu2  ;;  %v927_v3 = vpop.f32.mrf.mxu0 }
  0xaf   :  { %v1071_v63 = vpop.f32.mrf.mxu3  ;;  %v1023_v2 = vadd.f32 %v1022_v62, %v974_v52  ;;  %v976_v4 = vpop.f32.mrf.mxu1  ;;  %v1633_v52 = vor.u32 %v2060_v43, %v1632_v42  ;;  %v1706_v42 = vld [vmem:[%s3024_s0 + $0x178] sm:$0xf0] }
  0xb0   :  { %v977_v7 = vadd.f32 %v976_v4, %v927_v3 }
  0xb1   :  { %v2667_v8 = vadd.f32 %v1071_v63, %v1023_v2  ;;  %1122 = vmatmul.bf16.gmra.mxu0 %v1569_v0 }
  0xb2   :  { %1171 = vmatmul.bf16.gmra.mxu1 %v1573_v1 }
  0xb3   :  { %1220 = vmatmul.bf16.gmra.mxu2 %v1577_v5  ;;  %v1664_v5 = vld [vmem:[%s3024_s0 + $0x110] sm:$0xf] }
  0xb4   :  { %1269 = vmatmul.bf16.gmra.mxu3 %v1581_v6  ;;  %v2068_v6 = vld [vmem:[%s3024_s0 + $0x12c] sm:$0xf0] }
  0xb5   :  { %v1665_v17 = vor.u32 %v2068_v6, %v1664_v5  ;;  %v2085_v5 = vld [vmem:[%s3024_s0 + $0x1b4] sm:$0xf0]  ;;  %v2081_v6 = vld [vmem:[%s3024_s0 + $0x19c] sm:$0xf] }
  0xb6   :  { %v1025_v9 = vpop.f32.mrf.mxu2  ;;  %v929_v12 = vpop.f32.mrf.mxu0 }
  0xb7   :  { %v1074_v10 = vpop.f32.mrf.mxu3  ;;  %v1026_v11 = vadd.f32 %v1025_v9, %v977_v7  ;;  %v978_v13 = vpop.f32.mrf.mxu1  ;;  %v2064_v7 = vld [vmem:[%s3024_s0 + $0x114] sm:$0xf] }
  0xb8   :  { %v979_v14 = vadd.f32 %v978_v13, %v929_v12  ;;  %v1666_v9 = vld [vmem:[%s3024_s0 + $0x130] sm:$0xf0]  ;;  %v2065_v12 = vld [vmem:[%s3024_s0 + $0x11c] sm:$0xf] }
  0xb9   :  { %v2669_v15 = vadd.f32 %v1074_v10, %v1026_v11  ;;  %v1672_v10 = vld [vmem:[%s3024_s0 + $0x118] sm:$0xf]  ;;  %v1674_v13 = vld [vmem:[%s3024_s0 + $0x138] sm:$0xf0]  ;;  %v1669_v18 = vor.u32 %v2064_v7, %v1666_v9 }
  0xba   :  { %v2069_v11 = vld [vmem:[%s3024_s0 + $0x134] sm:$0xf0]  ;;  %v1677_v23 = vor.u32 %v2065_v12, %v1674_v13  ;;  %v1738_v7 = vld [vmem:[%s3024_s0 + $0x1b8] sm:$0xf0] }
  0xbb   :  { %v1673_v22 = vor.u32 %v2069_v11, %v1672_v10 }
  0xbe   :  { %v1027_v24 = vpop.f32.mrf.mxu2  ;;  %v932_v29 = vpop.f32.mrf.mxu0 }
  0xbf   :  { %v1076_v25 = vpop.f32.mrf.mxu3  ;;  %v1028_v28 = vadd.f32 %v1027_v24, %v979_v14  ;;  %v981_v30 = vpop.f32.mrf.mxu1 }
  0xc0   :  { %v982_v33 = vadd.f32 %v981_v30, %v932_v29 }
  0xc1   :  { %v2695_v34 = vadd.f32 %v1076_v25, %v1028_v28  ;;  %1127 = vmatmul.bf16.gmra.mxu0 %v1601_v26 }
  0xc2   :  { %1176 = vmatmul.bf16.gmra.mxu1 %v1605_v27 }
  0xc3   :  { %1225 = vmatmul.bf16.gmra.mxu2 %v1609_v31 }
  0xc4   :  { %1274 = vmatmul.bf16.gmra.mxu3 %v1613_v32 }
  0xc6   :  { %v1030_v35 = vpop.f32.mrf.mxu2  ;;  %v934_v38 = vpop.f32.mrf.mxu0 }
  0xc7   :  { %v1079_v36 = vpop.f32.mrf.mxu3  ;;  %v1031_v37 = vadd.f32 %v1030_v35, %v982_v33  ;;  %v983_v39 = vpop.f32.mrf.mxu1  ;;  %v1696_v33 = vld [vmem:[%s3024_s0 + $0x150] sm:$0xf] }
  0xc8   :  { %v984_v40 = vadd.f32 %v983_v39, %v934_v38  ;;  %v2076_v35 = vld [vmem:[%s3024_s0 + $0x16c] sm:$0xf0]  ;;  %v1704_v38 = vld [vmem:[%s3024_s0 + $0x158] sm:$0xf] }
  0xc9   :  { %v2697_v41 = vadd.f32 %v1079_v36, %v1031_v37  ;;  %v2072_v36 = vld [vmem:[%s3024_s0 + $0x154] sm:$0xf]  ;;  %v2077_v39 = vld [vmem:[%s3024_s0 + $0x174] sm:$0xf0]  ;;  %v1697_v45 = vor.u32 %v2076_v35, %v1696_v33 }
  0xca   :  { %v1698_v37 = vld [vmem:[%s3024_s0 + $0x170] sm:$0xf0]  ;;  %v1768_v35 = vld [vmem:[%s3024_s0 + $0x1d8] sm:$0xf] }
  0xcb   :  { %v1701_v46 = vor.u32 %v2072_v36, %v1698_v37  ;;  %v1762_v33 = vld [vmem:[%s3024_s0 + $0x1f0] sm:$0xf0]  ;;  %v2093_v36 = vld [vmem:[%s3024_s0 + $0x1f4] sm:$0xf0]  ;;  %v2089_v37 = vld [vmem:[%s3024_s0 + $0x1dc] sm:$0xf] }
  0xce   :  { %v1032_v50 = vpop.f32.mrf.mxu2  ;;  %v937_v56 = vpop.f32.mrf.mxu0 }
  0xcf   :  { %v1081_v51 = vpop.f32.mrf.mxu3  ;;  %v1033_v55 = vadd.f32 %v1032_v50, %v984_v40  ;;  %v986_v57 = vpop.f32.mrf.mxu1  ;;  %v2073_v40 = vld [vmem:[%s3024_s0 + $0x15c] sm:$0xf]  ;;  %v1705_v50 = vor.u32 %v2077_v39, %v1704_v38 }
  0xd0   :  { %v987_v60 = vadd.f32 %v986_v57, %v937_v56  ;;  %v1770_v38 = vld [vmem:[%s3024_s0 + $0x1f8] sm:$0xf0] }
  0xd1   :  { %v2723_v61 = vadd.f32 %v1081_v51, %v1033_v55  ;;  %1132 = vmatmul.bf16.gmra.mxu0 %v1633_v52  ;;  %v1709_v51 = vor.u32 %v2073_v40, %v1706_v42 }
  0xd2   :  { %1181 = vmatmul.bf16.gmra.mxu1 %v1637_v54 }
  0xd3   :  { %1230 = vmatmul.bf16.gmra.mxu2 %v1641_v58 }
  0xd4   :  { %1279 = vmatmul.bf16.gmra.mxu3 %v1645_v59 }
  0xd6   :  { %v1035_v62 = vpop.f32.mrf.mxu2  ;;  %v939_v1 = vpop.f32.mrf.mxu0 }
  0xd7   :  { %v1084_v63 = vpop.f32.mrf.mxu3  ;;  %v1036_v0 = vadd.f32 %v1035_v62, %v987_v60  ;;  %v988_v2 = vpop.f32.mrf.mxu1 }
  0xd8   :  { %v989_v3 = vadd.f32 %v988_v2, %v939_v1  ;;  %v2080_v1 = vld [vmem:[%s3024_s0 + $0x194] sm:$0xf] }
  0xd9   :  { %v2725_v4 = vadd.f32 %v1084_v63, %v1036_v0  ;;  %v1728_v63 = vld [vmem:[%s3024_s0 + $0x190] sm:$0xf]  ;;  %v1730_v2 = vld [vmem:[%s3024_s0 + $0x1b0] sm:$0xf0] }
  0xda   :  { %v2084_v0 = vld [vmem:[%s3024_s0 + $0x1ac] sm:$0xf0]  ;;  %v1733_v12 = vor.u32 %v2080_v1, %v1730_v2 }
  0xdb   :  { %v1729_v11 = vor.u32 %v2084_v0, %v1728_v63 }
  0xde   :  { %v1037_v14 = vpop.f32.mrf.mxu2  ;;  %v942_v20 = vpop.f32.mrf.mxu0 }
  0xdf   :  { %v1086_v16 = vpop.f32.mrf.mxu3  ;;  %v1038_v19 = vadd.f32 %v1037_v14, %v989_v3  ;;  %v991_v21 = vpop.f32.mrf.mxu1  ;;  %v1736_v3 = vld [vmem:[%s3024_s0 + $0x198] sm:$0xf] }
  0xe0   :  { %v992_v24 = vadd.f32 %v991_v21, %v942_v20 }
  0xe1   :  { %v2751_v25 = vadd.f32 %v1086_v16, %v1038_v19  ;;  %1137 = vmatmul.bf16.gmra.mxu0 %v1665_v17  ;;  %v1737_v17 = vor.u32 %v2085_v5, %v1736_v3 }
  0xe2   :  { %1186 = vmatmul.bf16.gmra.mxu1 %v1669_v18  ;;  %v1741_v18 = vor.u32 %v2081_v6, %v1738_v7 }
  0xe3   :  { %1235 = vmatmul.bf16.gmra.mxu2 %v1673_v22 }
  0xe4   :  { %1284 = vmatmul.bf16.gmra.mxu3 %v1677_v23 }
  0xe6   :  { %v1040_v26 = vpop.f32.mrf.mxu2  ;;  %v944_v29 = vpop.f32.mrf.mxu0 }
  0xe7   :  { %v1089_v27 = vpop.f32.mrf.mxu3  ;;  %v1041_v28 = vadd.f32 %v1040_v26, %v992_v24  ;;  %v993_v30 = vpop.f32.mrf.mxu1 }
  0xe8   :  { %v994_v31 = vadd.f32 %v993_v30, %v944_v29  ;;  %v1760_v29 = vld [vmem:[%s3024_s0 + $0x1d0] sm:$0xf] }
  0xe9   :  { %v2753_v32 = vadd.f32 %v1089_v27, %v1041_v28  ;;  %v2092_v30 = vld [vmem:[%s3024_s0 + $0x1ec] sm:$0xf0] }
  0xea   :  { %v1761_v42 = vor.u32 %v2092_v30, %v1760_v29 }
  0xee   :  { %v1042_v43 = vpop.f32.mrf.mxu2  ;;  %v947_v48 = vpop.f32.mrf.mxu0 }
  0xef   :  { %v1091_v44 = vpop.f32.mrf.mxu3  ;;  %v1043_v47 = vadd.f32 %v1042_v43, %v994_v31  ;;  %v996_v49 = vpop.f32.mrf.mxu1  ;;  %v2088_v31 = vld [vmem:[%s3024_s0 + $0x1d4] sm:$0xf] }
  0xf0   :  { %v997_v52 = vadd.f32 %v996_v49, %v947_v48  ;;  %v1765_v43 = vor.u32 %v2088_v31, %v1762_v33  ;;  %v1773_v48 = vor.u32 %v2089_v37, %v1770_v38 }
  0xf1   :  { %v2779_v54 = vadd.f32 %v1091_v44, %v1043_v47  ;;  %1142 = vmatmul.bf16.gmra.mxu0 %v1697_v45  ;;  %v1769_v47 = vor.u32 %v2093_v36, %v1768_v35 }
  0xf2   :  { %1191 = vmatmul.bf16.gmra.mxu1 %v1701_v46 }
  0xf3   :  { %1240 = vmatmul.bf16.gmra.mxu2 %v1705_v50 }
  0xf4   :  { %1289 = vmatmul.bf16.gmra.mxu3 %v1709_v51 }
  0xf6   :  { %v1045_v55 = vpop.f32.mrf.mxu2  ;;  %v949_v58 = vpop.f32.mrf.mxu0 }
  0xf7   :  { %v1094_v56 = vpop.f32.mrf.mxu3  ;;  %v1046_v57 = vadd.f32 %v1045_v55, %v997_v52  ;;  %v998_v59 = vpop.f32.mrf.mxu1 }
  0xf8   :  { %v999_v60 = vadd.f32 %v998_v59, %v949_v58 }
  0xf9   :  { %v2781_v62 = vadd.f32 %v1094_v56, %v1046_v57 }
  0xfe   :  { %v1047_v9 = vpop.f32.mrf.mxu2  ;;  %v952_v14 = vpop.f32.mrf.mxu0 }
  0xff   :  { %v1096_v10 = vpop.f32.mrf.mxu3  ;;  %v1048_v13 = vadd.f32 %v1047_v9, %v999_v60  ;;  %v1001_v16 = vpop.f32.mrf.mxu1 }
 0x100   :  { %v1002_v19 = vadd.f32 %v1001_v16, %v952_v14 }
 0x101   :  { %v2807_v20 = vadd.f32 %v1096_v10, %v1048_v13  ;;  %1147 = vmatmul.bf16.gmra.mxu0 %v1729_v11 }
 0x102   :  { %1196 = vmatmul.bf16.gmra.mxu1 %v1733_v12 }
 0x103   :  { %1245 = vmatmul.bf16.gmra.mxu2 %v1737_v17 }
 0x104   :  { %1294 = vmatmul.bf16.gmra.mxu3 %v1741_v18 }
 0x106   :  { %v1050_v21 = vpop.f32.mrf.mxu2  ;;  %v954_v24 = vpop.f32.mrf.mxu0 }
 0x107   :  { %v1099_v22 = vpop.f32.mrf.mxu3  ;;  %v1051_v23 = vadd.f32 %v1050_v21, %v1002_v19  ;;  %v1003_v26 = vpop.f32.mrf.mxu1 }
 0x108   :  { %v1004_v27 = vadd.f32 %v1003_v26, %v954_v24 }
 0x109   :  { %v2809_v28 = vadd.f32 %v1099_v22, %v1051_v23 }
 0x10e   :  { %v1052_v39 = vpop.f32.mrf.mxu2  ;;  %v957_v45 = vpop.f32.mrf.mxu0 }
 0x10f   :  { %v1101_v40 = vpop.f32.mrf.mxu3  ;;  %v1053_v44 = vadd.f32 %v1052_v39, %v1004_v27  ;;  %v1006_v46 = vpop.f32.mrf.mxu1 }
 0x110   :  { %v1007_v49 = vadd.f32 %v1006_v46, %v957_v45 }
 0x111   :  { %v2835_v50 = vadd.f32 %v1101_v40, %v1053_v44  ;;  %1152 = vmatmul.bf16.gmra.mxu0 %v1761_v42 }
 0x112   :  { %1201 = vmatmul.bf16.gmra.mxu1 %v1765_v43 }
 0x113   :  { %1250 = vmatmul.bf16.gmra.mxu2 %v1769_v47 }
 0x114   :  { %1299 = vmatmul.bf16.gmra.mxu3 %v1773_v48 }
 0x116   :  { %v1055_v51 = vpop.f32.mrf.mxu2  ;;  %v959_v56 = vpop.f32.mrf.mxu0 }
 0x117   :  { %v1104_v52 = vpop.f32.mrf.mxu3  ;;  %v1056_v55 = vadd.f32 %v1055_v51, %v1007_v49  ;;  %v1008_v57 = vpop.f32.mrf.mxu1 }
 0x118   :  { %v1009_v58 = vadd.f32 %v1008_v57, %v959_v56 }
 0x119   :  { %v2837_v59 = vadd.f32 %v1104_v52, %v1056_v55 }
 0x11e   :  { %v1057_v60 = vpop.f32.mrf.mxu2  ;;  %v1118_v1 = vpop.f32.mrf.mxu0 }
 0x11f   :  { %v1106_v63 = vpop.f32.mrf.mxu3  ;;  %v1058_v0 = vadd.f32 %v1057_v60, %v1009_v58  ;;  %v1167_v2 = vpop.f32.mrf.mxu1  ;;  %v1119_v3 = vadd.f32 %v1118_v1, %v2641_v53 }
 0x121   :  { %v2840_v5 = vadd.f32 %v1106_v63, %v1058_v0  ;;  %v1168_v6 = vadd.f32 %v1167_v2, %v1119_v3 }
 0x126   :  { %v1216_v7 = vpop.f32.mrf.mxu2  ;;  %v1120_v11 = vpop.f32.mrf.mxu0 }
 0x127   :  { %v1265_v9 = vpop.f32.mrf.mxu3  ;;  %v1217_v10 = vadd.f32 %v1216_v7, %v1168_v6  ;;  %v1169_v12 = vpop.f32.mrf.mxu1  ;;  %v1121_v13 = vadd.f32 %v1120_v11, %v2667_v8 }
 0x129   :  { %v2843_v14 = vadd.f32 %v1265_v9, %v1217_v10  ;;  %v1170_v16 = vadd.f32 %v1169_v12, %v1121_v13 }
 0x12e   :  { %v1218_v17 = vpop.f32.mrf.mxu2  ;;  %v1123_v21 = vpop.f32.mrf.mxu0 }
 0x12f   :  { %v1267_v18 = vpop.f32.mrf.mxu3  ;;  %v1219_v19 = vadd.f32 %v1218_v17, %v1170_v16  ;;  %v1172_v22 = vpop.f32.mrf.mxu1  ;;  %v1124_v53 = vadd.f32 %v1123_v21, %v2669_v15 }
 0x131   :  { %v2846_v23 = vadd.f32 %v1267_v18, %v1219_v19  ;;  %v1173_v24 = vadd.f32 %v1172_v22, %v1124_v53 }
 0x133   :  { %v1305_v26 = vadd.f32 %v2846_v23, %v2843_v14 }
 0x136   :  { %v1221_v27 = vpop.f32.mrf.mxu2  ;;  %v1125_v8 = vpop.f32.mrf.mxu0 }
 0x137   :  { %v1270_v29 = vpop.f32.mrf.mxu3  ;;  %v1222_v30 = vadd.f32 %v1221_v27, %v1173_v24  ;;  %v1174_v31 = vpop.f32.mrf.mxu1  ;;  %v1126_v33 = vadd.f32 %v1125_v8, %v2695_v34 }
 0x139   :  { %v2851_v35 = vadd.f32 %v1270_v29, %v1222_v30  ;;  %v1175_v36 = vadd.f32 %v1174_v31, %v1126_v33 }
 0x13b   :  { %v1306_v37 = vadd.f32 %v1305_v26, %v2851_v35 }
 0x13e   :  { %v1223_v38 = vpop.f32.mrf.mxu2  ;;  %v1128_v40 = vpop.f32.mrf.mxu0 }
 0x13f   :  { %v1272_v15 = vpop.f32.mrf.mxu3  ;;  %v1224_v39 = vadd.f32 %v1223_v38, %v1175_v36  ;;  %v1177_v42 = vpop.f32.mrf.mxu1  ;;  %v1129_v43 = vadd.f32 %v1128_v40, %v2697_v41 }
 0x141   :  { %v2855_v44 = vadd.f32 %v1272_v15, %v1224_v39  ;;  %v1178_v45 = vadd.f32 %v1177_v42, %v1129_v43 }
 0x143   :  { %v1307_v46 = vadd.f32 %v1306_v37, %v2855_v44 }
 0x146   :  { %v1226_v47 = vpop.f32.mrf.mxu2  ;;  %v1130_v49 = vpop.f32.mrf.mxu0 }
 0x147   :  { %v1275_v48 = vpop.f32.mrf.mxu3  ;;  %v1227_v34 = vadd.f32 %v1226_v47, %v1178_v45  ;;  %v1179_v51 = vpop.f32.mrf.mxu1  ;;  %v1131_v55 = vadd.f32 %v1130_v49, %v2723_v61 }
 0x149   :  { %v2858_v52 = vadd.f32 %v1275_v48, %v1227_v34  ;;  %v1180_v57 = vadd.f32 %v1179_v51, %v1131_v55 }
 0x14b   :  { %v1308_v56 = vadd.f32 %v1307_v46, %v2858_v52 }
 0x14e   :  { %v1228_v58 = vpop.f32.mrf.mxu2  ;;  %v1133_v63 = vpop.f32.mrf.mxu0 }
 0x14f   :  { %v1277_v60 = vpop.f32.mrf.mxu3  ;;  %v1229_v41 = vadd.f32 %v1228_v58, %v1180_v57  ;;  %v1182_v0 = vpop.f32.mrf.mxu1  ;;  %v1134_v2 = vadd.f32 %v1133_v63, %v2725_v4 }
 0x151   :  { %v2862_v1 = vadd.f32 %v1277_v60, %v1229_v41  ;;  %v1183_v6 = vadd.f32 %v1182_v0, %v1134_v2 }
 0x153   :  { %v1309_v3 = vadd.f32 %v1308_v56, %v2862_v1 }
 0x156   :  { %v1231_v7 = vpop.f32.mrf.mxu2  ;;  %v1135_v11 = vpop.f32.mrf.mxu0 }
 0x157   :  { %v1280_v9 = vpop.f32.mrf.mxu3  ;;  %v1232_v10 = vadd.f32 %v1231_v7, %v1183_v6  ;;  %v1184_v61 = vpop.f32.mrf.mxu1  ;;  %v1136_v13 = vadd.f32 %v1135_v11, %v2751_v25 }
 0x159   :  { %v2866_v12 = vadd.f32 %v1280_v9, %v1232_v10  ;;  %v1185_v17 = vadd.f32 %v1184_v61, %v1136_v13 }
 0x15b   :  { %v1310_v16 = vadd.f32 %v1309_v3, %v2866_v12 }
 0x15e   :  { %v1233_v18 = vpop.f32.mrf.mxu2  ;;  %v1138_v22 = vpop.f32.mrf.mxu0 }
 0x15f   :  { %v1282_v19 = vpop.f32.mrf.mxu3  ;;  %v1234_v21 = vadd.f32 %v1233_v18, %v1185_v17  ;;  %v1187_v4 = vpop.f32.mrf.mxu1  ;;  %v1139_v24 = vadd.f32 %v1138_v22, %v2753_v32 }
 0x161   :  { %v2870_v53 = vadd.f32 %v1282_v19, %v1234_v21  ;;  %v1188_v27 = vadd.f32 %v1187_v4, %v1139_v24 }
 0x163   :  { %v1311_v26 = vadd.f32 %v1310_v16, %v2870_v53 }
 0x166   :  { %v1236_v29 = vpop.f32.mrf.mxu2  ;;  %v1140_v31 = vpop.f32.mrf.mxu0 }
 0x167   :  { %v1285_v30 = vpop.f32.mrf.mxu3  ;;  %v1237_v8 = vadd.f32 %v1236_v29, %v1188_v27  ;;  %v1189_v25 = vpop.f32.mrf.mxu1  ;;  %v1141_v36 = vadd.f32 %v1140_v31, %v2779_v54 }
 0x169   :  { %v2874_v33 = vadd.f32 %v1285_v30, %v1237_v8  ;;  %v1190_v38 = vadd.f32 %v1189_v25, %v1141_v36 }
 0x16b   :  { %v1312_v37 = vadd.f32 %v1311_v26, %v2874_v33 }
 0x16e   :  { %v1238_v15 = vpop.f32.mrf.mxu2  ;;  %v1143_v42 = vpop.f32.mrf.mxu0 }
 0x16f   :  { %v1287_v39 = vpop.f32.mrf.mxu3  ;;  %v1239_v40 = vadd.f32 %v1238_v15, %v1190_v38  ;;  %v1192_v32 = vpop.f32.mrf.mxu1  ;;  %v1144_v45 = vadd.f32 %v1143_v42, %v2781_v62 }
 0x171   :  { %v2878_v43 = vadd.f32 %v1287_v39, %v1239_v40  ;;  %v1193_v47 = vadd.f32 %v1192_v32, %v1144_v45 }
 0x173   :  { %v1313_v46 = vadd.f32 %v1312_v37, %v2878_v43 }
 0x176   :  { %v1241_v48 = vpop.f32.mrf.mxu2  ;;  %v1145_v51 = vpop.f32.mrf.mxu0 }
 0x177   :  { %v1290_v34 = vpop.f32.mrf.mxu3  ;;  %v1242_v49 = vadd.f32 %v1241_v48, %v1193_v47  ;;  %v1194_v54 = vpop.f32.mrf.mxu1  ;;  %v1146_v56 = vadd.f32 %v1145_v51, %v2807_v20 }
 0x179   :  { %v1291_v55 = vadd.f32 %v1290_v34, %v1242_v49  ;;  %v1195_v58 = vadd.f32 %v1194_v54, %v1146_v56 }
 0x17b   :  { %v1314_v57 = vadd.f32 %v1313_v46, %v1291_v55 }
 0x17e   :  { %v1243_v60 = vpop.f32.mrf.mxu2  ;;  %v1148_v0 = vpop.f32.mrf.mxu0 }
 0x17f   :  { %v1292_v41 = vpop.f32.mrf.mxu3  ;;  %v1244_v63 = vadd.f32 %v1243_v60, %v1195_v58  ;;  %v1197_v2 = vpop.f32.mrf.mxu1  ;;  %v1149_v62 = vadd.f32 %v1148_v0, %v2809_v28 }
 0x181   :  { %v1293_v3 = vadd.f32 %v1292_v41, %v1244_v63  ;;  %v1198_v7 = vadd.f32 %v1197_v2, %v1149_v62 }
 0x183   :  { %v1315_v6 = vadd.f32 %v1314_v57, %v1293_v3 }
 0x186   :  { %v1246_v9 = vpop.f32.mrf.mxu2  ;;  %v1150_v61 = vpop.f32.mrf.mxu0 }
 0x187   :  { %v1295_v10 = vpop.f32.mrf.mxu3  ;;  %v1247_v11 = vadd.f32 %v1246_v9, %v1198_v7  ;;  %v1199_v13 = vpop.f32.mrf.mxu1  ;;  %v1151_v20 = vadd.f32 %v1150_v61, %v2835_v50 }
 0x189   :  { %v1296_v16 = vadd.f32 %v1295_v10, %v1247_v11  ;;  %v1200_v18 = vadd.f32 %v1199_v13, %v1151_v20 }
 0x18b   :  { %v1316_v17 = vadd.f32 %v1315_v6, %v1296_v16 }
 0x18e   :  { %v1248_v19 = vpop.f32.mrf.mxu2  ;;  %v1153_v4 = vpop.f32.mrf.mxu0 }
 0x18f   :  { %v1297_v21 = vpop.f32.mrf.mxu3  ;;  %v1249_v22 = vadd.f32 %v1248_v19, %v1200_v18  ;;  %v1154_v26 = vadd.f32 %v1153_v4, %v2837_v59  ;;  %v1202_v28 = vpop.f32.mrf.mxu1 }
 0x191   :  { %v1298_v24 = vadd.f32 %v1297_v21, %v1249_v22  ;;  %v1203_v29 = vadd.f32 %v1202_v28, %v1154_v26 }
 0x193   :  { %v1317_v27 = vadd.f32 %v1316_v17, %v1298_v24 }
 0x196   :  { %v1251_v30 = vpop.f32.mrf.mxu2  ;;  %v1155_v25 = vpop.f32.mrf.mxu0 }
 0x197   :  { %v1300_v8 = vpop.f32.mrf.mxu3  ;;  %v1252_v31 = vadd.f32 %v1251_v30, %v1203_v29  ;;  %v1156_v37 = vadd.f32 %v1155_v25, %v2840_v5  ;;  %v1204_v38 = vpop.f32.mrf.mxu1 }
 0x199   :  { %v1301_v36 = vadd.f32 %v1300_v8, %v1252_v31  ;;  %v1205_v15 = vadd.f32 %v1204_v38, %v1156_v37 }
 0x19b   :  { %v1318_v50 = vadd.f32 %v1317_v27, %v1301_v36 }
 0x19e   :  { %v1253_v39 = vpop.f32.mrf.mxu2 }
 0x19f   :  { %v1254_v40 = vadd.f32 %v1253_v39, %v1205_v15  ;;  %v1302_v42 = vpop.f32.mrf.mxu3 }
 0x1a1   :  { %v1303_v32 = vadd.f32 %v1302_v42, %v1254_v40 }
 0x1a3   :  { %v1319_v45 = vadd.f32 %v1318_v50, %v1303_v32 }
 0x1a5   :  { %v1320_v46 = vrot.slane %v1319_v45, 4 }
 0x1a7   :  { %v1321_v59 = vadd.f32 %v1320_v46, %v1319_v45 }
 0x1a9   :  { %v1322_v47 = vrot.slane %v1321_v59, 2 }
 0x1ab   :  { %v1323_v48 = vadd.f32 %v1322_v47, %v1321_v59 }
 0x1ad   :  { %v1324_v34 = vrot.slane %v1323_v48, 1 }
 0x1af   :  { %v1325_v49 = vadd.f32 %v1324_v34, %v1323_v48  ;;  %v1382_v34 = vld [vmem:[%s3026_s2] sm:$0x1] }
 0x1b1   :  { %v1326_v51 = vmul.f32 0.0078125, %v1325_v49 }
 0x1b3   :  { %v2888_v54 = vsub.f32 %v2843_v14, %v1326_v51  ;;  %v2891_v5 = vsub.f32 %v2846_v23, %v1326_v51  ;;  %v2894_v56 = vsub.f32 %v2851_v35, %v1326_v51  ;;  %v2897_v57 = vsub.f32 %v2855_v44, %v1326_v51 }
 0x1b4   :  { %v2900_v58 = vsub.f32 %v2858_v52, %v1326_v51  ;;  %v2903_v60 = vsub.f32 %v2862_v1, %v1326_v51  ;;  %v2906_v41 = vsub.f32 %v2866_v12, %v1326_v51  ;;  %v2909_v14 = vsub.f32 %v2870_v53, %v1326_v51 }
 0x1b5   :  { %v2912_v23 = vsub.f32 %v2874_v33, %v1326_v51  ;;  %v2915_v35 = vsub.f32 %v2878_v43, %v1326_v51  ;;  %v2917_v44 = vsub.f32 %v1291_v55, %v1326_v51  ;;  %v2919_v63 = vsub.f32 %v1293_v3, %v1326_v51 }
 0x1b6   :  { %v2921_v52 = vsub.f32 %v1296_v16, %v1326_v51  ;;  %v2923_v1 = vsub.f32 %v1298_v24, %v1326_v51  ;;  %v2925_v0 = vsub.f32 %v1301_v36, %v1326_v51  ;;  %v2927_v12 = vsub.f32 %v1303_v32, %v1326_v51 }
 0x1b7   :  { %v1343_v53 = vmul.f32 %v2888_v54, %v2888_v54  ;;  %v1344_v33 = vmul.f32 %v2891_v5, %v2891_v5  ;;  %v1345_v43 = vmul.f32 %v2894_v56, %v2894_v56  ;;  %v1346_v2 = vmul.f32 %v2897_v57, %v2897_v57 }
 0x1b8   :  { %v1347_v62 = vmul.f32 %v2900_v58, %v2900_v58  ;;  %v1348_v7 = vmul.f32 %v2903_v60, %v2903_v60  ;;  %v1349_v10 = vmul.f32 %v2906_v41, %v2906_v41  ;;  %v1350_v61 = vmul.f32 %v2909_v14, %v2909_v14 }
 0x1b9   :  { %v1359_v55 = vadd.f32 %v1344_v33, %v1343_v53  ;;  %v1351_v16 = vmul.f32 %v2912_v23, %v2912_v23  ;;  %v1352_v17 = vmul.f32 %v2915_v35, %v2915_v35  ;;  %v1353_v19 = vmul.f32 %v2917_v44, %v2917_v44 }
 0x1ba   :  { %v1354_v22 = vmul.f32 %v2919_v63, %v2919_v63  ;;  %v1355_v24 = vmul.f32 %v2921_v52, %v2921_v52  ;;  %v1356_v28 = vmul.f32 %v2923_v1, %v2923_v1  ;;  %v1357_v29 = vmul.f32 %v2925_v0, %v2925_v0 }
 0x1bb   :  { %v1360_v3 = vadd.f32 %v1359_v55, %v1345_v43  ;;  %v1358_v8 = vmul.f32 %v2927_v12, %v2927_v12 }
 0x1bd   :  { %v1361_v6 = vadd.f32 %v1360_v3, %v1346_v2 }
 0x1bf   :  { %v1362_v9 = vadd.f32 %v1361_v6, %v1347_v62  ;;  %v2205_v62 = vld [vmem:[%s3025_s3] ss:$0 sm:$0xff] }
 0x1c1   :  { %v1363_v11 = vadd.f32 %v1362_v9, %v1348_v7 }
 0x1c3   :  { %v1364_v13 = vadd.f32 %v1363_v11, %v1349_v10 }
 0x1c5   :  { %v1365_v20 = vadd.f32 %v1364_v13, %v1350_v61 }
 0x1c7   :  { %v1366_v18 = vadd.f32 %v1365_v20, %v1351_v16 }
 0x1c9   :  { %v1367_v21 = vadd.f32 %v1366_v18, %v1352_v17 }
 0x1cb   :  { %v1368_v4 = vadd.f32 %v1367_v21, %v1353_v19 }
 0x1cd   :  { %v1369_v26 = vadd.f32 %v1368_v4, %v1354_v22 }
 0x1cf   :  { %v1370_v27 = vadd.f32 %v1369_v26, %v1355_v24 }
 0x1d1   :  { %v1371_v30 = vadd.f32 %v1370_v27, %v1356_v28 }
 0x1d3   :  { %v1372_v31 = vadd.f32 %v1371_v30, %v1357_v29 }
 0x1d5   :  { %v1373_v25 = vadd.f32 %v1372_v31, %v1358_v8 }
 0x1d7   :  { %v1374_v36 = vrot.slane %v1373_v25, 4 }
 0x1d9   :  { %v1375_v37 = vadd.f32 %v1374_v36, %v1373_v25 }
 0x1db   :  { %v1376_v50 = vrot.slane %v1375_v37, 2 }
 0x1dd   :  { %v1377_v38 = vadd.f32 %v1376_v50, %v1375_v37 }
 0x1df   :  { %v1378_v15 = vrot.slane %v1377_v38, 1 }
 0x1e1   :  { %v1379_v39 = vadd.f32 %v1378_v15, %v1377_v38 }
 0x1e3   :  { %v1380_v40 = vmul.f32 0.0078125, %v1379_v39 }
 0x1e5   :  { %v1381_v42 = vmax.f32 %v1380_v40, 0.0 }
 0x1e7   :  { %v1383_v32 = vadd.f32 1e-05, %v1381_v42 }
 0x1e9   :  { %2206 = vrsqrt.f32 %v1383_v32  ;;  %vm1390_vm1 = vweird.f32 %v1383_v32 }
 0x1ef   :  { %v2207_v45 = vpop.eup %2206 }
 0x1f0   :  { %v1385_v46 = vmul.f32 %v2207_v45, %v1383_v32  ;;  %vm1391_vm0 = vweird.f32 %v2207_v45 }
 0x1f1   :  { %vm1392_vm2 = vmor %vm1390_vm1, %vm1391_vm0 }
 0x1f2   :  { %v1386_v59 = vmul.f32 %v2207_v45, %v1385_v46 }
 0x1f4   :  { %v1387_v47 = vmul.f32 0.5, %v1386_v59 }
 0x1f6   :  { %v1388_v48 = vsub.f32 1.5, %v1387_v47 }
 0x1f8   :  { %v1389_v49 = vmul.f32 %v2207_v45, %v1388_v48 }
 0x1fa   :  { %v1393_v51 = vsel %vm1392_vm2, %v2207_v45, %v1389_v49 }
 0x1fb   :  { %v1394_v53 = vmul.f32 %v1393_v51, %v1382_v34 }
 0x1fd   :  { %v1396_v33 = vperm.slane %v1394_v53, 0 }
 0x1ff   :  { %v1398_v43 = vmul.f32 %v1396_v33, %v2888_v54  ;;  %v1399_v55 = vmul.f32 %v1396_v33, %v2891_v5  ;;  %v1400_v2 = vmul.f32 %v1396_v33, %v2894_v56  ;;  %v1401_v3 = vmul.f32 %v1396_v33, %v2897_v57 }
 0x200   :  { %v1402_v6 = vmul.f32 %v1396_v33, %v2900_v58  ;;  %v1403_v7 = vmul.f32 %v1396_v33, %v2903_v60  ;;  %v1404_v9 = vmul.f32 %v1396_v33, %v2906_v41  ;;  %v1405_v10 = vmul.f32 %v1396_v33, %v2909_v14 }
 0x201   :  { %v1406_v54 = vmul.f32 %v1396_v33, %v2912_v23  ;;  %v1407_v5 = vmul.f32 %v1396_v33, %v2915_v35  ;;  %v1408_v56 = vmul.f32 %v1396_v33, %v2917_v44  ;;  %v1409_v57 = vmul.f32 %v1396_v33, %v2919_v63 }
 0x202   :  { %v1410_v11 = vmul.f32 %v1396_v33, %v2921_v52  ;;  %v1411_v61 = vmul.f32 %v1396_v33, %v2923_v1  ;;  %v1412_v58 = vmul.f32 %v1396_v33, %v2925_v0  ;;  %v1413_v60 = vmul.f32 %v1396_v33, %v2927_v12 }
 0x203   :  { %v1418_v13 = vadd.f32 %v2205_v62, %v1398_v43  ;;  %v1419_v41 = vadd.f32 %v2205_v62, %v1399_v55  ;;  %v1420_v16 = vadd.f32 %v2205_v62, %v1400_v2  ;;  %v1421_v14 = vadd.f32 %v2205_v62, %v1401_v3 }
 0x204   :  { %v1422_v20 = vadd.f32 %v2205_v62, %v1402_v6  ;;  %v1423_v23 = vadd.f32 %v2205_v62, %v1403_v7  ;;  %v1424_v17 = vadd.f32 %v2205_v62, %v1404_v9  ;;  %v1425_v35 = vadd.f32 %v2205_v62, %v1405_v10 }
 0x205   :  { %v1426_v18 = vadd.f32 %v2205_v62, %v1406_v54  ;;  %v1427_v44 = vadd.f32 %v2205_v62, %v1407_v5  ;;  %v1428_v19 = vadd.f32 %v2205_v62, %v1408_v56  ;;  %v1429_v63 = vadd.f32 %v2205_v62, %v1409_v57 }
 0x206   :  { %v1430_v21 = vadd.f32 %v2205_v62, %v1410_v11  ;;  %v1431_v52 = vadd.f32 %v2205_v62, %v1411_v61  ;;  %v1432_v22 = vadd.f32 %v2205_v62, %v1412_v58  ;;  %v1433_v1 = vadd.f32 %v2205_v62, %v1413_v60 }
 0x207   :  { %vm1434_vm3 = vcmp.ge.f32.partialorder %v1418_v13, 0.0  ;;  %vm1435_vm4 = vcmp.ge.f32.partialorder %v1419_v41, 0.0  ;;  %vm1436_vm5 = vcmp.ge.f32.partialorder %v1420_v16, 0.0  ;;  %vm1437_vm6 = vcmp.ge.f32.partialorder %v1421_v14, 0.0 }
 0x208   :  { %vm1438_vm7 = vcmp.ge.f32.partialorder %v1422_v20, 0.0  ;;  %vm1439_vm8 = vcmp.ge.f32.partialorder %v1423_v23, 0.0  ;;  %vm1440_vm9 = vcmp.ge.f32.partialorder %v1424_v17, 0.0  ;;  %vm1441_vm10 = vcmp.ge.f32.partialorder %v1425_v35, 0.0 }
 0x209   :  { %vm1442_vm11 = vcmp.ge.f32.partialorder %v1426_v18, 0.0  ;;  %vm1443_vm12 = vcmp.ge.f32.partialorder %v1427_v44, 0.0  ;;  %vm1444_vm13 = vcmp.ge.f32.partialorder %v1428_v19, 0.0  ;;  %vm1445_vm14 = vcmp.ge.f32.partialorder %v1429_v63, 0.0 }
 0x20a   :  { %vm1446_vm15 = vcmp.ge.f32.partialorder %v1430_v21, 0.0  ;;  %vm1447_vm0 = vcmp.ge.f32.partialorder %v1431_v52, 0.0  ;;  %vm1448_vm1 = vcmp.ge.f32.partialorder %v1432_v22, 0.0  ;;  %vm1449_vm2 = vcmp.ge.f32.partialorder %v1433_v1, 0.0 }
 0x20b   :  { %v1450_v0 = vmul.f32 0.2, %v1418_v13  ;;  %v1451_v12 = vmul.f32 0.2, %v1419_v41  ;;  %v1452_v4 = vmul.f32 0.2, %v1420_v16 }
 0x20c   :  { %v1453_v24 = vmul.f32 0.2, %v1421_v14  ;;  %v1454_v26 = vmul.f32 0.2, %v1422_v20  ;;  %v1455_v28 = vmul.f32 0.2, %v1423_v23 }
 0x20d   :  { %v1456_v27 = vmul.f32 0.2, %v1424_v17  ;;  %v1457_v29 = vmul.f32 0.2, %v1425_v35  ;;  %v1458_v30 = vmul.f32 0.2, %v1426_v18  ;;  %v1466_v8 = vsel %vm1434_vm3, %v1418_v13, %v1450_v0 }
 0x20e   :  { %v1459_v31 = vmul.f32 0.2, %v1427_v44  ;;  %v1460_v25 = vmul.f32 0.2, %v1428_v19  ;;  %v1461_v36 = vmul.f32 0.2, %v1429_v63  ;;  %v1467_v37 = vsel %vm1435_vm4, %v1419_v41, %v1451_v12 }
 0x20f   :  { %v1462_v50 = vmul.f32 0.2, %v1430_v21  ;;  %v1463_v38 = vmul.f32 0.2, %v1431_v52  ;;  %v1464_v15 = vmul.f32 0.2, %v1432_v22  ;;  %v1468_v39 = vsel %vm1436_vm5, %v1420_v16, %v1452_v4 }
 0x210   :  { %v1465_v40 = vmul.f32 0.2, %v1433_v1  ;;  %v1469_v42 = vsel %vm1437_vm6, %v1421_v14, %v1453_v24  ;;  %v1470_v32 = vsel %vm1438_vm7, %v1422_v20, %v1454_v26  ;;  %v1471_v45 = vsel %vm1439_vm8, %v1423_v23, %v1455_v28 }
 0x211   :  { %v1472_v46 = vsel %vm1440_vm9, %v1424_v17, %v1456_v27  ;;  %v1473_v59 = vsel %vm1441_vm10, %v1425_v35, %v1457_v29  ;;  %v1474_v47 = vsel %vm1442_vm11, %v1426_v18, %v1458_v30  ;;  %v1475_v48 = vsel %vm1443_vm12, %v1427_v44, %v1459_v31 }
 0x212   :  { %v1476_v34 = vsel %vm1444_vm13, %v1428_v19, %v1460_v25  ;;  %v1477_v49 = vsel %vm1445_vm14, %v1429_v63, %v1461_v36  ;;  %v1478_v51 = vsel %vm1446_vm15, %v1430_v21, %v1462_v50  ;;  %v1479_v53 = vsel %vm1447_vm0, %v1431_v52, %v1463_v38 }
 0x213   :  { %v1480_v33 = vsel %vm1448_vm1, %v1432_v22, %v1464_v15  ;;  %v1481_v43 = vsel %vm1449_vm2, %v1433_v1, %v1465_v40  ;;  %v2161_v55 = vpack.c.bf16 %v1467_v37, %v1466_v8  ;;  %v2166_v2 = vpack.c.bf16 %v1469_v42, %v1468_v39 }
 0x214   :  { %v2171_v3 = vpack.c.bf16 %v1471_v45, %v1470_v32  ;;  %v2176_v62 = vpack.c.bf16 %v1473_v59, %v1472_v46  ;;  %v2181_v6 = vpack.c.bf16 %v1475_v48, %v1474_v47  ;;  %v2186_v7 = vpack.c.bf16 %v1477_v49, %v1476_v34 }
 0x215   :  { %2162 = vst [vmem:[%s3027_s4] sm:$0xff] %v2161_v55   ;;  %v2191_v9 = vpack.c.bf16 %v1479_v53, %v1478_v51  ;;  %v2196_v10 = vpack.c.bf16 %v1481_v43, %v1480_v33 }
 0x216   :  { %2198 = vst [vmem:[%s3027_s4 + $0x8] sm:$0xff] %v2166_v2  }
 0x217   :  { %2199 = vst [vmem:[%s3027_s4 + $0x10] sm:$0xff] %v2171_v3  }
 0x218   :  { %2200 = vst [vmem:[%s3027_s4 + $0x18] sm:$0xff] %v2176_v62  }
 0x219   :  { %2201 = vst [vmem:[%s3027_s4 + $0x20] sm:$0xff] %v2181_v6  }
 0x21a   :  { %2202 = vst [vmem:[%s3027_s4 + $0x28] sm:$0xff] %v2186_v7  }
 0x21b   :  { %2203 = vst [vmem:[%s3027_s4 + $0x30] sm:$0xff] %v2191_v9  }
 0x21c   :  { %2204 = vst [vmem:[%s3027_s4 + $0x38] sm:$0xff] %v2196_v10  }

// kernel: dnet_forward.7
= control target key start
LH: loop header
LB: loop body
LE: loop exit
PB: predicated region body
PF: predicated region fallthrough
CT: control target
= control target key end

     0   :  { %vm2437_vm5 = vcmask 1040384   ;;  %s5906_s1 = inlined_call_operand.vmem [shape: bf16[2048,256], index: 1, kind: input, shape index: {}]   ;;  %s5907_s0 = inlined_call_operand.vmem [shape: bf16[32,2048], index: 0, kind: input, shape index: {}]   ;;  %s5908_s2 = inlined_call_operand.vmem [shape: f32[1,256], index: 2, kind: input, shape index: {}]   ;;  %s5909_s3 = inlined_call_operand.vmem [shape: f32[1,256], index: 3, kind: input, shape index: {}]   ;;  %s5910_s4 = inlined_call_operand.vmem [shape: bf16[32,256], index: 4, kind: output, shape index: {}]  }
   0x1   :  { %v2690_v0 = vld [vmem:[%s5906_s1 + $0x70] sm:$0xf]  ;;  %v3703_v1 = vld [vmem:[%s5906_s1 + $0x74] sm:$0xf0]  ;;  %v2682_v11 = vld [vmem:[%s5906_s1 + $0x60] sm:$0xf] }
   0x2   :  { %v2754_v2 = vld [vmem:[%s5906_s1 + $0xf0] sm:$0xf]  ;;  %v2691_v3 = vor.u32 %v3703_v1, %v2690_v0  ;;  %v3719_v4 = vld [vmem:[%s5906_s1 + $0xf4] sm:$0xf0]  ;;  %v3701_v13 = vld [vmem:[%s5906_s1 + $0x64] sm:$0xf0] }
   0x3   :  { %v2818_v5 = vld [vmem:[%s5906_s1 + $0x170] sm:$0xf]  ;;  %v3735_v6 = vld [vmem:[%s5906_s1 + $0x174] sm:$0xf0]  ;;  %v2755_v7 = vor.u32 %v3719_v4, %v2754_v2  ;;  %v2746_v14 = vld [vmem:[%s5906_s1 + $0xe0] sm:$0xf]  ;;  %v2683_v16 = vor.u32 %v3701_v13, %v2682_v11 }
   0x4   :  { %v2819_v8 = vor.u32 %v3735_v6, %v2818_v5  ;;  %v2882_v9 = vld [vmem:[%s5906_s1 + $0x1f0] sm:$0xf]  ;;  %v3751_v10 = vld [vmem:[%s5906_s1 + $0x1f4] sm:$0xf0]  ;;  %1745 = vmatpush.bf16.msra.mxu0 %v2691_v3  ;;  %v3717_v15 = vld [vmem:[%s5906_s1 + $0xe4] sm:$0xf0] }
   0x5   :  { %v2883_v12 = vor.u32 %v3751_v10, %v2882_v9  ;;  %1764 = vmatpush.bf16.msra.mxu1 %v2755_v7  ;;  %v2747_v17 = vor.u32 %v3717_v15, %v2746_v14  ;;  %v2810_v18 = vld [vmem:[%s5906_s1 + $0x160] sm:$0xf]  ;;  %v3733_v19 = vld [vmem:[%s5906_s1 + $0x164] sm:$0xf0]  ;;  %v2674_v23 = vld [vmem:[%s5906_s1 + $0x50] sm:$0xf] }
   0x6   :  { %1783 = vmatpush.bf16.msra.mxu2 %v2819_v8  ;;  %v2874_v20 = vld [vmem:[%s5906_s1 + $0x1e0] sm:$0xf]  ;;  %v2811_v21 = vor.u32 %v3733_v19, %v2810_v18  ;;  %v3749_v22 = vld [vmem:[%s5906_s1 + $0x1e4] sm:$0xf0]  ;;  %v3699_v24 = vld [vmem:[%s5906_s1 + $0x54] sm:$0xf0] }
   0x7   :  { %1802 = vmatpush.bf16.msra.mxu3 %v2883_v12  ;;  %v2875_v25 = vor.u32 %v3749_v22, %v2874_v20  ;;  %v2738_v26 = vld [vmem:[%s5906_s1 + $0xd0] sm:$0xf]  ;;  %v3715_v27 = vld [vmem:[%s5906_s1 + $0xd4] sm:$0xf0]  ;;  %v2675_v29 = vor.u32 %v3699_v24, %v2674_v23  ;;  %v2666_v35 = vld [vmem:[%s5906_s1 + $0x40] sm:$0xf] }
   0x8   :  { %v2802_v28 = vld [vmem:[%s5906_s1 + $0x150] sm:$0xf]  ;;  %1746 = vmatpush.bf16.msra.mxu0 %v2683_v16  ;;  %v3731_v30 = vld [vmem:[%s5906_s1 + $0x154] sm:$0xf0]  ;;  %v2739_v33 = vor.u32 %v3715_v27, %v2738_v26  ;;  %v3697_v36 = vld [vmem:[%s5906_s1 + $0x44] sm:$0xf0] }
   0x9   :  { %v2866_v31 = vld [vmem:[%s5906_s1 + $0x1d0] sm:$0xf]  ;;  %v3747_v32 = vld [vmem:[%s5906_s1 + $0x1d4] sm:$0xf0]  ;;  %1765 = vmatpush.bf16.msra.mxu1 %v2747_v17  ;;  %v2803_v34 = vor.u32 %v3731_v30, %v2802_v28  ;;  %v2730_v37 = vld [vmem:[%s5906_s1 + $0xc0] sm:$0xf]  ;;  %v2667_v44 = vor.u32 %v3697_v36, %v2666_v35 }
   0xa   :  { %1784 = vmatpush.bf16.msra.mxu2 %v2811_v21  ;;  %v2867_v38 = vor.u32 %v3747_v32, %v2866_v31  ;;  %v3713_v39 = vld [vmem:[%s5906_s1 + $0xc4] sm:$0xf0]  ;;  %v2794_v40 = vld [vmem:[%s5906_s1 + $0x140] sm:$0xf]  ;;  %v2658_v47 = vld [vmem:[%s5906_s1 + $0x30] sm:$0xf] }
   0xb   :  { %1803 = vmatpush.bf16.msra.mxu3 %v2875_v25  ;;  %v3729_v41 = vld [vmem:[%s5906_s1 + $0x144] sm:$0xf0]  ;;  %v2858_v42 = vld [vmem:[%s5906_s1 + $0x1c0] sm:$0xf]  ;;  %v2731_v45 = vor.u32 %v3713_v39, %v2730_v37  ;;  %v3695_v48 = vld [vmem:[%s5906_s1 + $0x34] sm:$0xf0] }
   0xc   :  { %v3745_v43 = vld [vmem:[%s5906_s1 + $0x1c4] sm:$0xf0]  ;;  %1747 = vmatpush.bf16.msra.mxu0 %v2675_v29  ;;  %v2795_v46 = vor.u32 %v3729_v41, %v2794_v40  ;;  %v2722_v49 = vld [vmem:[%s5906_s1 + $0xb0] sm:$0xf]  ;;  %v3711_v51 = vld [vmem:[%s5906_s1 + $0xb4] sm:$0xf0]  ;;  %v2659_v56 = vor.u32 %v3695_v48, %v2658_v47 }
   0xd   :  { %1766 = vmatpush.bf16.msra.mxu1 %v2739_v33  ;;  %v2859_v50 = vor.u32 %v3745_v43, %v2858_v42  ;;  %v2786_v52 = vld [vmem:[%s5906_s1 + $0x130] sm:$0xf]  ;;  %v3727_v53 = vld [vmem:[%s5906_s1 + $0x134] sm:$0xf0]  ;;  %v2723_v57 = vor.u32 %v3711_v51, %v2722_v49  ;;  %v2650_v59 = vld [vmem:[%s5906_s1 + $0x20] sm:$0xf] }
   0xe   :  { %1785 = vmatpush.bf16.msra.mxu2 %v2803_v34  ;;  %v2850_v54 = vld [vmem:[%s5906_s1 + $0x1b0] sm:$0xf]  ;;  %v3743_v55 = vld [vmem:[%s5906_s1 + $0x1b4] sm:$0xf0]  ;;  %v2787_v58 = vor.u32 %v3727_v53, %v2786_v52  ;;  %v3693_v60 = vld [vmem:[%s5906_s1 + $0x24] sm:$0xf0] }
   0xf   :  { %1804 = vmatpush.bf16.msra.mxu3 %v2867_v38  ;;  %v2714_v61 = vld [vmem:[%s5906_s1 + $0xa0] sm:$0xf]  ;;  %v2851_v62 = vor.u32 %v3743_v55, %v2850_v54  ;;  %v3709_v63 = vld [vmem:[%s5906_s1 + $0xa4] sm:$0xf0]  ;;  %v2651_v4 = vor.u32 %v3693_v60, %v2650_v59  ;;  %v2642_v7 = vld [vmem:[%s5906_s1 + $0x10] sm:$0xf] }
  0x10   :  { %1748 = vmatpush.bf16.msra.mxu0 %v2667_v44  ;;  %v2778_v0 = vld [vmem:[%s5906_s1 + $0x120] sm:$0xf]  ;;  %v3725_v1 = vld [vmem:[%s5906_s1 + $0x124] sm:$0xf0]  ;;  %v2715_v5 = vor.u32 %v3709_v63, %v2714_v61  ;;  %v3691_v8 = vld [vmem:[%s5906_s1 + $0x14] sm:$0xf0] }
  0x11   :  { %1767 = vmatpush.bf16.msra.mxu1 %v2731_v45  ;;  %v2842_v2 = vld [vmem:[%s5906_s1 + $0x1a0] sm:$0xf]  ;;  %v3741_v3 = vld [vmem:[%s5906_s1 + $0x1a4] sm:$0xf0]  ;;  %v2779_v6 = vor.u32 %v3725_v1, %v2778_v0  ;;  %v2706_v9 = vld [vmem:[%s5906_s1 + $0x90] sm:$0xf]  ;;  %v2643_v17 = vor.u32 %v3691_v8, %v2642_v7 }
  0x12   :  { %1786 = vmatpush.bf16.msra.mxu2 %v2795_v46  ;;  %v2843_v10 = vor.u32 %v3741_v3, %v2842_v2  ;;  %v3707_v11 = vld [vmem:[%s5906_s1 + $0x94] sm:$0xf0]  ;;  %v2770_v12 = vld [vmem:[%s5906_s1 + $0x110] sm:$0xf]  ;;  %v2634_v16 = vld [vmem:[%s5906_s1] sm:$0xf] }
  0x13   :  { %1805 = vmatpush.bf16.msra.mxu3 %v2859_v50  ;;  %v3723_v13 = vld [vmem:[%s5906_s1 + $0x114] sm:$0xf0]  ;;  %v2834_v14 = vld [vmem:[%s5906_s1 + $0x190] sm:$0xf]  ;;  %v3689_v18 = vld [vmem:[%s5906_s1 + $0x4] sm:$0xf0]  ;;  %v2707_v21 = vor.u32 %v3707_v11, %v2706_v9 }
  0x14   :  { %1749 = vmatpush.bf16.msra.mxu0 %v2659_v56  ;;  %v3739_v15 = vld [vmem:[%s5906_s1 + $0x194] sm:$0xf0]  ;;  %v2698_v19 = vld [vmem:[%s5906_s1 + $0x80] sm:$0xf]  ;;  %v3705_v20 = vld [vmem:[%s5906_s1 + $0x84] sm:$0xf0]  ;;  %v2771_v22 = vor.u32 %v3723_v13, %v2770_v12  ;;  %v2635_v34 = vor.u32 %v3689_v18, %v2634_v16 }
  0x15   :  { %1768 = vmatpush.bf16.msra.mxu1 %v2723_v57  ;;  %v2762_v23 = vld [vmem:[%s5906_s1 + $0x100] sm:$0xf]  ;;  %v3721_v24 = vld [vmem:[%s5906_s1 + $0x104] sm:$0xf0]  ;;  %v2835_v26 = vor.u32 %v3739_v15, %v2834_v14  ;;  %v3656_v30 = vld [vmem:[%s5907_s0 + $0x4] sm:$0xf]  ;;  %v2699_v38 = vor.u32 %v3705_v20, %v2698_v19 }
  0x16   :  { %1787 = vmatpush.bf16.msra.mxu2 %v2787_v58  ;;  %v2826_v25 = vld [vmem:[%s5906_s1 + $0x180] sm:$0xf]  ;;  %v3737_v27 = vld [vmem:[%s5906_s1 + $0x184] sm:$0xf0]  ;;  %v2508_v31 = vld [vmem:[%s5907_s0 + $0x40] sm:$0xf0]  ;;  %v2763_v39 = vor.u32 %v3721_v24, %v2762_v23 }
  0x17   :  { %1806 = vmatpush.bf16.msra.mxu3 %v2851_v62  ;;  %v2506_v28 = vld [vmem:[%s5907_s0] sm:$0xf]  ;;  %v3074_v32 = vld [vmem:[%s5906_s1 + $0x370] sm:$0xf]  ;;  %v3799_v33 = vld [vmem:[%s5906_s1 + $0x374] sm:$0xf0]  ;;  %v2827_v43 = vor.u32 %v3737_v27, %v2826_v25  ;;  %v4221_v53 = vor.u32 %v3656_v30, %v2508_v31 }
  0x18   :  { %1750 = vmatpush.bf16.msra.mxu0 %v2651_v4  ;;  %v3664_v29 = vld [vmem:[%s5907_s0 + $0x3c] sm:$0xf0]  ;;  %v2514_v35 = vld [vmem:[%s5907_s0 + $0x8] sm:$0xf]  ;;  %v3010_v36 = vld [vmem:[%s5906_s1 + $0x2f0] sm:$0xf]  ;;  %v3075_v44 = vor.u32 %v3799_v33, %v3074_v32 }
  0x19   :  { %1769 = vmatpush.bf16.msra.mxu1 %v2715_v5  ;;  %v3783_v37 = vld [vmem:[%s5906_s1 + $0x2f4] sm:$0xf0]  ;;  %v3665_v40 = vld [vmem:[%s5907_s0 + $0x44] sm:$0xf0]  ;;  %v3657_v41 = vld [vmem:[%s5907_s0 + $0xc] sm:$0xf]  ;;  %v4210_v48 = vor.u32 %v3664_v29, %v2506_v28 }
  0x1a   :  { %1788 = vmatpush.bf16.msra.mxu2 %v2779_v6  ;;  %v2516_v42 = vld [vmem:[%s5907_s0 + $0x48] sm:$0xf0]  ;;  %v2946_v45 = vld [vmem:[%s5906_s1 + $0x270] sm:$0xf]  ;;  %v3767_v46 = vld [vmem:[%s5906_s1 + $0x274] sm:$0xf0]  ;;  %v3011_v49 = vor.u32 %v3783_v37, %v3010_v36  ;;  %v4223_v54 = vor.u32 %v3665_v40, %v2514_v35 }
  0x1b   :  { %1807 = vmatpush.bf16.msra.mxu3 %v2843_v10  ;;  %v3138_v47 = vld [vmem:[%s5906_s1 + $0x3f0] sm:$0xf]  ;;  %v3815_v50 = vld [vmem:[%s5906_s1 + $0x3f4] sm:$0xf0]  ;;  %v3066_v51 = vld [vmem:[%s5906_s1 + $0x360] sm:$0xf]  ;;  %v4231_v57 = vor.u32 %v3657_v41, %v2516_v42  ;;  %v2947_v58 = vor.u32 %v3767_v46, %v2946_v45 }
  0x1c   :  { %1751 = vmatpush.bf16.msra.mxu0 %v2643_v17  ;;  %v3797_v52 = vld [vmem:[%s5906_s1 + $0x364] sm:$0xf0]  ;;  %v3002_v55 = vld [vmem:[%s5906_s1 + $0x2e0] sm:$0xf]  ;;  %v3139_v59 = vor.u32 %v3815_v50, %v3138_v47  ;;  %v3058_v2 = vld [vmem:[%s5906_s1 + $0x350] sm:$0xf] }
  0x1d   :  { %1770 = vmatpush.bf16.msra.mxu1 %v2707_v21  ;;  %v3781_v56 = vld [vmem:[%s5906_s1 + $0x2e4] sm:$0xf0]  ;;  %v3067_v60 = vor.u32 %v3797_v52, %v3066_v51  ;;  %v2938_v61 = vld [vmem:[%s5906_s1 + $0x260] sm:$0xf]  ;;  %v3795_v3 = vld [vmem:[%s5906_s1 + $0x354] sm:$0xf0] }
  0x1e   :  { %1789 = vmatpush.bf16.msra.mxu2 %v2771_v22  ;;  %v3765_v62 = vld [vmem:[%s5906_s1 + $0x264] sm:$0xf0]  ;;  %v3130_v63 = vld [vmem:[%s5906_s1 + $0x3e0] sm:$0xf]  ;;  %v3003_v0 = vor.u32 %v3781_v56, %v3002_v55  ;;  %v2994_v4 = vld [vmem:[%s5906_s1 + $0x2d0] sm:$0xf]  ;;  %v3059_v8 = vor.u32 %v3795_v3, %v3058_v2 }
  0x1f   :  { %1808 = vmatpush.bf16.msra.mxu3 %v2835_v26  ;;  %v3813_v1 = vld [vmem:[%s5906_s1 + $0x3e4] sm:$0xf0]  ;;  %v3779_v5 = vld [vmem:[%s5906_s1 + $0x2d4] sm:$0xf0]  ;;  %v2939_v6 = vor.u32 %v3765_v62, %v2938_v61  ;;  %v2930_v9 = vld [vmem:[%s5906_s1 + $0x250] sm:$0xf] }
  0x20   :  { %1752 = vmatpush.bf16.msra.mxu0 %v2635_v34  ;;  %v3131_v7 = vor.u32 %v3813_v1, %v3130_v63  ;;  %v3763_v10 = vld [vmem:[%s5906_s1 + $0x254] sm:$0xf0]  ;;  %v3122_v11 = vld [vmem:[%s5906_s1 + $0x3d0] sm:$0xf]  ;;  %v2995_v12 = vor.u32 %v3779_v5, %v2994_v4  ;;  %v3050_v14 = vld [vmem:[%s5906_s1 + $0x340] sm:$0xf] }
  0x21   :  { %1771 = vmatpush.bf16.msra.mxu1 %v2699_v38  ;;  %v3811_v13 = vld [vmem:[%s5906_s1 + $0x3d4] sm:$0xf0]  ;;  %v3793_v15 = vld [vmem:[%s5906_s1 + $0x344] sm:$0xf0]  ;;  %v2986_v16 = vld [vmem:[%s5906_s1 + $0x2c0] sm:$0xf]  ;;  %v2931_v18 = vor.u32 %v3763_v10, %v2930_v9 }
  0x22   :  { %1790 = vmatpush.bf16.msra.mxu2 %v2763_v39  ;;  %v3777_v17 = vld [vmem:[%s5906_s1 + $0x2c4] sm:$0xf0]  ;;  %v2922_v19 = vld [vmem:[%s5906_s1 + $0x240] sm:$0xf]  ;;  %v3123_v22 = vor.u32 %v3811_v13, %v3122_v11  ;;  %v3051_v23 = vor.u32 %v3793_v15, %v3050_v14  ;;  %v3672_v28 = vld [vmem:[%s5907_s0 + $0x84] sm:$0xf] }
  0x23   :  { %1809 = vmatpush.bf16.msra.mxu3 %v2827_v43  ;;  %1753 = vmatmul.bf16.vlgmr.msra.gmra.mxu0 %v4210_v48  ;;  %v3761_v20 = vld [vmem:[%s5906_s1 + $0x244] sm:$0xf0]  ;;  %v3114_v21 = vld [vmem:[%s5906_s1 + $0x3c0] sm:$0xf]  ;;  %v2987_v27 = vor.u32 %v3777_v17, %v2986_v16  ;;  %v2572_v29 = vld [vmem:[%s5907_s0 + $0xc0] sm:$0xf0] }
  0x24   :  { %1772 = vmatmul.bf16.vlgmr.msra.gmra.mxu1 %v4221_v53  ;;  %1821 = vmatpush.bf16.msrb.mxu0 %v2947_v58  ;;  %v3809_v24 = vld [vmem:[%s5906_s1 + $0x3c4] sm:$0xf0]  ;;  %v2570_v25 = vld [vmem:[%s5907_s0 + $0x80] sm:$0xf]  ;;  %v3042_v30 = vld [vmem:[%s5906_s1 + $0x330] sm:$0xf]  ;;  %v2923_v35 = vor.u32 %v3761_v20, %v2922_v19  ;;  %v4353_v50 = vor.u32 %v3672_v28, %v2572_v29 }
  0x25   :  { %1840 = vmatpush.bf16.msrb.mxu1 %v3011_v49  ;;  %1791 = vmatmul.bf16.vlgmr.msra.gmra.mxu2 %v4223_v54  ;;  %v3680_v26 = vld [vmem:[%s5907_s0 + $0xbc] sm:$0xf0]  ;;  %v3791_v31 = vld [vmem:[%s5906_s1 + $0x334] sm:$0xf0]  ;;  %v2578_v32 = vld [vmem:[%s5907_s0 + $0x88] sm:$0xf]  ;;  %v3115_v39 = vor.u32 %v3809_v24, %v3114_v21 }
  0x26   :  { %1859 = vmatpush.bf16.msrb.mxu2 %v3075_v44  ;;  %1810 = vmatmul.bf16.vlgmr.msra.gmra.mxu3 %v4231_v57  ;;  %v2978_v33 = vld [vmem:[%s5906_s1 + $0x2b0] sm:$0xf]  ;;  %v3775_v34 = vld [vmem:[%s5906_s1 + $0x2b4] sm:$0xf0]  ;;  %v3681_v36 = vld [vmem:[%s5907_s0 + $0xc4] sm:$0xf0]  ;;  %v3043_v40 = vor.u32 %v3791_v31, %v3042_v30  ;;  %v4342_v44 = vor.u32 %v3680_v26, %v2570_v25 }
  0x27   :  { %1878 = vmatpush.bf16.msrb.mxu3 %v3139_v59  ;;  %v3673_v37 = vld [vmem:[%s5907_s0 + $0x8c] sm:$0xf]  ;;  %v2914_v41 = vld [vmem:[%s5906_s1 + $0x230] sm:$0xf]  ;;  %v3759_v42 = vld [vmem:[%s5906_s1 + $0x234] sm:$0xf0]  ;;  %v2979_v45 = vor.u32 %v3775_v34, %v2978_v33  ;;  %v4355_v51 = vor.u32 %v3681_v36, %v2578_v32 }
  0x28   :  { %1822 = vmatpush.bf16.msrb.mxu0 %v2939_v6  ;;  %v2580_v38 = vld [vmem:[%s5907_s0 + $0xc8] sm:$0xf0]  ;;  %v3106_v43 = vld [vmem:[%s5906_s1 + $0x3b0] sm:$0xf]  ;;  %v3807_v46 = vld [vmem:[%s5906_s1 + $0x3b4] sm:$0xf0]  ;;  %v2915_v58 = vor.u32 %v3759_v42, %v2914_v41 }
  0x29   :  { %1841 = vmatpush.bf16.msrb.mxu1 %v3003_v0  ;;  %v3034_v47 = vld [vmem:[%s5906_s1 + $0x320] sm:$0xf]  ;;  %v3789_v49 = vld [vmem:[%s5906_s1 + $0x324] sm:$0xf0]  ;;  %v4363_v56 = vor.u32 %v3673_v37, %v2580_v38  ;;  %v3107_v59 = vor.u32 %v3807_v46, %v3106_v43  ;;  %v3026_v2 = vld [vmem:[%s5906_s1 + $0x310] sm:$0xf] }
  0x2a   :  { %1860 = vmatpush.bf16.msrb.mxu2 %v3067_v60  ;;  %v2970_v52 = vld [vmem:[%s5906_s1 + $0x2a0] sm:$0xf]  ;;  %v3773_v55 = vld [vmem:[%s5906_s1 + $0x2a4] sm:$0xf0]  ;;  %v3035_v60 = vor.u32 %v3789_v49, %v3034_v47  ;;  %v3787_v3 = vld [vmem:[%s5906_s1 + $0x314] sm:$0xf0] }
  0x2b   :  { %1879 = vmatpush.bf16.msrb.mxu3 %v3131_v7  ;;  %v2906_v61 = vld [vmem:[%s5906_s1 + $0x220] sm:$0xf]  ;;  %v3757_v62 = vld [vmem:[%s5906_s1 + $0x224] sm:$0xf0]  ;;  %v2971_v0 = vor.u32 %v3773_v55, %v2970_v52  ;;  %v2962_v4 = vld [vmem:[%s5906_s1 + $0x290] sm:$0xf]  ;;  %v3027_v9 = vor.u32 %v3787_v3, %v3026_v2 }
  0x2c   :  { %1823 = vmatpush.bf16.msrb.mxu0 %v2931_v18  ;;  %v3098_v63 = vld [vmem:[%s5906_s1 + $0x3a0] sm:$0xf]  ;;  %v3805_v1 = vld [vmem:[%s5906_s1 + $0x3a4] sm:$0xf0]  ;;  %v3771_v5 = vld [vmem:[%s5906_s1 + $0x294] sm:$0xf0]  ;;  %v2907_v6 = vor.u32 %v3757_v62, %v2906_v61 }
  0x2d   :  { %1842 = vmatpush.bf16.msrb.mxu1 %v2995_v12  ;;  %v2898_v7 = vld [vmem:[%s5906_s1 + $0x210] sm:$0xf]  ;;  %v3755_v10 = vld [vmem:[%s5906_s1 + $0x214] sm:$0xf0]  ;;  %v2963_v13 = vor.u32 %v3771_v5, %v2962_v4  ;;  %v3018_v14 = vld [vmem:[%s5906_s1 + $0x300] sm:$0xf] }
  0x2e   :  { %1861 = vmatpush.bf16.msrb.mxu2 %v3059_v8  ;;  %v3099_v8 = vor.u32 %v3805_v1, %v3098_v63  ;;  %v3090_v11 = vld [vmem:[%s5906_s1 + $0x390] sm:$0xf]  ;;  %v3803_v12 = vld [vmem:[%s5906_s1 + $0x394] sm:$0xf0]  ;;  %v3785_v15 = vld [vmem:[%s5906_s1 + $0x304] sm:$0xf0]  ;;  %v2899_v20 = vor.u32 %v3755_v10, %v2898_v7 }
  0x2f   :  { %1880 = vmatpush.bf16.msrb.mxu3 %v3123_v22  ;;  %v2954_v16 = vld [vmem:[%s5906_s1 + $0x280] sm:$0xf]  ;;  %v3769_v17 = vld [vmem:[%s5906_s1 + $0x284] sm:$0xf0]  ;;  %v3330_v18 = vld [vmem:[%s5906_s1 + $0x570] sm:$0xf]  ;;  %v3091_v24 = vor.u32 %v3803_v12, %v3090_v11  ;;  %v3019_v25 = vor.u32 %v3785_v15, %v3018_v14 }
  0x30   :  { %1824 = vmatpush.bf16.msrb.mxu0 %v2923_v35  ;;  %v3863_v19 = vld [vmem:[%s5906_s1 + $0x574] sm:$0xf0]  ;;  %v2890_v21 = vld [vmem:[%s5906_s1 + $0x200] sm:$0xf]  ;;  %v3266_v22 = vld [vmem:[%s5906_s1 + $0x4f0] sm:$0xf]  ;;  %v2955_v29 = vor.u32 %v3769_v17, %v2954_v16 }
  0x31   :  { %1843 = vmatpush.bf16.msrb.mxu1 %v2987_v27  ;;  %v3753_v26 = vld [vmem:[%s5906_s1 + $0x204] sm:$0xf0]  ;;  %v3082_v27 = vld [vmem:[%s5906_s1 + $0x380] sm:$0xf]  ;;  %v2522_v30 = vld [vmem:[%s5907_s0 + $0x10] sm:$0xf]  ;;  %v3331_v34 = vor.u32 %v3863_v19, %v3330_v18 }
  0x32   :  { %1862 = vmatpush.bf16.msrb.mxu2 %v3051_v23  ;;  %v3847_v23 = vld [vmem:[%s5906_s1 + $0x4f4] sm:$0xf0]  ;;  %v3801_v28 = vld [vmem:[%s5906_s1 + $0x384] sm:$0xf0]  ;;  %v3666_v31 = vld [vmem:[%s5907_s0 + $0x4c] sm:$0xf0]  ;;  %v2891_v42 = vor.u32 %v3753_v26, %v2890_v21 }
  0x33   :  { %1881 = vmatpush.bf16.msrb.mxu3 %v3115_v39  ;;  %1758 = vmatmul.bf16.gmra.mxu0 %v4342_v44  ;;  %v3658_v32 = vld [vmem:[%s5907_s0 + $0x14] sm:$0xf]  ;;  %v3202_v35 = vld [vmem:[%s5906_s1 + $0x470] sm:$0xf]  ;;  %v3831_v36 = vld [vmem:[%s5906_s1 + $0x474] sm:$0xf0]  ;;  %v3267_v38 = vor.u32 %v3847_v23, %v3266_v22  ;;  %v3083_v47 = vor.u32 %v3801_v28, %v3082_v27 }
  0x34   :  { %1777 = vmatmul.bf16.gmra.mxu1 %v4353_v50  ;;  %1825 = vmatpush.bf16.msrb.mxu0 %v2915_v58  ;;  %v2524_v33 = vld [vmem:[%s5907_s0 + $0x50] sm:$0xf0]  ;;  %v3394_v37 = vld [vmem:[%s5906_s1 + $0x5f0] sm:$0xf]  ;;  %v3879_v39 = vld [vmem:[%s5906_s1 + $0x5f4] sm:$0xf0]  ;;  %v3203_v52 = vor.u32 %v3831_v36, %v3202_v35 }
  0x35   :  { %1844 = vmatpush.bf16.msrb.mxu1 %v2979_v45  ;;  %1796 = vmatmul.bf16.gmra.mxu2 %v4355_v51  ;;  %v3861_v41 = vld [vmem:[%s5906_s1 + $0x564] sm:$0xf0]  ;;  %v2530_v43 = vld [vmem:[%s5907_s0 + $0x18] sm:$0xf]  ;;  %v3659_v46 = vld [vmem:[%s5907_s0 + $0x1c] sm:$0xf]  ;;  %v4500_v1 = vor.u32 %v3658_v32, %v2524_v33 }
  0x36   :  { %1863 = vmatpush.bf16.msrb.mxu2 %v3043_v40  ;;  %1815 = vmatmul.bf16.gmra.mxu3 %v4363_v56  ;;  %v3322_v40 = vld [vmem:[%s5906_s1 + $0x560] sm:$0xf]  ;;  %v3667_v45 = vld [vmem:[%s5907_s0 + $0x54] sm:$0xf0]  ;;  %v2532_v49 = vld [vmem:[%s5907_s0 + $0x58] sm:$0xf0] }
  0x37   :  { %1882 = vmatpush.bf16.msrb.mxu3 %v3107_v59  ;;  %v3194_v55 = vld [vmem:[%s5906_s1 + $0x460] sm:$0xf]  ;;  %v3829_v58 = vld [vmem:[%s5906_s1 + $0x464] sm:$0xf0]  ;;  %v3395_v59 = vor.u32 %v3879_v39, %v3394_v37  ;;  %v3314_v3 = vld [vmem:[%s5906_s1 + $0x550] sm:$0xf]  ;;  %v4511_v5 = vor.u32 %v3667_v45, %v2530_v43 }
  0x38   :  { %1826 = vmatpush.bf16.msrb.mxu0 %v2907_v6  ;;  %v3258_v61 = vld [vmem:[%s5906_s1 + $0x4e0] sm:$0xf]  ;;  %v3845_v62 = vld [vmem:[%s5906_s1 + $0x4e4] sm:$0xf0]  ;;  %v3859_v4 = vld [vmem:[%s5906_s1 + $0x554] sm:$0xf0]  ;;  %v4513_v6 = vor.u32 %v3659_v46, %v2532_v49  ;;  %v3195_v7 = vor.u32 %v3829_v58, %v3194_v55 }
  0x39   :  { %1845 = vmatpush.bf16.msrb.mxu1 %v2971_v0  ;;  %v3386_v63 = vld [vmem:[%s5906_s1 + $0x5e0] sm:$0xf]  ;;  %v4498_v0 = vor.u32 %v3666_v31, %v2522_v30  ;;  %v3877_v2 = vld [vmem:[%s5906_s1 + $0x5e4] sm:$0xf0]  ;;  %v3827_v10 = vld [vmem:[%s5906_s1 + $0x454] sm:$0xf0]  ;;  %v3315_v12 = vor.u32 %v3859_v4, %v3314_v3 }
  0x3a   :  { %1864 = vmatpush.bf16.msrb.mxu2 %v3035_v60  ;;  %v3323_v60 = vor.u32 %v3861_v41, %v3322_v40  ;;  %v3387_v11 = vor.u32 %v3877_v2, %v3386_v63  ;;  %v3843_v14 = vld [vmem:[%s5906_s1 + $0x4d4] sm:$0xf0]  ;;  %v3378_v15 = vld [vmem:[%s5906_s1 + $0x5d0] sm:$0xf]  ;;  %v3306_v17 = vld [vmem:[%s5906_s1 + $0x540] sm:$0xf] }
  0x3b   :  { %1883 = vmatpush.bf16.msrb.mxu3 %v3099_v8  ;;  %v3259_v8 = vor.u32 %v3845_v62, %v3258_v61  ;;  %v3875_v16 = vld [vmem:[%s5906_s1 + $0x5d4] sm:$0xf0]  ;;  %v3857_v18 = vld [vmem:[%s5906_s1 + $0x544] sm:$0xf0]  ;;  %v3178_v21 = vld [vmem:[%s5906_s1 + $0x440] sm:$0xf] }
  0x3c   :  { %1827 = vmatpush.bf16.msrb.mxu0 %v2899_v20  ;;  %v3825_v22 = vld [vmem:[%s5906_s1 + $0x444] sm:$0xf0]  ;;  %v3379_v23 = vor.u32 %v3875_v16, %v3378_v15  ;;  %v3370_v27 = vld [vmem:[%s5906_s1 + $0x5c0] sm:$0xf]  ;;  %v3855_v30 = vld [vmem:[%s5906_s1 + $0x534] sm:$0xf0] }
  0x3d   :  { %1846 = vmatpush.bf16.msrb.mxu1 %v2963_v13  ;;  %v3250_v13 = vld [vmem:[%s5906_s1 + $0x4d0] sm:$0xf]  ;;  %v3841_v26 = vld [vmem:[%s5906_s1 + $0x4c4] sm:$0xf0]  ;;  %v3179_v31 = vor.u32 %v3825_v22, %v3178_v21  ;;  %v2588_v39 = vld [vmem:[%s5907_s0 + $0xd0] sm:$0xf0] }
  0x3e   :  { %1865 = vmatpush.bf16.msrb.mxu2 %v3027_v9  ;;  %v3186_v9 = vld [vmem:[%s5906_s1 + $0x450] sm:$0xf]  ;;  %v3251_v20 = vor.u32 %v3843_v14, %v3250_v13  ;;  %v3873_v28 = vld [vmem:[%s5906_s1 + $0x5c4] sm:$0xf0]  ;;  %v3871_v45 = vld [vmem:[%s5906_s1 + $0x5b4] sm:$0xf0] }
  0x3f   :  { %1884 = vmatpush.bf16.msrb.mxu3 %v3091_v24  ;;  %v3187_v19 = vor.u32 %v3827_v10, %v3186_v9  ;;  %v3307_v24 = vor.u32 %v3857_v18, %v3306_v17  ;;  %v3170_v33 = vld [vmem:[%s5906_s1 + $0x430] sm:$0xf]  ;;  %v3371_v35 = vor.u32 %v3873_v28, %v3370_v27  ;;  %v3290_v46 = vld [vmem:[%s5906_s1 + $0x520] sm:$0xf]  ;;  %v2594_v49 = vld [vmem:[%s5907_s0 + $0x98] sm:$0xf] }
  0x40   :  { %1828 = vmatpush.bf16.msrb.mxu0 %v2891_v42  ;;  %v2586_v36 = vld [vmem:[%s5907_s0 + $0x90] sm:$0xf]  ;;  %v3839_v42 = vld [vmem:[%s5906_s1 + $0x4b4] sm:$0xf0]  ;;  %v3675_v55 = vld [vmem:[%s5907_s0 + $0x9c] sm:$0xf] }
  0x41   :  { %1847 = vmatpush.bf16.msrb.mxu1 %v2955_v29  ;;  %v3298_v29 = vld [vmem:[%s5906_s1 + $0x530] sm:$0xf]  ;;  %v2596_v58 = vld [vmem:[%s5907_s0 + $0xd8] sm:$0xf0]  ;;  %v3162_v61 = vld [vmem:[%s5906_s1 + $0x420] sm:$0xf] }
  0x42   :  { %1866 = vmatpush.bf16.msrb.mxu2 %v3019_v25  ;;  %v3242_v25 = vld [vmem:[%s5906_s1 + $0x4c0] sm:$0xf]  ;;  %v3682_v37 = vld [vmem:[%s5907_s0 + $0xcc] sm:$0xf0]  ;;  %v3299_v40 = vor.u32 %v3855_v30, %v3298_v29  ;;  %v3821_v62 = vld [vmem:[%s5906_s1 + $0x424] sm:$0xf0]  ;;  %v4645_v14 = vor.u32 %v3675_v55, %v2596_v58 }
  0x43   :  { %1885 = vmatpush.bf16.msrb.mxu3 %v3083_v47  ;;  %1829 = vmatmul.bf16.vlgmr.msrb.gmra.mxu0 %v4498_v0  ;;  %v3243_v32 = vor.u32 %v3841_v26, %v3242_v25  ;;  %v3234_v41 = vld [vmem:[%s5906_s1 + $0x4b0] sm:$0xf]  ;;  %v3853_v47 = vld [vmem:[%s5906_s1 + $0x524] sm:$0xf0]  ;;  %v3226_v3 = vld [vmem:[%s5906_s1 + $0x4a0] sm:$0xf]  ;;  %v3163_v15 = vor.u32 %v3821_v62, %v3162_v61 }
  0x44   :  { %1897 = vmatpush.bf16.msra.mxu0 %v3203_v52  ;;  %1848 = vmatmul.bf16.vlgmr.msrb.gmra.mxu1 %v4500_v1  ;;  %v3362_v43 = vld [vmem:[%s5906_s1 + $0x5b0] sm:$0xf]  ;;  %v3683_v52 = vld [vmem:[%s5907_s0 + $0xd4] sm:$0xf0]  ;;  %v3291_v2 = vor.u32 %v3853_v47, %v3290_v46  ;;  %v3837_v4 = vld [vmem:[%s5906_s1 + $0x4a4] sm:$0xf0] }
  0x45   :  { %1916 = vmatpush.bf16.msra.mxu1 %v3267_v38  ;;  %1867 = vmatmul.bf16.vlgmr.msrb.gmra.mxu2 %v4511_v5  ;;  %v3674_v38 = vld [vmem:[%s5907_s0 + $0x94] sm:$0xf]  ;;  %v3363_v63 = vor.u32 %v3871_v45, %v3362_v43  ;;  %v3869_v10 = vld [vmem:[%s5906_s1 + $0x5a4] sm:$0xf0]  ;;  %v4643_v13 = vor.u32 %v3683_v52, %v2594_v49  ;;  %v3227_v16 = vor.u32 %v3837_v4, %v3226_v3  ;;  %v3154_v17 = vld [vmem:[%s5906_s1 + $0x410] sm:$0xf] }
  0x46   :  { %1935 = vmatpush.bf16.msra.mxu2 %v3331_v34  ;;  %1886 = vmatmul.bf16.vlgmr.msrb.gmra.mxu3 %v4513_v6  ;;  %v3823_v34 = vld [vmem:[%s5906_s1 + $0x434] sm:$0xf0]  ;;  %v4632_v9 = vor.u32 %v3674_v38, %v2588_v39  ;;  %v3218_v21 = vld [vmem:[%s5906_s1 + $0x490] sm:$0xf]  ;;  %v3274_v25 = vld [vmem:[%s5906_s1 + $0x500] sm:$0xf] }
  0x47   :  { %1954 = vmatpush.bf16.msra.mxu3 %v3395_v59  ;;  %v3171_v59 = vor.u32 %v3823_v34, %v3170_v33  ;;  %v3819_v18 = vld [vmem:[%s5906_s1 + $0x414] sm:$0xf0]  ;;  %v3849_v26 = vld [vmem:[%s5906_s1 + $0x504] sm:$0xf0]  ;;  %v3586_v27 = vld [vmem:[%s5906_s1 + $0x770] sm:$0xf] }
  0x48   :  { %1898 = vmatpush.bf16.msra.mxu0 %v3195_v7  ;;  %v3354_v7 = vld [vmem:[%s5906_s1 + $0x5a0] sm:$0xf]  ;;  %v3835_v22 = vld [vmem:[%s5906_s1 + $0x494] sm:$0xf0]  ;;  %v3155_v29 = vor.u32 %v3819_v18, %v3154_v17  ;;  %v3865_v38 = vld [vmem:[%s5906_s1 + $0x584] sm:$0xf0] }
  0x49   :  { %1917 = vmatpush.bf16.msra.mxu1 %v3259_v8  ;;  %v4630_v8 = vor.u32 %v3682_v37, %v2586_v36  ;;  %v3927_v28 = vld [vmem:[%s5906_s1 + $0x774] sm:$0xf0]  ;;  %v3219_v30 = vor.u32 %v3835_v22, %v3218_v21  ;;  %v3210_v33 = vld [vmem:[%s5906_s1 + $0x480] sm:$0xf]  ;;  %v3833_v36 = vld [vmem:[%s5906_s1 + $0x484] sm:$0xf0] }
  0x4a   :  { %1936 = vmatpush.bf16.msra.mxu2 %v3323_v60  ;;  %v3235_v60 = vor.u32 %v3839_v42, %v3234_v41  ;;  %v3338_v37 = vld [vmem:[%s5906_s1 + $0x580] sm:$0xf]  ;;  %v3587_v39 = vor.u32 %v3927_v28, %v3586_v27  ;;  %v3895_v41 = vld [vmem:[%s5906_s1 + $0x674] sm:$0xf0]  ;;  %v3522_v42 = vld [vmem:[%s5906_s1 + $0x6f0] sm:$0xf]  ;;  %v3211_v49 = vor.u32 %v3833_v36, %v3210_v33 }
  0x4b   :  { %1955 = vmatpush.bf16.msra.mxu3 %v3387_v11  ;;  %v3282_v11 = vld [vmem:[%s5906_s1 + $0x510] sm:$0xf]  ;;  %v3911_v43 = vld [vmem:[%s5906_s1 + $0x6f4] sm:$0xf0]  ;;  %v3578_v52 = vld [vmem:[%s5906_s1 + $0x760] sm:$0xf]  ;;  %v3339_v58 = vor.u32 %v3865_v38, %v3338_v37 }
  0x4c   :  { %1899 = vmatpush.bf16.msra.mxu0 %v3187_v19  ;;  %v3355_v19 = vor.u32 %v3869_v10, %v3354_v7  ;;  %v3650_v45 = vld [vmem:[%s5906_s1 + $0x7f0] sm:$0xf]  ;;  %v3943_v46 = vld [vmem:[%s5906_s1 + $0x7f4] sm:$0xf0]  ;;  %v3925_v55 = vld [vmem:[%s5906_s1 + $0x764] sm:$0xf0] }
  0x4d   :  { %1918 = vmatpush.bf16.msra.mxu1 %v3251_v20  ;;  %v3660_v61 = vld [vmem:[%s5907_s0 + $0x24] sm:$0xf]  ;;  %v3651_v3 = vor.u32 %v3943_v46, %v3650_v45  ;;  %v3450_v4 = vld [vmem:[%s5906_s1 + $0x660] sm:$0xf]  ;;  %v3893_v7 = vld [vmem:[%s5906_s1 + $0x664] sm:$0xf0] }
  0x4e   :  { %1937 = vmatpush.bf16.msra.mxu2 %v3315_v12  ;;  %v3851_v12 = vld [vmem:[%s5906_s1 + $0x514] sm:$0xf0]  ;;  %v2546_v10 = vld [vmem:[%s5907_s0 + $0x28] sm:$0xf]  ;;  %v3514_v17 = vld [vmem:[%s5906_s1 + $0x6e0] sm:$0xf] }
  0x4f   :  { %1956 = vmatpush.bf16.msra.mxu3 %v3379_v23  ;;  %v3283_v20 = vor.u32 %v3851_v12, %v3282_v11  ;;  %v3346_v23 = vld [vmem:[%s5906_s1 + $0x590] sm:$0xf]  ;;  %v3669_v11 = vld [vmem:[%s5907_s0 + $0x64] sm:$0xf0]  ;;  %v3661_v12 = vld [vmem:[%s5907_s0 + $0x2c] sm:$0xf] }
  0x50   :  { %1900 = vmatpush.bf16.msra.mxu0 %v3179_v31  ;;  %v3146_v31 = vld [vmem:[%s5906_s1 + $0x400] sm:$0xf]  ;;  %v3909_v18 = vld [vmem:[%s5906_s1 + $0x6e4] sm:$0xf0]  ;;  %v3570_v22 = vld [vmem:[%s5906_s1 + $0x750] sm:$0xf]  ;;  %v4781_v28 = vor.u32 %v3669_v11, %v2546_v10 }
  0x51   :  { %1919 = vmatpush.bf16.msra.mxu1 %v3243_v32  ;;  %v3817_v32 = vld [vmem:[%s5906_s1 + $0x404] sm:$0xf0]  ;;  %v3891_v27 = vld [vmem:[%s5906_s1 + $0x654] sm:$0xf0]  ;;  %v3634_v36 = vld [vmem:[%s5906_s1 + $0x7d0] sm:$0xf] }
  0x52   :  { %1938 = vmatpush.bf16.msra.mxu2 %v3307_v24  ;;  %v3867_v24 = vld [vmem:[%s5906_s1 + $0x594] sm:$0xf0]  ;;  %v3147_v47 = vor.u32 %v3817_v32, %v3146_v31  ;;  %v3941_v21 = vld [vmem:[%s5906_s1 + $0x7e4] sm:$0xf0]  ;;  %v3506_v32 = vld [vmem:[%s5906_s1 + $0x6d0] sm:$0xf] }
  0x53   :  { %1957 = vmatpush.bf16.msra.mxu3 %v3371_v35  ;;  %1834 = vmatmul.bf16.gmra.mxu0 %v4630_v8  ;;  %v3347_v34 = vor.u32 %v3867_v24, %v3346_v23  ;;  %v3275_v35 = vor.u32 %v3849_v26, %v3274_v25  ;;  %v3923_v25 = vld [vmem:[%s5906_s1 + $0x754] sm:$0xf0]  ;;  %v3442_v26 = vld [vmem:[%s5906_s1 + $0x650] sm:$0xf]  ;;  %v3562_v38 = vld [vmem:[%s5906_s1 + $0x740] sm:$0xf] }
  0x54   :  { %1901 = vmatpush.bf16.msra.mxu0 %v3171_v59  ;;  %1853 = vmatmul.bf16.gmra.mxu1 %v4632_v9  ;;  %v2538_v59 = vld [vmem:[%s5907_s0 + $0x20] sm:$0xf]  ;;  %v3907_v33 = vld [vmem:[%s5906_s1 + $0x6d4] sm:$0xf0]  ;;  %v3905_v46 = vld [vmem:[%s5906_s1 + $0x6c4] sm:$0xf0] }
  0x55   :  { %1920 = vmatpush.bf16.msra.mxu1 %v3235_v60  ;;  %1872 = vmatmul.bf16.gmra.mxu2 %v4643_v13  ;;  %v3668_v60 = vld [vmem:[%s5907_s0 + $0x5c] sm:$0xf0]  ;;  %v3939_v37 = vld [vmem:[%s5906_s1 + $0x7d4] sm:$0xf0]  ;;  %v3676_v10 = vld [vmem:[%s5907_s0 + $0xa4] sm:$0xf] }
  0x56   :  { %1939 = vmatpush.bf16.msra.mxu2 %v3299_v40  ;;  %1891 = vmatmul.bf16.gmra.mxu3 %v4645_v14  ;;  %v3458_v40 = vld [vmem:[%s5906_s1 + $0x670] sm:$0xf]  ;;  %v4768_v23 = vor.u32 %v3668_v60, %v2538_v59  ;;  %v3498_v45 = vld [vmem:[%s5906_s1 + $0x6c0] sm:$0xf]  ;;  %v3919_v59 = vld [vmem:[%s5906_s1 + $0x734] sm:$0xf0] }
  0x57   :  { %1958 = vmatpush.bf16.msra.mxu3 %v3363_v63  ;;  %v3459_v62 = vor.u32 %v3895_v41, %v3458_v40  ;;  %v2540_v63 = vld [vmem:[%s5907_s0 + $0x60] sm:$0xf0]  ;;  %v3434_v40 = vld [vmem:[%s5906_s1 + $0x640] sm:$0xf]  ;;  %v3889_v41 = vld [vmem:[%s5906_s1 + $0x644] sm:$0xf0] }
  0x58   :  { %1902 = vmatpush.bf16.msra.mxu0 %v3163_v15  ;;  %v3579_v15 = vor.u32 %v3925_v55, %v3578_v52  ;;  %v4770_v24 = vor.u32 %v3660_v61, %v2540_v63  ;;  %v3626_v52 = vld [vmem:[%s5906_s1 + $0x7c0] sm:$0xf]  ;;  %v3937_v55 = vld [vmem:[%s5906_s1 + $0x7c4] sm:$0xf0]  ;;  %v3426_v60 = vld [vmem:[%s5906_s1 + $0x630] sm:$0xf] }
  0x59   :  { %1921 = vmatpush.bf16.msra.mxu1 %v3227_v16  ;;  %v2548_v16 = vld [vmem:[%s5907_s0 + $0x68] sm:$0xf0]  ;;  %v3887_v61 = vld [vmem:[%s5906_s1 + $0x634] sm:$0xf0]  ;;  %v3627_v63 = vor.u32 %v3937_v55, %v3626_v52  ;;  %v2604_v11 = vld [vmem:[%s5907_s0 + $0xe0] sm:$0xf0] }
  0x5a   :  { %1940 = vmatpush.bf16.msra.mxu2 %v3291_v2  ;;  %v3523_v2 = vor.u32 %v3911_v43, %v3522_v42  ;;  %v3507_v42 = vor.u32 %v3907_v33, %v3506_v32  ;;  %v3635_v43 = vor.u32 %v3939_v37, %v3634_v36  ;;  %v3482_v32 = vld [vmem:[%s5906_s1 + $0x6a0] sm:$0xf]  ;;  %v3901_v33 = vld [vmem:[%s5906_s1 + $0x6a4] sm:$0xf0]  ;;  %v3474_v52 = vld [vmem:[%s5906_s1 + $0x690] sm:$0xf] }
  0x5b   :  { %1959 = vmatpush.bf16.msra.mxu3 %v3355_v19  ;;  %v3451_v19 = vor.u32 %v3893_v7, %v3450_v4  ;;  %v2602_v4 = vld [vmem:[%s5907_s0 + $0xa0] sm:$0xf]  ;;  %v3933_v37 = vld [vmem:[%s5906_s1 + $0x7a4] sm:$0xf0]  ;;  %v3899_v55 = vld [vmem:[%s5906_s1 + $0x694] sm:$0xf0] }
  0x5c   :  { %1903 = vmatpush.bf16.msra.mxu0 %v3155_v29  ;;  %v4783_v29 = vor.u32 %v3661_v12, %v2548_v16  ;;  %v3684_v7 = vld [vmem:[%s5907_s0 + $0xdc] sm:$0xf0]  ;;  %v3618_v16 = vld [vmem:[%s5906_s1 + $0x7b0] sm:$0xf] }
  0x5d   :  { %1922 = vmatpush.bf16.msra.mxu1 %v3219_v30  ;;  %v3515_v30 = vor.u32 %v3909_v18, %v3514_v17  ;;  %v3935_v17 = vld [vmem:[%s5906_s1 + $0x7b4] sm:$0xf0]  ;;  %v3546_v18 = vld [vmem:[%s5906_s1 + $0x720] sm:$0xf] }
  0x5e   :  { %1941 = vmatpush.bf16.msra.mxu2 %v3283_v20  ;;  %v3642_v20 = vld [vmem:[%s5906_s1 + $0x7e0] sm:$0xf] }
  0x5f   :  { %1960 = vmatpush.bf16.msra.mxu3 %v3347_v34  ;;  %v3643_v31 = vor.u32 %v3941_v21, %v3642_v20  ;;  %v3571_v34 = vor.u32 %v3923_v25, %v3570_v22  ;;  %v3418_v20 = vld [vmem:[%s5906_s1 + $0x620] sm:$0xf]  ;;  %v3885_v21 = vld [vmem:[%s5906_s1 + $0x624] sm:$0xf0] }
  0x60   :  { %1904 = vmatpush.bf16.msra.mxu0 %v3147_v47  ;;  %v2610_v22 = vld [vmem:[%s5907_s0 + $0xa8] sm:$0xf]  ;;  %v3610_v36 = vld [vmem:[%s5906_s1 + $0x7a0] sm:$0xf] }
  0x61   :  { %1923 = vmatpush.bf16.msra.mxu1 %v3211_v49  ;;  %v3435_v49 = vor.u32 %v3889_v41, %v3434_v40  ;;  %v3685_v25 = vld [vmem:[%s5907_s0 + $0xe4] sm:$0xf0]  ;;  %v4902_v40 = vor.u32 %v3676_v10, %v2604_v11  ;;  %v3915_v41 = vld [vmem:[%s5906_s1 + $0x714] sm:$0xf0]  ;;  %v3702_v10 = vld [vmem:[%s5906_s1 + $0x74] sm:$0xf] }
  0x62   :  { %1942 = vmatpush.bf16.msra.mxu2 %v3275_v35  ;;  %v3443_v35 = vor.u32 %v3891_v27, %v3442_v26  ;;  %v3677_v26 = vld [vmem:[%s5907_s0 + $0xac] sm:$0xf]  ;;  %v2692_v11 = vld [vmem:[%s5906_s1 + $0x78] sm:$0xf0] }
  0x63   :  { %1961 = vmatpush.bf16.msra.mxu3 %v3339_v58  ;;  %1905 = vmatmul.bf16.vlgmr.msra.gmra.mxu0 %v4768_v23  ;;  %v3554_v58 = vld [vmem:[%s5906_s1 + $0x730] sm:$0xf]  ;;  %v2612_v27 = vld [vmem:[%s5907_s0 + $0xe8] sm:$0xf0] }
  0x64   :  { %1973 = vmatpush.bf16.msrb.mxu0 %v3459_v62  ;;  %1924 = vmatmul.bf16.vlgmr.msra.gmra.mxu1 %v4770_v24  ;;  %v3499_v62 = vor.u32 %v3905_v46, %v3498_v45  ;;  %v3555_v12 = vor.u32 %v3919_v59, %v3554_v58  ;;  %v4913_v45 = vor.u32 %v3685_v25, %v2610_v22  ;;  %v3602_v58 = vld [vmem:[%s5906_s1 + $0x790] sm:$0xf]  ;;  %v3718_v22 = vld [vmem:[%s5906_s1 + $0xf4] sm:$0xf]  ;;  %v2756_v25 = vld [vmem:[%s5906_s1 + $0xf8] sm:$0xf0] }
  0x65   :  { %1992 = vmatpush.bf16.msrb.mxu1 %v3523_v2  ;;  %1943 = vmatmul.bf16.vlgmr.msra.gmra.mxu2 %v4781_v28  ;;  %v3490_v2 = vld [vmem:[%s5906_s1 + $0x6b0] sm:$0xf]  ;;  %v4915_v46 = vor.u32 %v3677_v26, %v2612_v27  ;;  %v2695_v27 = vor.u32 %v3702_v10, %v2692_v11 }
  0x66   :  { %2011 = vmatpush.bf16.msrb.mxu2 %v3587_v39  ;;  %v3921_v39 = vld [vmem:[%s5906_s1 + $0x744] sm:$0xf0]  ;;  %1962 = vmatmul.bf16.vlgmr.msra.gmra.mxu3 %v4783_v29 }
  0x67   :  { %2030 = vmatpush.bf16.msrb.mxu3 %v3651_v3  ;;  %v3563_v47 = vor.u32 %v3921_v39, %v3562_v38  ;;  %v3903_v3 = vld [vmem:[%s5906_s1 + $0x6b4] sm:$0xf0]  ;;  %v3538_v38 = vld [vmem:[%s5906_s1 + $0x710] sm:$0xf]  ;;  %v4900_v39 = vor.u32 %v3684_v7, %v2602_v4  ;;  %v3734_v4 = vld [vmem:[%s5906_s1 + $0x174] sm:$0xf] }
  0x68   :  { %1974 = vmatpush.bf16.msrb.mxu0 %v3451_v19  ;;  %v3917_v19 = vld [vmem:[%s5906_s1 + $0x724] sm:$0xf0]  ;;  %v3539_v59 = vor.u32 %v3915_v41, %v3538_v38  ;;  %v2820_v7 = vld [vmem:[%s5906_s1 + $0x178] sm:$0xf0]  ;;  %v2554_v38 = vld [vmem:[%s5907_s0 + $0x30] sm:$0xf] }
  0x69   :  { %1993 = vmatpush.bf16.msrb.mxu1 %v3515_v30  ;;  %v3491_v30 = vor.u32 %v3903_v3, %v3490_v2  ;;  %v3402_v2 = vld [vmem:[%s5906_s1 + $0x600] sm:$0xf]  ;;  %v3881_v3 = vld [vmem:[%s5906_s1 + $0x604] sm:$0xf0]  ;;  %v2823_v26 = vor.u32 %v3734_v4, %v2820_v7  ;;  %v3670_v41 = vld [vmem:[%s5907_s0 + $0x6c] sm:$0xf0] }
  0x6a   :  { %2012 = vmatpush.bf16.msrb.mxu2 %v3579_v15  ;;  %v3427_v15 = vor.u32 %v3887_v61, %v3426_v60  ;;  %v3931_v61 = vld [vmem:[%s5906_s1 + $0x794] sm:$0xf0]  ;;  %v3730_v4 = vld [vmem:[%s5906_s1 + $0x154] sm:$0xf]  ;;  %v2804_v7 = vld [vmem:[%s5906_s1 + $0x158] sm:$0xf0] }
  0x6b   :  { %2031 = vmatpush.bf16.msrb.mxu3 %v3643_v31  ;;  %v3619_v31 = vor.u32 %v3935_v17, %v3618_v16  ;;  %v3466_v16 = vld [vmem:[%s5906_s1 + $0x680] sm:$0xf]  ;;  %v3897_v17 = vld [vmem:[%s5906_s1 + $0x684] sm:$0xf0] }
  0x6c   :  { %1975 = vmatpush.bf16.msrb.mxu0 %v3443_v35  ;;  %v3419_v35 = vor.u32 %v3885_v21, %v3418_v20  ;;  %v3403_v20 = vor.u32 %v3881_v3, %v3402_v2  ;;  %v3929_v21 = vld [vmem:[%s5906_s1 + $0x784] sm:$0xf0]  ;;  %v3663_v2 = vld [vmem:[%s5907_s0 + $0x3c] sm:$0xf] }
  0x6d   :  { %1994 = vmatpush.bf16.msrb.mxu1 %v3507_v42  ;;  %v3410_v42 = vld [vmem:[%s5906_s1 + $0x610] sm:$0xf]  ;;  %v2564_v3 = vld [vmem:[%s5907_s0 + $0x78] sm:$0xf0] }
  0x6e   :  { %2013 = vmatpush.bf16.msrb.mxu2 %v3571_v34  ;;  %v3547_v34 = vor.u32 %v3917_v19, %v3546_v18  ;;  %v3594_v18 = vld [vmem:[%s5906_s1 + $0x780] sm:$0xf] }
  0x6f   :  { %2032 = vmatpush.bf16.msrb.mxu3 %v3635_v43  ;;  %v3883_v43 = vld [vmem:[%s5906_s1 + $0x614] sm:$0xf0] }
  0x70   :  { %1976 = vmatpush.bf16.msrb.mxu0 %v3435_v49  ;;  %v3611_v49 = vor.u32 %v3933_v37, %v3610_v36  ;;  %v3411_v60 = vor.u32 %v3883_v43, %v3410_v42  ;;  %v3467_v36 = vor.u32 %v3897_v17, %v3466_v16  ;;  %v3595_v37 = vor.u32 %v3929_v21, %v3594_v18  ;;  %v3662_v42 = vld [vmem:[%s5907_s0 + $0x34] sm:$0xf]  ;;  %v2868_v21 = vld [vmem:[%s5906_s1 + $0x1d8] sm:$0xf0] }
  0x71   :  { %1995 = vmatpush.bf16.msrb.mxu1 %v3499_v62  ;;  %v3530_v62 = vld [vmem:[%s5906_s1 + $0x700] sm:$0xf]  ;;  %v2556_v43 = vld [vmem:[%s5907_s0 + $0x70] sm:$0xf0]  ;;  %v5044_v17 = vor.u32 %v3670_v41, %v2554_v38  ;;  %v3744_v38 = vld [vmem:[%s5906_s1 + $0x1c4] sm:$0xf] }
  0x72   :  { %2014 = vmatpush.bf16.msrb.mxu2 %v3563_v47  ;;  %v3483_v47 = vor.u32 %v3901_v33, %v3482_v32  ;;  %v3732_v32 = vld [vmem:[%s5906_s1 + $0x164] sm:$0xf]  ;;  %v2812_v33 = vld [vmem:[%s5906_s1 + $0x168] sm:$0xf0]  ;;  %v3714_v16 = vld [vmem:[%s5906_s1 + $0xd4] sm:$0xf]  ;;  %v5046_v18 = vor.u32 %v3662_v42, %v2556_v43 }
  0x73   :  { %2033 = vmatpush.bf16.msrb.mxu3 %v3627_v63  ;;  %v3913_v63 = vld [vmem:[%s5906_s1 + $0x704] sm:$0xf0]  ;;  %1910 = vmatmul.bf16.gmra.mxu0 %v4900_v39  ;;  %v2860_v41 = vld [vmem:[%s5906_s1 + $0x1c8] sm:$0xf0] }
  0x74   :  { %1977 = vmatpush.bf16.msrb.mxu0 %v3427_v15  ;;  %1929 = vmatmul.bf16.gmra.mxu1 %v4902_v40  ;;  %v3603_v15 = vor.u32 %v3931_v61, %v3602_v58  ;;  %v3531_v19 = vor.u32 %v3913_v63, %v3530_v62  ;;  %v2876_v61 = vld [vmem:[%s5906_s1 + $0x1e8] sm:$0xf0]  ;;  %v2562_v62 = vld [vmem:[%s5907_s0 + $0x38] sm:$0xf] }
  0x75   :  { %1996 = vmatpush.bf16.msrb.mxu1 %v3491_v30  ;;  %1948 = vmatmul.bf16.gmra.mxu2 %v4913_v45  ;;  %v3750_v30 = vld [vmem:[%s5906_s1 + $0x1f4] sm:$0xf]  ;;  %v3671_v63 = vld [vmem:[%s5907_s0 + $0x74] sm:$0xf0] }
  0x76   :  { %2015 = vmatpush.bf16.msrb.mxu2 %v3555_v12  ;;  %1967 = vmatmul.bf16.gmra.mxu3 %v4915_v46  ;;  %v3475_v12 = vor.u32 %v3899_v55, %v3474_v52  ;;  %v3716_v52 = vld [vmem:[%s5906_s1 + $0xe4] sm:$0xf]  ;;  %v2815_v55 = vor.u32 %v3732_v32, %v2812_v33 }
  0x77   :  { %2034 = vmatpush.bf16.msrb.mxu3 %v3619_v31  ;;  %v2884_v31 = vld [vmem:[%s5906_s1 + $0x1f8] sm:$0xf0] }
  0x78   :  { %1978 = vmatpush.bf16.msrb.mxu0 %v3419_v35  ;;  %v2684_v35 = vld [vmem:[%s5906_s1 + $0x68] sm:$0xf0] }
  0x79   :  { %1997 = vmatpush.bf16.msrb.mxu1 %v3483_v47  ;;  %v2759_v47 = vor.u32 %v3718_v22, %v2756_v25  ;;  %v5057_v22 = vor.u32 %v3671_v63, %v2562_v62  ;;  %v5059_v25 = vor.u32 %v3663_v2, %v2564_v3  ;;  %v3742_v62 = vld [vmem:[%s5906_s1 + $0x1b4] sm:$0xf]  ;;  %v2852_v63 = vld [vmem:[%s5906_s1 + $0x1b8] sm:$0xf0] }
  0x7a   :  { %2016 = vmatpush.bf16.msrb.mxu2 %v3547_v34  ;;  %v3700_v34 = vld [vmem:[%s5906_s1 + $0x64] sm:$0xf] }
  0x7b   :  { %2035 = vmatpush.bf16.msrb.mxu3 %v3611_v49  ;;  %v2887_v49 = vor.u32 %v3750_v30, %v2884_v31  ;;  %v2687_v58 = vor.u32 %v3700_v34, %v2684_v35  ;;  %v3728_v30 = vld [vmem:[%s5906_s1 + $0x144] sm:$0xf]  ;;  %v2796_v31 = vld [vmem:[%s5906_s1 + $0x148] sm:$0xf0] }
  0x7c   :  { %1979 = vmatpush.bf16.msrb.mxu0 %v3411_v60  ;;  %v3748_v60 = vld [vmem:[%s5906_s1 + $0x1e4] sm:$0xf]  ;;  %v2668_v35 = vld [vmem:[%s5906_s1 + $0x48] sm:$0xf0]  ;;  %v2799_v42 = vor.u32 %v3728_v30, %v2796_v31 }
  0x7d   :  { %1998 = vmatpush.bf16.msrb.mxu1 %v3475_v12  ;;  %v2879_v11 = vor.u32 %v3748_v60, %v2876_v61  ;;  %v3698_v12 = vld [vmem:[%s5906_s1 + $0x54] sm:$0xf]  ;;  %v3696_v34 = vld [vmem:[%s5906_s1 + $0x44] sm:$0xf]  ;;  %v2724_v61 = vld [vmem:[%s5906_s1 + $0xb8] sm:$0xf0] }
  0x7e   :  { %2017 = vmatpush.bf16.msrb.mxu2 %v3539_v59  ;;  %v2748_v59 = vld [vmem:[%s5906_s1 + $0xe8] sm:$0xf0]  ;;  %v2671_v43 = vor.u32 %v3696_v34, %v2668_v35  ;;  %v3710_v60 = vld [vmem:[%s5906_s1 + $0xb4] sm:$0xf]  ;;  %v3740_v30 = vld [vmem:[%s5906_s1 + $0x1a4] sm:$0xf] }
  0x7f   :  { %2036 = vmatpush.bf16.msrb.mxu3 %v3603_v15  ;;  %v2751_v10 = vor.u32 %v3716_v52, %v2748_v59  ;;  %v2676_v15 = vld [vmem:[%s5906_s1 + $0x58] sm:$0xf0]  ;;  %v2844_v31 = vld [vmem:[%s5906_s1 + $0x1a8] sm:$0xf0] }
  0x80   :  { %1980 = vmatpush.bf16.msrb.mxu0 %v3403_v20  ;;  %v3746_v20 = vld [vmem:[%s5906_s1 + $0x1d4] sm:$0xf]  ;;  %v2660_v59 = vld [vmem:[%s5906_s1 + $0x38] sm:$0xf0] }
  0x81   :  { %1999 = vmatpush.bf16.msrb.mxu1 %v3467_v36  ;;  %v2871_v33 = vor.u32 %v3746_v20, %v2868_v21  ;;  %v3712_v36 = vld [vmem:[%s5906_s1 + $0xc4] sm:$0xf]  ;;  %v2652_v21 = vld [vmem:[%s5906_s1 + $0x28] sm:$0xf0]  ;;  %v3679_v34 = vld [vmem:[%s5907_s0 + $0xbc] sm:$0xf] }
  0x82   :  { %2018 = vmatpush.bf16.msrb.mxu2 %v3531_v19  ;;  %v2740_v19 = vld [vmem:[%s5906_s1 + $0xd8] sm:$0xf0]  ;;  %v3692_v20 = vld [vmem:[%s5906_s1 + $0x24] sm:$0xf] }
  0x83   :  { %2037 = vmatpush.bf16.msrb.mxu3 %v3595_v37  ;;  %v2743_v32 = vor.u32 %v3714_v16, %v2740_v19  ;;  %1981 = vmatmul.bf16.vlgmr.msrb.gmra.mxu0 %v5044_v17  ;;  %v2732_v37 = vld [vmem:[%s5906_s1 + $0xc8] sm:$0xf0]  ;;  %v2727_v16 = vor.u32 %v3710_v60, %v2724_v61  ;;  %v2855_v19 = vor.u32 %v3742_v62, %v2852_v63  ;;  %v2628_v35 = vld [vmem:[%s5907_s0 + $0xf8] sm:$0xf0]  ;;  %v3738_v60 = vld [vmem:[%s5906_s1 + $0x194] sm:$0xf] }
  0x84   :  { %2049 = vmatpush.bf16.msra.mxu0 %v2695_v27  ;;  %v2679_v27 = vor.u32 %v3698_v12, %v2676_v15  ;;  %2000 = vmatmul.bf16.vlgmr.msrb.gmra.mxu1 %v5046_v18  ;;  %v2735_v52 = vor.u32 %v3712_v36, %v2732_v37  ;;  %v3678_v12 = vld [vmem:[%s5907_s0 + $0xb4] sm:$0xf]  ;;  %v2655_v37 = vor.u32 %v3692_v20, %v2652_v21  ;;  %v2836_v61 = vld [vmem:[%s5906_s1 + $0x198] sm:$0xf0]  ;;  %v3736_v20 = vld [vmem:[%s5906_s1 + $0x184] sm:$0xf] }
  0x85   :  { %2068 = vmatpush.bf16.msra.mxu1 %v2759_v47  ;;  %2019 = vmatmul.bf16.vlgmr.msrb.gmra.mxu2 %v5057_v22  ;;  %v3726_v47 = vld [vmem:[%s5906_s1 + $0x134] sm:$0xf]  ;;  %v5191_v63 = vor.u32 %v3679_v34, %v2628_v35  ;;  %v2828_v21 = vld [vmem:[%s5906_s1 + $0x188] sm:$0xf0]  ;;  %v3012_v35 = vld [vmem:[%s5906_s1 + $0x2f8] sm:$0xf0] }
  0x86   :  { %2087 = vmatpush.bf16.msra.mxu2 %v2823_v26  ;;  %v2807_v26 = vor.u32 %v3730_v4, %v2804_v7  ;;  %2038 = vmatmul.bf16.vlgmr.msrb.gmra.mxu3 %v5059_v25  ;;  %v3724_v4 = vld [vmem:[%s5906_s1 + $0x124] sm:$0xf]  ;;  %v2780_v7 = vld [vmem:[%s5906_s1 + $0x128] sm:$0xf0]  ;;  %v2620_v15 = vld [vmem:[%s5907_s0 + $0xf0] sm:$0xf0] }
  0x87   :  { %2106 = vmatpush.bf16.msra.mxu3 %v2887_v49  ;;  %v2788_v49 = vld [vmem:[%s5906_s1 + $0x138] sm:$0xf0]  ;;  %v2783_v36 = vor.u32 %v3724_v4, %v2780_v7  ;;  %v2764_v7 = vld [vmem:[%s5906_s1 + $0x108] sm:$0xf0] }
  0x88   :  { %2050 = vmatpush.bf16.msra.mxu0 %v2687_v58  ;;  %v3694_v58 = vld [vmem:[%s5906_s1 + $0x34] sm:$0xf]  ;;  %v2791_v2 = vor.u32 %v3726_v47, %v2788_v49  ;;  %v2644_v49 = vld [vmem:[%s5906_s1 + $0x18] sm:$0xf0] }
  0x89   :  { %2069 = vmatpush.bf16.msra.mxu1 %v2751_v10  ;;  %v2663_v3 = vor.u32 %v3694_v58, %v2660_v59  ;;  %v2618_v10 = vld [vmem:[%s5907_s0 + $0xb0] sm:$0xf]  ;;  %v3690_v47 = vld [vmem:[%s5906_s1 + $0x14] sm:$0xf]  ;;  %v5178_v58 = vor.u32 %v3678_v12, %v2620_v15  ;;  %v2708_v59 = vld [vmem:[%s5906_s1 + $0x98] sm:$0xf0]  ;;  %v2839_v15 = vor.u32 %v3738_v60, %v2836_v61 }
  0x8a   :  { %2088 = vmatpush.bf16.msra.mxu2 %v2815_v55  ;;  %v2863_v55 = vor.u32 %v3744_v38, %v2860_v41  ;;  %v3722_v38 = vld [vmem:[%s5906_s1 + $0x114] sm:$0xf]  ;;  %v2772_v41 = vld [vmem:[%s5906_s1 + $0x118] sm:$0xf0]  ;;  %v2647_v4 = vor.u32 %v3690_v47, %v2644_v49  ;;  %v3796_v47 = vld [vmem:[%s5906_s1 + $0x364] sm:$0xf] }
  0x8b   :  { %2107 = vmatpush.bf16.msra.mxu3 %v2879_v11  ;;  %v3686_v11 = vld [vmem:[%s5907_s0 + $0xec] sm:$0xf0]  ;;  %v3068_v49 = vld [vmem:[%s5906_s1 + $0x368] sm:$0xf0]  ;;  %v3764_v60 = vld [vmem:[%s5906_s1 + $0x264] sm:$0xf] }
  0x8c   :  { %2051 = vmatpush.bf16.msra.mxu0 %v2679_v27  ;;  %v2716_v27 = vld [vmem:[%s5906_s1 + $0xa8] sm:$0xf0] }
  0x8d   :  { %2070 = vmatpush.bf16.msra.mxu1 %v2743_v32  ;;  %v2626_v32 = vld [vmem:[%s5907_s0 + $0xb8] sm:$0xf]  ;;  %v2940_v61 = vld [vmem:[%s5906_s1 + $0x268] sm:$0xf0] }
  0x8e   :  { %2089 = vmatpush.bf16.msra.mxu2 %v2807_v26  ;;  %v3708_v26 = vld [vmem:[%s5906_s1 + $0xa4] sm:$0xf] }
  0x8f   :  { %2108 = vmatpush.bf16.msra.mxu3 %v2871_v33  ;;  %v3687_v33 = vld [vmem:[%s5907_s0 + $0xf4] sm:$0xf0] }
  0x90   :  { %2052 = vmatpush.bf16.msra.mxu0 %v2671_v43  ;;  %v2847_v43 = vor.u32 %v3740_v30, %v2844_v31  ;;  %v5189_v62 = vor.u32 %v3687_v33, %v2626_v32  ;;  %v3766_v30 = vld [vmem:[%s5906_s1 + $0x274] sm:$0xf]  ;;  %v2948_v31 = vld [vmem:[%s5906_s1 + $0x278] sm:$0xf0] }
  0x91   :  { %2071 = vmatpush.bf16.msra.mxu1 %v2735_v52  ;;  %v3706_v52 = vld [vmem:[%s5906_s1 + $0x94] sm:$0xf] }
  0x92   :  { %2090 = vmatpush.bf16.msra.mxu2 %v2799_v42  ;;  %v2719_v42 = vor.u32 %v3708_v26, %v2716_v27  ;;  %v2711_v12 = vor.u32 %v3706_v52, %v2708_v59  ;;  %v3798_v26 = vld [vmem:[%s5906_s1 + $0x374] sm:$0xf]  ;;  %v3076_v27 = vld [vmem:[%s5906_s1 + $0x378] sm:$0xf0] }
  0x93   :  { %2109 = vmatpush.bf16.msra.mxu3 %v2863_v55  ;;  %v5176_v55 = vor.u32 %v3686_v11, %v2618_v10  ;;  %v3688_v10 = vld [vmem:[%s5906_s1 + $0x4] sm:$0xf]  ;;  %v2636_v11 = vld [vmem:[%s5906_s1 + $0x8] sm:$0xf0]  ;;  %v3782_v32 = vld [vmem:[%s5906_s1 + $0x2f4] sm:$0xf] }
  0x94   :  { %2053 = vmatpush.bf16.msra.mxu0 %v2663_v3  ;;  %v2775_v3 = vor.u32 %v3722_v38, %v2772_v41  ;;  %2005 = vmatmul.bf16.gmra.mxu1 %v5178_v58  ;;  %v2639_v34 = vor.u32 %v3688_v10, %v2636_v11  ;;  %v2831_v41 = vor.u32 %v3736_v20, %v2828_v21  ;;  %v3762_v20 = vld [vmem:[%s5906_s1 + $0x254] sm:$0xf]  ;;  %v2932_v21 = vld [vmem:[%s5906_s1 + $0x258] sm:$0xf0] }
  0x95   :  { %2072 = vmatpush.bf16.msra.mxu1 %v2727_v16  ;;  %v3704_v16 = vld [vmem:[%s5906_s1 + $0x84] sm:$0xf]  ;;  %1986 = vmatmul.bf16.gmra.mxu0 %v5176_v55  ;;  %v3015_v52 = vor.u32 %v3782_v32, %v3012_v35  ;;  %v3071_v10 = vor.u32 %v3796_v47, %v3068_v49  ;;  %v2943_v11 = vor.u32 %v3764_v60, %v2940_v61  ;;  %v3124_v32 = vld [vmem:[%s5906_s1 + $0x3d8] sm:$0xf0]  ;;  %v2924_v47 = vld [vmem:[%s5906_s1 + $0x248] sm:$0xf0] }
  0x96   :  { %2091 = vmatpush.bf16.msra.mxu2 %v2791_v2  ;;  %v3720_v2 = vld [vmem:[%s5906_s1 + $0x104] sm:$0xf]  ;;  %2043 = vmatmul.bf16.gmra.mxu3 %v5191_v63  ;;  %v3116_v60 = vld [vmem:[%s5906_s1 + $0x3c8] sm:$0xf0]  ;;  %v3790_v61 = vld [vmem:[%s5906_s1 + $0x334] sm:$0xf] }
  0x97   :  { %2110 = vmatpush.bf16.msra.mxu3 %v2855_v19  ;;  %v2700_v19 = vld [vmem:[%s5906_s1 + $0x88] sm:$0xf0]  ;;  %2024 = vmatmul.bf16.gmra.mxu2 %v5189_v62  ;;  %v2767_v33 = vor.u32 %v3720_v2, %v2764_v7  ;;  %v3780_v2 = vld [vmem:[%s5906_s1 + $0x2e4] sm:$0xf] }
  0x98   :  { %2054 = vmatpush.bf16.msra.mxu0 %v2655_v37  ;;  %v3140_v37 = vld [vmem:[%s5906_s1 + $0x3f8] sm:$0xf0]  ;;  %v2703_v38 = vor.u32 %v3704_v16, %v2700_v19  ;;  %v3132_v7 = vld [vmem:[%s5906_s1 + $0x3e8] sm:$0xf0]  ;;  %v3794_v16 = vld [vmem:[%s5906_s1 + $0x354] sm:$0xf] }
  0x99   :  { %2073 = vmatpush.bf16.msra.mxu1 %v2719_v42  ;;  %v3079_v42 = vor.u32 %v3798_v26, %v3076_v27  ;;  %v3060_v19 = vld [vmem:[%s5906_s1 + $0x358] sm:$0xf0]  ;;  %v3778_v26 = vld [vmem:[%s5906_s1 + $0x2d4] sm:$0xf]  ;;  %v3776_v49 = vld [vmem:[%s5906_s1 + $0x2c4] sm:$0xf] }
  0x9a   :  { %2092 = vmatpush.bf16.msra.mxu2 %v2783_v36  ;;  %v3814_v36 = vld [vmem:[%s5906_s1 + $0x3f4] sm:$0xf]  ;;  %v3063_v35 = vor.u32 %v3794_v16, %v3060_v19  ;;  %v2980_v16 = vld [vmem:[%s5906_s1 + $0x2b8] sm:$0xf0] }
  0x9b   :  { %2111 = vmatpush.bf16.msra.mxu3 %v2847_v43  ;;  %v2951_v43 = vor.u32 %v3766_v30, %v2948_v31  ;;  %v3143_v59 = vor.u32 %v3814_v36, %v3140_v37  ;;  %v2996_v30 = vld [vmem:[%s5906_s1 + $0x2d8] sm:$0xf0]  ;;  %v3810_v31 = vld [vmem:[%s5906_s1 + $0x3d4] sm:$0xf]  ;;  %v2935_v36 = vor.u32 %v3762_v20, %v2932_v21  ;;  %v3792_v37 = vld [vmem:[%s5906_s1 + $0x344] sm:$0xf] }
  0x9c   :  { %2055 = vmatpush.bf16.msra.mxu0 %v2647_v4  ;;  %v3812_v4 = vld [vmem:[%s5906_s1 + $0x3e4] sm:$0xf]  ;;  %v3806_v19 = vld [vmem:[%s5906_s1 + $0x3b4] sm:$0xf]  ;;  %v3108_v20 = vld [vmem:[%s5906_s1 + $0x3b8] sm:$0xf0] }
  0x9d   :  { %2074 = vmatpush.bf16.msra.mxu1 %v2711_v12 }
  0x9e   :  { %2093 = vmatpush.bf16.msra.mxu2 %v2775_v3  ;;  %v3004_v3 = vld [vmem:[%s5906_s1 + $0x2e8] sm:$0xf0] }
  0x9f   :  { %2112 = vmatpush.bf16.msra.mxu3 %v2839_v15  ;;  %v3007_v12 = vor.u32 %v3780_v2, %v3004_v3  ;;  %v3135_v15 = vor.u32 %v3812_v4, %v3132_v7  ;;  %v3044_v2 = vld [vmem:[%s5906_s1 + $0x338] sm:$0xf0] }
  0xa0   :  { %2056 = vmatpush.bf16.msra.mxu0 %v2639_v34  ;;  %v1754_v27 = vpop.f32.mrf.mxu0 }
  0xa1   :  { %2075 = vmatpush.bf16.msra.mxu1 %v2703_v38  ;;  %v3052_v38 = vld [vmem:[%s5906_s1 + $0x348] sm:$0xf0] }
  0xa2   :  { %2094 = vmatpush.bf16.msra.mxu2 %v2767_v33  ;;  %v1773_v33 = vpop.f32.mrf.mxu1 }
  0xa3   :  { %2113 = vmatpush.bf16.msra.mxu3 %v2831_v41  ;;  %v1774_v34 = vadd.f32 %v1773_v33, %v1754_v27  ;;  %v2999_v41 = vor.u32 %v3778_v26, %v2996_v30  ;;  %v3047_v26 = vor.u32 %v3790_v61, %v3044_v2  ;;  %v3036_v33 = vld [vmem:[%s5906_s1 + $0x328] sm:$0xf0]  ;;  %v3754_v61 = vld [vmem:[%s5906_s1 + $0x214] sm:$0xf]  ;;  %v2900_v2 = vld [vmem:[%s5906_s1 + $0x218] sm:$0xf0] }
  0xa4   :  { %2125 = vmatpush.bf16.msrb.mxu0 %v2951_v43  ;;  %v3760_v43 = vld [vmem:[%s5906_s1 + $0x244] sm:$0xf]  ;;  %2076 = vmatmul.bf16.vlgmr.msra.gmra.mxu1 %v4221_v53 }
  0xa5   :  { %2144 = vmatpush.bf16.msrb.mxu1 %v3015_v52  ;;  %2057 = vmatmul.bf16.vlgmr.msra.gmra.mxu0 %v4210_v48  ;;  %v2988_v52 = vld [vmem:[%s5906_s1 + $0x2c8] sm:$0xf0]  ;;  %v3055_v48 = vor.u32 %v3792_v37, %v3052_v38  ;;  %v2927_v53 = vor.u32 %v3760_v43, %v2924_v47  ;;  %v3772_v38 = vld [vmem:[%s5906_s1 + $0x2a4] sm:$0xf] }
  0xa6   :  { %2163 = vmatpush.bf16.msrb.mxu2 %v3079_v42  ;;  %v3127_v42 = vor.u32 %v3810_v31, %v3124_v32  ;;  %2114 = vmatmul.bf16.vlgmr.msra.gmra.mxu3 %v4231_v57  ;;  %v2991_v4 = vor.u32 %v3776_v49, %v2988_v52  ;;  %v2916_v57 = vld [vmem:[%s5906_s1 + $0x238] sm:$0xf0]  ;;  %v3788_v32 = vld [vmem:[%s5906_s1 + $0x324] sm:$0xf]  ;;  %v2908_v37 = vld [vmem:[%s5906_s1 + $0x228] sm:$0xf0] }
  0xa7   :  { %2182 = vmatpush.bf16.msrb.mxu3 %v3143_v59  ;;  %v3808_v59 = vld [vmem:[%s5906_s1 + $0x3c4] sm:$0xf]  ;;  %2095 = vmatmul.bf16.vlgmr.msra.gmra.mxu2 %v4223_v54  ;;  %v3758_v54 = vld [vmem:[%s5906_s1 + $0x234] sm:$0xf]  ;;  %v3100_v43 = vld [vmem:[%s5906_s1 + $0x3a8] sm:$0xf0]  ;;  %v3039_v47 = vor.u32 %v3788_v32, %v3036_v33 }
  0xa8   :  { %2126 = vmatpush.bf16.msrb.mxu0 %v2943_v11  ;;  %v1792_v3 = vpop.f32.mrf.mxu2  ;;  %v3119_v7 = vor.u32 %v3808_v59, %v3116_v60  ;;  %v2919_v31 = vor.u32 %v3758_v54, %v2916_v57  ;;  %v3786_v52 = vld [vmem:[%s5906_s1 + $0x314] sm:$0xf]  ;;  %v3028_v59 = vld [vmem:[%s5906_s1 + $0x318] sm:$0xf0] }
  0xa9   :  { %2145 = vmatpush.bf16.msrb.mxu1 %v3007_v12  ;;  %v1793_v11 = vadd.f32 %v1792_v3, %v1774_v34  ;;  %v1811_v12 = vpop.f32.mrf.mxu3  ;;  %v3770_v3 = vld [vmem:[%s5906_s1 + $0x294] sm:$0xf]  ;;  %v2964_v57 = vld [vmem:[%s5906_s1 + $0x298] sm:$0xf0] }
  0xaa   :  { %2164 = vmatpush.bf16.msrb.mxu2 %v3071_v10  ;;  %v3774_v10 = vld [vmem:[%s5906_s1 + $0x2b4] sm:$0xf]  ;;  %v1775_v21 = vpop.f32.mrf.mxu1  ;;  %v2967_v32 = vor.u32 %v3770_v3, %v2964_v57 }
  0xab   :  { %2183 = vmatpush.bf16.msrb.mxu3 %v3135_v15  ;;  %v1756_v15 = vpop.f32.mrf.mxu0  ;;  %v5345_v27 = vadd.f32 %v1811_v12, %v1793_v11  ;;  %v2983_v34 = vor.u32 %v3774_v10, %v2980_v16  ;;  %v3802_v10 = vld [vmem:[%s5906_s1 + $0x394] sm:$0xf]  ;;  %v3092_v11 = vld [vmem:[%s5906_s1 + $0x398] sm:$0xf0]  ;;  %v3784_v16 = vld [vmem:[%s5906_s1 + $0x304] sm:$0xf] }
  0xac   :  { %2127 = vmatpush.bf16.msrb.mxu0 %v2935_v36  ;;  %v1776_v30 = vadd.f32 %v1775_v21, %v1756_v15  ;;  %v3756_v36 = vld [vmem:[%s5906_s1 + $0x224] sm:$0xf]  ;;  %v3031_v15 = vor.u32 %v3786_v52, %v3028_v59  ;;  %v2903_v21 = vor.u32 %v3754_v61, %v2900_v2  ;;  %v3095_v33 = vor.u32 %v3802_v10, %v3092_v11 }
  0xad   :  { %2146 = vmatpush.bf16.msrb.mxu1 %v2999_v41  ;;  %v2972_v41 = vld [vmem:[%s5906_s1 + $0x2a8] sm:$0xf0]  ;;  %v2911_v49 = vor.u32 %v3756_v36, %v2908_v37  ;;  %v3800_v36 = vld [vmem:[%s5906_s1 + $0x384] sm:$0xf] }
  0xae   :  { %2165 = vmatpush.bf16.msrb.mxu2 %v3063_v35  ;;  %v3111_v35 = vor.u32 %v3806_v19, %v3108_v20  ;;  %v3084_v37 = vld [vmem:[%s5906_s1 + $0x388] sm:$0xf0]  ;;  %v3828_v11 = vld [vmem:[%s5906_s1 + $0x464] sm:$0xf] }
  0xaf   :  { %2184 = vmatpush.bf16.msrb.mxu3 %v3127_v42  ;;  %v3804_v42 = vld [vmem:[%s5906_s1 + $0x3a4] sm:$0xf] }
  0xb0   :  { %2128 = vmatpush.bf16.msrb.mxu0 %v2927_v53  ;;  %v1794_v60 = vpop.f32.mrf.mxu2  ;;  %v3103_v53 = vor.u32 %v3804_v42, %v3100_v43  ;;  %v3846_v42 = vld [vmem:[%s5906_s1 + $0x4f4] sm:$0xf] }
  0xb1   :  { %2147 = vmatpush.bf16.msrb.mxu1 %v2991_v4  ;;  %v1795_v4 = vadd.f32 %v1794_v60, %v1776_v30  ;;  %v3752_v30 = vld [vmem:[%s5906_s1 + $0x204] sm:$0xf]  ;;  %v3087_v60 = vor.u32 %v3800_v36, %v3084_v37  ;;  %v3316_v36 = vld [vmem:[%s5906_s1 + $0x558] sm:$0xf0] }
  0xb2   :  { %2166 = vmatpush.bf16.msrb.mxu2 %v3055_v48  ;;  %v2975_v48 = vor.u32 %v3772_v38, %v2972_v41  ;;  %v1778_v12 = vpop.f32.mrf.mxu1  ;;  %v3862_v38 = vld [vmem:[%s5906_s1 + $0x574] sm:$0xf]  ;;  %v3332_v41 = vld [vmem:[%s5906_s1 + $0x578] sm:$0xf0] }
  0xb3   :  { %2185 = vmatpush.bf16.msrb.mxu3 %v3119_v7  ;;  %v1813_v7 = vpop.f32.mrf.mxu3  ;;  %v1759_v54 = vpop.f32.mrf.mxu0  ;;  %v3335_v2 = vor.u32 %v3862_v38, %v3332_v41  ;;  %v3826_v38 = vld [vmem:[%s5906_s1 + $0x454] sm:$0xf]  ;;  %v3188_v41 = vld [vmem:[%s5906_s1 + $0x458] sm:$0xf0] }
  0xb4   :  { %2129 = vmatpush.bf16.msrb.mxu0 %v2919_v31  ;;  %v5398_v19 = vadd.f32 %v1813_v7, %v1795_v4  ;;  %v1779_v20 = vadd.f32 %v1778_v12, %v1759_v54  ;;  %v2892_v31 = vld [vmem:[%s5906_s1 + $0x208] sm:$0xf0]  ;;  %2081 = vmatmul.bf16.gmra.mxu1 %v4353_v50  ;;  %v3204_v50 = vld [vmem:[%s5906_s1 + $0x478] sm:$0xf0]  ;;  %v3860_v4 = vld [vmem:[%s5906_s1 + $0x564] sm:$0xf] }
  0xb5   :  { %2148 = vmatpush.bf16.msrb.mxu1 %v2983_v34  ;;  %v3768_v34 = vld [vmem:[%s5906_s1 + $0x284] sm:$0xf]  ;;  %2062 = vmatmul.bf16.gmra.mxu0 %v4342_v44  ;;  %v3830_v44 = vld [vmem:[%s5906_s1 + $0x474] sm:$0xf]  ;;  %v3324_v7 = vld [vmem:[%s5906_s1 + $0x568] sm:$0xf0] }
  0xb6   :  { %2167 = vmatpush.bf16.msrb.mxu2 %v3047_v26  ;;  %v3020_v26 = vld [vmem:[%s5906_s1 + $0x308] sm:$0xf0]  ;;  %2119 = vmatmul.bf16.gmra.mxu3 %v4363_v56  ;;  %v3878_v56 = vld [vmem:[%s5906_s1 + $0x5f4] sm:$0xf]  ;;  %v3207_v3 = vor.u32 %v3830_v44, %v3204_v50 }
  0xb7   :  { %2186 = vmatpush.bf16.msrb.mxu3 %v3111_v35  ;;  %v2956_v35 = vld [vmem:[%s5906_s1 + $0x288] sm:$0xf0]  ;;  %2100 = vmatmul.bf16.gmra.mxu2 %v4355_v51  ;;  %v3023_v43 = vor.u32 %v3784_v16, %v3020_v26  ;;  %v3268_v51 = vld [vmem:[%s5906_s1 + $0x4f8] sm:$0xf0]  ;;  %v3876_v26 = vld [vmem:[%s5906_s1 + $0x5e4] sm:$0xf] }
  0xb8   :  { %2130 = vmatpush.bf16.msrb.mxu0 %v2911_v49  ;;  %v3396_v49 = vld [vmem:[%s5906_s1 + $0x5f8] sm:$0xf0]  ;;  %v1797_v52 = vpop.f32.mrf.mxu2  ;;  %v2959_v59 = vor.u32 %v3768_v34, %v2956_v35  ;;  %v3271_v57 = vor.u32 %v3846_v42, %v3268_v51  ;;  %v3196_v12 = vld [vmem:[%s5906_s1 + $0x468] sm:$0xf0]  ;;  %v3858_v35 = vld [vmem:[%s5906_s1 + $0x554] sm:$0xf] }
  0xb9   :  { %2149 = vmatpush.bf16.msrb.mxu1 %v2975_v48  ;;  %v1798_v48 = vadd.f32 %v1797_v52, %v1779_v20  ;;  %v3399_v10 = vor.u32 %v3878_v56, %v3396_v49  ;;  %v3842_v44 = vld [vmem:[%s5906_s1 + $0x4d4] sm:$0xf]  ;;  %v3380_v51 = vld [vmem:[%s5906_s1 + $0x5d8] sm:$0xf0] }
  0xba   :  { %2168 = vmatpush.bf16.msrb.mxu2 %v3039_v47  ;;  %v2895_v47 = vor.u32 %v3752_v30, %v2892_v31  ;;  %v1780_v54 = vpop.f32.mrf.mxu1  ;;  %v3388_v30 = vld [vmem:[%s5906_s1 + $0x5e8] sm:$0xf0]  ;;  %v3327_v31 = vor.u32 %v3860_v4, %v3324_v7  ;;  %v3824_v4 = vld [vmem:[%s5906_s1 + $0x444] sm:$0xf] }
  0xbb   :  { %2187 = vmatpush.bf16.msrb.mxu3 %v3103_v53  ;;  %v1816_v53 = vpop.f32.mrf.mxu3  ;;  %v1761_v61 = vpop.f32.mrf.mxu0  ;;  %v3391_v34 = vor.u32 %v3876_v26, %v3388_v30  ;;  %v3840_v7 = vld [vmem:[%s5906_s1 + $0x4c4] sm:$0xf]  ;;  %v3838_v26 = vld [vmem:[%s5906_s1 + $0x4b4] sm:$0xf] }
  0xbc   :  { %2131 = vmatpush.bf16.msrb.mxu0 %v2903_v21  ;;  %v5464_v16 = vadd.f32 %v1816_v53, %v1798_v48  ;;  %v1781_v20 = vadd.f32 %v1780_v54, %v1761_v61  ;;  %v3260_v21 = vld [vmem:[%s5906_s1 + $0x4e8] sm:$0xf0]  ;;  %v3191_v48 = vor.u32 %v3826_v38, %v3188_v41  ;;  %v3856_v53 = vld [vmem:[%s5906_s1 + $0x544] sm:$0xf] }
  0xbd   :  { %2150 = vmatpush.bf16.msrb.mxu1 %v2967_v32  ;;  %v3199_v32 = vor.u32 %v3828_v11, %v3196_v12  ;;  %v3308_v61 = vld [vmem:[%s5906_s1 + $0x548] sm:$0xf0]  ;;  %v3854_v12 = vld [vmem:[%s5906_s1 + $0x534] sm:$0xf] }
  0xbe   :  { %2169 = vmatpush.bf16.msrb.mxu2 %v3031_v15  ;;  %v3844_v15 = vld [vmem:[%s5906_s1 + $0x4e4] sm:$0xf]  ;;  %v3372_v11 = vld [vmem:[%s5906_s1 + $0x5c8] sm:$0xf0] }
  0xbf   :  { %2188 = vmatpush.bf16.msrb.mxu3 %v3095_v33  ;;  %v3263_v33 = vor.u32 %v3844_v15, %v3260_v21  ;;  %v3300_v15 = vld [vmem:[%s5906_s1 + $0x538] sm:$0xf0] }
  0xc0   :  { %2132 = vmatpush.bf16.msrb.mxu0 %v2895_v47  ;;  %v1799_v37 = vpop.f32.mrf.mxu2  ;;  %v3874_v47 = vld [vmem:[%s5906_s1 + $0x5d4] sm:$0xf]  ;;  %v3303_v41 = vor.u32 %v3854_v12, %v3300_v15  ;;  %v3348_v15 = vld [vmem:[%s5906_s1 + $0x598] sm:$0xf0] }
  0xc1   :  { %2151 = vmatpush.bf16.msrb.mxu1 %v2959_v59  ;;  %v1800_v50 = vadd.f32 %v1799_v37, %v1781_v20  ;;  %v3866_v12 = vld [vmem:[%s5906_s1 + $0x594] sm:$0xf] }
  0xc2   :  { %2170 = vmatpush.bf16.msrb.mxu2 %v3023_v43  ;;  %v3252_v43 = vld [vmem:[%s5906_s1 + $0x4d8] sm:$0xf0]  ;;  %v1849_v49 = vpop.f32.mrf.mxu1 }
  0xc3   :  { %2189 = vmatpush.bf16.msrb.mxu3 %v3087_v60  ;;  %v1818_v42 = vpop.f32.mrf.mxu3  ;;  %v1830_v56 = vpop.f32.mrf.mxu0  ;;  %v3319_v60 = vor.u32 %v3858_v35, %v3316_v36 }
  0xc4   :  { %2201 = vmatpush.bf16.msra.mxu0 %v3207_v3  ;;  %v5499_v52 = vadd.f32 %v1818_v42, %v1800_v50  ;;  %v1831_v59 = vadd.f32 %v1830_v56, %v5345_v27  ;;  %v3383_v3 = vor.u32 %v3874_v47, %v3380_v51  ;;  %v3180_v27 = vld [vmem:[%s5906_s1 + $0x448] sm:$0xf0]  ;;  %2152 = vmatmul.bf16.vlgmr.msrb.gmra.mxu1 %v4500_v1  ;;  %v3852_v50 = vld [vmem:[%s5906_s1 + $0x524] sm:$0xf] }
  0xc5   :  { %2220 = vmatpush.bf16.msra.mxu1 %v3271_v57  ;;  %2133 = vmatmul.bf16.vlgmr.msrb.gmra.mxu0 %v4498_v0  ;;  %v3244_v57 = vld [vmem:[%s5906_s1 + $0x4c8] sm:$0xf0]  ;;  %v3311_v0 = vor.u32 %v3856_v53, %v3308_v61  ;;  %v3183_v1 = vor.u32 %v3824_v4, %v3180_v27  ;;  %v3284_v4 = vld [vmem:[%s5906_s1 + $0x518] sm:$0xf0] }
  0xc6   :  { %2239 = vmatpush.bf16.msra.mxu2 %v3335_v2  ;;  %v3255_v2 = vor.u32 %v3842_v44, %v3252_v43  ;;  %v1850_v54 = vadd.f32 %v1849_v49, %v1831_v59  ;;  %2190 = vmatmul.bf16.vlgmr.msrb.gmra.mxu3 %v4513_v6  ;;  %v3247_v20 = vor.u32 %v3840_v7, %v3244_v57  ;;  %v3172_v6 = vld [vmem:[%s5906_s1 + $0x438] sm:$0xf0]  ;;  %v3292_v42 = vld [vmem:[%s5906_s1 + $0x528] sm:$0xf0]  ;;  %v3836_v49 = vld [vmem:[%s5906_s1 + $0x4a4] sm:$0xf] }
  0xc7   :  { %2258 = vmatpush.bf16.msra.mxu3 %v3399_v10  ;;  %v3872_v10 = vld [vmem:[%s5906_s1 + $0x5c4] sm:$0xf]  ;;  %2171 = vmatmul.bf16.vlgmr.msrb.gmra.mxu2 %v4511_v5  ;;  %v3822_v5 = vld [vmem:[%s5906_s1 + $0x434] sm:$0xf]  ;;  %v3164_v56 = vld [vmem:[%s5906_s1 + $0x428] sm:$0xf0]  ;;  %v3295_v61 = vor.u32 %v3852_v50, %v3292_v42 }
  0xc8   :  { %2202 = vmatpush.bf16.msra.mxu0 %v3199_v32  ;;  %v3375_v21 = vor.u32 %v3872_v10, %v3372_v11  ;;  %v1868_v30 = vpop.f32.mrf.mxu2  ;;  %v3236_v32 = vld [vmem:[%s5906_s1 + $0x4b8] sm:$0xf0]  ;;  %v3175_v44 = vor.u32 %v3822_v5, %v3172_v6  ;;  %v3356_v53 = vld [vmem:[%s5906_s1 + $0x5a8] sm:$0xf0]  ;;  %v3834_v10 = vld [vmem:[%s5906_s1 + $0x494] sm:$0xf] }
  0xc9   :  { %2221 = vmatpush.bf16.msra.mxu1 %v3263_v33  ;;  %v3870_v33 = vld [vmem:[%s5906_s1 + $0x5b4] sm:$0xf]  ;;  %v1869_v35 = vadd.f32 %v1868_v30, %v1850_v54  ;;  %v3239_v47 = vor.u32 %v3838_v26, %v3236_v32  ;;  %v3156_v57 = vld [vmem:[%s5906_s1 + $0x418] sm:$0xf0]  ;;  %v3848_v6 = vld [vmem:[%s5906_s1 + $0x504] sm:$0xf] }
  0xca   :  { %2240 = vmatpush.bf16.msra.mxu2 %v3327_v31  ;;  %v1851_v37 = vpop.f32.mrf.mxu1  ;;  %v3818_v54 = vld [vmem:[%s5906_s1 + $0x414] sm:$0xf]  ;;  %v3276_v32 = vld [vmem:[%s5906_s1 + $0x508] sm:$0xf0] }
  0xcb   :  { %2259 = vmatpush.bf16.msra.mxu3 %v3391_v34  ;;  %v1887_v31 = vpop.f32.mrf.mxu3  ;;  %v3364_v34 = vld [vmem:[%s5906_s1 + $0x5b8] sm:$0xf0]  ;;  %v1832_v36 = vpop.f32.mrf.mxu0  ;;  %v3340_v50 = vld [vmem:[%s5906_s1 + $0x588] sm:$0xf0]  ;;  %v3926_v42 = vld [vmem:[%s5906_s1 + $0x774] sm:$0xf] }
  0xcc   :  { %2203 = vmatpush.bf16.msra.mxu0 %v3191_v48  ;;  %v1833_v38 = vadd.f32 %v1832_v36, %v5398_v19  ;;  %v5561_v43 = vadd.f32 %v1887_v31, %v1869_v35  ;;  %v3367_v51 = vor.u32 %v3870_v33, %v3364_v34  ;;  %v3820_v19 = vld [vmem:[%s5906_s1 + $0x424] sm:$0xf]  ;;  %v3159_v31 = vor.u32 %v3818_v54, %v3156_v57  ;;  %v3148_v34 = vld [vmem:[%s5906_s1 + $0x408] sm:$0xf0] }
  0xcd   :  { %2222 = vmatpush.bf16.msra.mxu1 %v3255_v2  ;;  %v3868_v48 = vld [vmem:[%s5906_s1 + $0x5a4] sm:$0xf]  ;;  %v3167_v2 = vor.u32 %v3820_v19, %v3164_v56  ;;  %v3351_v36 = vor.u32 %v3866_v12, %v3348_v15  ;;  %v3279_v19 = vor.u32 %v3848_v6, %v3276_v32  ;;  %v3516_v15 = vld [vmem:[%s5906_s1 + $0x6e8] sm:$0xf0]  ;;  %v3922_v32 = vld [vmem:[%s5906_s1 + $0x754] sm:$0xf] }
  0xce   :  { %2241 = vmatpush.bf16.msra.mxu2 %v3319_v60  ;;  %v1852_v59 = vadd.f32 %v1851_v37, %v1833_v38  ;;  %v3228_v60 = vld [vmem:[%s5906_s1 + $0x4a8] sm:$0xf0]  ;;  %v3359_v7 = vor.u32 %v3868_v48, %v3356_v53  ;;  %v3816_v33 = vld [vmem:[%s5906_s1 + $0x404] sm:$0xf] }
  0xcf   :  { %2260 = vmatpush.bf16.msra.mxu3 %v3383_v3  ;;  %v3850_v3 = vld [vmem:[%s5906_s1 + $0x514] sm:$0xf]  ;;  %v3231_v27 = vor.u32 %v3836_v49, %v3228_v60  ;;  %v3832_v37 = vld [vmem:[%s5906_s1 + $0x484] sm:$0xf]  ;;  %v3212_v38 = vld [vmem:[%s5906_s1 + $0x488] sm:$0xf0]  ;;  %v3151_v56 = vor.u32 %v3816_v33, %v3148_v34 }
  0xd0   :  { %2204 = vmatpush.bf16.msra.mxu0 %v3183_v1  ;;  %v1870_v11 = vpop.f32.mrf.mxu2  ;;  %v3220_v1 = vld [vmem:[%s5906_s1 + $0x498] sm:$0xf0]  ;;  %v3287_v30 = vor.u32 %v3850_v3, %v3284_v4  ;;  %v3924_v3 = vld [vmem:[%s5906_s1 + $0x764] sm:$0xf]  ;;  %v3580_v4 = vld [vmem:[%s5906_s1 + $0x768] sm:$0xf0] }
  0xd1   :  { %2223 = vmatpush.bf16.msra.mxu1 %v3247_v20  ;;  %v1871_v20 = vadd.f32 %v1870_v11, %v1852_v59  ;;  %v3652_v49 = vld [vmem:[%s5906_s1 + $0x7f8] sm:$0xf0]  ;;  %v3215_v59 = vor.u32 %v3832_v37, %v3212_v38  ;;  %v3892_v11 = vld [vmem:[%s5906_s1 + $0x664] sm:$0xf]  ;;  %v3890_v34 = vld [vmem:[%s5906_s1 + $0x654] sm:$0xf] }
  0xd2   :  { %2242 = vmatpush.bf16.msra.mxu2 %v3311_v0  ;;  %v1854_v5 = vpop.f32.mrf.mxu1  ;;  %v3572_v33 = vld [vmem:[%s5906_s1 + $0x758] sm:$0xf0] }
  0xd3   :  { %2261 = vmatpush.bf16.msra.mxu3 %v3375_v21  ;;  %v1889_v0 = vpop.f32.mrf.mxu3  ;;  %v1835_v21 = vpop.f32.mrf.mxu0 }
  0xd4   :  { %2205 = vmatpush.bf16.msra.mxu0 %v3175_v44  ;;  %v1836_v26 = vadd.f32 %v1835_v21, %v5464_v16  ;;  %v5618_v35 = vadd.f32 %v1889_v0, %v1871_v20  ;;  %v3223_v16 = vor.u32 %v3834_v10, %v3220_v1  ;;  %2157 = vmatmul.bf16.gmra.mxu1 %v4632_v9  ;;  %v3460_v9 = vld [vmem:[%s5906_s1 + $0x678] sm:$0xf0]  ;;  %v3452_v0 = vld [vmem:[%s5906_s1 + $0x668] sm:$0xf0]  ;;  %v3908_v1 = vld [vmem:[%s5906_s1 + $0x6e4] sm:$0xf] }
  0xd5   :  { %2224 = vmatpush.bf16.msra.mxu1 %v3239_v47  ;;  %2138 = vmatmul.bf16.gmra.mxu0 %v4630_v8  ;;  %v3588_v47 = vld [vmem:[%s5906_s1 + $0x778] sm:$0xf0]  ;;  %v3894_v8 = vld [vmem:[%s5906_s1 + $0x674] sm:$0xf]  ;;  %v3940_v20 = vld [vmem:[%s5906_s1 + $0x7e4] sm:$0xf] }
  0xd6   :  { %2243 = vmatpush.bf16.msra.mxu2 %v3303_v41  ;;  %v3864_v41 = vld [vmem:[%s5906_s1 + $0x584] sm:$0xf]  ;;  %v1855_v44 = vadd.f32 %v1854_v5, %v1836_v26  ;;  %2195 = vmatmul.bf16.gmra.mxu3 %v4645_v14  ;;  %v3942_v14 = vld [vmem:[%s5906_s1 + $0x7f4] sm:$0xf]  ;;  %v3644_v21 = vld [vmem:[%s5906_s1 + $0x7e8] sm:$0xf0]  ;;  %v3455_v26 = vor.u32 %v3892_v11, %v3452_v0 }
  0xd7   :  { %2262 = vmatpush.bf16.msra.mxu3 %v3367_v51  ;;  %2176 = vmatmul.bf16.gmra.mxu2 %v4643_v13  ;;  %v3910_v51 = vld [vmem:[%s5906_s1 + $0x6f4] sm:$0xf]  ;;  %v3524_v13 = vld [vmem:[%s5906_s1 + $0x6f8] sm:$0xf0]  ;;  %v3343_v60 = vor.u32 %v3864_v41, %v3340_v50  ;;  %v3655_v10 = vor.u32 %v3942_v14, %v3652_v49 }
  0xd8   :  { %2206 = vmatpush.bf16.msra.mxu0 %v3167_v2  ;;  %v1873_v48 = vpop.f32.mrf.mxu2  ;;  %v3463_v2 = vor.u32 %v3894_v8, %v3460_v9  ;;  %v3527_v57 = vor.u32 %v3910_v51, %v3524_v13  ;;  %v3508_v41 = vld [vmem:[%s5906_s1 + $0x6d8] sm:$0xf0]  ;;  %v3575_v51 = vor.u32 %v3922_v32, %v3572_v33  ;;  %v3564_v13 = vld [vmem:[%s5906_s1 + $0x748] sm:$0xf0] }
  0xd9   :  { %2225 = vmatpush.bf16.msra.mxu1 %v3231_v27  ;;  %v1874_v27 = vadd.f32 %v1873_v48, %v1855_v44  ;;  %v3938_v44 = vld [vmem:[%s5906_s1 + $0x7d4] sm:$0xf]  ;;  %v3636_v50 = vld [vmem:[%s5906_s1 + $0x7d8] sm:$0xf0]  ;;  %v3904_v48 = vld [vmem:[%s5906_s1 + $0x6c4] sm:$0xf] }
  0xda   :  { %2244 = vmatpush.bf16.msra.mxu2 %v3295_v61  ;;  %v3591_v61 = vor.u32 %v3926_v42, %v3588_v47  ;;  %v1856_v54 = vpop.f32.mrf.mxu1  ;;  %v3492_v0 = vld [vmem:[%s5906_s1 + $0x6b8] sm:$0xf0] }
  0xdb   :  { %2263 = vmatpush.bf16.msra.mxu3 %v3359_v7  ;;  %v1892_v53 = vpop.f32.mrf.mxu3  ;;  %v1837_v7 = vpop.f32.mrf.mxu0 }
  0xdc   :  { %2207 = vmatpush.bf16.msra.mxu0 %v3159_v31  ;;  %v1838_v12 = vadd.f32 %v1837_v7, %v5499_v52  ;;  %v5685_v5 = vadd.f32 %v1892_v53, %v1874_v27  ;;  %v3583_v52 = vor.u32 %v3924_v3, %v3580_v4  ;;  %v3647_v31 = vor.u32 %v3940_v20, %v3644_v21  ;;  %v3628_v3 = vld [vmem:[%s5906_s1 + $0x7c8] sm:$0xf0]  ;;  %v3918_v4 = vld [vmem:[%s5906_s1 + $0x734] sm:$0xf]  ;;  %v3556_v27 = vld [vmem:[%s5906_s1 + $0x738] sm:$0xf0] }
  0xdd   :  { %2226 = vmatpush.bf16.msra.mxu1 %v3223_v16  ;;  %v3444_v16 = vld [vmem:[%s5906_s1 + $0x658] sm:$0xf0] }
  0xde   :  { %2245 = vmatpush.bf16.msra.mxu2 %v3287_v30  ;;  %v1857_v6 = vadd.f32 %v1856_v54, %v1838_v12  ;;  %v3519_v30 = vor.u32 %v3908_v1, %v3516_v15  ;;  %v3934_v1 = vld [vmem:[%s5906_s1 + $0x7b4] sm:$0xf]  ;;  %v3620_v12 = vld [vmem:[%s5906_s1 + $0x7b8] sm:$0xf0] }
  0xdf   :  { %2264 = vmatpush.bf16.msra.mxu3 %v3351_v36  ;;  %v3906_v36 = vld [vmem:[%s5906_s1 + $0x6d4] sm:$0xf] }
  0xe0   :  { %2208 = vmatpush.bf16.msra.mxu0 %v3151_v56  ;;  %v1875_v37 = vpop.f32.mrf.mxu2  ;;  %v3920_v56 = vld [vmem:[%s5906_s1 + $0x744] sm:$0xf]  ;;  %v3511_v49 = vor.u32 %v3906_v36, %v3508_v41 }
  0xe1   :  { %2227 = vmatpush.bf16.msra.mxu1 %v3215_v59  ;;  %v1876_v42 = vadd.f32 %v1875_v37, %v1857_v6  ;;  %v3639_v59 = vor.u32 %v3938_v44, %v3636_v50  ;;  %v3900_v36 = vld [vmem:[%s5906_s1 + $0x6a4] sm:$0xf]  ;;  %v3612_v44 = vld [vmem:[%s5906_s1 + $0x7a8] sm:$0xf0] }
  0xe2   :  { %2246 = vmatpush.bf16.msra.mxu2 %v3279_v19  ;;  %v1925_v8 = vpop.f32.mrf.mxu1  ;;  %v3447_v19 = vor.u32 %v3890_v34, %v3444_v16  ;;  %v3623_v34 = vor.u32 %v3934_v1, %v3620_v12  ;;  %v3420_v16 = vld [vmem:[%s5906_s1 + $0x628] sm:$0xf0]  ;;  %v3932_v41 = vld [vmem:[%s5906_s1 + $0x7a4] sm:$0xf] }
  0xe3   :  { %2265 = vmatpush.bf16.msra.mxu3 %v3343_v60  ;;  %v1894_v38 = vpop.f32.mrf.mxu3  ;;  %v1906_v47 = vpop.f32.mrf.mxu0  ;;  %v3888_v60 = vld [vmem:[%s5906_s1 + $0x644] sm:$0xf]  ;;  %v3596_v1 = vld [vmem:[%s5906_s1 + $0x788] sm:$0xf0] }
  0xe4   :  { %2277 = vmatpush.bf16.msrb.mxu0 %v3463_v2  ;;  %v1907_v9 = vadd.f32 %v1906_v47, %v5561_v43  ;;  %v5718_v14 = vadd.f32 %v1894_v38, %v1876_v42  ;;  %v3436_v43 = vld [vmem:[%s5906_s1 + $0x648] sm:$0xf0]  ;;  %2228 = vmatmul.bf16.vlgmr.msra.gmra.mxu1 %v4770_v24  ;;  %v3936_v2 = vld [vmem:[%s5906_s1 + $0x7c4] sm:$0xf]  ;;  %v3914_v47 = vld [vmem:[%s5906_s1 + $0x714] sm:$0xf] }
  0xe5   :  { %2296 = vmatpush.bf16.msrb.mxu1 %v3527_v57  ;;  %2209 = vmatmul.bf16.vlgmr.msra.gmra.mxu0 %v4768_v23  ;;  %v3567_v23 = vor.u32 %v3920_v56, %v3564_v13  ;;  %v3439_v24 = vor.u32 %v3888_v60, %v3436_v43  ;;  %v3631_v54 = vor.u32 %v3936_v2, %v3628_v3  ;;  %v3902_v57 = vld [vmem:[%s5906_s1 + $0x6b4] sm:$0xf]  ;;  %v3484_v38 = vld [vmem:[%s5906_s1 + $0x6a8] sm:$0xf0]  ;;  %v3412_v56 = vld [vmem:[%s5906_s1 + $0x618] sm:$0xf0] }
  0xe6   :  { %2315 = vmatpush.bf16.msrb.mxu2 %v3591_v61  ;;  %v1926_v53 = vadd.f32 %v1925_v8, %v1907_v9  ;;  %v3500_v61 = vld [vmem:[%s5906_s1 + $0x6c8] sm:$0xf0]  ;;  %2266 = vmatmul.bf16.vlgmr.msra.gmra.mxu3 %v4783_v29  ;;  %v3428_v29 = vld [vmem:[%s5906_s1 + $0x638] sm:$0xf0]  ;;  %v3495_v33 = vor.u32 %v3902_v57, %v3492_v0  ;;  %v3487_v9 = vor.u32 %v3900_v36, %v3484_v38  ;;  %v3898_v13 = vld [vmem:[%s5906_s1 + $0x694] sm:$0xf] }
  0xe7   :  { %2334 = vmatpush.bf16.msrb.mxu3 %v3655_v10  ;;  %2247 = vmatmul.bf16.vlgmr.msra.gmra.mxu2 %v4781_v28  ;;  %v3503_v7 = vor.u32 %v3904_v48, %v3500_v61  ;;  %v3886_v28 = vld [vmem:[%s5906_s1 + $0x634] sm:$0xf]  ;;  %v3540_v8 = vld [vmem:[%s5906_s1 + $0x718] sm:$0xf0]  ;;  %v3896_v57 = vld [vmem:[%s5906_s1 + $0x684] sm:$0xf] }
  0xe8   :  { %2278 = vmatpush.bf16.msrb.mxu0 %v3455_v26  ;;  %v1944_v10 = vpop.f32.mrf.mxu2  ;;  %v3431_v26 = vor.u32 %v3886_v28, %v3428_v29  ;;  %v3476_v60 = vld [vmem:[%s5906_s1 + $0x698] sm:$0xf0]  ;;  %v3930_v43 = vld [vmem:[%s5906_s1 + $0x794] sm:$0xf]  ;;  %v3404_v29 = vld [vmem:[%s5906_s1 + $0x608] sm:$0xf0] }
  0xe9   :  { %2297 = vmatpush.bf16.msrb.mxu1 %v3519_v30  ;;  %v1945_v15 = vadd.f32 %v1944_v10, %v1926_v53  ;;  %v3916_v30 = vld [vmem:[%s5906_s1 + $0x724] sm:$0xf]  ;;  %v3604_v48 = vld [vmem:[%s5906_s1 + $0x798] sm:$0xf0] }
  0xea   :  { %2316 = vmatpush.bf16.msrb.mxu2 %v3583_v52  ;;  %v1927_v21 = vpop.f32.mrf.mxu1  ;;  %v3559_v52 = vor.u32 %v3918_v4, %v3556_v27  ;;  %v3912_v4 = vld [vmem:[%s5906_s1 + $0x704] sm:$0xf]  ;;  %v3532_v27 = vld [vmem:[%s5906_s1 + $0x708] sm:$0xf0]  ;;  %v3607_v28 = vor.u32 %v3930_v43, %v3604_v48 }
  0xeb   :  { %2335 = vmatpush.bf16.msrb.mxu3 %v3647_v31  ;;  %v1963_v11 = vpop.f32.mrf.mxu3  ;;  %v1908_v20 = vpop.f32.mrf.mxu0  ;;  %v3548_v31 = vld [vmem:[%s5906_s1 + $0x728] sm:$0xf0]  ;;  %v3928_v0 = vld [vmem:[%s5906_s1 + $0x784] sm:$0xf] }
  0xec   :  { %2279 = vmatpush.bf16.msrb.mxu0 %v3447_v19  ;;  %v1909_v6 = vadd.f32 %v1908_v20, %v5618_v35  ;;  %v5773_v32 = vadd.f32 %v1963_v11, %v1945_v15  ;;  %v3884_v35 = vld [vmem:[%s5906_s1 + $0x624] sm:$0xf]  ;;  %v3551_v50 = vor.u32 %v3916_v30, %v3548_v31  ;;  %v3882_v19 = vld [vmem:[%s5906_s1 + $0x614] sm:$0xf]  ;;  %v3468_v11 = vld [vmem:[%s5906_s1 + $0x688] sm:$0xf0]  ;;  %v3599_v15 = vor.u32 %v3928_v0, %v3596_v1 }
  0xed   :  { %2298 = vmatpush.bf16.msrb.mxu1 %v3511_v49  ;;  %v3423_v42 = vor.u32 %v3884_v35, %v3420_v16  ;;  %v3471_v12 = vor.u32 %v3896_v57, %v3468_v11 }
  0xee   :  { %2317 = vmatpush.bf16.msrb.mxu2 %v3575_v51  ;;  %v1928_v37 = vadd.f32 %v1927_v21, %v1909_v6  ;;  %v3615_v51 = vor.u32 %v3932_v41, %v3612_v44 }
  0xef   :  { %2336 = vmatpush.bf16.msrb.mxu3 %v3639_v59 }
  0xf0   :  { %2280 = vmatpush.bf16.msrb.mxu0 %v3439_v24  ;;  %v1946_v49 = vpop.f32.mrf.mxu2  ;;  %v3415_v24 = vor.u32 %v3882_v19, %v3412_v56 }
  0xf1   :  { %2299 = vmatpush.bf16.msrb.mxu1 %v3503_v7  ;;  %v1947_v53 = vadd.f32 %v1946_v49, %v1928_v37 }
  0xf2   :  { %2318 = vmatpush.bf16.msrb.mxu2 %v3567_v23  ;;  %v1930_v2 = vpop.f32.mrf.mxu1  ;;  %v3543_v23 = vor.u32 %v3914_v47, %v3540_v8 }
  0xf3   :  { %2337 = vmatpush.bf16.msrb.mxu3 %v3631_v54  ;;  %v1965_v59 = vpop.f32.mrf.mxu3  ;;  %v1911_v61 = vpop.f32.mrf.mxu0  ;;  %v3479_v54 = vor.u32 %v3898_v13, %v3476_v60 }
  0xf4   :  { %2281 = vmatpush.bf16.msrb.mxu0 %v3431_v26  ;;  %v1912_v3 = vadd.f32 %v1911_v61, %v5685_v5  ;;  %v1966_v7 = vadd.f32 %v1965_v59, %v1947_v53  ;;  %v3880_v5 = vld [vmem:[%s5906_s1 + $0x604] sm:$0xf]  ;;  %2233 = vmatmul.bf16.gmra.mxu1 %v4902_v40 }
  0xf5   :  { %2300 = vmatpush.bf16.msrb.mxu1 %v3495_v33  ;;  %2214 = vmatmul.bf16.gmra.mxu0 %v4900_v39  ;;  %v3535_v39 = vor.u32 %v3912_v4, %v3532_v27  ;;  %v3407_v40 = vor.u32 %v3880_v5, %v3404_v29 }
  0xf6   :  { %2319 = vmatpush.bf16.msrb.mxu2 %v3559_v52  ;;  %v1931_v10 = vadd.f32 %v1930_v2, %v1912_v3  ;;  %2271 = vmatmul.bf16.gmra.mxu3 %v4915_v46 }
  0xf7   :  { %2338 = vmatpush.bf16.msrb.mxu3 %v3623_v34  ;;  %2252 = vmatmul.bf16.gmra.mxu2 %v4913_v45 }
  0xf8   :  { %2282 = vmatpush.bf16.msrb.mxu0 %v3423_v42  ;;  %v1949_v20 = vpop.f32.mrf.mxu2 }
  0xf9   :  { %2301 = vmatpush.bf16.msrb.mxu1 %v3487_v9  ;;  %v1950_v6 = vadd.f32 %v1949_v20, %v1931_v10 }
  0xfa   :  { %2320 = vmatpush.bf16.msrb.mxu2 %v3551_v50  ;;  %v1932_v26 = vpop.f32.mrf.mxu1 }
  0xfb   :  { %2339 = vmatpush.bf16.msrb.mxu3 %v3615_v51  ;;  %v1968_v21 = vpop.f32.mrf.mxu3  ;;  %v1913_v52 = vpop.f32.mrf.mxu0 }
  0xfc   :  { %2283 = vmatpush.bf16.msrb.mxu0 %v3415_v24  ;;  %v1914_v30 = vadd.f32 %v1913_v52, %v5718_v14  ;;  %v1969_v45 = vadd.f32 %v1968_v21, %v1950_v6 }
  0xfd   :  { %2302 = vmatpush.bf16.msrb.mxu1 %v3479_v54 }
  0xfe   :  { %2321 = vmatpush.bf16.msrb.mxu2 %v3543_v23  ;;  %v1933_v46 = vadd.f32 %v1932_v26, %v1914_v30 }
  0xff   :  { %2340 = vmatpush.bf16.msrb.mxu3 %v3607_v28 }
 0x100   :  { %2284 = vmatpush.bf16.msrb.mxu0 %v3407_v40  ;;  %v1951_v31 = vpop.f32.mrf.mxu2 }
 0x101   :  { %2303 = vmatpush.bf16.msrb.mxu1 %v3471_v12  ;;  %v1952_v34 = vadd.f32 %v1951_v31, %v1933_v46 }
 0x102   :  { %2322 = vmatpush.bf16.msrb.mxu2 %v3535_v39  ;;  %v2001_v16 = vpop.f32.mrf.mxu1 }
 0x103   :  { %2341 = vmatpush.bf16.msrb.mxu3 %v3599_v15  ;;  %v1970_v33 = vpop.f32.mrf.mxu3  ;;  %v1982_v35 = vpop.f32.mrf.mxu0 }
 0x104   :  { %v1983_v36 = vadd.f32 %v1982_v35, %v5773_v32  ;;  %v1971_v37 = vadd.f32 %v1970_v33, %v1952_v34  ;;  %2304 = vmatmul.bf16.vlgmr.msrb.gmra.mxu1 %v5046_v18 }
 0x105   :  { %2285 = vmatmul.bf16.vlgmr.msrb.gmra.mxu0 %v5044_v17 }
 0x106   :  { %v2002_v38 = vadd.f32 %v2001_v16, %v1983_v36  ;;  %2342 = vmatmul.bf16.vlgmr.msrb.gmra.mxu3 %v5059_v25 }
 0x107   :  { %2323 = vmatmul.bf16.vlgmr.msrb.gmra.mxu2 %v5057_v22 }
 0x108   :  { %v2020_v14 = vpop.f32.mrf.mxu2 }
 0x109   :  { %v2021_v44 = vadd.f32 %v2020_v14, %v2002_v38 }
 0x10a   :  { %v2003_v42 = vpop.f32.mrf.mxu1 }
 0x10b   :  { %v2039_v41 = vpop.f32.mrf.mxu3  ;;  %v1984_v50 = vpop.f32.mrf.mxu0 }
 0x10c   :  { %v1985_v47 = vadd.f32 %v1984_v50, %v1966_v7  ;;  %v2040_v8 = vadd.f32 %v2039_v41, %v2021_v44 }
 0x10e   :  { %v2004_v9 = vadd.f32 %v2003_v42, %v1985_v47 }
 0x110   :  { %v2022_v51 = vpop.f32.mrf.mxu2 }
 0x111   :  { %v2023_v19 = vadd.f32 %v2022_v51, %v2004_v9 }
 0x112   :  { %v2006_v13 = vpop.f32.mrf.mxu1 }
 0x113   :  { %v2041_v32 = vpop.f32.mrf.mxu3  ;;  %v1987_v56 = vpop.f32.mrf.mxu0 }
 0x114   :  { %v1988_v17 = vadd.f32 %v1987_v56, %v1969_v45  ;;  %v2042_v49 = vadd.f32 %v2041_v32, %v2023_v19  ;;  %2309 = vmatmul.bf16.gmra.mxu1 %v5178_v58 }
 0x115   :  { %2290 = vmatmul.bf16.gmra.mxu0 %v5176_v55 }
 0x116   :  { %v2007_v18 = vadd.f32 %v2006_v13, %v1988_v17  ;;  %v2353_v22 = vadd.f32 %v2042_v49, %v2040_v8  ;;  %2347 = vmatmul.bf16.gmra.mxu3 %v5191_v63 }
 0x117   :  { %2328 = vmatmul.bf16.gmra.mxu2 %v5189_v62 }
 0x11a   :  { %v2025_v25 = vpop.f32.mrf.mxu2  ;;  %v2008_v48 = vpop.f32.mrf.mxu1 }
 0x11b   :  { %v2044_v59 = vpop.f32.mrf.mxu3  ;;  %v2026_v60 = vadd.f32 %v2025_v25, %v2007_v18  ;;  %v1989_v43 = vpop.f32.mrf.mxu0 }
 0x11c   :  { %v1990_v53 = vadd.f32 %v1989_v43, %v1971_v37 }
 0x11d   :  { %v2045_v61 = vadd.f32 %v2044_v59, %v2026_v60 }
 0x11e   :  { %v2009_v2 = vadd.f32 %v2008_v48, %v1990_v53 }
 0x11f   :  { %v2354_v3 = vadd.f32 %v2353_v22, %v2045_v61 }
 0x122   :  { %v2027_v23 = vpop.f32.mrf.mxu2  ;;  %v2077_v27 = vpop.f32.mrf.mxu1 }
 0x123   :  { %v2046_v24 = vpop.f32.mrf.mxu3  ;;  %v2028_v4 = vadd.f32 %v2027_v23, %v2009_v2  ;;  %v2058_v55 = vpop.f32.mrf.mxu0 }
 0x124   :  { %v2078_v58 = vadd.f32 %v2077_v27, %v2058_v55 }
 0x125   :  { %v2047_v7 = vadd.f32 %v2046_v24, %v2028_v4 }
 0x127   :  { %v2355_v54 = vadd.f32 %v2354_v3, %v2047_v7 }
 0x129   :  { %v2356_v62 = vrot.slane %v2355_v54, 4 }
 0x12a   :  { %v2096_v28 = vpop.f32.mrf.mxu2  ;;  %v2079_v10 = vpop.f32.mrf.mxu1 }
 0x12b   :  { %v2115_v63 = vpop.f32.mrf.mxu3  ;;  %v2357_v5 = vadd.f32 %v2356_v62, %v2355_v54  ;;  %v2097_v29 = vadd.f32 %v2096_v28, %v2078_v58  ;;  %v2060_v57 = vpop.f32.mrf.mxu0 }
 0x12c   :  { %v2080_v11 = vadd.f32 %v2079_v10, %v2060_v57 }
 0x12d   :  { %v2358_v0 = vrot.slane %v2357_v5, 2  ;;  %v2116_v1 = vadd.f32 %v2115_v63, %v2097_v29 }
 0x12f   :  { %v2359_v39 = vadd.f32 %v2358_v0, %v2357_v5 }
 0x131   :  { %v2360_v40 = vrot.slane %v2359_v39, 1 }
 0x132   :  { %v2098_v12 = vpop.f32.mrf.mxu2  ;;  %v2082_v52 = vpop.f32.mrf.mxu1 }
 0x133   :  { %v2117_v15 = vpop.f32.mrf.mxu3  ;;  %v2361_v20 = vadd.f32 %v2360_v40, %v2359_v39  ;;  %v2099_v21 = vadd.f32 %v2098_v12, %v2080_v11  ;;  %v2063_v6 = vpop.f32.mrf.mxu0 }
 0x134   :  { %v2083_v26 = vadd.f32 %v2082_v52, %v2063_v6 }
 0x135   :  { %v2371_v30 = vmul.f32 0.03125, %v2361_v20  ;;  %v2118_v45 = vadd.f32 %v2117_v15, %v2099_v21 }
 0x137   :  { %v5856_v46 = vsub.f32 %v2040_v8, %v2371_v30  ;;  %v5858_v31 = vsub.f32 %v2042_v49, %v2371_v30  ;;  %v5860_v33 = vsub.f32 %v2045_v61, %v2371_v30  ;;  %v5862_v34 = vsub.f32 %v2047_v7, %v2371_v30 }
 0x139   :  { %v2381_v35 = vmul.f32 %v5856_v46, %v5856_v46  ;;  %v2383_v16 = vmul.f32 %v5858_v31, %v5858_v31  ;;  %v2385_v38 = vmul.f32 %v5860_v33, %v5860_v33  ;;  %v2387_v47 = vmul.f32 %v5862_v34, %v5862_v34 }
 0x13a   :  { %v2101_v36 = vpop.f32.mrf.mxu2  ;;  %v2084_v50 = vpop.f32.mrf.mxu1 }
 0x13b   :  { %v2120_v37 = vpop.f32.mrf.mxu3  ;;  %v2389_v14 = vadd.f32 %v2383_v16, %v2381_v35  ;;  %v2102_v41 = vadd.f32 %v2101_v36, %v2083_v26  ;;  %v2065_v44 = vpop.f32.mrf.mxu0 }
 0x13c   :  { %v2085_v42 = vadd.f32 %v2084_v50, %v2065_v44 }
 0x13d   :  { %v2390_v8 = vadd.f32 %v2389_v14, %v2385_v38  ;;  %v2121_v9 = vadd.f32 %v2120_v37, %v2102_v41 }
 0x13f   :  { %v5872_v51 = vadd.f32 %v2390_v8, %v2387_v47 }
 0x142   :  { %v2103_v32 = vpop.f32.mrf.mxu2  ;;  %v2153_v17 = vpop.f32.mrf.mxu1 }
 0x143   :  { %v2122_v19 = vpop.f32.mrf.mxu3  ;;  %v2104_v56 = vadd.f32 %v2103_v32, %v2085_v42  ;;  %v2134_v13 = vpop.f32.mrf.mxu0 }
 0x144   :  { %v2135_v49 = vadd.f32 %v2134_v13, %v2116_v1 }
 0x145   :  { %v2123_v18 = vadd.f32 %v2122_v19, %v2104_v56 }
 0x146   :  { %v2154_v22 = vadd.f32 %v2153_v17, %v2135_v49 }
 0x14a   :  { %v2172_v25 = vpop.f32.mrf.mxu2  ;;  %v2155_v48 = vpop.f32.mrf.mxu1 }
 0x14b   :  { %v2191_v59 = vpop.f32.mrf.mxu3  ;;  %v2173_v60 = vadd.f32 %v2172_v25, %v2154_v22  ;;  %v2136_v43 = vpop.f32.mrf.mxu0 }
 0x14c   :  { %v2137_v1 = vadd.f32 %v2136_v43, %v2118_v45 }
 0x14d   :  { %v2192_v53 = vadd.f32 %v2191_v59, %v2173_v60 }
 0x14e   :  { %v2156_v39 = vadd.f32 %v2155_v48, %v2137_v1 }
 0x152   :  { %v2174_v61 = vpop.f32.mrf.mxu2  ;;  %v2158_v23 = vpop.f32.mrf.mxu1 }
 0x153   :  { %v2193_v2 = vpop.f32.mrf.mxu3  ;;  %v2139_v3 = vpop.f32.mrf.mxu0  ;;  %v2175_v15 = vadd.f32 %v2174_v61, %v2156_v39 }
 0x154   :  { %v2140_v6 = vadd.f32 %v2139_v3, %v2121_v9 }
 0x155   :  { %v2194_v52 = vadd.f32 %v2193_v2, %v2175_v15 }
 0x156   :  { %v2159_v30 = vadd.f32 %v2158_v23, %v2140_v6 }
 0x15a   :  { %v2177_v24 = vpop.f32.mrf.mxu2  ;;  %v2160_v27 = vpop.f32.mrf.mxu1 }
 0x15b   :  { %v2196_v4 = vpop.f32.mrf.mxu3  ;;  %v2141_v55 = vpop.f32.mrf.mxu0  ;;  %v2178_v37 = vadd.f32 %v2177_v24, %v2159_v30 }
 0x15c   :  { %v2142_v44 = vadd.f32 %v2141_v55, %v2123_v18 }
 0x15d   :  { %v2197_v42 = vadd.f32 %v2196_v4, %v2178_v37 }
 0x15e   :  { %v2161_v8 = vadd.f32 %v2160_v27, %v2142_v44 }
 0x162   :  { %v2179_v58 = vpop.f32.mrf.mxu2  ;;  %v2229_v62 = vpop.f32.mrf.mxu1 }
 0x163   :  { %v2198_v7 = vpop.f32.mrf.mxu3  ;;  %v2210_v54 = vpop.f32.mrf.mxu0  ;;  %v2180_v13 = vadd.f32 %v2179_v58, %v2161_v8 }
 0x164   :  { %v2211_v26 = vadd.f32 %v2210_v54, %v2192_v53 }
 0x165   :  { %v2199_v43 = vadd.f32 %v2198_v7, %v2180_v13 }
 0x166   :  { %v2230_v38 = vadd.f32 %v2229_v62, %v2211_v26 }
 0x16a   :  { %v2248_v28 = vpop.f32.mrf.mxu2  ;;  %v2231_v29 = vpop.f32.mrf.mxu1 }
 0x16b   :  { %v2267_v63 = vpop.f32.mrf.mxu3  ;;  %v2212_v5 = vpop.f32.mrf.mxu0  ;;  %v2249_v50 = vadd.f32 %v2248_v28, %v2230_v38 }
 0x16c   :  { %v2213_v35 = vadd.f32 %v2212_v5, %v2194_v52  ;;  %v2392_v52 = vrot.slane %v5872_v51, 4 }
 0x16d   :  { %v2268_v32 = vadd.f32 %v2267_v63, %v2249_v50 }
 0x16e   :  { %v2232_v45 = vadd.f32 %v2231_v29, %v2213_v35  ;;  %v2393_v35 = vadd.f32 %v2392_v52, %v5872_v51 }
 0x170   :  { %v2394_v38 = vrot.slane %v2393_v35, 2 }
 0x172   :  { %v2250_v57 = vpop.f32.mrf.mxu2  ;;  %v2234_v0 = vpop.f32.mrf.mxu1 }
 0x173   :  { %v2269_v10 = vpop.f32.mrf.mxu3  ;;  %v2215_v11 = vpop.f32.mrf.mxu0  ;;  %v2251_v47 = vadd.f32 %v2250_v57, %v2232_v45 }
 0x174   :  { %v2216_v19 = vadd.f32 %v2215_v11, %v2197_v42 }
 0x175   :  { %v2270_v17 = vadd.f32 %v2269_v10, %v2251_v47 }
 0x176   :  { %v2235_v59 = vadd.f32 %v2234_v0, %v2216_v19 }
 0x17a   :  { %v2253_v40 = vpop.f32.mrf.mxu2  ;;  %v2236_v21 = vpop.f32.mrf.mxu1 }
 0x17b   :  { %v2272_v12 = vpop.f32.mrf.mxu3  ;;  %v2217_v20 = vpop.f32.mrf.mxu0  ;;  %v2254_v48 = vadd.f32 %v2253_v40, %v2235_v59 }
 0x17c   :  { %v2218_v18 = vadd.f32 %v2217_v20, %v2199_v43 }
 0x17d   :  { %v2273_v24 = vadd.f32 %v2272_v12, %v2254_v48 }
 0x17e   :  { %v2237_v27 = vadd.f32 %v2236_v21, %v2218_v18 }
 0x182   :  { %v2255_v16 = vpop.f32.mrf.mxu2  ;;  %v2305_v41 = vpop.f32.mrf.mxu1 }
 0x183   :  { %v2274_v36 = vpop.f32.mrf.mxu3  ;;  %v2286_v14 = vpop.f32.mrf.mxu0  ;;  %v2256_v63 = vadd.f32 %v2255_v16, %v2237_v27 }
 0x184   :  { %v2287_v49 = vadd.f32 %v2286_v14, %v2268_v32 }
 0x185   :  { %v2275_v10 = vadd.f32 %v2274_v36, %v2256_v63 }
 0x186   :  { %v2306_v53 = vadd.f32 %v2305_v41, %v2287_v49  ;;  %v2395_v41 = vadd.f32 %v2394_v38, %v2393_v35 }
 0x188   :  { %v2396_v45 = vrot.slane %v2395_v41, 1 }
 0x18a   :  { %v2324_v56 = vpop.f32.mrf.mxu2  ;;  %v2307_v25 = vpop.f32.mrf.mxu1 }
 0x18b   :  { %v2343_v9 = vpop.f32.mrf.mxu3  ;;  %v2288_v22 = vpop.f32.mrf.mxu0  ;;  %v2325_v61 = vadd.f32 %v2324_v56, %v2306_v53  ;;  %v2397_v56 = vadd.f32 %v2396_v45, %v2395_v41 }
 0x18c   :  { %v2289_v60 = vadd.f32 %v2288_v22, %v2270_v17 }
 0x18d   :  { %v2344_v54 = vadd.f32 %v2343_v9, %v2325_v61  ;;  %v2407_v51 = vmul.f32 0.03125, %v2397_v56 }
 0x18e   :  { %v2308_v2 = vadd.f32 %v2307_v25, %v2289_v60 }
 0x18f   :  { %v2409_v60 = vmax.f32 %v2407_v51, 0.0 }
 0x191   :  { %v2412_v53 = vadd.f32 1e-05, %v2409_v60 }
 0x192   :  { %v2326_v3 = vpop.f32.mrf.mxu2  ;;  %v2310_v28 = vpop.f32.mrf.mxu1 }
 0x193   :  { %v2345_v23 = vpop.f32.mrf.mxu3  ;;  %v2327_v4 = vadd.f32 %v2326_v3, %v2308_v2  ;;  %v2291_v55 = vpop.f32.mrf.mxu0  ;;  %3944 = vrsqrt.f32 %v2412_v53  ;;  %vm2420_vm4 = vweird.f32 %v2412_v53 }
 0x194   :  { %v2292_v62 = vadd.f32 %v2291_v55, %v2273_v24 }
 0x195   :  { %v2346_v58 = vadd.f32 %v2345_v23, %v2327_v4 }
 0x196   :  { %v2311_v29 = vadd.f32 %v2310_v28, %v2292_v62 }
 0x197   :  { %v2362_v5 = vadd.f32 %v2346_v58, %v2344_v54 }
 0x199   :  { %v3945_v24 = vpop.eup %3944 }
 0x19a   :  { %v2329_v57 = vpop.f32.mrf.mxu2  ;;  %v2312_v15 = vpop.f32.mrf.mxu1  ;;  %v2415_v27 = vmul.f32 %v3945_v24, %v2412_v53  ;;  %vm2421_vm1 = vweird.f32 %v3945_v24 }
 0x19b   :  { %v2348_v7 = vpop.f32.mrf.mxu3  ;;  %v2330_v11 = vadd.f32 %v2329_v57, %v2311_v29  ;;  %v2293_v0 = vpop.f32.mrf.mxu0  ;;  %vm2422_vm6 = vmor %vm2420_vm4, %vm2421_vm1 }
 0x19c   :  { %v2294_v39 = vadd.f32 %v2293_v0, %v2275_v10  ;;  %v2411_v0 = vld [vmem:[%s5908_s2] sm:$0x3] }
 0x19d   :  { %v2349_v1 = vadd.f32 %v2348_v7, %v2330_v11 }
 0x19e   :  { %v2313_v12 = vadd.f32 %v2312_v15, %v2294_v39  ;;  %v2454_v15 = vld [vmem:[%s5909_s3] sm:$0x3] }
 0x19f   :  { %v2363_v40 = vadd.f32 %v2362_v5, %v2349_v1  ;;  %v2457_v52 = vperm.slane %v2454_v15, 1 }
 0x1a2   :  { %v2331_v20 = vpop.f32.mrf.mxu2 }
 0x1a3   :  { %v2332_v6 = vadd.f32 %v2331_v20, %v2313_v12  ;;  %v2350_v21 = vpop.f32.mrf.mxu3 }
 0x1a5   :  { %v2351_v26 = vadd.f32 %v2350_v21, %v2332_v6  ;;  %v2456_v21 = vperm.slane %v2454_v15, 0 }
 0x1a7   :  { %v2364_v30 = vadd.f32 %v2363_v40, %v2351_v26 }
 0x1a9   :  { %v2365_v16 = vrot.slane %v2364_v30, 4 }
 0x1ab   :  { %v2366_v37 = vadd.f32 %v2365_v16, %v2364_v30 }
 0x1ad   :  { %v2367_v36 = vrot.slane %v2366_v37, 2 }
 0x1af   :  { %v2368_v14 = vadd.f32 %v2367_v36, %v2366_v37 }
 0x1b1   :  { %v2369_v44 = vrot.slane %v2368_v14, 1 }
 0x1b3   :  { %v2370_v50 = vadd.f32 %v2369_v44, %v2368_v14 }
 0x1b5   :  { %v2372_v42 = vmul.f32 0.03125, %v2370_v50 }
 0x1b7   :  { %v2374_v47 = vsub.f32 %v2344_v54, %v2372_v42  ;;  %v2376_v8 = vsub.f32 %v2346_v58, %v2372_v42  ;;  %v2378_v32 = vsub.f32 %v2349_v1, %v2372_v42  ;;  %v2380_v19 = vsub.f32 %v2351_v26, %v2372_v42 }
 0x1b8   :  { %v2416_v54 = vmul.f32 %v3945_v24, %v2415_v27 }
 0x1b9   :  { %v2382_v9 = vmul.f32 %v2374_v47, %v2374_v47  ;;  %v2384_v13 = vmul.f32 %v2376_v8, %v2376_v8  ;;  %v2386_v17 = vmul.f32 %v2378_v32, %v2378_v32  ;;  %v2388_v22 = vmul.f32 %v2380_v19, %v2380_v19 }
 0x1ba   :  { %v2417_v62 = vmul.f32 0.5, %v2416_v54 }
 0x1bb   :  { %v2398_v49 = vadd.f32 %v2384_v13, %v2382_v9 }
 0x1bc   :  { %v2418_v5 = vsub.f32 1.5, %v2417_v62 }
 0x1bd   :  { %v2399_v25 = vadd.f32 %v2398_v49, %v2386_v17 }
 0x1be   :  { %v2419_v7 = vmul.f32 %v3945_v24, %v2418_v5 }
 0x1bf   :  { %v2400_v59 = vadd.f32 %v2399_v25, %v2388_v22 }
 0x1c0   :  { %v2423_v39 = vsel %vm2422_vm6, %v3945_v24, %v2419_v7 }
 0x1c1   :  { %v2401_v43 = vrot.slane %v2400_v59, 4 }
 0x1c3   :  { %v2402_v48 = vadd.f32 %v2401_v43, %v2400_v59 }
 0x1c5   :  { %v2403_v18 = vrot.slane %v2402_v48, 2 }
 0x1c7   :  { %v2404_v61 = vadd.f32 %v2403_v18, %v2402_v48 }
 0x1c9   :  { %v2405_v2 = vrot.slane %v2404_v61, 1 }
 0x1cb   :  { %v2406_v3 = vadd.f32 %v2405_v2, %v2404_v61 }
 0x1cd   :  { %v2408_v23 = vmul.f32 0.03125, %v2406_v3 }
 0x1cf   :  { %v2410_v4 = vmax.f32 %v2408_v23, 0.0 }
 0x1d1   :  { %v2413_v55 = vadd.f32 1e-05, %v2410_v4 }
 0x1d3   :  { %3946 = vrsqrt.f32 %v2413_v55  ;;  %vm2430_vm2 = vweird.f32 %v2413_v55 }
 0x1d9   :  { %v3947_v58 = vpop.eup %3946 }
 0x1da   :  { %v2425_v28 = vmul.f32 %v3947_v58, %v2413_v55  ;;  %vm2431_vm0 = vweird.f32 %v3947_v58 }
 0x1db   :  { %vm2432_vm3 = vmor %vm2430_vm2, %vm2431_vm0 }
 0x1dc   :  { %v2426_v63 = vmul.f32 %v3947_v58, %v2425_v28 }
 0x1de   :  { %v2427_v29 = vmul.f32 0.5, %v2426_v63 }
 0x1e0   :  { %v2428_v57 = vsub.f32 1.5, %v2427_v29 }
 0x1e2   :  { %v2429_v10 = vmul.f32 %v3947_v58, %v2428_v57 }
 0x1e4   :  { %v2433_v11 = vsel %vm2432_vm3, %v3947_v58, %v2429_v10 }
 0x1e5   :  { %v2436_v1 = vrot.slane %v2433_v11, 7 }
 0x1e7   :  { %v2438_v40 = vsel %vm2437_vm5, %v2423_v39, %v2436_v1 }
 0x1e8   :  { %v2440_v12 = vmul.f32 %v2438_v40, %v2411_v0 }
 0x1ea   :  { %v2442_v20 = vperm.slane %v2440_v12, 0  ;;  %v2443_v6 = vperm.slane %v2440_v12, 1 }
 0x1ec   :  { %v2446_v26 = vmul.f32 %v2442_v20, %v5856_v46  ;;  %v2447_v30 = vmul.f32 %v2443_v6, %v2374_v47  ;;  %v2448_v35 = vmul.f32 %v2442_v20, %v5858_v31  ;;  %v2449_v16 = vmul.f32 %v2443_v6, %v2376_v8 }
 0x1ed   :  { %v2450_v37 = vmul.f32 %v2442_v20, %v5860_v33  ;;  %v2451_v38 = vmul.f32 %v2443_v6, %v2378_v32  ;;  %v2452_v36 = vmul.f32 %v2442_v20, %v5862_v34  ;;  %v2453_v14 = vmul.f32 %v2443_v6, %v2380_v19 }
 0x1ee   :  { %v2460_v41 = vadd.f32 %v2456_v21, %v2446_v26  ;;  %v2461_v44 = vadd.f32 %v2457_v52, %v2447_v30  ;;  %v2462_v50 = vadd.f32 %v2456_v21, %v2448_v35  ;;  %v2463_v45 = vadd.f32 %v2457_v52, %v2449_v16 }
 0x1ef   :  { %v2464_v42 = vadd.f32 %v2456_v21, %v2450_v37  ;;  %v2465_v56 = vadd.f32 %v2457_v52, %v2451_v38  ;;  %v2466_v9 = vadd.f32 %v2456_v21, %v2452_v36  ;;  %v2467_v13 = vadd.f32 %v2457_v52, %v2453_v14 }
 0x1f0   :  { %vm2468_vm7 = vcmp.ge.f32.partialorder %v2460_v41, 0.0  ;;  %vm2469_vm8 = vcmp.ge.f32.partialorder %v2461_v44, 0.0  ;;  %vm2470_vm9 = vcmp.ge.f32.partialorder %v2462_v50, 0.0  ;;  %vm2471_vm10 = vcmp.ge.f32.partialorder %v2463_v45, 0.0 }
 0x1f1   :  { %vm2472_vm11 = vcmp.ge.f32.partialorder %v2464_v42, 0.0  ;;  %vm2473_vm12 = vcmp.ge.f32.partialorder %v2465_v56, 0.0  ;;  %vm2474_vm13 = vcmp.ge.f32.partialorder %v2466_v9, 0.0  ;;  %vm2475_vm14 = vcmp.ge.f32.partialorder %v2467_v13, 0.0 }
 0x1f2   :  { %v2476_v46 = vmul.f32 0.2, %v2460_v41  ;;  %v2477_v31 = vmul.f32 0.2, %v2461_v44  ;;  %v2478_v33 = vmul.f32 0.2, %v2462_v50 }
 0x1f3   :  { %v2479_v34 = vmul.f32 0.2, %v2463_v45  ;;  %v2480_v47 = vmul.f32 0.2, %v2464_v42  ;;  %v2481_v8 = vmul.f32 0.2, %v2465_v56 }
 0x1f4   :  { %v2482_v32 = vmul.f32 0.2, %v2466_v9  ;;  %v2483_v19 = vmul.f32 0.2, %v2467_v13  ;;  %v2484_v17 = vsel %vm2468_vm7, %v2460_v41, %v2476_v46  ;;  %v2485_v49 = vsel %vm2469_vm8, %v2461_v44, %v2477_v31 }
 0x1f5   :  { %v2486_v51 = vsel %vm2470_vm9, %v2462_v50, %v2478_v33  ;;  %v2487_v22 = vsel %vm2471_vm10, %v2463_v45, %v2479_v34  ;;  %v2488_v25 = vsel %vm2472_vm11, %v2464_v42, %v2480_v47  ;;  %v2489_v59 = vsel %vm2473_vm12, %v2465_v56, %v2481_v8 }
 0x1f6   :  { %v2490_v60 = vsel %vm2474_vm13, %v2466_v9, %v2482_v32  ;;  %v2491_v43 = vsel %vm2475_vm14, %v2467_v13, %v2483_v19  ;;  %v2492_v48 = vpack.c.bf16 %v2485_v49, %v2484_v17  ;;  %v2493_v53 = vpack.c.bf16 %v2487_v22, %v2486_v51 }
 0x1f7   :  { %v2494_v18 = vpack.c.bf16 %v2489_v59, %v2488_v25  ;;  %v2495_v61 = vpack.c.bf16 %v2491_v43, %v2490_v60 }
 0x1f8   :  { %2496 = vst [vmem:[%s5910_s4] sm:$0xff] %v2492_v48 }
 0x1f9   :  { %2497 = vst [vmem:[%s5910_s4 + $0x8] sm:$0xff] %v2493_v53 }
 0x1fa   :  { %2498 = vst [vmem:[%s5910_s4 + $0x10] sm:$0xff] %v2494_v18 }
 0x1fb   :  { %2499 = vst [vmem:[%s5910_s4 + $0x18] sm:$0xff] %v2495_v61 }

</bundles_post_ra>
